<compile_context>
chip_gen: v5e
topology: v5e:2x2
jax: 0.10.0
libtpu: 0.0.40
codegen_flags: <defaults>
</compile_context>

<pallas_src>
import functools
import math

import jax
import jax.numpy as jnp
from jax.experimental import pallas as pl
from jax.experimental.pallas import tpu as pltpu


# ----------------------------- in-kernel helpers -----------------------------

def _erf(x):
    # Abramowitz & Stegun 7.1.26 rational approximation (max abs err ~1.5e-7),
    # used instead of lax.erf to guarantee Mosaic lowering (only exp/abs needed).
    a1, a2, a3, a4, a5 = 0.254829592, -0.284496736, 1.421413741, -1.453152027, 1.061405429
    p = 0.3275911
    sign = jnp.where(x >= 0.0, 1.0, -1.0)
    ax = jnp.abs(x)
    t = 1.0 / (1.0 + p * ax)
    poly = ((((a5 * t + a4) * t + a3) * t + a2) * t + a1) * t
    return sign * (1.0 - poly * jnp.exp(-ax * ax))


def _gelu_exact(x):
    # nn.GELU() default = exact (erf-based) GELU.
    return 0.5 * x * (1.0 + _erf(x * (1.0 / math.sqrt(2.0))))


# ------------------------------- Pallas kernel --------------------------------

def transformer_kernel(x_ref, mask_ref, a_ref,
                       ln1_g_ref, ln1_b_ref,
                       q_w_ref, q_b_ref, k_w_ref, k_b_ref, v_w_ref, v_b_ref,
                       proj_w_ref, proj_b_ref,
                       ln2_g_ref, ln2_b_ref,
                       fc_w_ref, fc_b_ref, fc2_w_ref, fc2_b_ref,
                       out_ref, *, num_heads, num_layers):
    B, T, W = out_ref.shape
    H = num_heads
    C = W // H                               # attn_ch = (3*W) // H // 3
    L = num_layers
    scale = 1.0 / math.sqrt(math.sqrt(C))
    eps = 1e-5
    bf16 = jnp.bfloat16
    f32 = jnp.float32

    def layer_norm(v, g, b):                 # fp32 LN, eps matches nn.LayerNorm
        mu = jnp.mean(v, axis=-1, keepdims=True)
        var = jnp.mean(jnp.square(v - mu), axis=-1, keepdims=True)
        return (v - mu) * jax.lax.rsqrt(var + eps) * g + b

    # Hoisted once for the whole network (constant across layers).
    keymask = mask_ref[...][:, None, :] > 0.0            # (B, 1, T)
    rewt_all = 1.0 + 0.2 * a_ref[...]                    # (B, H, T, T)

    x = x_ref[...]                                       # (B, T, W) fp32

    # Statically unrolled layer loop (L is small; weights are all VMEM-resident).
    for l in range(L):
        # --------------------------- attention branch ---------------------------
        hln = layer_norm(x, ln1_g_ref[l], ln1_b_ref[l])
        h2d = hln.reshape(B * T, W).astype(bf16)         # shared MXU operand

        attn_acc = jnp.zeros((B * T, W), f32)
        for hh in range(H):
            # Per-head q/k/v linears directly on the MXU (no lane slicing of a
            # wide qkv result).  bf16 operands, fp32 accumulation, fp32 bias.
            q = jnp.dot(h2d, q_w_ref[l, hh], preferred_element_type=f32) + q_b_ref[l, hh]
            k = jnp.dot(h2d, k_w_ref[l, hh], preferred_element_type=f32) + k_b_ref[l, hh]
            v = jnp.dot(h2d, v_w_ref[l, hh], preferred_element_type=f32) + v_b_ref[l, hh]
            q = (q * scale).reshape(B, T, C)
            k = (k * scale).reshape(B, T, C)
            v = v.reshape(B, T, C)

            w = jnp.einsum('btc,bsc->bts', q.astype(bf16), k.astype(bf16),
                           preferred_element_type=f32)   # (B, T, T)
            w = jnp.where(keymask, -1e30, w)             # finite "masked_fill(-inf)"

            # Fused softmax + (1 + 0.2*a) reweight + renormalize_attention:
            # the softmax denominator cancels, so normalize exactly once.
            e = jnp.exp(w - jnp.max(w, axis=-1, keepdims=True))
            p = e * rewt_all[:, hh]
            p = p * pl.reciprocal(jnp.sum(p, axis=-1, keepdims=True), approx=True)

            hv = jnp.einsum('bts,bsc->btc', p.astype(bf16), v.astype(bf16),
                            preferred_element_type=f32)  # (B, T, C)

            # Fold the output projection into the head loop: per-head (C, W)
            # matmul accumulated in fp32 — no lane concatenate of head outputs.
            attn_acc = attn_acc + jnp.dot(hv.reshape(B * T, C).astype(bf16),
                                          proj_w_ref[l, hh],
                                          preferred_element_type=f32)

        x = x + (attn_acc + proj_b_ref[l]).reshape(B, T, W)

        # ------------------------------ MLP branch ------------------------------
        h2 = layer_norm(x, ln2_g_ref[l], ln2_b_ref[l])
        fc = jnp.dot(h2.reshape(B * T, W).astype(bf16), fc_w_ref[l],
                     preferred_element_type=f32) + fc_b_ref[l]
        fc = _gelu_exact(fc)                              # fp32 GELU
        mlp = jnp.dot(fc.astype(bf16), fc2_w_ref[l],
                      preferred_element_type=f32) + fc2_b_ref[l]
        x = x + mlp.reshape(B, T, W)

    out_ref[...] = x                                      # single store at the end


# ------------------------------- JAX wrapper ----------------------------------

_WEIGHT_ORDER = ('ln1_g', 'ln1_b',
                 'q_w', 'q_b', 'k_w', 'k_b', 'v_w', 'v_b',
                 'proj_w', 'proj_b',
                 'ln2_g', 'ln2_b',
                 'fc_w', 'fc_b', 'fc2_w', 'fc2_b')


def transformer_forward(x, key_padding_mask, attention_weights, stacked, heads):
    B, T, W = x.shape
    L = stacked['ln1_g'].shape[0]
    H = heads

    # Exact emulation of the PyTorch `attention_weights.repeat(H,1,1).reshape(B,H,T,T)`
    # (layout plumbing only; the (1 + 0.2*a) reweight is computed in-kernel, hoisted
    # out of the layer loop).
    a_eff = jnp.tile(attention_weights, (H, 1, 1)).reshape(B, H, T, T)

    weights = [stacked[name] for name in _WEIGHT_ORDER]
    n_in = 3 + len(weights)

    def vmem():
        return pl.BlockSpec(memory_space=pltpu.MemorySpace.VMEM)

    return pl.pallas_call(
        functools.partial(transformer_kernel, num_heads=H, num_layers=L),
        out_shape=jax.ShapeDtypeStruct((B, T, W), jnp.float32),
        in_specs=[vmem() for _ in range(n_in)],
        out_specs=vmem(),
    )(x, key_padding_mask, a_eff, *weights)


# --------------------------- parameter init / prep -----------------------------

def init_layer(key, width):
    ks = jax.random.split(key, 4)

    def lin(k, out_dim, in_dim):
        bound = 1.0 / math.sqrt(in_dim)
        kw, kb = jax.random.split(k)
        w = jax.random.uniform(kw, (out_dim, in_dim), jnp.float32, -bound, bound)
        b = jax.random.uniform(kb, (out_dim,), jnp.float32, -bound, bound)
        return w, b

    qkv_w, qkv_b = lin(ks[0], 3 * width, width)
    proj_w, proj_b = lin(ks[1], width, width)
    fc_w, fc_b = lin(ks[2], 4 * width, width)
    fc2_w, fc2_b = lin(ks[3], width, 4 * width)
    return dict(
        ln1_g=jnp.ones((width,), jnp.float32), ln1_b=jnp.zeros((width,), jnp.float32),
        ln2_g=jnp.ones((width,), jnp.float32), ln2_b=jnp.zeros((width,), jnp.float32),
        qkv_w=qkv_w, qkv_b=qkv_b, proj_w=proj_w, proj_b=proj_b,
        fc_w=fc_w, fc_b=fc_b, fc2_w=fc2_w, fc2_b=fc2_b)


def stack_layer_params(layer_params, heads):
    """Pre-split qkv/proj weights per head, transpose to (in, out), cast all
    matmul weights to bf16, and stack along a leading layer axis."""
    H = heads
    W = layer_params[0]['ln1_g'].shape[0]
    C = W // H
    bf16 = jnp.bfloat16

    def prep(p):
        # PyTorch qkv output dim is [h0:(q,k,v), h1:(q,k,v), ...], each chunk C wide.
        qkv_w = p['qkv_w'].reshape(H, 3, C, W)            # (H, 3, C, W)  (out, in)
        qkv_b = p['qkv_b'].reshape(H, 3, C)
        return dict(
            ln1_g=p['ln1_g'].reshape(1, W), ln1_b=p['ln1_b'].reshape(1, W),
            q_w=jnp.transpose(qkv_w[:, 0], (0, 2, 1)).astype(bf16),   # (H, W, C)
            k_w=jnp.transpose(qkv_w[:, 1], (0, 2, 1)).astype(bf16),
            v_w=jnp.transpose(qkv_w[:, 2], (0, 2, 1)).astype(bf16),
            q_b=qkv_b[:, 0].reshape(H, 1, C),
            k_b=qkv_b[:, 1].reshape(H, 1, C),
            v_b=qkv_b[:, 2].reshape(H, 1, C),
            # proj_w (out W, in W): per-head input columns -> (H, C, W)
            proj_w=jnp.transpose(p['proj_w'].reshape(W, H, C), (1, 2, 0)).astype(bf16),
            proj_b=p['proj_b'].reshape(1, W),
            ln2_g=p['ln2_g'].reshape(1, W), ln2_b=p['ln2_b'].reshape(1, W),
            fc_w=p['fc_w'].T.astype(bf16), fc_b=p['fc_b'].reshape(1, -1),
            fc2_w=p['fc2_w'].T.astype(bf16), fc2_b=p['fc2_b'].reshape(1, -1),
        )

    per_layer = [prep(p) for p in layer_params]
    return {name: jnp.stack([d[name] for d in per_layer], axis=0)
            for name in _WEIGHT_ORDER}


# --------------------------- pure-JAX reference check ---------------------------

def transformer_reference(x, mask, a, layer_params, heads):
    """Mirror of the PyTorch forward (with the same bf16-at-MXU-boundary policy
    the kernel uses for the attention and MLP linears)."""
    B, T, W = x.shape
    H, C = heads, W // heads
    scale = 1.0 / math.sqrt(math.sqrt(C))
    bf16, f32 = jnp.bfloat16, jnp.float32
    # Same repeat/reshape semantics as the PyTorch module.
    a_eff = jnp.tile(a, (H, 1, 1)).reshape(B, H, T, T)

    def ln(v, g, b):
        mu = v.mean(-1, keepdims=True)
        var = ((v - mu) ** 2).mean(-1, keepdims=True)
        return (v - mu) / jnp.sqrt(var + 1e-5) * g + b

    def dot16(u, wt):
        return jnp.dot(u.astype(bf16), wt.astype(bf16), preferred_element_type=f32)

    for p in layer_params:
        h = ln(x, p['ln1_g'], p['ln1_b'])
        qkv = dot16(h, p['qkv_w'].T) + p['qkv_b']
        qkv = qkv.reshape(B, T, H, 3 * C)
        q, k, v = qkv[..., :C], qkv[..., C:2 * C], qkv[..., 2 * C:]
        w = jnp.einsum('bthc,bshc->bhts', (q * scale).astype(bf16),
                       (k * scale).astype(bf16), preferred_element_type=f32)
        w = jnp.where(mask[:, None, None, :] > 0, -jnp.inf, w)
        w = jax.nn.softmax(w, axis=-1)
        w = w * (1.0 + 0.2 * a_eff)
        w = w / w.sum(-1, keepdims=True)
        o = jnp.einsum('bhts,bshc->bthc', w.astype(bf16), v.astype(bf16),
                       preferred_element_type=f32).reshape(B, T, W)
        x = x + dot16(o, p['proj_w'].T) + p['proj_b']
        h2 = ln(x, p['ln2_g'], p['ln2_b'])
        fc = jax.nn.gelu(dot16(h2, p['fc_w'].T) + p['fc_b'], approximate=False)
        x = x + dot16(fc, p['fc2_w'].T) + p['fc2_b']
    return x


# ------------------------------------ main --------------------------------------

if __name__ == "__main__":
    # n_ctx must be 10: the reference hard-codes .reshape(bs, n_heads, 10, 10).
    B, T, W, HEADS, LAYERS = 2, 10, 32, 4, 2

    root = jax.random.PRNGKey(0)
    kx, ka, kp = jax.random.split(root, 3)

    x = jax.random.normal(kx, (B, T, W), jnp.float32)
    attention_weights = jax.random.uniform(ka, (B, T, T), jnp.float32)
    # No padded positions (equivalent to key_padding_mask=None for demo inputs);
    # >0 marks a padded key position.
    key_padding_mask = jnp.zeros((B, T), jnp.float32)

    layer_keys = jax.random.split(kp, LAYERS)
    layer_params = [init_layer(layer_keys[i], W) for i in range(LAYERS)]
    stacked = stack_layer_params(layer_params, HEADS)

    y = transformer_forward(x, key_padding_mask, attention_weights, stacked, HEADS)
    jax.block_until_ready(y)

    assert y.shape == (B, T, W) and y.dtype == jnp.float32
    assert bool(jnp.all(jnp.isfinite(y)))

    y_ref = transformer_reference(x, key_padding_mask, attention_weights,
                                  layer_params, HEADS)
    max_diff = float(jnp.max(jnp.abs(y - y_ref)))
    assert max_diff < 5e-2, f"max_diff={max_diff}"

    print("KERNEL_OK")
</pallas_src>

<mosaic_0001>
module attributes {stable_mosaic.version = 11 : i64} {
  func.func @transformer_kernel(%arg0: memref<2x10x32xf32, #tpu.memory_space<vmem>>, %arg1: memref<2x10xf32, #tpu.memory_space<vmem>>, %arg2: memref<2x4x10x10xf32, #tpu.memory_space<vmem>>, %arg3: memref<2x1x32xf32, #tpu.memory_space<vmem>>, %arg4: memref<2x1x32xf32, #tpu.memory_space<vmem>>, %arg5: memref<2x4x32x8xbf16, #tpu.memory_space<vmem>>, %arg6: memref<2x4x1x8xf32, #tpu.memory_space<vmem>>, %arg7: memref<2x4x32x8xbf16, #tpu.memory_space<vmem>>, %arg8: memref<2x4x1x8xf32, #tpu.memory_space<vmem>>, %arg9: memref<2x4x32x8xbf16, #tpu.memory_space<vmem>>, %arg10: memref<2x4x1x8xf32, #tpu.memory_space<vmem>>, %arg11: memref<2x4x8x32xbf16, #tpu.memory_space<vmem>>, %arg12: memref<2x1x32xf32, #tpu.memory_space<vmem>>, %arg13: memref<2x1x32xf32, #tpu.memory_space<vmem>>, %arg14: memref<2x1x32xf32, #tpu.memory_space<vmem>>, %arg15: memref<2x32x128xbf16, #tpu.memory_space<vmem>>, %arg16: memref<2x1x128xf32, #tpu.memory_space<vmem>>, %arg17: memref<2x128x32xbf16, #tpu.memory_space<vmem>>, %arg18: memref<2x1x32xf32, #tpu.memory_space<vmem>>, %arg19: memref<2x10x32xf32, #tpu.memory_space<vmem>>) attributes {dimension_semantics = [], scalar_prefetch = 0 : i64, scratch_operands = 0 : i64, tpu.core_type = #tpu.core_type<tc>} {
    %c0 = arith.constant 0 : index
    %c0_0 = arith.constant 0 : index
    %0 = vector.load %arg1[%c0, %c0_0] : memref<2x10xf32, #tpu.memory_space<vmem>>, vector<2x10xf32>
    %1 = vector.shape_cast %0 : vector<2x10xf32> to vector<2x1x10xf32>
    %cst = arith.constant 0.000000e+00 : f32
    %2 = vector.broadcast %cst : f32 to vector<2x1x10xf32>
    %3 = arith.cmpf ogt, %1, %2 : vector<2x1x10xf32>
    %c0_1 = arith.constant 0 : index
    %c0_2 = arith.constant 0 : index
    %c0_3 = arith.constant 0 : index
    %c0_4 = arith.constant 0 : index
    %4 = vector.load %arg2[%c0_1, %c0_2, %c0_3, %c0_4] : memref<2x4x10x10xf32, #tpu.memory_space<vmem>>, vector<2x4x10x10xf32>
    %cst_5 = arith.constant 2.000000e-01 : f32
    %5 = vector.broadcast %cst_5 : f32 to vector<2x4x10x10xf32>
    %6 = arith.mulf %5, %4 : vector<2x4x10x10xf32>
    %cst_6 = arith.constant 1.000000e+00 : f32
    %7 = vector.broadcast %cst_6 : f32 to vector<2x4x10x10xf32>
    %8 = arith.addf %7, %6 : vector<2x4x10x10xf32>
    %c0_7 = arith.constant 0 : index
    %c0_8 = arith.constant 0 : index
    %c0_9 = arith.constant 0 : index
    %9 = vector.load %arg0[%c0_7, %c0_8, %c0_9] : memref<2x10x32xf32, #tpu.memory_space<vmem>>, vector<2x10x32xf32>
    %c0_10 = arith.constant 0 : index
    %c0_11 = arith.constant 0 : index
    %c0_12 = arith.constant 0 : index
    %10 = vector.load %arg3[%c0_10, %c0_11, %c0_12] : memref<2x1x32xf32, #tpu.memory_space<vmem>>, vector<1x1x32xf32>
    %11 = vector.shape_cast %10 : vector<1x1x32xf32> to vector<1x32xf32>
    %c0_13 = arith.constant 0 : index
    %c0_14 = arith.constant 0 : index
    %c0_15 = arith.constant 0 : index
    %12 = vector.load %arg4[%c0_13, %c0_14, %c0_15] : memref<2x1x32xf32, #tpu.memory_space<vmem>>, vector<1x1x32xf32>
    %13 = vector.shape_cast %12 : vector<1x1x32xf32> to vector<1x32xf32>
    %cst_16 = arith.constant dense<0.000000e+00> : vector<2x10xf32>
    %14 = vector.multi_reduction <add>, %9, %cst_16 [2] : vector<2x10x32xf32> to vector<2x10xf32>
    %15 = vector.shape_cast %14 : vector<2x10xf32> to vector<2x10x1xf32>
    %cst_17 = arith.constant 3.200000e+01 : f32
    %16 = vector.broadcast %cst_17 : f32 to vector<2x10x1xf32>
    %17 = arith.divf %15, %16 : vector<2x10x1xf32>
    %18 = vector.broadcast %17 : vector<2x10x1xf32> to vector<2x10x32xf32>
    %19 = arith.subf %9, %18 : vector<2x10x32xf32>
    %20 = arith.mulf %19, %19 : vector<2x10x32xf32>
    %cst_18 = arith.constant dense<0.000000e+00> : vector<2x10xf32>
    %21 = vector.multi_reduction <add>, %20, %cst_18 [2] : vector<2x10x32xf32> to vector<2x10xf32>
    %22 = vector.shape_cast %21 : vector<2x10xf32> to vector<2x10x1xf32>
    %cst_19 = arith.constant 3.200000e+01 : f32
    %23 = vector.broadcast %cst_19 : f32 to vector<2x10x1xf32>
    %24 = arith.divf %22, %23 : vector<2x10x1xf32>
    %25 = vector.broadcast %17 : vector<2x10x1xf32> to vector<2x10x32xf32>
    %26 = arith.subf %9, %25 : vector<2x10x32xf32>
    %cst_20 = arith.constant 9.99999974E-6 : f32
    %27 = vector.broadcast %cst_20 : f32 to vector<2x10x1xf32>
    %28 = arith.addf %24, %27 : vector<2x10x1xf32>
    %29 = math.rsqrt %28 : vector<2x10x1xf32>
    %30 = vector.broadcast %29 : vector<2x10x1xf32> to vector<2x10x32xf32>
    %31 = arith.mulf %26, %30 : vector<2x10x32xf32>
    %32 = vector.shape_cast %11 : vector<1x32xf32> to vector<1x1x32xf32>
    %33 = vector.broadcast %32 : vector<1x1x32xf32> to vector<2x10x32xf32>
    %34 = arith.mulf %31, %33 : vector<2x10x32xf32>
    %35 = vector.shape_cast %13 : vector<1x32xf32> to vector<1x1x32xf32>
    %36 = vector.broadcast %35 : vector<1x1x32xf32> to vector<2x10x32xf32>
    %37 = arith.addf %34, %36 : vector<2x10x32xf32>
    %38 = vector.shape_cast %37 : vector<2x10x32xf32> to vector<20x32xf32>
    %39 = arith.truncf %38 : vector<20x32xf32> to vector<20x32xbf16>
    %cst_21 = arith.constant 0.000000e+00 : f32
    %40 = vector.broadcast %cst_21 : f32 to vector<20x32xf32>
    %c0_22 = arith.constant 0 : index
    %c0_23 = arith.constant 0 : index
    %c0_24 = arith.constant 0 : index
    %c0_25 = arith.constant 0 : index
    %41 = vector.load %arg5[%c0_22, %c0_23, %c0_24, %c0_25] : memref<2x4x32x8xbf16, #tpu.memory_space<vmem>>, vector<1x1x32x8xbf16>
    %42 = vector.shape_cast %41 : vector<1x1x32x8xbf16> to vector<32x8xbf16>
    %cst_26 = arith.constant dense<0.000000e+00> : vector<20x8xf32>
    %43 = tpu.matmul %39, %42, %cst_26 {dimension_numbers = #tpu.dot_dimension_numbers<[1], [0], [0], [1], [0, 0, 1, 1], [], []>} : vector<20x32xbf16>, vector<32x8xbf16>, vector<20x8xf32> -> vector<20x8xf32>
    %c0_27 = arith.constant 0 : index
    %c0_28 = arith.constant 0 : index
    %c0_29 = arith.constant 0 : index
    %c0_30 = arith.constant 0 : index
    %44 = vector.load %arg6[%c0_27, %c0_28, %c0_29, %c0_30] : memref<2x4x1x8xf32, #tpu.memory_space<vmem>>, vector<1x1x1x8xf32>
    %45 = vector.shape_cast %44 : vector<1x1x1x8xf32> to vector<1x8xf32>
    %46 = vector.broadcast %45 : vector<1x8xf32> to vector<20x8xf32>
    %47 = arith.addf %43, %46 : vector<20x8xf32>
    %c0_31 = arith.constant 0 : index
    %c0_32 = arith.constant 0 : index
    %c0_33 = arith.constant 0 : index
    %c0_34 = arith.constant 0 : index
    %48 = vector.load %arg7[%c0_31, %c0_32, %c0_33, %c0_34] : memref<2x4x32x8xbf16, #tpu.memory_space<vmem>>, vector<1x1x32x8xbf16>
    %49 = vector.shape_cast %48 : vector<1x1x32x8xbf16> to vector<32x8xbf16>
    %cst_35 = arith.constant dense<0.000000e+00> : vector<20x8xf32>
    %50 = tpu.matmul %39, %49, %cst_35 {dimension_numbers = #tpu.dot_dimension_numbers<[1], [0], [0], [1], [0, 0, 1, 1], [], []>} : vector<20x32xbf16>, vector<32x8xbf16>, vector<20x8xf32> -> vector<20x8xf32>
    %c0_36 = arith.constant 0 : index
    %c0_37 = arith.constant 0 : index
    %c0_38 = arith.constant 0 : index
    %c0_39 = arith.constant 0 : index
    %51 = vector.load %arg8[%c0_36, %c0_37, %c0_38, %c0_39] : memref<2x4x1x8xf32, #tpu.memory_space<vmem>>, vector<1x1x1x8xf32>
    %52 = vector.shape_cast %51 : vector<1x1x1x8xf32> to vector<1x8xf32>
    %53 = vector.broadcast %52 : vector<1x8xf32> to vector<20x8xf32>
    %54 = arith.addf %50, %53 : vector<20x8xf32>
    %c0_40 = arith.constant 0 : index
    %c0_41 = arith.constant 0 : index
    %c0_42 = arith.constant 0 : index
    %c0_43 = arith.constant 0 : index
    %55 = vector.load %arg9[%c0_40, %c0_41, %c0_42, %c0_43] : memref<2x4x32x8xbf16, #tpu.memory_space<vmem>>, vector<1x1x32x8xbf16>
    %56 = vector.shape_cast %55 : vector<1x1x32x8xbf16> to vector<32x8xbf16>
    %cst_44 = arith.constant dense<0.000000e+00> : vector<20x8xf32>
    %57 = tpu.matmul %39, %56, %cst_44 {dimension_numbers = #tpu.dot_dimension_numbers<[1], [0], [0], [1], [0, 0, 1, 1], [], []>} : vector<20x32xbf16>, vector<32x8xbf16>, vector<20x8xf32> -> vector<20x8xf32>
    %c0_45 = arith.constant 0 : index
    %c0_46 = arith.constant 0 : index
    %c0_47 = arith.constant 0 : index
    %c0_48 = arith.constant 0 : index
    %58 = vector.load %arg10[%c0_45, %c0_46, %c0_47, %c0_48] : memref<2x4x1x8xf32, #tpu.memory_space<vmem>>, vector<1x1x1x8xf32>
    %59 = vector.shape_cast %58 : vector<1x1x1x8xf32> to vector<1x8xf32>
    %60 = vector.broadcast %59 : vector<1x8xf32> to vector<20x8xf32>
    %61 = arith.addf %57, %60 : vector<20x8xf32>
    %cst_49 = arith.constant 0.594603539 : f32
    %62 = vector.broadcast %cst_49 : f32 to vector<20x8xf32>
    %63 = arith.mulf %47, %62 : vector<20x8xf32>
    %64 = vector.shape_cast %63 : vector<20x8xf32> to vector<2x10x8xf32>
    %cst_50 = arith.constant 0.594603539 : f32
    %65 = vector.broadcast %cst_50 : f32 to vector<20x8xf32>
    %66 = arith.mulf %54, %65 : vector<20x8xf32>
    %67 = vector.shape_cast %66 : vector<20x8xf32> to vector<2x10x8xf32>
    %68 = vector.shape_cast %61 : vector<20x8xf32> to vector<2x10x8xf32>
    %69 = arith.truncf %64 : vector<2x10x8xf32> to vector<2x10x8xbf16>
    %70 = arith.truncf %67 : vector<2x10x8xf32> to vector<2x10x8xbf16>
    "tpu.trace_start"() <{level = 10 : i32, message = "btc,bsc->bts"}> : () -> ()
    %cst_51 = arith.constant dense<0.000000e+00> : vector<2x10x10xf32>
    %71 = tpu.matmul %69, %70, %cst_51 {dimension_numbers = #tpu.dot_dimension_numbers<[2], [2], [1], [1], [0, 0, 0, 1, 1, 1], [0], [0]>} : vector<2x10x8xbf16>, vector<2x10x8xbf16>, vector<2x10x10xf32> -> vector<2x10x10xf32>
    %cst_52 = arith.constant -1.000000e+30 : f32
    "tpu.trace_stop"() : () -> ()
    %72 = vector.shape_cast %3 : vector<2x1x10xi1> to vector<2x1x10xi1>
    %73 = vector.broadcast %72 : vector<2x1x10xi1> to vector<2x10x10xi1>
    %74 = vector.broadcast %cst_52 : f32 to vector<2x10x10xf32>
    %75 = arith.select %73, %74, %71 : vector<2x10x10xi1>, vector<2x10x10xf32>
    %cst_53 = arith.constant dense<0xFF800000> : vector<2x10xf32>
    %76 = vector.multi_reduction <maximumf>, %75, %cst_53 [2] : vector<2x10x10xf32> to vector<2x10xf32>
    %77 = vector.shape_cast %76 : vector<2x10xf32> to vector<2x10x1xf32>
    %78 = vector.broadcast %77 : vector<2x10x1xf32> to vector<2x10x10xf32>
    %79 = arith.subf %75, %78 : vector<2x10x10xf32>
    %80 = math.exp %79 : vector<2x10x10xf32>
    %81 = vector.extract_strided_slice %8 {offsets = [0, 0, 0, 0], sizes = [2, 1, 10, 10], strides = [1, 1, 1, 1]} : vector<2x4x10x10xf32> to vector<2x1x10x10xf32>
    %82 = vector.shape_cast %81 : vector<2x1x10x10xf32> to vector<2x10x10xf32>
    %83 = arith.mulf %80, %82 : vector<2x10x10xf32>
    %cst_54 = arith.constant dense<0.000000e+00> : vector<2x10xf32>
    %84 = vector.multi_reduction <add>, %83, %cst_54 [2] : vector<2x10x10xf32> to vector<2x10xf32>
    %85 = vector.shape_cast %84 : vector<2x10xf32> to vector<2x10x1xf32>
    %86 = tpu.reciprocal %85 {approx = true} : vector<2x10x1xf32> -> vector<2x10x1xf32>
    %87 = vector.broadcast %86 : vector<2x10x1xf32> to vector<2x10x10xf32>
    %88 = arith.mulf %83, %87 : vector<2x10x10xf32>
    %89 = arith.truncf %88 : vector<2x10x10xf32> to vector<2x10x10xbf16>
    %90 = arith.truncf %68 : vector<2x10x8xf32> to vector<2x10x8xbf16>
    "tpu.trace_start"() <{level = 10 : i32, message = "bts,bsc->btc"}> : () -> ()
    %cst_55 = arith.constant dense<0.000000e+00> : vector<2x10x8xf32>
    %91 = tpu.matmul %89, %90, %cst_55 {dimension_numbers = #tpu.dot_dimension_numbers<[2], [1], [1], [2], [0, 0, 0, 1, 1, 2], [0], [0]>} : vector<2x10x10xbf16>, vector<2x10x8xbf16>, vector<2x10x8xf32> -> vector<2x10x8xf32>
    "tpu.trace_stop"() : () -> ()
    %92 = vector.shape_cast %91 : vector<2x10x8xf32> to vector<20x8xf32>
    %93 = arith.truncf %92 : vector<20x8xf32> to vector<20x8xbf16>
    %c0_56 = arith.constant 0 : index
    %c0_57 = arith.constant 0 : index
    %c0_58 = arith.constant 0 : index
    %c0_59 = arith.constant 0 : index
    %94 = vector.load %arg11[%c0_56, %c0_57, %c0_58, %c0_59] : memref<2x4x8x32xbf16, #tpu.memory_space<vmem>>, vector<1x1x8x32xbf16>
    %95 = vector.shape_cast %94 : vector<1x1x8x32xbf16> to vector<8x32xbf16>
    %cst_60 = arith.constant dense<0.000000e+00> : vector<20x32xf32>
    %96 = tpu.matmul %93, %95, %cst_60 {dimension_numbers = #tpu.dot_dimension_numbers<[1], [0], [0], [1], [0, 0, 1, 1], [], []>} : vector<20x8xbf16>, vector<8x32xbf16>, vector<20x32xf32> -> vector<20x32xf32>
    %97 = arith.addf %40, %96 : vector<20x32xf32>
    %c0_61 = arith.constant 0 : index
    %c1 = arith.constant 1 : index
    %c0_62 = arith.constant 0 : index
    %c0_63 = arith.constant 0 : index
    %98 = vector.load %arg5[%c0_61, %c1, %c0_62, %c0_63] : memref<2x4x32x8xbf16, #tpu.memory_space<vmem>>, vector<1x1x32x8xbf16>
    %99 = vector.shape_cast %98 : vector<1x1x32x8xbf16> to vector<32x8xbf16>
    %cst_64 = arith.constant dense<0.000000e+00> : vector<20x8xf32>
    %100 = tpu.matmul %39, %99, %cst_64 {dimension_numbers = #tpu.dot_dimension_numbers<[1], [0], [0], [1], [0, 0, 1, 1], [], []>} : vector<20x32xbf16>, vector<32x8xbf16>, vector<20x8xf32> -> vector<20x8xf32>
    %c0_65 = arith.constant 0 : index
    %c1_66 = arith.constant 1 : index
    %c0_67 = arith.constant 0 : index
    %c0_68 = arith.constant 0 : index
    %101 = vector.load %arg6[%c0_65, %c1_66, %c0_67, %c0_68] : memref<2x4x1x8xf32, #tpu.memory_space<vmem>>, vector<1x1x1x8xf32>
    %102 = vector.shape_cast %101 : vector<1x1x1x8xf32> to vector<1x8xf32>
    %103 = vector.broadcast %102 : vector<1x8xf32> to vector<20x8xf32>
    %104 = arith.addf %100, %103 : vector<20x8xf32>
    %c0_69 = arith.constant 0 : index
    %c1_70 = arith.constant 1 : index
    %c0_71 = arith.constant 0 : index
    %c0_72 = arith.constant 0 : index
    %105 = vector.load %arg7[%c0_69, %c1_70, %c0_71, %c0_72] : memref<2x4x32x8xbf16, #tpu.memory_space<vmem>>, vector<1x1x32x8xbf16>
    %106 = vector.shape_cast %105 : vector<1x1x32x8xbf16> to vector<32x8xbf16>
    %cst_73 = arith.constant dense<0.000000e+00> : vector<20x8xf32>
    %107 = tpu.matmul %39, %106, %cst_73 {dimension_numbers = #tpu.dot_dimension_numbers<[1], [0], [0], [1], [0, 0, 1, 1], [], []>} : vector<20x32xbf16>, vector<32x8xbf16>, vector<20x8xf32> -> vector<20x8xf32>
    %c0_74 = arith.constant 0 : index
    %c1_75 = arith.constant 1 : index
    %c0_76 = arith.constant 0 : index
    %c0_77 = arith.constant 0 : index
    %108 = vector.load %arg8[%c0_74, %c1_75, %c0_76, %c0_77] : memref<2x4x1x8xf32, #tpu.memory_space<vmem>>, vector<1x1x1x8xf32>
    %109 = vector.shape_cast %108 : vector<1x1x1x8xf32> to vector<1x8xf32>
    %110 = vector.broadcast %109 : vector<1x8xf32> to vector<20x8xf32>
    %111 = arith.addf %107, %110 : vector<20x8xf32>
    %c0_78 = arith.constant 0 : index
    %c1_79 = arith.constant 1 : index
    %c0_80 = arith.constant 0 : index
    %c0_81 = arith.constant 0 : index
    %112 = vector.load %arg9[%c0_78, %c1_79, %c0_80, %c0_81] : memref<2x4x32x8xbf16, #tpu.memory_space<vmem>>, vector<1x1x32x8xbf16>
    %113 = vector.shape_cast %112 : vector<1x1x32x8xbf16> to vector<32x8xbf16>
    %cst_82 = arith.constant dense<0.000000e+00> : vector<20x8xf32>
    %114 = tpu.matmul %39, %113, %cst_82 {dimension_numbers = #tpu.dot_dimension_numbers<[1], [0], [0], [1], [0, 0, 1, 1], [], []>} : vector<20x32xbf16>, vector<32x8xbf16>, vector<20x8xf32> -> vector<20x8xf32>
    %c0_83 = arith.constant 0 : index
    %c1_84 = arith.constant 1 : index
    %c0_85 = arith.constant 0 : index
    %c0_86 = arith.constant 0 : index
    %115 = vector.load %arg10[%c0_83, %c1_84, %c0_85, %c0_86] : memref<2x4x1x8xf32, #tpu.memory_space<vmem>>, vector<1x1x1x8xf32>
    %116 = vector.shape_cast %115 : vector<1x1x1x8xf32> to vector<1x8xf32>
    %117 = vector.broadcast %116 : vector<1x8xf32> to vector<20x8xf32>
    %118 = arith.addf %114, %117 : vector<20x8xf32>
    %cst_87 = arith.constant 0.594603539 : f32
    %119 = vector.broadcast %cst_87 : f32 to vector<20x8xf32>
    %120 = arith.mulf %104, %119 : vector<20x8xf32>
    %121 = vector.shape_cast %120 : vector<20x8xf32> to vector<2x10x8xf32>
    %cst_88 = arith.constant 0.594603539 : f32
    %122 = vector.broadcast %cst_88 : f32 to vector<20x8xf32>
    %123 = arith.mulf %111, %122 : vector<20x8xf32>
    %124 = vector.shape_cast %123 : vector<20x8xf32> to vector<2x10x8xf32>
    %125 = vector.shape_cast %118 : vector<20x8xf32> to vector<2x10x8xf32>
    %126 = arith.truncf %121 : vector<2x10x8xf32> to vector<2x10x8xbf16>
    %127 = arith.truncf %124 : vector<2x10x8xf32> to vector<2x10x8xbf16>
    "tpu.trace_start"() <{level = 10 : i32, message = "btc,bsc->bts"}> : () -> ()
    %cst_89 = arith.constant dense<0.000000e+00> : vector<2x10x10xf32>
    %128 = tpu.matmul %126, %127, %cst_89 {dimension_numbers = #tpu.dot_dimension_numbers<[2], [2], [1], [1], [0, 0, 0, 1, 1, 1], [0], [0]>} : vector<2x10x8xbf16>, vector<2x10x8xbf16>, vector<2x10x10xf32> -> vector<2x10x10xf32>
    %cst_90 = arith.constant -1.000000e+30 : f32
    "tpu.trace_stop"() : () -> ()
    %129 = vector.shape_cast %3 : vector<2x1x10xi1> to vector<2x1x10xi1>
    %130 = vector.broadcast %129 : vector<2x1x10xi1> to vector<2x10x10xi1>
    %131 = vector.broadcast %cst_90 : f32 to vector<2x10x10xf32>
    %132 = arith.select %130, %131, %128 : vector<2x10x10xi1>, vector<2x10x10xf32>
    %cst_91 = arith.constant dense<0xFF800000> : vector<2x10xf32>
    %133 = vector.multi_reduction <maximumf>, %132, %cst_91 [2] : vector<2x10x10xf32> to vector<2x10xf32>
    %134 = vector.shape_cast %133 : vector<2x10xf32> to vector<2x10x1xf32>
    %135 = vector.broadcast %134 : vector<2x10x1xf32> to vector<2x10x10xf32>
    %136 = arith.subf %132, %135 : vector<2x10x10xf32>
    %137 = math.exp %136 : vector<2x10x10xf32>
    %138 = vector.extract_strided_slice %8 {offsets = [0, 1, 0, 0], sizes = [2, 1, 10, 10], strides = [1, 1, 1, 1]} : vector<2x4x10x10xf32> to vector<2x1x10x10xf32>
    %139 = vector.shape_cast %138 : vector<2x1x10x10xf32> to vector<2x10x10xf32>
    %140 = arith.mulf %137, %139 : vector<2x10x10xf32>
    %cst_92 = arith.constant dense<0.000000e+00> : vector<2x10xf32>
    %141 = vector.multi_reduction <add>, %140, %cst_92 [2] : vector<2x10x10xf32> to vector<2x10xf32>
    %142 = vector.shape_cast %141 : vector<2x10xf32> to vector<2x10x1xf32>
    %143 = tpu.reciprocal %142 {approx = true} : vector<2x10x1xf32> -> vector<2x10x1xf32>
    %144 = vector.broadcast %143 : vector<2x10x1xf32> to vector<2x10x10xf32>
    %145 = arith.mulf %140, %144 : vector<2x10x10xf32>
    %146 = arith.truncf %145 : vector<2x10x10xf32> to vector<2x10x10xbf16>
    %147 = arith.truncf %125 : vector<2x10x8xf32> to vector<2x10x8xbf16>
    "tpu.trace_start"() <{level = 10 : i32, message = "bts,bsc->btc"}> : () -> ()
    %cst_93 = arith.constant dense<0.000000e+00> : vector<2x10x8xf32>
    %148 = tpu.matmul %146, %147, %cst_93 {dimension_numbers = #tpu.dot_dimension_numbers<[2], [1], [1], [2], [0, 0, 0, 1, 1, 2], [0], [0]>} : vector<2x10x10xbf16>, vector<2x10x8xbf16>, vector<2x10x8xf32> -> vector<2x10x8xf32>
    "tpu.trace_stop"() : () -> ()
    %149 = vector.shape_cast %148 : vector<2x10x8xf32> to vector<20x8xf32>
    %150 = arith.truncf %149 : vector<20x8xf32> to vector<20x8xbf16>
    %c0_94 = arith.constant 0 : index
    %c1_95 = arith.constant 1 : index
    %c0_96 = arith.constant 0 : index
    %c0_97 = arith.constant 0 : index
    %151 = vector.load %arg11[%c0_94, %c1_95, %c0_96, %c0_97] : memref<2x4x8x32xbf16, #tpu.memory_space<vmem>>, vector<1x1x8x32xbf16>
    %152 = vector.shape_cast %151 : vector<1x1x8x32xbf16> to vector<8x32xbf16>
    %cst_98 = arith.constant dense<0.000000e+00> : vector<20x32xf32>
    %153 = tpu.matmul %150, %152, %cst_98 {dimension_numbers = #tpu.dot_dimension_numbers<[1], [0], [0], [1], [0, 0, 1, 1], [], []>} : vector<20x8xbf16>, vector<8x32xbf16>, vector<20x32xf32> -> vector<20x32xf32>
    %154 = arith.addf %97, %153 : vector<20x32xf32>
    %c0_99 = arith.constant 0 : index
    %c2 = arith.constant 2 : index
    %c0_100 = arith.constant 0 : index
    %c0_101 = arith.constant 0 : index
    %155 = vector.load %arg5[%c0_99, %c2, %c0_100, %c0_101] : memref<2x4x32x8xbf16, #tpu.memory_space<vmem>>, vector<1x1x32x8xbf16>
    %156 = vector.shape_cast %155 : vector<1x1x32x8xbf16> to vector<32x8xbf16>
    %cst_102 = arith.constant dense<0.000000e+00> : vector<20x8xf32>
    %157 = tpu.matmul %39, %156, %cst_102 {dimension_numbers = #tpu.dot_dimension_numbers<[1], [0], [0], [1], [0, 0, 1, 1], [], []>} : vector<20x32xbf16>, vector<32x8xbf16>, vector<20x8xf32> -> vector<20x8xf32>
    %c0_103 = arith.constant 0 : index
    %c2_104 = arith.constant 2 : index
    %c0_105 = arith.constant 0 : index
    %c0_106 = arith.constant 0 : index
    %158 = vector.load %arg6[%c0_103, %c2_104, %c0_105, %c0_106] : memref<2x4x1x8xf32, #tpu.memory_space<vmem>>, vector<1x1x1x8xf32>
    %159 = vector.shape_cast %158 : vector<1x1x1x8xf32> to vector<1x8xf32>
    %160 = vector.broadcast %159 : vector<1x8xf32> to vector<20x8xf32>
    %161 = arith.addf %157, %160 : vector<20x8xf32>
    %c0_107 = arith.constant 0 : index
    %c2_108 = arith.constant 2 : index
    %c0_109 = arith.constant 0 : index
    %c0_110 = arith.constant 0 : index
    %162 = vector.load %arg7[%c0_107, %c2_108, %c0_109, %c0_110] : memref<2x4x32x8xbf16, #tpu.memory_space<vmem>>, vector<1x1x32x8xbf16>
    %163 = vector.shape_cast %162 : vector<1x1x32x8xbf16> to vector<32x8xbf16>
    %cst_111 = arith.constant dense<0.000000e+00> : vector<20x8xf32>
    %164 = tpu.matmul %39, %163, %cst_111 {dimension_numbers = #tpu.dot_dimension_numbers<[1], [0], [0], [1], [0, 0, 1, 1], [], []>} : vector<20x32xbf16>, vector<32x8xbf16>, vector<20x8xf32> -> vector<20x8xf32>
    %c0_112 = arith.constant 0 : index
    %c2_113 = arith.constant 2 : index
    %c0_114 = arith.constant 0 : index
    %c0_115 = arith.constant 0 : index
    %165 = vector.load %arg8[%c0_112, %c2_113, %c0_114, %c0_115] : memref<2x4x1x8xf32, #tpu.memory_space<vmem>>, vector<1x1x1x8xf32>
    %166 = vector.shape_cast %165 : vector<1x1x1x8xf32> to vector<1x8xf32>
    %167 = vector.broadcast %166 : vector<1x8xf32> to vector<20x8xf32>
    %168 = arith.addf %164, %167 : vector<20x8xf32>
    %c0_116 = arith.constant 0 : index
    %c2_117 = arith.constant 2 : index
    %c0_118 = arith.constant 0 : index
    %c0_119 = arith.constant 0 : index
    %169 = vector.load %arg9[%c0_116, %c2_117, %c0_118, %c0_119] : memref<2x4x32x8xbf16, #tpu.memory_space<vmem>>, vector<1x1x32x8xbf16>
    %170 = vector.shape_cast %169 : vector<1x1x32x8xbf16> to vector<32x8xbf16>
    %cst_120 = arith.constant dense<0.000000e+00> : vector<20x8xf32>
    %171 = tpu.matmul %39, %170, %cst_120 {dimension_numbers = #tpu.dot_dimension_numbers<[1], [0], [0], [1], [0, 0, 1, 1], [], []>} : vector<20x32xbf16>, vector<32x8xbf16>, vector<20x8xf32> -> vector<20x8xf32>
    %c0_121 = arith.constant 0 : index
    %c2_122 = arith.constant 2 : index
    %c0_123 = arith.constant 0 : index
    %c0_124 = arith.constant 0 : index
    %172 = vector.load %arg10[%c0_121, %c2_122, %c0_123, %c0_124] : memref<2x4x1x8xf32, #tpu.memory_space<vmem>>, vector<1x1x1x8xf32>
    %173 = vector.shape_cast %172 : vector<1x1x1x8xf32> to vector<1x8xf32>
    %174 = vector.broadcast %173 : vector<1x8xf32> to vector<20x8xf32>
    %175 = arith.addf %171, %174 : vector<20x8xf32>
    %cst_125 = arith.constant 0.594603539 : f32
    %176 = vector.broadcast %cst_125 : f32 to vector<20x8xf32>
    %177 = arith.mulf %161, %176 : vector<20x8xf32>
    %178 = vector.shape_cast %177 : vector<20x8xf32> to vector<2x10x8xf32>
    %cst_126 = arith.constant 0.594603539 : f32
    %179 = vector.broadcast %cst_126 : f32 to vector<20x8xf32>
    %180 = arith.mulf %168, %179 : vector<20x8xf32>
    %181 = vector.shape_cast %180 : vector<20x8xf32> to vector<2x10x8xf32>
    %182 = vector.shape_cast %175 : vector<20x8xf32> to vector<2x10x8xf32>
    %183 = arith.truncf %178 : vector<2x10x8xf32> to vector<2x10x8xbf16>
    %184 = arith.truncf %181 : vector<2x10x8xf32> to vector<2x10x8xbf16>
    "tpu.trace_start"() <{level = 10 : i32, message = "btc,bsc->bts"}> : () -> ()
    %cst_127 = arith.constant dense<0.000000e+00> : vector<2x10x10xf32>
    %185 = tpu.matmul %183, %184, %cst_127 {dimension_numbers = #tpu.dot_dimension_numbers<[2], [2], [1], [1], [0, 0, 0, 1, 1, 1], [0], [0]>} : vector<2x10x8xbf16>, vector<2x10x8xbf16>, vector<2x10x10xf32> -> vector<2x10x10xf32>
    %cst_128 = arith.constant -1.000000e+30 : f32
    "tpu.trace_stop"() : () -> ()
    %186 = vector.shape_cast %3 : vector<2x1x10xi1> to vector<2x1x10xi1>
    %187 = vector.broadcast %186 : vector<2x1x10xi1> to vector<2x10x10xi1>
    %188 = vector.broadcast %cst_128 : f32 to vector<2x10x10xf32>
    %189 = arith.select %187, %188, %185 : vector<2x10x10xi1>, vector<2x10x10xf32>
    %cst_129 = arith.constant dense<0xFF800000> : vector<2x10xf32>
    %190 = vector.multi_reduction <maximumf>, %189, %cst_129 [2] : vector<2x10x10xf32> to vector<2x10xf32>
    %191 = vector.shape_cast %190 : vector<2x10xf32> to vector<2x10x1xf32>
    %192 = vector.broadcast %191 : vector<2x10x1xf32> to vector<2x10x10xf32>
    %193 = arith.subf %189, %192 : vector<2x10x10xf32>
    %194 = math.exp %193 : vector<2x10x10xf32>
    %195 = vector.extract_strided_slice %8 {offsets = [0, 2, 0, 0], sizes = [2, 1, 10, 10], strides = [1, 1, 1, 1]} : vector<2x4x10x10xf32> to vector<2x1x10x10xf32>
    %196 = vector.shape_cast %195 : vector<2x1x10x10xf32> to vector<2x10x10xf32>
    %197 = arith.mulf %194, %196 : vector<2x10x10xf32>
    %cst_130 = arith.constant dense<0.000000e+00> : vector<2x10xf32>
    %198 = vector.multi_reduction <add>, %197, %cst_130 [2] : vector<2x10x10xf32> to vector<2x10xf32>
    %199 = vector.shape_cast %198 : vector<2x10xf32> to vector<2x10x1xf32>
    %200 = tpu.reciprocal %199 {approx = true} : vector<2x10x1xf32> -> vector<2x10x1xf32>
    %201 = vector.broadcast %200 : vector<2x10x1xf32> to vector<2x10x10xf32>
    %202 = arith.mulf %197, %201 : vector<2x10x10xf32>
    %203 = arith.truncf %202 : vector<2x10x10xf32> to vector<2x10x10xbf16>
    %204 = arith.truncf %182 : vector<2x10x8xf32> to vector<2x10x8xbf16>
    "tpu.trace_start"() <{level = 10 : i32, message = "bts,bsc->btc"}> : () -> ()
    %cst_131 = arith.constant dense<0.000000e+00> : vector<2x10x8xf32>
    %205 = tpu.matmul %203, %204, %cst_131 {dimension_numbers = #tpu.dot_dimension_numbers<[2], [1], [1], [2], [0, 0, 0, 1, 1, 2], [0], [0]>} : vector<2x10x10xbf16>, vector<2x10x8xbf16>, vector<2x10x8xf32> -> vector<2x10x8xf32>
    "tpu.trace_stop"() : () -> ()
    %206 = vector.shape_cast %205 : vector<2x10x8xf32> to vector<20x8xf32>
    %207 = arith.truncf %206 : vector<20x8xf32> to vector<20x8xbf16>
    %c0_132 = arith.constant 0 : index
    %c2_133 = arith.constant 2 : index
    %c0_134 = arith.constant 0 : index
    %c0_135 = arith.constant 0 : index
    %208 = vector.load %arg11[%c0_132, %c2_133, %c0_134, %c0_135] : memref<2x4x8x32xbf16, #tpu.memory_space<vmem>>, vector<1x1x8x32xbf16>
    %209 = vector.shape_cast %208 : vector<1x1x8x32xbf16> to vector<8x32xbf16>
    %cst_136 = arith.constant dense<0.000000e+00> : vector<20x32xf32>
    %210 = tpu.matmul %207, %209, %cst_136 {dimension_numbers = #tpu.dot_dimension_numbers<[1], [0], [0], [1], [0, 0, 1, 1], [], []>} : vector<20x8xbf16>, vector<8x32xbf16>, vector<20x32xf32> -> vector<20x32xf32>
    %211 = arith.addf %154, %210 : vector<20x32xf32>
    %c0_137 = arith.constant 0 : index
    %c3 = arith.constant 3 : index
    %c0_138 = arith.constant 0 : index
    %c0_139 = arith.constant 0 : index
    %212 = vector.load %arg5[%c0_137, %c3, %c0_138, %c0_139] : memref<2x4x32x8xbf16, #tpu.memory_space<vmem>>, vector<1x1x32x8xbf16>
    %213 = vector.shape_cast %212 : vector<1x1x32x8xbf16> to vector<32x8xbf16>
    %cst_140 = arith.constant dense<0.000000e+00> : vector<20x8xf32>
    %214 = tpu.matmul %39, %213, %cst_140 {dimension_numbers = #tpu.dot_dimension_numbers<[1], [0], [0], [1], [0, 0, 1, 1], [], []>} : vector<20x32xbf16>, vector<32x8xbf16>, vector<20x8xf32> -> vector<20x8xf32>
    %c0_141 = arith.constant 0 : index
    %c3_142 = arith.constant 3 : index
    %c0_143 = arith.constant 0 : index
    %c0_144 = arith.constant 0 : index
    %215 = vector.load %arg6[%c0_141, %c3_142, %c0_143, %c0_144] : memref<2x4x1x8xf32, #tpu.memory_space<vmem>>, vector<1x1x1x8xf32>
    %216 = vector.shape_cast %215 : vector<1x1x1x8xf32> to vector<1x8xf32>
    %217 = vector.broadcast %216 : vector<1x8xf32> to vector<20x8xf32>
    %218 = arith.addf %214, %217 : vector<20x8xf32>
    %c0_145 = arith.constant 0 : index
    %c3_146 = arith.constant 3 : index
    %c0_147 = arith.constant 0 : index
    %c0_148 = arith.constant 0 : index
    %219 = vector.load %arg7[%c0_145, %c3_146, %c0_147, %c0_148] : memref<2x4x32x8xbf16, #tpu.memory_space<vmem>>, vector<1x1x32x8xbf16>
    %220 = vector.shape_cast %219 : vector<1x1x32x8xbf16> to vector<32x8xbf16>
    %cst_149 = arith.constant dense<0.000000e+00> : vector<20x8xf32>
    %221 = tpu.matmul %39, %220, %cst_149 {dimension_numbers = #tpu.dot_dimension_numbers<[1], [0], [0], [1], [0, 0, 1, 1], [], []>} : vector<20x32xbf16>, vector<32x8xbf16>, vector<20x8xf32> -> vector<20x8xf32>
    %c0_150 = arith.constant 0 : index
    %c3_151 = arith.constant 3 : index
    %c0_152 = arith.constant 0 : index
    %c0_153 = arith.constant 0 : index
    %222 = vector.load %arg8[%c0_150, %c3_151, %c0_152, %c0_153] : memref<2x4x1x8xf32, #tpu.memory_space<vmem>>, vector<1x1x1x8xf32>
    %223 = vector.shape_cast %222 : vector<1x1x1x8xf32> to vector<1x8xf32>
    %224 = vector.broadcast %223 : vector<1x8xf32> to vector<20x8xf32>
    %225 = arith.addf %221, %224 : vector<20x8xf32>
    %c0_154 = arith.constant 0 : index
    %c3_155 = arith.constant 3 : index
    %c0_156 = arith.constant 0 : index
    %c0_157 = arith.constant 0 : index
    %226 = vector.load %arg9[%c0_154, %c3_155, %c0_156, %c0_157] : memref<2x4x32x8xbf16, #tpu.memory_space<vmem>>, vector<1x1x32x8xbf16>
    %227 = vector.shape_cast %226 : vector<1x1x32x8xbf16> to vector<32x8xbf16>
    %cst_158 = arith.constant dense<0.000000e+00> : vector<20x8xf32>
    %228 = tpu.matmul %39, %227, %cst_158 {dimension_numbers = #tpu.dot_dimension_numbers<[1], [0], [0], [1], [0, 0, 1, 1], [], []>} : vector<20x32xbf16>, vector<32x8xbf16>, vector<20x8xf32> -> vector<20x8xf32>
    %c0_159 = arith.constant 0 : index
    %c3_160 = arith.constant 3 : index
    %c0_161 = arith.constant 0 : index
    %c0_162 = arith.constant 0 : index
    %229 = vector.load %arg10[%c0_159, %c3_160, %c0_161, %c0_162] : memref<2x4x1x8xf32, #tpu.memory_space<vmem>>, vector<1x1x1x8xf32>
    %230 = vector.shape_cast %229 : vector<1x1x1x8xf32> to vector<1x8xf32>
    %231 = vector.broadcast %230 : vector<1x8xf32> to vector<20x8xf32>
    %232 = arith.addf %228, %231 : vector<20x8xf32>
    %cst_163 = arith.constant 0.594603539 : f32
    %233 = vector.broadcast %cst_163 : f32 to vector<20x8xf32>
    %234 = arith.mulf %218, %233 : vector<20x8xf32>
    %235 = vector.shape_cast %234 : vector<20x8xf32> to vector<2x10x8xf32>
    %cst_164 = arith.constant 0.594603539 : f32
    %236 = vector.broadcast %cst_164 : f32 to vector<20x8xf32>
    %237 = arith.mulf %225, %236 : vector<20x8xf32>
    %238 = vector.shape_cast %237 : vector<20x8xf32> to vector<2x10x8xf32>
    %239 = vector.shape_cast %232 : vector<20x8xf32> to vector<2x10x8xf32>
    %240 = arith.truncf %235 : vector<2x10x8xf32> to vector<2x10x8xbf16>
    %241 = arith.truncf %238 : vector<2x10x8xf32> to vector<2x10x8xbf16>
    "tpu.trace_start"() <{level = 10 : i32, message = "btc,bsc->bts"}> : () -> ()
    %cst_165 = arith.constant dense<0.000000e+00> : vector<2x10x10xf32>
    %242 = tpu.matmul %240, %241, %cst_165 {dimension_numbers = #tpu.dot_dimension_numbers<[2], [2], [1], [1], [0, 0, 0, 1, 1, 1], [0], [0]>} : vector<2x10x8xbf16>, vector<2x10x8xbf16>, vector<2x10x10xf32> -> vector<2x10x10xf32>
    %cst_166 = arith.constant -1.000000e+30 : f32
    "tpu.trace_stop"() : () -> ()
    %243 = vector.shape_cast %3 : vector<2x1x10xi1> to vector<2x1x10xi1>
    %244 = vector.broadcast %243 : vector<2x1x10xi1> to vector<2x10x10xi1>
    %245 = vector.broadcast %cst_166 : f32 to vector<2x10x10xf32>
    %246 = arith.select %244, %245, %242 : vector<2x10x10xi1>, vector<2x10x10xf32>
    %cst_167 = arith.constant dense<0xFF800000> : vector<2x10xf32>
    %247 = vector.multi_reduction <maximumf>, %246, %cst_167 [2] : vector<2x10x10xf32> to vector<2x10xf32>
    %248 = vector.shape_cast %247 : vector<2x10xf32> to vector<2x10x1xf32>
    %249 = vector.broadcast %248 : vector<2x10x1xf32> to vector<2x10x10xf32>
    %250 = arith.subf %246, %249 : vector<2x10x10xf32>
    %251 = math.exp %250 : vector<2x10x10xf32>
    %252 = vector.extract_strided_slice %8 {offsets = [0, 3, 0, 0], sizes = [2, 1, 10, 10], strides = [1, 1, 1, 1]} : vector<2x4x10x10xf32> to vector<2x1x10x10xf32>
    %253 = vector.shape_cast %252 : vector<2x1x10x10xf32> to vector<2x10x10xf32>
    %254 = arith.mulf %251, %253 : vector<2x10x10xf32>
    %cst_168 = arith.constant dense<0.000000e+00> : vector<2x10xf32>
    %255 = vector.multi_reduction <add>, %254, %cst_168 [2] : vector<2x10x10xf32> to vector<2x10xf32>
    %256 = vector.shape_cast %255 : vector<2x10xf32> to vector<2x10x1xf32>
    %257 = tpu.reciprocal %256 {approx = true} : vector<2x10x1xf32> -> vector<2x10x1xf32>
    %258 = vector.broadcast %257 : vector<2x10x1xf32> to vector<2x10x10xf32>
    %259 = arith.mulf %254, %258 : vector<2x10x10xf32>
    %260 = arith.truncf %259 : vector<2x10x10xf32> to vector<2x10x10xbf16>
    %261 = arith.truncf %239 : vector<2x10x8xf32> to vector<2x10x8xbf16>
    "tpu.trace_start"() <{level = 10 : i32, message = "bts,bsc->btc"}> : () -> ()
    %cst_169 = arith.constant dense<0.000000e+00> : vector<2x10x8xf32>
    %262 = tpu.matmul %260, %261, %cst_169 {dimension_numbers = #tpu.dot_dimension_numbers<[2], [1], [1], [2], [0, 0, 0, 1, 1, 2], [0], [0]>} : vector<2x10x10xbf16>, vector<2x10x8xbf16>, vector<2x10x8xf32> -> vector<2x10x8xf32>
    "tpu.trace_stop"() : () -> ()
    %263 = vector.shape_cast %262 : vector<2x10x8xf32> to vector<20x8xf32>
    %264 = arith.truncf %263 : vector<20x8xf32> to vector<20x8xbf16>
    %c0_170 = arith.constant 0 : index
    %c3_171 = arith.constant 3 : index
    %c0_172 = arith.constant 0 : index
    %c0_173 = arith.constant 0 : index
    %265 = vector.load %arg11[%c0_170, %c3_171, %c0_172, %c0_173] : memref<2x4x8x32xbf16, #tpu.memory_space<vmem>>, vector<1x1x8x32xbf16>
    %266 = vector.shape_cast %265 : vector<1x1x8x32xbf16> to vector<8x32xbf16>
    %cst_174 = arith.constant dense<0.000000e+00> : vector<20x32xf32>
    %267 = tpu.matmul %264, %266, %cst_174 {dimension_numbers = #tpu.dot_dimension_numbers<[1], [0], [0], [1], [0, 0, 1, 1], [], []>} : vector<20x8xbf16>, vector<8x32xbf16>, vector<20x32xf32> -> vector<20x32xf32>
    %268 = arith.addf %211, %267 : vector<20x32xf32>
    %c0_175 = arith.constant 0 : index
    %c0_176 = arith.constant 0 : index
    %c0_177 = arith.constant 0 : index
    %269 = vector.load %arg12[%c0_175, %c0_176, %c0_177] : memref<2x1x32xf32, #tpu.memory_space<vmem>>, vector<1x1x32xf32>
    %270 = vector.shape_cast %269 : vector<1x1x32xf32> to vector<1x32xf32>
    %271 = vector.broadcast %270 : vector<1x32xf32> to vector<20x32xf32>
    %272 = arith.addf %268, %271 : vector<20x32xf32>
    %273 = vector.shape_cast %272 : vector<20x32xf32> to vector<2x10x32xf32>
    %274 = arith.addf %9, %273 : vector<2x10x32xf32>
    %c0_178 = arith.constant 0 : index
    %c0_179 = arith.constant 0 : index
    %c0_180 = arith.constant 0 : index
    %275 = vector.load %arg13[%c0_178, %c0_179, %c0_180] : memref<2x1x32xf32, #tpu.memory_space<vmem>>, vector<1x1x32xf32>
    %276 = vector.shape_cast %275 : vector<1x1x32xf32> to vector<1x32xf32>
    %c0_181 = arith.constant 0 : index
    %c0_182 = arith.constant 0 : index
    %c0_183 = arith.constant 0 : index
    %277 = vector.load %arg14[%c0_181, %c0_182, %c0_183] : memref<2x1x32xf32, #tpu.memory_space<vmem>>, vector<1x1x32xf32>
    %278 = vector.shape_cast %277 : vector<1x1x32xf32> to vector<1x32xf32>
    %cst_184 = arith.constant dense<0.000000e+00> : vector<2x10xf32>
    %279 = vector.multi_reduction <add>, %274, %cst_184 [2] : vector<2x10x32xf32> to vector<2x10xf32>
    %280 = vector.shape_cast %279 : vector<2x10xf32> to vector<2x10x1xf32>
    %cst_185 = arith.constant 3.200000e+01 : f32
    %281 = vector.broadcast %cst_185 : f32 to vector<2x10x1xf32>
    %282 = arith.divf %280, %281 : vector<2x10x1xf32>
    %283 = vector.broadcast %282 : vector<2x10x1xf32> to vector<2x10x32xf32>
    %284 = arith.subf %274, %283 : vector<2x10x32xf32>
    %285 = arith.mulf %284, %284 : vector<2x10x32xf32>
    %cst_186 = arith.constant dense<0.000000e+00> : vector<2x10xf32>
    %286 = vector.multi_reduction <add>, %285, %cst_186 [2] : vector<2x10x32xf32> to vector<2x10xf32>
    %287 = vector.shape_cast %286 : vector<2x10xf32> to vector<2x10x1xf32>
    %cst_187 = arith.constant 3.200000e+01 : f32
    %288 = vector.broadcast %cst_187 : f32 to vector<2x10x1xf32>
    %289 = arith.divf %287, %288 : vector<2x10x1xf32>
    %290 = vector.broadcast %282 : vector<2x10x1xf32> to vector<2x10x32xf32>
    %291 = arith.subf %274, %290 : vector<2x10x32xf32>
    %cst_188 = arith.constant 9.99999974E-6 : f32
    %292 = vector.broadcast %cst_188 : f32 to vector<2x10x1xf32>
    %293 = arith.addf %289, %292 : vector<2x10x1xf32>
    %294 = math.rsqrt %293 : vector<2x10x1xf32>
    %295 = vector.broadcast %294 : vector<2x10x1xf32> to vector<2x10x32xf32>
    %296 = arith.mulf %291, %295 : vector<2x10x32xf32>
    %297 = vector.shape_cast %276 : vector<1x32xf32> to vector<1x1x32xf32>
    %298 = vector.broadcast %297 : vector<1x1x32xf32> to vector<2x10x32xf32>
    %299 = arith.mulf %296, %298 : vector<2x10x32xf32>
    %300 = vector.shape_cast %278 : vector<1x32xf32> to vector<1x1x32xf32>
    %301 = vector.broadcast %300 : vector<1x1x32xf32> to vector<2x10x32xf32>
    %302 = arith.addf %299, %301 : vector<2x10x32xf32>
    %303 = vector.shape_cast %302 : vector<2x10x32xf32> to vector<20x32xf32>
    %304 = arith.truncf %303 : vector<20x32xf32> to vector<20x32xbf16>
    %c0_189 = arith.constant 0 : index
    %c0_190 = arith.constant 0 : index
    %c0_191 = arith.constant 0 : index
    %305 = vector.load %arg15[%c0_189, %c0_190, %c0_191] : memref<2x32x128xbf16, #tpu.memory_space<vmem>>, vector<1x32x128xbf16>
    %306 = vector.shape_cast %305 : vector<1x32x128xbf16> to vector<32x128xbf16>
    %cst_192 = arith.constant dense<0.000000e+00> : vector<20x128xf32>
    %307 = tpu.matmul %304, %306, %cst_192 {dimension_numbers = #tpu.dot_dimension_numbers<[1], [0], [0], [1], [0, 0, 1, 1], [], []>} : vector<20x32xbf16>, vector<32x128xbf16>, vector<20x128xf32> -> vector<20x128xf32>
    %c0_193 = arith.constant 0 : index
    %c0_194 = arith.constant 0 : index
    %c0_195 = arith.constant 0 : index
    %308 = vector.load %arg16[%c0_193, %c0_194, %c0_195] : memref<2x1x128xf32, #tpu.memory_space<vmem>>, vector<1x1x128xf32>
    %309 = vector.shape_cast %308 : vector<1x1x128xf32> to vector<1x128xf32>
    %310 = vector.broadcast %309 : vector<1x128xf32> to vector<20x128xf32>
    %311 = arith.addf %307, %310 : vector<20x128xf32>
    %cst_196 = arith.constant 5.000000e-01 : f32
    %312 = vector.broadcast %cst_196 : f32 to vector<20x128xf32>
    %313 = arith.mulf %312, %311 : vector<20x128xf32>
    %cst_197 = arith.constant 0.707106769 : f32
    %314 = vector.broadcast %cst_197 : f32 to vector<20x128xf32>
    %315 = arith.mulf %311, %314 : vector<20x128xf32>
    %cst_198 = arith.constant 0.000000e+00 : f32
    %316 = vector.broadcast %cst_198 : f32 to vector<20x128xf32>
    %317 = arith.cmpf oge, %315, %316 : vector<20x128xf32>
    %cst_199 = arith.constant 1.000000e+00 : f32
    %cst_200 = arith.constant -1.000000e+00 : f32
    %318 = vector.broadcast %cst_199 : f32 to vector<20x128xf32>
    %319 = vector.broadcast %cst_200 : f32 to vector<20x128xf32>
    %320 = arith.select %317, %318, %319 : vector<20x128xi1>, vector<20x128xf32>
    %321 = math.absf %315 : vector<20x128xf32>
    %cst_201 = arith.constant 0.327591091 : f32
    %322 = vector.broadcast %cst_201 : f32 to vector<20x128xf32>
    %323 = arith.mulf %322, %321 : vector<20x128xf32>
    %cst_202 = arith.constant 1.000000e+00 : f32
    %324 = vector.broadcast %cst_202 : f32 to vector<20x128xf32>
    %325 = arith.addf %324, %323 : vector<20x128xf32>
    %cst_203 = arith.constant 1.000000e+00 : f32
    %326 = vector.broadcast %cst_203 : f32 to vector<20x128xf32>
    %327 = arith.divf %326, %325 : vector<20x128xf32>
    %cst_204 = arith.constant 1.06140542 : f32
    %328 = vector.broadcast %cst_204 : f32 to vector<20x128xf32>
    %329 = arith.mulf %328, %327 : vector<20x128xf32>
    %cst_205 = arith.constant -1.45315206 : f32
    %330 = vector.broadcast %cst_205 : f32 to vector<20x128xf32>
    %331 = arith.addf %329, %330 : vector<20x128xf32>
    %332 = arith.mulf %331, %327 : vector<20x128xf32>
    %cst_206 = arith.constant 1.42141378 : f32
    %333 = vector.broadcast %cst_206 : f32 to vector<20x128xf32>
    %334 = arith.addf %332, %333 : vector<20x128xf32>
    %335 = arith.mulf %334, %327 : vector<20x128xf32>
    %cst_207 = arith.constant -0.284496725 : f32
    %336 = vector.broadcast %cst_207 : f32 to vector<20x128xf32>
    %337 = arith.addf %335, %336 : vector<20x128xf32>
    %338 = arith.mulf %337, %327 : vector<20x128xf32>
    %cst_208 = arith.constant 0.254829586 : f32
    %339 = vector.broadcast %cst_208 : f32 to vector<20x128xf32>
    %340 = arith.addf %338, %339 : vector<20x128xf32>
    %341 = arith.mulf %340, %327 : vector<20x128xf32>
    %cst_209 = arith.constant 0.000000e+00 : f32
    %342 = vector.broadcast %cst_209 : f32 to vector<20x128xf32>
    %343 = arith.subf %342, %321 : vector<20x128xf32>
    %344 = arith.mulf %343, %321 : vector<20x128xf32>
    %345 = math.exp %344 : vector<20x128xf32>
    %346 = arith.mulf %341, %345 : vector<20x128xf32>
    %cst_210 = arith.constant 1.000000e+00 : f32
    %347 = vector.broadcast %cst_210 : f32 to vector<20x128xf32>
    %348 = arith.subf %347, %346 : vector<20x128xf32>
    %349 = arith.mulf %320, %348 : vector<20x128xf32>
    %cst_211 = arith.constant 1.000000e+00 : f32
    %350 = vector.broadcast %cst_211 : f32 to vector<20x128xf32>
    %351 = arith.addf %350, %349 : vector<20x128xf32>
    %352 = arith.mulf %313, %351 : vector<20x128xf32>
    %353 = arith.truncf %352 : vector<20x128xf32> to vector<20x128xbf16>
    %c0_212 = arith.constant 0 : index
    %c0_213 = arith.constant 0 : index
    %c0_214 = arith.constant 0 : index
    %354 = vector.load %arg17[%c0_212, %c0_213, %c0_214] : memref<2x128x32xbf16, #tpu.memory_space<vmem>>, vector<1x128x32xbf16>
    %355 = vector.shape_cast %354 : vector<1x128x32xbf16> to vector<128x32xbf16>
    %cst_215 = arith.constant dense<0.000000e+00> : vector<20x32xf32>
    %356 = tpu.matmul %353, %355, %cst_215 {dimension_numbers = #tpu.dot_dimension_numbers<[1], [0], [0], [1], [0, 0, 1, 1], [], []>} : vector<20x128xbf16>, vector<128x32xbf16>, vector<20x32xf32> -> vector<20x32xf32>
    %c0_216 = arith.constant 0 : index
    %c0_217 = arith.constant 0 : index
    %c0_218 = arith.constant 0 : index
    %357 = vector.load %arg18[%c0_216, %c0_217, %c0_218] : memref<2x1x32xf32, #tpu.memory_space<vmem>>, vector<1x1x32xf32>
    %358 = vector.shape_cast %357 : vector<1x1x32xf32> to vector<1x32xf32>
    %359 = vector.broadcast %358 : vector<1x32xf32> to vector<20x32xf32>
    %360 = arith.addf %356, %359 : vector<20x32xf32>
    %361 = vector.shape_cast %360 : vector<20x32xf32> to vector<2x10x32xf32>
    %362 = arith.addf %274, %361 : vector<2x10x32xf32>
    %c1_219 = arith.constant 1 : index
    %c0_220 = arith.constant 0 : index
    %c0_221 = arith.constant 0 : index
    %363 = vector.load %arg3[%c1_219, %c0_220, %c0_221] : memref<2x1x32xf32, #tpu.memory_space<vmem>>, vector<1x1x32xf32>
    %364 = vector.shape_cast %363 : vector<1x1x32xf32> to vector<1x32xf32>
    %c1_222 = arith.constant 1 : index
    %c0_223 = arith.constant 0 : index
    %c0_224 = arith.constant 0 : index
    %365 = vector.load %arg4[%c1_222, %c0_223, %c0_224] : memref<2x1x32xf32, #tpu.memory_space<vmem>>, vector<1x1x32xf32>
    %366 = vector.shape_cast %365 : vector<1x1x32xf32> to vector<1x32xf32>
    %cst_225 = arith.constant dense<0.000000e+00> : vector<2x10xf32>
    %367 = vector.multi_reduction <add>, %362, %cst_225 [2] : vector<2x10x32xf32> to vector<2x10xf32>
    %368 = vector.shape_cast %367 : vector<2x10xf32> to vector<2x10x1xf32>
    %cst_226 = arith.constant 3.200000e+01 : f32
    %369 = vector.broadcast %cst_226 : f32 to vector<2x10x1xf32>
    %370 = arith.divf %368, %369 : vector<2x10x1xf32>
    %371 = vector.broadcast %370 : vector<2x10x1xf32> to vector<2x10x32xf32>
    %372 = arith.subf %362, %371 : vector<2x10x32xf32>
    %373 = arith.mulf %372, %372 : vector<2x10x32xf32>
    %cst_227 = arith.constant dense<0.000000e+00> : vector<2x10xf32>
    %374 = vector.multi_reduction <add>, %373, %cst_227 [2] : vector<2x10x32xf32> to vector<2x10xf32>
    %375 = vector.shape_cast %374 : vector<2x10xf32> to vector<2x10x1xf32>
    %cst_228 = arith.constant 3.200000e+01 : f32
    %376 = vector.broadcast %cst_228 : f32 to vector<2x10x1xf32>
    %377 = arith.divf %375, %376 : vector<2x10x1xf32>
    %378 = vector.broadcast %370 : vector<2x10x1xf32> to vector<2x10x32xf32>
    %379 = arith.subf %362, %378 : vector<2x10x32xf32>
    %cst_229 = arith.constant 9.99999974E-6 : f32
    %380 = vector.broadcast %cst_229 : f32 to vector<2x10x1xf32>
    %381 = arith.addf %377, %380 : vector<2x10x1xf32>
    %382 = math.rsqrt %381 : vector<2x10x1xf32>
    %383 = vector.broadcast %382 : vector<2x10x1xf32> to vector<2x10x32xf32>
    %384 = arith.mulf %379, %383 : vector<2x10x32xf32>
    %385 = vector.shape_cast %364 : vector<1x32xf32> to vector<1x1x32xf32>
    %386 = vector.broadcast %385 : vector<1x1x32xf32> to vector<2x10x32xf32>
    %387 = arith.mulf %384, %386 : vector<2x10x32xf32>
    %388 = vector.shape_cast %366 : vector<1x32xf32> to vector<1x1x32xf32>
    %389 = vector.broadcast %388 : vector<1x1x32xf32> to vector<2x10x32xf32>
    %390 = arith.addf %387, %389 : vector<2x10x32xf32>
    %391 = vector.shape_cast %390 : vector<2x10x32xf32> to vector<20x32xf32>
    %392 = arith.truncf %391 : vector<20x32xf32> to vector<20x32xbf16>
    %cst_230 = arith.constant 0.000000e+00 : f32
    %393 = vector.broadcast %cst_230 : f32 to vector<20x32xf32>
    %c1_231 = arith.constant 1 : index
    %c0_232 = arith.constant 0 : index
    %c0_233 = arith.constant 0 : index
    %c0_234 = arith.constant 0 : index
    %394 = vector.load %arg5[%c1_231, %c0_232, %c0_233, %c0_234] : memref<2x4x32x8xbf16, #tpu.memory_space<vmem>>, vector<1x1x32x8xbf16>
    %395 = vector.shape_cast %394 : vector<1x1x32x8xbf16> to vector<32x8xbf16>
    %cst_235 = arith.constant dense<0.000000e+00> : vector<20x8xf32>
    %396 = tpu.matmul %392, %395, %cst_235 {dimension_numbers = #tpu.dot_dimension_numbers<[1], [0], [0], [1], [0, 0, 1, 1], [], []>} : vector<20x32xbf16>, vector<32x8xbf16>, vector<20x8xf32> -> vector<20x8xf32>
    %c1_236 = arith.constant 1 : index
    %c0_237 = arith.constant 0 : index
    %c0_238 = arith.constant 0 : index
    %c0_239 = arith.constant 0 : index
    %397 = vector.load %arg6[%c1_236, %c0_237, %c0_238, %c0_239] : memref<2x4x1x8xf32, #tpu.memory_space<vmem>>, vector<1x1x1x8xf32>
    %398 = vector.shape_cast %397 : vector<1x1x1x8xf32> to vector<1x8xf32>
    %399 = vector.broadcast %398 : vector<1x8xf32> to vector<20x8xf32>
    %400 = arith.addf %396, %399 : vector<20x8xf32>
    %c1_240 = arith.constant 1 : index
    %c0_241 = arith.constant 0 : index
    %c0_242 = arith.constant 0 : index
    %c0_243 = arith.constant 0 : index
    %401 = vector.load %arg7[%c1_240, %c0_241, %c0_242, %c0_243] : memref<2x4x32x8xbf16, #tpu.memory_space<vmem>>, vector<1x1x32x8xbf16>
    %402 = vector.shape_cast %401 : vector<1x1x32x8xbf16> to vector<32x8xbf16>
    %cst_244 = arith.constant dense<0.000000e+00> : vector<20x8xf32>
    %403 = tpu.matmul %392, %402, %cst_244 {dimension_numbers = #tpu.dot_dimension_numbers<[1], [0], [0], [1], [0, 0, 1, 1], [], []>} : vector<20x32xbf16>, vector<32x8xbf16>, vector<20x8xf32> -> vector<20x8xf32>
    %c1_245 = arith.constant 1 : index
    %c0_246 = arith.constant 0 : index
    %c0_247 = arith.constant 0 : index
    %c0_248 = arith.constant 0 : index
    %404 = vector.load %arg8[%c1_245, %c0_246, %c0_247, %c0_248] : memref<2x4x1x8xf32, #tpu.memory_space<vmem>>, vector<1x1x1x8xf32>
    %405 = vector.shape_cast %404 : vector<1x1x1x8xf32> to vector<1x8xf32>
    %406 = vector.broadcast %405 : vector<1x8xf32> to vector<20x8xf32>
    %407 = arith.addf %403, %406 : vector<20x8xf32>
    %c1_249 = arith.constant 1 : index
    %c0_250 = arith.constant 0 : index
    %c0_251 = arith.constant 0 : index
    %c0_252 = arith.constant 0 : index
    %408 = vector.load %arg9[%c1_249, %c0_250, %c0_251, %c0_252] : memref<2x4x32x8xbf16, #tpu.memory_space<vmem>>, vector<1x1x32x8xbf16>
    %409 = vector.shape_cast %408 : vector<1x1x32x8xbf16> to vector<32x8xbf16>
    %cst_253 = arith.constant dense<0.000000e+00> : vector<20x8xf32>
    %410 = tpu.matmul %392, %409, %cst_253 {dimension_numbers = #tpu.dot_dimension_numbers<[1], [0], [0], [1], [0, 0, 1, 1], [], []>} : vector<20x32xbf16>, vector<32x8xbf16>, vector<20x8xf32> -> vector<20x8xf32>
    %c1_254 = arith.constant 1 : index
    %c0_255 = arith.constant 0 : index
    %c0_256 = arith.constant 0 : index
    %c0_257 = arith.constant 0 : index
    %411 = vector.load %arg10[%c1_254, %c0_255, %c0_256, %c0_257] : memref<2x4x1x8xf32, #tpu.memory_space<vmem>>, vector<1x1x1x8xf32>
    %412 = vector.shape_cast %411 : vector<1x1x1x8xf32> to vector<1x8xf32>
    %413 = vector.broadcast %412 : vector<1x8xf32> to vector<20x8xf32>
    %414 = arith.addf %410, %413 : vector<20x8xf32>
    %cst_258 = arith.constant 0.594603539 : f32
    %415 = vector.broadcast %cst_258 : f32 to vector<20x8xf32>
    %416 = arith.mulf %400, %415 : vector<20x8xf32>
    %417 = vector.shape_cast %416 : vector<20x8xf32> to vector<2x10x8xf32>
    %cst_259 = arith.constant 0.594603539 : f32
    %418 = vector.broadcast %cst_259 : f32 to vector<20x8xf32>
    %419 = arith.mulf %407, %418 : vector<20x8xf32>
    %420 = vector.shape_cast %419 : vector<20x8xf32> to vector<2x10x8xf32>
    %421 = vector.shape_cast %414 : vector<20x8xf32> to vector<2x10x8xf32>
    %422 = arith.truncf %417 : vector<2x10x8xf32> to vector<2x10x8xbf16>
    %423 = arith.truncf %420 : vector<2x10x8xf32> to vector<2x10x8xbf16>
    "tpu.trace_start"() <{level = 10 : i32, message = "btc,bsc->bts"}> : () -> ()
    %cst_260 = arith.constant dense<0.000000e+00> : vector<2x10x10xf32>
    %424 = tpu.matmul %422, %423, %cst_260 {dimension_numbers = #tpu.dot_dimension_numbers<[2], [2], [1], [1], [0, 0, 0, 1, 1, 1], [0], [0]>} : vector<2x10x8xbf16>, vector<2x10x8xbf16>, vector<2x10x10xf32> -> vector<2x10x10xf32>
    %cst_261 = arith.constant -1.000000e+30 : f32
    "tpu.trace_stop"() : () -> ()
    %425 = vector.shape_cast %3 : vector<2x1x10xi1> to vector<2x1x10xi1>
    %426 = vector.broadcast %425 : vector<2x1x10xi1> to vector<2x10x10xi1>
    %427 = vector.broadcast %cst_261 : f32 to vector<2x10x10xf32>
    %428 = arith.select %426, %427, %424 : vector<2x10x10xi1>, vector<2x10x10xf32>
    %cst_262 = arith.constant dense<0xFF800000> : vector<2x10xf32>
    %429 = vector.multi_reduction <maximumf>, %428, %cst_262 [2] : vector<2x10x10xf32> to vector<2x10xf32>
    %430 = vector.shape_cast %429 : vector<2x10xf32> to vector<2x10x1xf32>
    %431 = vector.broadcast %430 : vector<2x10x1xf32> to vector<2x10x10xf32>
    %432 = arith.subf %428, %431 : vector<2x10x10xf32>
    %433 = math.exp %432 : vector<2x10x10xf32>
    %434 = vector.extract_strided_slice %8 {offsets = [0, 0, 0, 0], sizes = [2, 1, 10, 10], strides = [1, 1, 1, 1]} : vector<2x4x10x10xf32> to vector<2x1x10x10xf32>
    %435 = vector.shape_cast %434 : vector<2x1x10x10xf32> to vector<2x10x10xf32>
    %436 = arith.mulf %433, %435 : vector<2x10x10xf32>
    %cst_263 = arith.constant dense<0.000000e+00> : vector<2x10xf32>
    %437 = vector.multi_reduction <add>, %436, %cst_263 [2] : vector<2x10x10xf32> to vector<2x10xf32>
    %438 = vector.shape_cast %437 : vector<2x10xf32> to vector<2x10x1xf32>
    %439 = tpu.reciprocal %438 {approx = true} : vector<2x10x1xf32> -> vector<2x10x1xf32>
    %440 = vector.broadcast %439 : vector<2x10x1xf32> to vector<2x10x10xf32>
    %441 = arith.mulf %436, %440 : vector<2x10x10xf32>
    %442 = arith.truncf %441 : vector<2x10x10xf32> to vector<2x10x10xbf16>
    %443 = arith.truncf %421 : vector<2x10x8xf32> to vector<2x10x8xbf16>
    "tpu.trace_start"() <{level = 10 : i32, message = "bts,bsc->btc"}> : () -> ()
    %cst_264 = arith.constant dense<0.000000e+00> : vector<2x10x8xf32>
    %444 = tpu.matmul %442, %443, %cst_264 {dimension_numbers = #tpu.dot_dimension_numbers<[2], [1], [1], [2], [0, 0, 0, 1, 1, 2], [0], [0]>} : vector<2x10x10xbf16>, vector<2x10x8xbf16>, vector<2x10x8xf32> -> vector<2x10x8xf32>
    "tpu.trace_stop"() : () -> ()
    %445 = vector.shape_cast %444 : vector<2x10x8xf32> to vector<20x8xf32>
    %446 = arith.truncf %445 : vector<20x8xf32> to vector<20x8xbf16>
    %c1_265 = arith.constant 1 : index
    %c0_266 = arith.constant 0 : index
    %c0_267 = arith.constant 0 : index
    %c0_268 = arith.constant 0 : index
    %447 = vector.load %arg11[%c1_265, %c0_266, %c0_267, %c0_268] : memref<2x4x8x32xbf16, #tpu.memory_space<vmem>>, vector<1x1x8x32xbf16>
    %448 = vector.shape_cast %447 : vector<1x1x8x32xbf16> to vector<8x32xbf16>
    %cst_269 = arith.constant dense<0.000000e+00> : vector<20x32xf32>
    %449 = tpu.matmul %446, %448, %cst_269 {dimension_numbers = #tpu.dot_dimension_numbers<[1], [0], [0], [1], [0, 0, 1, 1], [], []>} : vector<20x8xbf16>, vector<8x32xbf16>, vector<20x32xf32> -> vector<20x32xf32>
    %450 = arith.addf %393, %449 : vector<20x32xf32>
    %c1_270 = arith.constant 1 : index
    %c1_271 = arith.constant 1 : index
    %c0_272 = arith.constant 0 : index
    %c0_273 = arith.constant 0 : index
    %451 = vector.load %arg5[%c1_270, %c1_271, %c0_272, %c0_273] : memref<2x4x32x8xbf16, #tpu.memory_space<vmem>>, vector<1x1x32x8xbf16>
    %452 = vector.shape_cast %451 : vector<1x1x32x8xbf16> to vector<32x8xbf16>
    %cst_274 = arith.constant dense<0.000000e+00> : vector<20x8xf32>
    %453 = tpu.matmul %392, %452, %cst_274 {dimension_numbers = #tpu.dot_dimension_numbers<[1], [0], [0], [1], [0, 0, 1, 1], [], []>} : vector<20x32xbf16>, vector<32x8xbf16>, vector<20x8xf32> -> vector<20x8xf32>
    %c1_275 = arith.constant 1 : index
    %c1_276 = arith.constant 1 : index
    %c0_277 = arith.constant 0 : index
    %c0_278 = arith.constant 0 : index
    %454 = vector.load %arg6[%c1_275, %c1_276, %c0_277, %c0_278] : memref<2x4x1x8xf32, #tpu.memory_space<vmem>>, vector<1x1x1x8xf32>
    %455 = vector.shape_cast %454 : vector<1x1x1x8xf32> to vector<1x8xf32>
    %456 = vector.broadcast %455 : vector<1x8xf32> to vector<20x8xf32>
    %457 = arith.addf %453, %456 : vector<20x8xf32>
    %c1_279 = arith.constant 1 : index
    %c1_280 = arith.constant 1 : index
    %c0_281 = arith.constant 0 : index
    %c0_282 = arith.constant 0 : index
    %458 = vector.load %arg7[%c1_279, %c1_280, %c0_281, %c0_282] : memref<2x4x32x8xbf16, #tpu.memory_space<vmem>>, vector<1x1x32x8xbf16>
    %459 = vector.shape_cast %458 : vector<1x1x32x8xbf16> to vector<32x8xbf16>
    %cst_283 = arith.constant dense<0.000000e+00> : vector<20x8xf32>
    %460 = tpu.matmul %392, %459, %cst_283 {dimension_numbers = #tpu.dot_dimension_numbers<[1], [0], [0], [1], [0, 0, 1, 1], [], []>} : vector<20x32xbf16>, vector<32x8xbf16>, vector<20x8xf32> -> vector<20x8xf32>
    %c1_284 = arith.constant 1 : index
    %c1_285 = arith.constant 1 : index
    %c0_286 = arith.constant 0 : index
    %c0_287 = arith.constant 0 : index
    %461 = vector.load %arg8[%c1_284, %c1_285, %c0_286, %c0_287] : memref<2x4x1x8xf32, #tpu.memory_space<vmem>>, vector<1x1x1x8xf32>
    %462 = vector.shape_cast %461 : vector<1x1x1x8xf32> to vector<1x8xf32>
    %463 = vector.broadcast %462 : vector<1x8xf32> to vector<20x8xf32>
    %464 = arith.addf %460, %463 : vector<20x8xf32>
    %c1_288 = arith.constant 1 : index
    %c1_289 = arith.constant 1 : index
    %c0_290 = arith.constant 0 : index
    %c0_291 = arith.constant 0 : index
    %465 = vector.load %arg9[%c1_288, %c1_289, %c0_290, %c0_291] : memref<2x4x32x8xbf16, #tpu.memory_space<vmem>>, vector<1x1x32x8xbf16>
    %466 = vector.shape_cast %465 : vector<1x1x32x8xbf16> to vector<32x8xbf16>
    %cst_292 = arith.constant dense<0.000000e+00> : vector<20x8xf32>
    %467 = tpu.matmul %392, %466, %cst_292 {dimension_numbers = #tpu.dot_dimension_numbers<[1], [0], [0], [1], [0, 0, 1, 1], [], []>} : vector<20x32xbf16>, vector<32x8xbf16>, vector<20x8xf32> -> vector<20x8xf32>
    %c1_293 = arith.constant 1 : index
    %c1_294 = arith.constant 1 : index
    %c0_295 = arith.constant 0 : index
    %c0_296 = arith.constant 0 : index
    %468 = vector.load %arg10[%c1_293, %c1_294, %c0_295, %c0_296] : memref<2x4x1x8xf32, #tpu.memory_space<vmem>>, vector<1x1x1x8xf32>
    %469 = vector.shape_cast %468 : vector<1x1x1x8xf32> to vector<1x8xf32>
    %470 = vector.broadcast %469 : vector<1x8xf32> to vector<20x8xf32>
    %471 = arith.addf %467, %470 : vector<20x8xf32>
    %cst_297 = arith.constant 0.594603539 : f32
    %472 = vector.broadcast %cst_297 : f32 to vector<20x8xf32>
    %473 = arith.mulf %457, %472 : vector<20x8xf32>
    %474 = vector.shape_cast %473 : vector<20x8xf32> to vector<2x10x8xf32>
    %cst_298 = arith.constant 0.594603539 : f32
    %475 = vector.broadcast %cst_298 : f32 to vector<20x8xf32>
    %476 = arith.mulf %464, %475 : vector<20x8xf32>
    %477 = vector.shape_cast %476 : vector<20x8xf32> to vector<2x10x8xf32>
    %478 = vector.shape_cast %471 : vector<20x8xf32> to vector<2x10x8xf32>
    %479 = arith.truncf %474 : vector<2x10x8xf32> to vector<2x10x8xbf16>
    %480 = arith.truncf %477 : vector<2x10x8xf32> to vector<2x10x8xbf16>
    "tpu.trace_start"() <{level = 10 : i32, message = "btc,bsc->bts"}> : () -> ()
    %cst_299 = arith.constant dense<0.000000e+00> : vector<2x10x10xf32>
    %481 = tpu.matmul %479, %480, %cst_299 {dimension_numbers = #tpu.dot_dimension_numbers<[2], [2], [1], [1], [0, 0, 0, 1, 1, 1], [0], [0]>} : vector<2x10x8xbf16>, vector<2x10x8xbf16>, vector<2x10x10xf32> -> vector<2x10x10xf32>
    %cst_300 = arith.constant -1.000000e+30 : f32
    "tpu.trace_stop"() : () -> ()
    %482 = vector.shape_cast %3 : vector<2x1x10xi1> to vector<2x1x10xi1>
    %483 = vector.broadcast %482 : vector<2x1x10xi1> to vector<2x10x10xi1>
    %484 = vector.broadcast %cst_300 : f32 to vector<2x10x10xf32>
    %485 = arith.select %483, %484, %481 : vector<2x10x10xi1>, vector<2x10x10xf32>
    %cst_301 = arith.constant dense<0xFF800000> : vector<2x10xf32>
    %486 = vector.multi_reduction <maximumf>, %485, %cst_301 [2] : vector<2x10x10xf32> to vector<2x10xf32>
    %487 = vector.shape_cast %486 : vector<2x10xf32> to vector<2x10x1xf32>
    %488 = vector.broadcast %487 : vector<2x10x1xf32> to vector<2x10x10xf32>
    %489 = arith.subf %485, %488 : vector<2x10x10xf32>
    %490 = math.exp %489 : vector<2x10x10xf32>
    %491 = vector.extract_strided_slice %8 {offsets = [0, 1, 0, 0], sizes = [2, 1, 10, 10], strides = [1, 1, 1, 1]} : vector<2x4x10x10xf32> to vector<2x1x10x10xf32>
    %492 = vector.shape_cast %491 : vector<2x1x10x10xf32> to vector<2x10x10xf32>
    %493 = arith.mulf %490, %492 : vector<2x10x10xf32>
    %cst_302 = arith.constant dense<0.000000e+00> : vector<2x10xf32>
    %494 = vector.multi_reduction <add>, %493, %cst_302 [2] : vector<2x10x10xf32> to vector<2x10xf32>
    %495 = vector.shape_cast %494 : vector<2x10xf32> to vector<2x10x1xf32>
    %496 = tpu.reciprocal %495 {approx = true} : vector<2x10x1xf32> -> vector<2x10x1xf32>
    %497 = vector.broadcast %496 : vector<2x10x1xf32> to vector<2x10x10xf32>
    %498 = arith.mulf %493, %497 : vector<2x10x10xf32>
    %499 = arith.truncf %498 : vector<2x10x10xf32> to vector<2x10x10xbf16>
    %500 = arith.truncf %478 : vector<2x10x8xf32> to vector<2x10x8xbf16>
    "tpu.trace_start"() <{level = 10 : i32, message = "bts,bsc->btc"}> : () -> ()
    %cst_303 = arith.constant dense<0.000000e+00> : vector<2x10x8xf32>
    %501 = tpu.matmul %499, %500, %cst_303 {dimension_numbers = #tpu.dot_dimension_numbers<[2], [1], [1], [2], [0, 0, 0, 1, 1, 2], [0], [0]>} : vector<2x10x10xbf16>, vector<2x10x8xbf16>, vector<2x10x8xf32> -> vector<2x10x8xf32>
    "tpu.trace_stop"() : () -> ()
    %502 = vector.shape_cast %501 : vector<2x10x8xf32> to vector<20x8xf32>
    %503 = arith.truncf %502 : vector<20x8xf32> to vector<20x8xbf16>
    %c1_304 = arith.constant 1 : index
    %c1_305 = arith.constant 1 : index
    %c0_306 = arith.constant 0 : index
    %c0_307 = arith.constant 0 : index
    %504 = vector.load %arg11[%c1_304, %c1_305, %c0_306, %c0_307] : memref<2x4x8x32xbf16, #tpu.memory_space<vmem>>, vector<1x1x8x32xbf16>
    %505 = vector.shape_cast %504 : vector<1x1x8x32xbf16> to vector<8x32xbf16>
    %cst_308 = arith.constant dense<0.000000e+00> : vector<20x32xf32>
    %506 = tpu.matmul %503, %505, %cst_308 {dimension_numbers = #tpu.dot_dimension_numbers<[1], [0], [0], [1], [0, 0, 1, 1], [], []>} : vector<20x8xbf16>, vector<8x32xbf16>, vector<20x32xf32> -> vector<20x32xf32>
    %507 = arith.addf %450, %506 : vector<20x32xf32>
    %c1_309 = arith.constant 1 : index
    %c2_310 = arith.constant 2 : index
    %c0_311 = arith.constant 0 : index
    %c0_312 = arith.constant 0 : index
    %508 = vector.load %arg5[%c1_309, %c2_310, %c0_311, %c0_312] : memref<2x4x32x8xbf16, #tpu.memory_space<vmem>>, vector<1x1x32x8xbf16>
    %509 = vector.shape_cast %508 : vector<1x1x32x8xbf16> to vector<32x8xbf16>
    %cst_313 = arith.constant dense<0.000000e+00> : vector<20x8xf32>
    %510 = tpu.matmul %392, %509, %cst_313 {dimension_numbers = #tpu.dot_dimension_numbers<[1], [0], [0], [1], [0, 0, 1, 1], [], []>} : vector<20x32xbf16>, vector<32x8xbf16>, vector<20x8xf32> -> vector<20x8xf32>
    %c1_314 = arith.constant 1 : index
    %c2_315 = arith.constant 2 : index
    %c0_316 = arith.constant 0 : index
    %c0_317 = arith.constant 0 : index
    %511 = vector.load %arg6[%c1_314, %c2_315, %c0_316, %c0_317] : memref<2x4x1x8xf32, #tpu.memory_space<vmem>>, vector<1x1x1x8xf32>
    %512 = vector.shape_cast %511 : vector<1x1x1x8xf32> to vector<1x8xf32>
    %513 = vector.broadcast %512 : vector<1x8xf32> to vector<20x8xf32>
    %514 = arith.addf %510, %513 : vector<20x8xf32>
    %c1_318 = arith.constant 1 : index
    %c2_319 = arith.constant 2 : index
    %c0_320 = arith.constant 0 : index
    %c0_321 = arith.constant 0 : index
    %515 = vector.load %arg7[%c1_318, %c2_319, %c0_320, %c0_321] : memref<2x4x32x8xbf16, #tpu.memory_space<vmem>>, vector<1x1x32x8xbf16>
    %516 = vector.shape_cast %515 : vector<1x1x32x8xbf16> to vector<32x8xbf16>
    %cst_322 = arith.constant dense<0.000000e+00> : vector<20x8xf32>
    %517 = tpu.matmul %392, %516, %cst_322 {dimension_numbers = #tpu.dot_dimension_numbers<[1], [0], [0], [1], [0, 0, 1, 1], [], []>} : vector<20x32xbf16>, vector<32x8xbf16>, vector<20x8xf32> -> vector<20x8xf32>
    %c1_323 = arith.constant 1 : index
    %c2_324 = arith.constant 2 : index
    %c0_325 = arith.constant 0 : index
    %c0_326 = arith.constant 0 : index
    %518 = vector.load %arg8[%c1_323, %c2_324, %c0_325, %c0_326] : memref<2x4x1x8xf32, #tpu.memory_space<vmem>>, vector<1x1x1x8xf32>
    %519 = vector.shape_cast %518 : vector<1x1x1x8xf32> to vector<1x8xf32>
    %520 = vector.broadcast %519 : vector<1x8xf32> to vector<20x8xf32>
    %521 = arith.addf %517, %520 : vector<20x8xf32>
    %c1_327 = arith.constant 1 : index
    %c2_328 = arith.constant 2 : index
    %c0_329 = arith.constant 0 : index
    %c0_330 = arith.constant 0 : index
    %522 = vector.load %arg9[%c1_327, %c2_328, %c0_329, %c0_330] : memref<2x4x32x8xbf16, #tpu.memory_space<vmem>>, vector<1x1x32x8xbf16>
    %523 = vector.shape_cast %522 : vector<1x1x32x8xbf16> to vector<32x8xbf16>
    %cst_331 = arith.constant dense<0.000000e+00> : vector<20x8xf32>
    %524 = tpu.matmul %392, %523, %cst_331 {dimension_numbers = #tpu.dot_dimension_numbers<[1], [0], [0], [1], [0, 0, 1, 1], [], []>} : vector<20x32xbf16>, vector<32x8xbf16>, vector<20x8xf32> -> vector<20x8xf32>
    %c1_332 = arith.constant 1 : index
    %c2_333 = arith.constant 2 : index
    %c0_334 = arith.constant 0 : index
    %c0_335 = arith.constant 0 : index
    %525 = vector.load %arg10[%c1_332, %c2_333, %c0_334, %c0_335] : memref<2x4x1x8xf32, #tpu.memory_space<vmem>>, vector<1x1x1x8xf32>
    %526 = vector.shape_cast %525 : vector<1x1x1x8xf32> to vector<1x8xf32>
    %527 = vector.broadcast %526 : vector<1x8xf32> to vector<20x8xf32>
    %528 = arith.addf %524, %527 : vector<20x8xf32>
    %cst_336 = arith.constant 0.594603539 : f32
    %529 = vector.broadcast %cst_336 : f32 to vector<20x8xf32>
    %530 = arith.mulf %514, %529 : vector<20x8xf32>
    %531 = vector.shape_cast %530 : vector<20x8xf32> to vector<2x10x8xf32>
    %cst_337 = arith.constant 0.594603539 : f32
    %532 = vector.broadcast %cst_337 : f32 to vector<20x8xf32>
    %533 = arith.mulf %521, %532 : vector<20x8xf32>
    %534 = vector.shape_cast %533 : vector<20x8xf32> to vector<2x10x8xf32>
    %535 = vector.shape_cast %528 : vector<20x8xf32> to vector<2x10x8xf32>
    %536 = arith.truncf %531 : vector<2x10x8xf32> to vector<2x10x8xbf16>
    %537 = arith.truncf %534 : vector<2x10x8xf32> to vector<2x10x8xbf16>
    "tpu.trace_start"() <{level = 10 : i32, message = "btc,bsc->bts"}> : () -> ()
    %cst_338 = arith.constant dense<0.000000e+00> : vector<2x10x10xf32>
    %538 = tpu.matmul %536, %537, %cst_338 {dimension_numbers = #tpu.dot_dimension_numbers<[2], [2], [1], [1], [0, 0, 0, 1, 1, 1], [0], [0]>} : vector<2x10x8xbf16>, vector<2x10x8xbf16>, vector<2x10x10xf32> -> vector<2x10x10xf32>
    %cst_339 = arith.constant -1.000000e+30 : f32
    "tpu.trace_stop"() : () -> ()
    %539 = vector.shape_cast %3 : vector<2x1x10xi1> to vector<2x1x10xi1>
    %540 = vector.broadcast %539 : vector<2x1x10xi1> to vector<2x10x10xi1>
    %541 = vector.broadcast %cst_339 : f32 to vector<2x10x10xf32>
    %542 = arith.select %540, %541, %538 : vector<2x10x10xi1>, vector<2x10x10xf32>
    %cst_340 = arith.constant dense<0xFF800000> : vector<2x10xf32>
    %543 = vector.multi_reduction <maximumf>, %542, %cst_340 [2] : vector<2x10x10xf32> to vector<2x10xf32>
    %544 = vector.shape_cast %543 : vector<2x10xf32> to vector<2x10x1xf32>
    %545 = vector.broadcast %544 : vector<2x10x1xf32> to vector<2x10x10xf32>
    %546 = arith.subf %542, %545 : vector<2x10x10xf32>
    %547 = math.exp %546 : vector<2x10x10xf32>
    %548 = vector.extract_strided_slice %8 {offsets = [0, 2, 0, 0], sizes = [2, 1, 10, 10], strides = [1, 1, 1, 1]} : vector<2x4x10x10xf32> to vector<2x1x10x10xf32>
    %549 = vector.shape_cast %548 : vector<2x1x10x10xf32> to vector<2x10x10xf32>
    %550 = arith.mulf %547, %549 : vector<2x10x10xf32>
    %cst_341 = arith.constant dense<0.000000e+00> : vector<2x10xf32>
    %551 = vector.multi_reduction <add>, %550, %cst_341 [2] : vector<2x10x10xf32> to vector<2x10xf32>
    %552 = vector.shape_cast %551 : vector<2x10xf32> to vector<2x10x1xf32>
    %553 = tpu.reciprocal %552 {approx = true} : vector<2x10x1xf32> -> vector<2x10x1xf32>
    %554 = vector.broadcast %553 : vector<2x10x1xf32> to vector<2x10x10xf32>
    %555 = arith.mulf %550, %554 : vector<2x10x10xf32>
    %556 = arith.truncf %555 : vector<2x10x10xf32> to vector<2x10x10xbf16>
    %557 = arith.truncf %535 : vector<2x10x8xf32> to vector<2x10x8xbf16>
    "tpu.trace_start"() <{level = 10 : i32, message = "bts,bsc->btc"}> : () -> ()
    %cst_342 = arith.constant dense<0.000000e+00> : vector<2x10x8xf32>
    %558 = tpu.matmul %556, %557, %cst_342 {dimension_numbers = #tpu.dot_dimension_numbers<[2], [1], [1], [2], [0, 0, 0, 1, 1, 2], [0], [0]>} : vector<2x10x10xbf16>, vector<2x10x8xbf16>, vector<2x10x8xf32> -> vector<2x10x8xf32>
    "tpu.trace_stop"() : () -> ()
    %559 = vector.shape_cast %558 : vector<2x10x8xf32> to vector<20x8xf32>
    %560 = arith.truncf %559 : vector<20x8xf32> to vector<20x8xbf16>
    %c1_343 = arith.constant 1 : index
    %c2_344 = arith.constant 2 : index
    %c0_345 = arith.constant 0 : index
    %c0_346 = arith.constant 0 : index
    %561 = vector.load %arg11[%c1_343, %c2_344, %c0_345, %c0_346] : memref<2x4x8x32xbf16, #tpu.memory_space<vmem>>, vector<1x1x8x32xbf16>
    %562 = vector.shape_cast %561 : vector<1x1x8x32xbf16> to vector<8x32xbf16>
    %cst_347 = arith.constant dense<0.000000e+00> : vector<20x32xf32>
    %563 = tpu.matmul %560, %562, %cst_347 {dimension_numbers = #tpu.dot_dimension_numbers<[1], [0], [0], [1], [0, 0, 1, 1], [], []>} : vector<20x8xbf16>, vector<8x32xbf16>, vector<20x32xf32> -> vector<20x32xf32>
    %564 = arith.addf %507, %563 : vector<20x32xf32>
    %c1_348 = arith.constant 1 : index
    %c3_349 = arith.constant 3 : index
    %c0_350 = arith.constant 0 : index
    %c0_351 = arith.constant 0 : index
    %565 = vector.load %arg5[%c1_348, %c3_349, %c0_350, %c0_351] : memref<2x4x32x8xbf16, #tpu.memory_space<vmem>>, vector<1x1x32x8xbf16>
    %566 = vector.shape_cast %565 : vector<1x1x32x8xbf16> to vector<32x8xbf16>
    %cst_352 = arith.constant dense<0.000000e+00> : vector<20x8xf32>
    %567 = tpu.matmul %392, %566, %cst_352 {dimension_numbers = #tpu.dot_dimension_numbers<[1], [0], [0], [1], [0, 0, 1, 1], [], []>} : vector<20x32xbf16>, vector<32x8xbf16>, vector<20x8xf32> -> vector<20x8xf32>
    %c1_353 = arith.constant 1 : index
    %c3_354 = arith.constant 3 : index
    %c0_355 = arith.constant 0 : index
    %c0_356 = arith.constant 0 : index
    %568 = vector.load %arg6[%c1_353, %c3_354, %c0_355, %c0_356] : memref<2x4x1x8xf32, #tpu.memory_space<vmem>>, vector<1x1x1x8xf32>
    %569 = vector.shape_cast %568 : vector<1x1x1x8xf32> to vector<1x8xf32>
    %570 = vector.broadcast %569 : vector<1x8xf32> to vector<20x8xf32>
    %571 = arith.addf %567, %570 : vector<20x8xf32>
    %c1_357 = arith.constant 1 : index
    %c3_358 = arith.constant 3 : index
    %c0_359 = arith.constant 0 : index
    %c0_360 = arith.constant 0 : index
    %572 = vector.load %arg7[%c1_357, %c3_358, %c0_359, %c0_360] : memref<2x4x32x8xbf16, #tpu.memory_space<vmem>>, vector<1x1x32x8xbf16>
    %573 = vector.shape_cast %572 : vector<1x1x32x8xbf16> to vector<32x8xbf16>
    %cst_361 = arith.constant dense<0.000000e+00> : vector<20x8xf32>
    %574 = tpu.matmul %392, %573, %cst_361 {dimension_numbers = #tpu.dot_dimension_numbers<[1], [0], [0], [1], [0, 0, 1, 1], [], []>} : vector<20x32xbf16>, vector<32x8xbf16>, vector<20x8xf32> -> vector<20x8xf32>
    %c1_362 = arith.constant 1 : index
    %c3_363 = arith.constant 3 : index
    %c0_364 = arith.constant 0 : index
    %c0_365 = arith.constant 0 : index
    %575 = vector.load %arg8[%c1_362, %c3_363, %c0_364, %c0_365] : memref<2x4x1x8xf32, #tpu.memory_space<vmem>>, vector<1x1x1x8xf32>
    %576 = vector.shape_cast %575 : vector<1x1x1x8xf32> to vector<1x8xf32>
    %577 = vector.broadcast %576 : vector<1x8xf32> to vector<20x8xf32>
    %578 = arith.addf %574, %577 : vector<20x8xf32>
    %c1_366 = arith.constant 1 : index
    %c3_367 = arith.constant 3 : index
    %c0_368 = arith.constant 0 : index
    %c0_369 = arith.constant 0 : index
    %579 = vector.load %arg9[%c1_366, %c3_367, %c0_368, %c0_369] : memref<2x4x32x8xbf16, #tpu.memory_space<vmem>>, vector<1x1x32x8xbf16>
    %580 = vector.shape_cast %579 : vector<1x1x32x8xbf16> to vector<32x8xbf16>
    %cst_370 = arith.constant dense<0.000000e+00> : vector<20x8xf32>
    %581 = tpu.matmul %392, %580, %cst_370 {dimension_numbers = #tpu.dot_dimension_numbers<[1], [0], [0], [1], [0, 0, 1, 1], [], []>} : vector<20x32xbf16>, vector<32x8xbf16>, vector<20x8xf32> -> vector<20x8xf32>
    %c1_371 = arith.constant 1 : index
    %c3_372 = arith.constant 3 : index
    %c0_373 = arith.constant 0 : index
    %c0_374 = arith.constant 0 : index
    %582 = vector.load %arg10[%c1_371, %c3_372, %c0_373, %c0_374] : memref<2x4x1x8xf32, #tpu.memory_space<vmem>>, vector<1x1x1x8xf32>
    %583 = vector.shape_cast %582 : vector<1x1x1x8xf32> to vector<1x8xf32>
    %584 = vector.broadcast %583 : vector<1x8xf32> to vector<20x8xf32>
    %585 = arith.addf %581, %584 : vector<20x8xf32>
    %cst_375 = arith.constant 0.594603539 : f32
    %586 = vector.broadcast %cst_375 : f32 to vector<20x8xf32>
    %587 = arith.mulf %571, %586 : vector<20x8xf32>
    %588 = vector.shape_cast %587 : vector<20x8xf32> to vector<2x10x8xf32>
    %cst_376 = arith.constant 0.594603539 : f32
    %589 = vector.broadcast %cst_376 : f32 to vector<20x8xf32>
    %590 = arith.mulf %578, %589 : vector<20x8xf32>
    %591 = vector.shape_cast %590 : vector<20x8xf32> to vector<2x10x8xf32>
    %592 = vector.shape_cast %585 : vector<20x8xf32> to vector<2x10x8xf32>
    %593 = arith.truncf %588 : vector<2x10x8xf32> to vector<2x10x8xbf16>
    %594 = arith.truncf %591 : vector<2x10x8xf32> to vector<2x10x8xbf16>
    "tpu.trace_start"() <{level = 10 : i32, message = "btc,bsc->bts"}> : () -> ()
    %cst_377 = arith.constant dense<0.000000e+00> : vector<2x10x10xf32>
    %595 = tpu.matmul %593, %594, %cst_377 {dimension_numbers = #tpu.dot_dimension_numbers<[2], [2], [1], [1], [0, 0, 0, 1, 1, 1], [0], [0]>} : vector<2x10x8xbf16>, vector<2x10x8xbf16>, vector<2x10x10xf32> -> vector<2x10x10xf32>
    %cst_378 = arith.constant -1.000000e+30 : f32
    "tpu.trace_stop"() : () -> ()
    %596 = vector.shape_cast %3 : vector<2x1x10xi1> to vector<2x1x10xi1>
    %597 = vector.broadcast %596 : vector<2x1x10xi1> to vector<2x10x10xi1>
    %598 = vector.broadcast %cst_378 : f32 to vector<2x10x10xf32>
    %599 = arith.select %597, %598, %595 : vector<2x10x10xi1>, vector<2x10x10xf32>
    %cst_379 = arith.constant dense<0xFF800000> : vector<2x10xf32>
    %600 = vector.multi_reduction <maximumf>, %599, %cst_379 [2] : vector<2x10x10xf32> to vector<2x10xf32>
    %601 = vector.shape_cast %600 : vector<2x10xf32> to vector<2x10x1xf32>
    %602 = vector.broadcast %601 : vector<2x10x1xf32> to vector<2x10x10xf32>
    %603 = arith.subf %599, %602 : vector<2x10x10xf32>
    %604 = math.exp %603 : vector<2x10x10xf32>
    %605 = vector.extract_strided_slice %8 {offsets = [0, 3, 0, 0], sizes = [2, 1, 10, 10], strides = [1, 1, 1, 1]} : vector<2x4x10x10xf32> to vector<2x1x10x10xf32>
    %606 = vector.shape_cast %605 : vector<2x1x10x10xf32> to vector<2x10x10xf32>
    %607 = arith.mulf %604, %606 : vector<2x10x10xf32>
    %cst_380 = arith.constant dense<0.000000e+00> : vector<2x10xf32>
    %608 = vector.multi_reduction <add>, %607, %cst_380 [2] : vector<2x10x10xf32> to vector<2x10xf32>
    %609 = vector.shape_cast %608 : vector<2x10xf32> to vector<2x10x1xf32>
    %610 = tpu.reciprocal %609 {approx = true} : vector<2x10x1xf32> -> vector<2x10x1xf32>
    %611 = vector.broadcast %610 : vector<2x10x1xf32> to vector<2x10x10xf32>
    %612 = arith.mulf %607, %611 : vector<2x10x10xf32>
    %613 = arith.truncf %612 : vector<2x10x10xf32> to vector<2x10x10xbf16>
    %614 = arith.truncf %592 : vector<2x10x8xf32> to vector<2x10x8xbf16>
    "tpu.trace_start"() <{level = 10 : i32, message = "bts,bsc->btc"}> : () -> ()
    %cst_381 = arith.constant dense<0.000000e+00> : vector<2x10x8xf32>
    %615 = tpu.matmul %613, %614, %cst_381 {dimension_numbers = #tpu.dot_dimension_numbers<[2], [1], [1], [2], [0, 0, 0, 1, 1, 2], [0], [0]>} : vector<2x10x10xbf16>, vector<2x10x8xbf16>, vector<2x10x8xf32> -> vector<2x10x8xf32>
    "tpu.trace_stop"() : () -> ()
    %616 = vector.shape_cast %615 : vector<2x10x8xf32> to vector<20x8xf32>
    %617 = arith.truncf %616 : vector<20x8xf32> to vector<20x8xbf16>
    %c1_382 = arith.constant 1 : index
    %c3_383 = arith.constant 3 : index
    %c0_384 = arith.constant 0 : index
    %c0_385 = arith.constant 0 : index
    %618 = vector.load %arg11[%c1_382, %c3_383, %c0_384, %c0_385] : memref<2x4x8x32xbf16, #tpu.memory_space<vmem>>, vector<1x1x8x32xbf16>
    %619 = vector.shape_cast %618 : vector<1x1x8x32xbf16> to vector<8x32xbf16>
    %cst_386 = arith.constant dense<0.000000e+00> : vector<20x32xf32>
    %620 = tpu.matmul %617, %619, %cst_386 {dimension_numbers = #tpu.dot_dimension_numbers<[1], [0], [0], [1], [0, 0, 1, 1], [], []>} : vector<20x8xbf16>, vector<8x32xbf16>, vector<20x32xf32> -> vector<20x32xf32>
    %621 = arith.addf %564, %620 : vector<20x32xf32>
    %c1_387 = arith.constant 1 : index
    %c0_388 = arith.constant 0 : index
    %c0_389 = arith.constant 0 : index
    %622 = vector.load %arg12[%c1_387, %c0_388, %c0_389] : memref<2x1x32xf32, #tpu.memory_space<vmem>>, vector<1x1x32xf32>
    %623 = vector.shape_cast %622 : vector<1x1x32xf32> to vector<1x32xf32>
    %624 = vector.broadcast %623 : vector<1x32xf32> to vector<20x32xf32>
    %625 = arith.addf %621, %624 : vector<20x32xf32>
    %626 = vector.shape_cast %625 : vector<20x32xf32> to vector<2x10x32xf32>
    %627 = arith.addf %362, %626 : vector<2x10x32xf32>
    %c1_390 = arith.constant 1 : index
    %c0_391 = arith.constant 0 : index
    %c0_392 = arith.constant 0 : index
    %628 = vector.load %arg13[%c1_390, %c0_391, %c0_392] : memref<2x1x32xf32, #tpu.memory_space<vmem>>, vector<1x1x32xf32>
    %629 = vector.shape_cast %628 : vector<1x1x32xf32> to vector<1x32xf32>
    %c1_393 = arith.constant 1 : index
    %c0_394 = arith.constant 0 : index
    %c0_395 = arith.constant 0 : index
    %630 = vector.load %arg14[%c1_393, %c0_394, %c0_395] : memref<2x1x32xf32, #tpu.memory_space<vmem>>, vector<1x1x32xf32>
    %631 = vector.shape_cast %630 : vector<1x1x32xf32> to vector<1x32xf32>
    %cst_396 = arith.constant dense<0.000000e+00> : vector<2x10xf32>
    %632 = vector.multi_reduction <add>, %627, %cst_396 [2] : vector<2x10x32xf32> to vector<2x10xf32>
    %633 = vector.shape_cast %632 : vector<2x10xf32> to vector<2x10x1xf32>
    %cst_397 = arith.constant 3.200000e+01 : f32
    %634 = vector.broadcast %cst_397 : f32 to vector<2x10x1xf32>
    %635 = arith.divf %633, %634 : vector<2x10x1xf32>
    %636 = vector.broadcast %635 : vector<2x10x1xf32> to vector<2x10x32xf32>
    %637 = arith.subf %627, %636 : vector<2x10x32xf32>
    %638 = arith.mulf %637, %637 : vector<2x10x32xf32>
    %cst_398 = arith.constant dense<0.000000e+00> : vector<2x10xf32>
    %639 = vector.multi_reduction <add>, %638, %cst_398 [2] : vector<2x10x32xf32> to vector<2x10xf32>
    %640 = vector.shape_cast %639 : vector<2x10xf32> to vector<2x10x1xf32>
    %cst_399 = arith.constant 3.200000e+01 : f32
    %641 = vector.broadcast %cst_399 : f32 to vector<2x10x1xf32>
    %642 = arith.divf %640, %641 : vector<2x10x1xf32>
    %643 = vector.broadcast %635 : vector<2x10x1xf32> to vector<2x10x32xf32>
    %644 = arith.subf %627, %643 : vector<2x10x32xf32>
    %cst_400 = arith.constant 9.99999974E-6 : f32
    %645 = vector.broadcast %cst_400 : f32 to vector<2x10x1xf32>
    %646 = arith.addf %642, %645 : vector<2x10x1xf32>
    %647 = math.rsqrt %646 : vector<2x10x1xf32>
    %648 = vector.broadcast %647 : vector<2x10x1xf32> to vector<2x10x32xf32>
    %649 = arith.mulf %644, %648 : vector<2x10x32xf32>
    %650 = vector.shape_cast %629 : vector<1x32xf32> to vector<1x1x32xf32>
    %651 = vector.broadcast %650 : vector<1x1x32xf32> to vector<2x10x32xf32>
    %652 = arith.mulf %649, %651 : vector<2x10x32xf32>
    %653 = vector.shape_cast %631 : vector<1x32xf32> to vector<1x1x32xf32>
    %654 = vector.broadcast %653 : vector<1x1x32xf32> to vector<2x10x32xf32>
    %655 = arith.addf %652, %654 : vector<2x10x32xf32>
    %656 = vector.shape_cast %655 : vector<2x10x32xf32> to vector<20x32xf32>
    %657 = arith.truncf %656 : vector<20x32xf32> to vector<20x32xbf16>
    %c1_401 = arith.constant 1 : index
    %c0_402 = arith.constant 0 : index
    %c0_403 = arith.constant 0 : index
    %658 = vector.load %arg15[%c1_401, %c0_402, %c0_403] : memref<2x32x128xbf16, #tpu.memory_space<vmem>>, vector<1x32x128xbf16>
    %659 = vector.shape_cast %658 : vector<1x32x128xbf16> to vector<32x128xbf16>
    %cst_404 = arith.constant dense<0.000000e+00> : vector<20x128xf32>
    %660 = tpu.matmul %657, %659, %cst_404 {dimension_numbers = #tpu.dot_dimension_numbers<[1], [0], [0], [1], [0, 0, 1, 1], [], []>} : vector<20x32xbf16>, vector<32x128xbf16>, vector<20x128xf32> -> vector<20x128xf32>
    %c1_405 = arith.constant 1 : index
    %c0_406 = arith.constant 0 : index
    %c0_407 = arith.constant 0 : index
    %661 = vector.load %arg16[%c1_405, %c0_406, %c0_407] : memref<2x1x128xf32, #tpu.memory_space<vmem>>, vector<1x1x128xf32>
    %662 = vector.shape_cast %661 : vector<1x1x128xf32> to vector<1x128xf32>
    %663 = vector.broadcast %662 : vector<1x128xf32> to vector<20x128xf32>
    %664 = arith.addf %660, %663 : vector<20x128xf32>
    %cst_408 = arith.constant 5.000000e-01 : f32
    %665 = vector.broadcast %cst_408 : f32 to vector<20x128xf32>
    %666 = arith.mulf %665, %664 : vector<20x128xf32>
    %cst_409 = arith.constant 0.707106769 : f32
    %667 = vector.broadcast %cst_409 : f32 to vector<20x128xf32>
    %668 = arith.mulf %664, %667 : vector<20x128xf32>
    %cst_410 = arith.constant 0.000000e+00 : f32
    %669 = vector.broadcast %cst_410 : f32 to vector<20x128xf32>
    %670 = arith.cmpf oge, %668, %669 : vector<20x128xf32>
    %cst_411 = arith.constant 1.000000e+00 : f32
    %cst_412 = arith.constant -1.000000e+00 : f32
    %671 = vector.broadcast %cst_411 : f32 to vector<20x128xf32>
    %672 = vector.broadcast %cst_412 : f32 to vector<20x128xf32>
    %673 = arith.select %670, %671, %672 : vector<20x128xi1>, vector<20x128xf32>
    %674 = math.absf %668 : vector<20x128xf32>
    %cst_413 = arith.constant 0.327591091 : f32
    %675 = vector.broadcast %cst_413 : f32 to vector<20x128xf32>
    %676 = arith.mulf %675, %674 : vector<20x128xf32>
    %cst_414 = arith.constant 1.000000e+00 : f32
    %677 = vector.broadcast %cst_414 : f32 to vector<20x128xf32>
    %678 = arith.addf %677, %676 : vector<20x128xf32>
    %cst_415 = arith.constant 1.000000e+00 : f32
    %679 = vector.broadcast %cst_415 : f32 to vector<20x128xf32>
    %680 = arith.divf %679, %678 : vector<20x128xf32>
    %cst_416 = arith.constant 1.06140542 : f32
    %681 = vector.broadcast %cst_416 : f32 to vector<20x128xf32>
    %682 = arith.mulf %681, %680 : vector<20x128xf32>
    %cst_417 = arith.constant -1.45315206 : f32
    %683 = vector.broadcast %cst_417 : f32 to vector<20x128xf32>
    %684 = arith.addf %682, %683 : vector<20x128xf32>
    %685 = arith.mulf %684, %680 : vector<20x128xf32>
    %cst_418 = arith.constant 1.42141378 : f32
    %686 = vector.broadcast %cst_418 : f32 to vector<20x128xf32>
    %687 = arith.addf %685, %686 : vector<20x128xf32>
    %688 = arith.mulf %687, %680 : vector<20x128xf32>
    %cst_419 = arith.constant -0.284496725 : f32
    %689 = vector.broadcast %cst_419 : f32 to vector<20x128xf32>
    %690 = arith.addf %688, %689 : vector<20x128xf32>
    %691 = arith.mulf %690, %680 : vector<20x128xf32>
    %cst_420 = arith.constant 0.254829586 : f32
    %692 = vector.broadcast %cst_420 : f32 to vector<20x128xf32>
    %693 = arith.addf %691, %692 : vector<20x128xf32>
    %694 = arith.mulf %693, %680 : vector<20x128xf32>
    %cst_421 = arith.constant 0.000000e+00 : f32
    %695 = vector.broadcast %cst_421 : f32 to vector<20x128xf32>
    %696 = arith.subf %695, %674 : vector<20x128xf32>
    %697 = arith.mulf %696, %674 : vector<20x128xf32>
    %698 = math.exp %697 : vector<20x128xf32>
    %699 = arith.mulf %694, %698 : vector<20x128xf32>
    %cst_422 = arith.constant 1.000000e+00 : f32
    %700 = vector.broadcast %cst_422 : f32 to vector<20x128xf32>
    %701 = arith.subf %700, %699 : vector<20x128xf32>
    %702 = arith.mulf %673, %701 : vector<20x128xf32>
    %cst_423 = arith.constant 1.000000e+00 : f32
    %703 = vector.broadcast %cst_423 : f32 to vector<20x128xf32>
    %704 = arith.addf %703, %702 : vector<20x128xf32>
    %705 = arith.mulf %666, %704 : vector<20x128xf32>
    %706 = arith.truncf %705 : vector<20x128xf32> to vector<20x128xbf16>
    %c1_424 = arith.constant 1 : index
    %c0_425 = arith.constant 0 : index
    %c0_426 = arith.constant 0 : index
    %707 = vector.load %arg17[%c1_424, %c0_425, %c0_426] : memref<2x128x32xbf16, #tpu.memory_space<vmem>>, vector<1x128x32xbf16>
    %708 = vector.shape_cast %707 : vector<1x128x32xbf16> to vector<128x32xbf16>
    %cst_427 = arith.constant dense<0.000000e+00> : vector<20x32xf32>
    %709 = tpu.matmul %706, %708, %cst_427 {dimension_numbers = #tpu.dot_dimension_numbers<[1], [0], [0], [1], [0, 0, 1, 1], [], []>} : vector<20x128xbf16>, vector<128x32xbf16>, vector<20x32xf32> -> vector<20x32xf32>
    %c1_428 = arith.constant 1 : index
    %c0_429 = arith.constant 0 : index
    %c0_430 = arith.constant 0 : index
    %710 = vector.load %arg18[%c1_428, %c0_429, %c0_430] : memref<2x1x32xf32, #tpu.memory_space<vmem>>, vector<1x1x32xf32>
    %711 = vector.shape_cast %710 : vector<1x1x32xf32> to vector<1x32xf32>
    %712 = vector.broadcast %711 : vector<1x32xf32> to vector<20x32xf32>
    %713 = arith.addf %709, %712 : vector<20x32xf32>
    %714 = vector.shape_cast %713 : vector<20x32xf32> to vector<2x10x32xf32>
    %715 = arith.addf %627, %714 : vector<2x10x32xf32>
    %c0_431 = arith.constant 0 : index
    %c0_432 = arith.constant 0 : index
    %c0_433 = arith.constant 0 : index
    %716 = vector.load %arg19[%c0_431, %c0_432, %c0_433] : memref<2x10x32xf32, #tpu.memory_space<vmem>>, vector<2x10x32xf32>
    tpu.vector_store %arg19[%c0_431, %c0_432, %c0_433], %715 {strides = array<i32>} : memref<2x10x32xf32, #tpu.memory_space<vmem>>, vector<2x10x32xf32>,
    return
  }
}

</mosaic_0001>

<bundles_post_ra>
// kernel: tpu_custom_call.1
= control target key start
LH: loop header
LB: loop body
LE: loop exit
PB: predicated region body
PF: predicated region fallthrough
CT: control target
= control target key end

     0   :  { %vm127_vm0 = vcmask 254976   ;;  %vm123_vm1 = vcmask 261120   ;;  %v5995_v8 = vmov 32.0   ;;  %vm487_vm15 = vcmask 64512   ;;  %s7422_s0 = inlined_call_operand.vmem [shape: f32[2,10,32], index: 0, kind: input, shape index: {}]   ;;  %s7423_s3 = inlined_call_operand.vmem [shape: f32[2,1,32], index: 3, kind: input, shape index: {}]   ;;  %s7424_s4 = inlined_call_operand.vmem [shape: f32[2,1,32], index: 4, kind: input, shape index: {}]   ;;  %s7425_s6 = inlined_call_operand.vmem [shape: f32[2,4,1,8], index: 6, kind: input, shape index: {}]   ;;  %s7426_s5 = inlined_call_operand.vmem [shape: bf16[2,4,32,8], index: 5, kind: input, shape index: {}]   ;;  %s7427_s7 = inlined_call_operand.vmem [shape: bf16[2,4,32,8], index: 7, kind: input, shape index: {}]   ;;  %s7428_s9 = inlined_call_operand.vmem [shape: bf16[2,4,32,8], index: 9, kind: input, shape index: {}]   ;;  %s7429_s8 = inlined_call_operand.vmem [shape: f32[2,4,1,8], index: 8, kind: input, shape index: {}]   ;;  %s7430_s10 = inlined_call_operand.vmem [shape: f32[2,4,1,8], index: 10, kind: input, shape index: {}]   ;;  %s7431_s1 = inlined_call_operand.vmem [shape: f32[2,10], index: 1, kind: input, shape index: {}]   ;;  %s7432_s2 = inlined_call_operand.vmem [shape: f32[2,4,10,10], index: 2, kind: input, shape index: {}]   ;;  %s7433_s11 = inlined_call_operand.vmem [shape: bf16[2,4,8,32], index: 11, kind: input, shape index: {}]   ;;  %s7434_s12 = inlined_call_operand.vmem [shape: f32[2,1,32], index: 12, kind: input, shape index: {}]   ;;  %s7435_s13 = inlined_call_operand.vmem [shape: f32[2,1,32], index: 13, kind: input, shape index: {}]   ;;  %s7436_s14 = inlined_call_operand.vmem [shape: f32[2,1,32], index: 14, kind: input, shape index: {}]   ;;  %s7437_s16 = inlined_call_operand.vmem [shape: f32[2,1,128], index: 16, kind: input, shape index: {}]   ;;  %s7438_s15 = inlined_call_operand.vmem [shape: bf16[2,32,128], index: 15, kind: input, shape index: {}]   ;;  %s7439_s18 = inlined_call_operand.vmem [shape: f32[2,1,32], index: 18, kind: input, shape index: {}]   ;;  %s7440_s17 = inlined_call_operand.vmem [shape: bf16[2,128,32], index: 17, kind: input, shape index: {}]   ;;  %s7441_s19 = inlined_call_operand.vmem [shape: f32[2,10,32], index: 19, kind: output, shape index: {}]  }
   0x1   :  { %7446 = sst [smem:[#allocation2_spill]] %s7422_s0  ;;  %5805 = vrcp.f32 %v5995_v8  ;;  %v5697_v50 = vld [vmem:[%s7426_s5 + $0x8] sm:$0xff]  ;;  %v5696_v57 = vld [vmem:[%s7426_s5] sm:$0xff] }
   0x2   :  { %7447 = sst [smem:[#allocation3_spill]] %s7423_s3  ;;  %v5699_v51 = vld [vmem:[%s7427_s7 + $0x8] sm:$0xff]  ;;  %301 = vmatpush.bf16.msra.mxu0 %v5697_v50  ;;  %v5698_v58 = vld [vmem:[%s7427_s7] sm:$0xff] }
   0x3   :  { %7448 = sst [smem:[#allocation4_spill]] %s7424_s4  ;;  %v5701_v52 = vld [vmem:[%s7428_s9 + $0x8] sm:$0xff]  ;;  %339 = vmatpush.bf16.msra.mxu1 %v5699_v51  ;;  %v5700_v59 = vld [vmem:[%s7428_s9] sm:$0xff] }
   0x4   :  { %7449 = sst [smem:[#allocation5_spill]] %s7425_s6  ;;  %377 = vmatpush.bf16.msra.mxu2 %v5701_v52 }
   0x5   :  { %s7450_s20 = sld [smem:[#allocation2_spill]] }
   0x6   :  { %302 = vmatpush.bf16.msra.mxu0 %v5696_v57  ;;  %s7451_s25 = sld [smem:[#allocation3_spill]] }
   0x7   :  { %v5806_v9 = vpop.eup %5805  ;;  %340 = vmatpush.bf16.msra.mxu1 %v5698_v58  ;;  %s7452_s27 = sld [smem:[#allocation4_spill]] }
   0x8   :  { %v138_v10 = vmul.f32 32.0, %v5806_v9  ;;  %vm142_vm2 = vweird.f32 %v5806_v9  ;;  %378 = vmatpush.bf16.msra.mxu2 %v5700_v59  ;;  %s7453_s22 = sld [smem:[#allocation5_spill]] }
   0xa   :  { %v139_v11 = vsub.f32 1.0, %v138_v10 }
   0xb   :  { %v118_v0 = vld [vmem:[%s7450_s20 + $0x8] sm:$0x3]  ;;  %v117_v1 = vld [vmem:[%s7450_s20] sm:$0xff]  ;;  %v120_v4 = vld [vmem:[%s7450_s20 + $0x18] sm:$0x3] }
   0xc   :  { %v128_v2 = vsel %vm127_vm0, %v118_v0, 0.0  ;;  %v124_v3 = vsel %vm123_vm1, %v117_v1, 0.0  ;;  %v119_v5 = vld [vmem:[%s7450_s20 + $0x10] sm:$0xff]  ;;  %v134_v6 = vsel %vm127_vm0, %v120_v4, 0.0  ;;  %v140_v12 = vmul.f32 %v5806_v9, %v139_v11 }
   0xd   :  { %129 = vadd.xlane.f32.xlu1 %v128_v2  ;;  %125 = vadd.xlane.f32.xlu0 %v124_v3  ;;  %v131_v7 = vsel %vm123_vm1, %v119_v5, 0.0  ;;  %v5767_v3 = vld [vmem:[%s7451_s25] ss:$0 sm:$0xff] }
   0xe   :  { %v141_v13 = vadd.f32 %v5806_v9, %v140_v12  ;;  %v5768_v8 = vld [vmem:[%s7452_s27] ss:$0 sm:$0xff] }
  0x10   :  { %v6114_v14 = vsel %vm142_vm2, %v5806_v9, %v141_v13  ;;  %vm641_vm2 = vcmask 1044480  }
  0x15   :  { %135 = vadd.xlane.f32.xlu1 %v134_v6  ;;  %132 = vadd.xlane.f32.xlu0 %v131_v7 }
  0x80   :  { %v130_v15 = vpop.xlane.xlu1 %129  ;;  %v126_v16 = vpop.xlane.xlu0 %125 }
  0x81   :  { %v145_v17 = vmul.f32 %v6114_v14, %v130_v15  ;;  %v144_v18 = vmul.f32 %v6114_v14, %v126_v16 }
  0x83   :  { %v6118_v19 = vsub.f32 %v118_v0, %v145_v17  ;;  %v6120_v20 = vsub.f32 %v117_v1, %v144_v18 }
  0x85   :  { %v153_v21 = vmul.f32 %v6118_v19, %v6118_v19  ;;  %v152_v22 = vmul.f32 %v6120_v20, %v6120_v20 }
  0x87   :  { %v159_v23 = vsel %vm127_vm0, %v153_v21, 0.0  ;;  %v156_v24 = vsel %vm123_vm1, %v152_v22, 0.0 }
  0x88   :  { %v136_v25 = vpop.xlane.xlu1 %135  ;;  %160 = vadd.xlane.f32.xlu0 %v159_v23  ;;  %157 = vadd.xlane.f32.xlu2 %v156_v24  ;;  %v133_v26 = vpop.xlane.xlu0 %132 }
  0x89   :  { %v147_v27 = vmul.f32 %v6114_v14, %v136_v25  ;;  %v146_v28 = vmul.f32 %v6114_v14, %v133_v26 }
  0x8b   :  { %v6130_v29 = vsub.f32 %v120_v4, %v147_v27  ;;  %v6132_v30 = vsub.f32 %v119_v5, %v146_v28 }
  0x8d   :  { %v155_v31 = vmul.f32 %v6130_v29, %v6130_v29  ;;  %v154_v32 = vmul.f32 %v6132_v30, %v6132_v30 }
  0x8f   :  { %v165_v33 = vsel %vm127_vm0, %v155_v31, 0.0  ;;  %v162_v34 = vsel %vm123_vm1, %v154_v32, 0.0 }
  0x90   :  { %166 = vadd.xlane.f32.xlu1 %v165_v33  ;;  %163 = vadd.xlane.f32.xlu2 %v162_v34 }
  0xfb   :  { %v158_v35 = vpop.xlane.xlu2 %157  ;;  %v161_v36 = vpop.xlane.xlu0 %160 }
  0xfc   :  { %v168_v37 = vmul.f32 %v158_v35, %v6114_v14  ;;  %v169_v38 = vmul.f32 %v161_v36, %v6114_v14  ;;  %v5703_v36 = vld [vmem:[%s7426_s5 + $0x18] sm:$0xff] }
  0xfd   :  { %753 = vmatpush.bf16.msrb.mxu2 %v5703_v36 }
  0xfe   :  { %v172_v39 = vadd.f32 1e-05, %v168_v37  ;;  %v173_v40 = vadd.f32 1e-05, %v169_v38 }
 0x100   :  { %5807 = vrsqrt.f32 %v172_v39  ;;  %vm192_vm4 = vweird.f32 %v173_v40  ;;  %vm182_vm6 = vweird.f32 %v172_v39 }
 0x101   :  { %5809 = vrsqrt.f32 %v173_v40 }
 0x103   :  { %v167_v41 = vpop.xlane.xlu1 %166  ;;  %v164_v42 = vpop.xlane.xlu2 %163 }
 0x104   :  { %v171_v43 = vmul.f32 %v167_v41, %v6114_v14  ;;  %v170_v44 = vmul.f32 %v164_v42, %v6114_v14 }
 0x106   :  { %v5808_v45 = vpop.eup %5807  ;;  %v175_v46 = vadd.f32 1e-05, %v171_v43  ;;  %v6144_v47 = vadd.f32 1e-05, %v170_v44 }
 0x107   :  { %v5810_v48 = vpop.eup %5809  ;;  %v177_v49 = vmul.f32 %v5808_v45, %v172_v39  ;;  %vm183_vm3 = vweird.f32 %v5808_v45 }
 0x108   :  { %v187_v53 = vmul.f32 %v5810_v48, %v173_v40  ;;  %5811 = vrsqrt.f32 %v175_v46  ;;  %vm193_vm5 = vweird.f32 %v5810_v48  ;;  %vm184_vm7 = vmor %vm182_vm6, %vm183_vm3  ;;  %vm212_vm9 = vweird.f32 %v175_v46 }
 0x109   :  { %v178_v54 = vmul.f32 %v5808_v45, %v177_v49  ;;  %5813 = vrsqrt.f32 %v6144_v47  ;;  %vm194_vm8 = vmor %vm192_vm4, %vm193_vm5  ;;  %vm202_vm13 = vweird.f32 %v6144_v47  ;;  %vm548_vm5 = vcmask 80896  }
 0x10a   :  { %v188_v55 = vmul.f32 %v5810_v48, %v187_v53 }
 0x10b   :  { %v179_v56 = vmul.f32 0.5, %v178_v54 }
 0x10c   :  { %v189_v60 = vmul.f32 0.5, %v188_v55 }
 0x10d   :  { %v180_v61 = vsub.f32 1.5, %v179_v56 }
 0x10e   :  { %v5812_v62 = vpop.eup %5811  ;;  %v190_v63 = vsub.f32 1.5, %v189_v60 }
 0x10f   :  { %v5814_v0 = vpop.eup %5813  ;;  %v181_v1 = vmul.f32 %v5808_v45, %v180_v61  ;;  %v207_v2 = vmul.f32 %v5812_v62, %v175_v46  ;;  %vm213_vm10 = vweird.f32 %v5812_v62 }
 0x110   :  { %v191_v4 = vmul.f32 %v5810_v48, %v190_v63  ;;  %v197_v5 = vmul.f32 %v5814_v0, %v6144_v47  ;;  %vm214_vm11 = vmor %vm212_vm9, %vm213_vm10  ;;  %vm203_vm12 = vweird.f32 %v5814_v0  ;;  %v5770_v63 = vld [vmem:[%s7429_s8] ss:$0 sm:$0xff]  ;;  %vm1178_vm9 = vcmask 1043456  }
 0x111   :  { %v185_v6 = vsel %vm184_vm7, %v5808_v45, %v181_v1  ;;  %v208_v7 = vmul.f32 %v5812_v62, %v207_v2  ;;  %vm204_vm14 = vmor %vm202_vm13, %vm203_vm12  ;;  %v5769_v45 = vld [vmem:[%s7453_s22] ss:$0 sm:$0xff]  ;;  %vm552_vm7 = vcmask 74752  }
 0x112   :  { %v216_v9 = vmul.f32 %v185_v6, %v6120_v20  ;;  %v195_v10 = vsel %vm194_vm8, %v5810_v48, %v191_v4  ;;  %v198_v11 = vmul.f32 %v5814_v0, %v197_v5 }
 0x113   :  { %v217_v12 = vmul.f32 %v195_v10, %v6118_v19  ;;  %v209_v13 = vmul.f32 0.5, %v208_v7 }
 0x114   :  { %v223_v15 = vmul.f32 %v5767_v3, %v216_v9  ;;  %v199_v16 = vmul.f32 0.5, %v198_v11 }
 0x115   :  { %v224_v17 = vmul.f32 %v5767_v3, %v217_v12  ;;  %v210_v18 = vsub.f32 1.5, %v209_v13 }
 0x116   :  { %v230_v21 = vadd.f32 %v5768_v8, %v223_v15  ;;  %v200_v22 = vsub.f32 1.5, %v199_v16 }
 0x117   :  { %v231_v23 = vadd.f32 %v5768_v8, %v224_v17  ;;  %v211_v24 = vmul.f32 %v5812_v62, %v210_v18 }
 0x118   :  { %v239_v20 = vrot.slane %v230_v21, 4  ;;  %v240_v25 = vrot.slane %v230_v21, 6  ;;  %244 = vst [vmem:[#allocation1] ss:$4 sm:$0xff] %v230_v21  ;;  %v238_v26 = vrot.slane %v230_v21, 2  ;;  %v201_v19 = vmul.f32 %v5814_v0, %v200_v22 }
 0x119   :  { %252 = vst [vmem:[#allocation1 + $0x20] ss:$4 sm:$0xff] %v231_v23  ;;  %v215_v27 = vsel %vm214_vm11, %v5812_v62, %v211_v24 }
 0x11a   :  { %248 = vst [vmem:[#allocation1 + $0x2] ss:$4 sm:$0xff] %v239_v20  ;;  %v219_v28 = vmul.f32 %v215_v27, %v6130_v29  ;;  %v205_v31 = vsel %vm204_vm14, %v5814_v0, %v201_v19  ;;  %v5702_v29 = vld [vmem:[%s7426_s5 + $0x10] sm:$0xff] }
 0x11b   :  { %250 = vst [vmem:[#allocation1 + $0x3] ss:$4 sm:$0xff] %v240_v25  ;;  %v218_v32 = vmul.f32 %v205_v31, %v6132_v30  ;;  %754 = vmatpush.bf16.msrb.mxu2 %v5702_v29 }
 0x11c   :  { %246 = vst [vmem:[#allocation1 + $0x1] ss:$4 sm:$0xff] %v238_v26  ;;  %v226_v34 = vmul.f32 %v5767_v3, %v219_v28 }
 0x11d   :  { %v225_v33 = vmul.f32 %v5767_v3, %v218_v32  ;;  %v5771_v32 = vld [vmem:[%s7430_s10] ss:$0 sm:$0xff] }
 0x11e   :  { %v233_v39 = vadd.f32 %v5768_v8, %v226_v34 }
 0x11f   :  { %v232_v35 = vadd.f32 %v5768_v8, %v225_v33 }
 0x121   :  { %v241_v37 = vrot.slane %v232_v35, 2  ;;  %v242_v38 = vrot.slane %v232_v35, 4  ;;  %254 = vst [vmem:[#allocation1 + $0x21] ss:$4 sm:$0xff] %v232_v35  ;;  %v243_v40 = vrot.slane %v232_v35, 6 }
 0x123   :  { %v259_v41 = vld.sshfl [vmem:[#allocation1] sm:$0xff pattern:$0x73625140]  ;;  %256 = vst [vmem:[#allocation1 + $0x22] ss:$4 sm:$0xff] %v241_v37 }
 0x124   :  { %262 = vst [vmem:[#allocation1 + $0x1] ss:$4 sm:$0xff] %v233_v39 }
 0x125   :  { %258 = vst [vmem:[#allocation1 + $0x23] ss:$4 sm:$0xff] %v242_v38 }
 0x126   :  { %261 = vst [vmem:[#allocation1] ss:$4 sm:$0xff] %v243_v40 }
 0x12c   :  { %v260_v30 = vld.sshfl [vmem:[#allocation1 + $0x20] sm:$0xff pattern:$0x73625140] }
 0x12d   :  { %v6183_v42 = vpack.c.bf16 %v260_v30, %v259_v41  ;;  %v263_v43 = vld.sshfl [vmem:[#allocation1] sm:$0xff pattern:$0x73625140] }
 0x12e   :  { %v6191_v44 = vpack.c.bf16 %v263_v43, %v263_v43 }
 0x12f   :  { %5193 = vmatmul.msk.bf16.vlgmr.msra.gmra.mxu0 %vm123_vm1, %v6183_v42  ;;  %5203 = vmatmul.msk.bf16.vlgmr.msra.gmra.mxu1 %vm123_vm1, %v6183_v42 }
 0x130   :  { %5213 = vmatmul.msk.bf16.vlgmr.msra.gmra.mxu2 %vm123_vm1, %v6183_v42 }
 0x13f   :  { %5194 = vmatmul.msk.bf16.gmra.mxu0 %vm123_vm1, %v6191_v44  ;;  %5204 = vmatmul.msk.bf16.gmra.mxu1 %vm123_vm1, %v6191_v44 }
 0x140   :  { %5214 = vmatmul.msk.bf16.gmra.mxu2 %vm123_vm1, %v6191_v44 }
 0x150   :  { %5232 = vmatmul.msk.bf16.vlgmr.msrb.gmra.mxu2 %vm123_vm1, %v6183_v42 }
 0x160   :  { %5233 = vmatmul.msk.bf16.gmra.mxu2 %vm123_vm1, %v6191_v44 }
 0x1ac   :  { %v304_v46 = vpop.f32.mrf.mxu0  ;;  %v342_v47 = vpop.f32.mrf.mxu1 }
 0x1ad   :  { %v305_v48 = vadd.f32 %v5769_v45, %v304_v46  ;;  %v343_v4 = vadd.f32 %v5770_v63, %v342_v47 }
 0x1af   :  { %v389_v49 = vmul.f32 0.59460354, %v305_v48  ;;  %v402_v8 = vmul.f32 0.59460354, %v343_v4 }
 0x1b1   :  { %v395_v50 = vrot.slane %v389_v49, 2  ;;  %v396_v51 = vrot.slane %v389_v49, 4  ;;  %v397_v52 = vrot.slane %v389_v49, 6  ;;  %425 = vst [vmem:[#allocation1] ss:$4 sm:$0xff] %v389_v49  ;;  %v408_v12 = vrot.slane %v402_v8, 2 }
 0x1b2   :  { %v409_v15 = vrot.slane %v402_v8, 4  ;;  %v410_v16 = vrot.slane %v402_v8, 6 }
 0x1b3   :  { %427 = vst [vmem:[#allocation1 + $0x1] ss:$4 sm:$0xff] %v395_v50  ;;  %v6206_v53 = vpop.f32.mrf.mxu2 }
 0x1b4   :  { %429 = vst [vmem:[#allocation1 + $0x2] ss:$4 sm:$0xff] %v396_v51  ;;  %v306_v54 = vpop.f32.mrf.mxu0  ;;  %v344_v55 = vpop.f32.mrf.mxu1  ;;  %v381_v38 = vadd.f32 %v5771_v32, %v6206_v53 }
 0x1b5   :  { %431 = vst [vmem:[#allocation1 + $0x3] ss:$4 sm:$0xff] %v397_v52  ;;  %v307_v56 = vadd.f32 %v5769_v45, %v306_v54  ;;  %v345_v11 = vadd.f32 %v5770_v63, %v344_v55 }
 0x1b6   :  { %v418_v30 = vrot.slane %v381_v38, 2  ;;  %v420_v49 = vrot.slane %v381_v38, 6 }
 0x1b7   :  { %v390_v57 = vmul.f32 0.59460354, %v307_v56  ;;  %v403_v18 = vmul.f32 0.59460354, %v345_v11 }
 0x1b9   :  { %v398_v58 = vrot.slane %v390_v57, 2  ;;  %433 = vst [vmem:[#allocation1 + $0x20] ss:$4 sm:$0xff] %v390_v57  ;;  %v399_v59 = vrot.slane %v390_v57, 4  ;;  %v400_v60 = vrot.slane %v390_v57, 6  ;;  %v411_v23 = vrot.slane %v403_v18, 2 }
 0x1ba   :  { %v412_v20 = vrot.slane %v403_v18, 4  ;;  %v413_v19 = vrot.slane %v403_v18, 6  ;;  %v5705_v57 = vld [vmem:[%s7427_s7 + $0x18] sm:$0xff] }
 0x1bb   :  { %v6208_v61 = vpop.f32.mrf.mxu2 }
 0x1bc   :  { %v6210_v62 = vld.sshfl [vmem:[#allocation1] sm:$0xff pattern:$0x73625140]  ;;  %v309_v0 = vpop.f32.mrf.mxu0  ;;  %v347_v1 = vpop.f32.mrf.mxu1  ;;  %v383_v51 = vadd.f32 %v5771_v32, %v6208_v61  ;;  %v5704_v61 = vld [vmem:[%s7427_s7 + $0x10] sm:$0xff] }
 0x1bd   :  { %436 = vst [vmem:[#allocation1] ss:$4 sm:$0xff] %v398_v58  ;;  %v310_v2 = vadd.f32 %v5769_v45, %v309_v0  ;;  %v348_v22 = vadd.f32 %v5770_v63, %v347_v1  ;;  %v447_v29 = vpack.c.bf16 %v6210_v62, %v6210_v62  ;;  %v419_v45 = vrot.slane %v381_v38, 4 }
 0x1be   :  { %437 = vst [vmem:[#allocation1 + $0x1] ss:$4 sm:$0xff] %v399_v59  ;;  %v421_v59 = vrot.slane %v383_v51, 2  ;;  %v422_v62 = vrot.slane %v383_v51, 4  ;;  %v423_v1 = vrot.slane %v383_v51, 6 }
 0x1bf   :  { %438 = vst [vmem:[#allocation1 + $0x2] ss:$4 sm:$0xff] %v400_v60  ;;  %v391_v3 = vmul.f32 0.59460354, %v310_v2  ;;  %v404_v24 = vmul.f32 0.59460354, %v348_v22  ;;  %v479_v47 = vunpack.c.l.b16 %v447_v29 }
 0x1c0   :  { %v435_v6 = vld.sshfl [vmem:[#allocation1 + $0x20] sm:$0xff pattern:$0x73625140] }
 0x1c1   :  { %v401_v5 = vrot.slane %v391_v3, 2  ;;  %439 = vst [vmem:[#allocation1 + $0x3] ss:$4 sm:$0xff] %v391_v3  ;;  %v414_v33 = vrot.slane %v404_v24, 2  ;;  %v448_v37 = vpack.c.bf16 %v435_v6, %v435_v6 }
 0x1c3   :  { %440 = vst [vmem:[#allocation1 + $0x20] ss:$4 sm:$0xff] %v401_v5  ;;  %v6215_v7 = vpop.f32.mrf.mxu2  ;;  %v480_v41 = vunpack.c.l.b16 %v448_v37 }
 0x1c4   :  { %v311_v9 = vpop.f32.mrf.mxu0  ;;  %v349_v10 = vpop.f32.mrf.mxu1  ;;  %v386_v60 = vadd.f32 %v5771_v32, %v6215_v7 }
 0x1c5   :  { %v481_v52 = vpack.c.b16 %v480_v41, %v479_v47 }
 0x1c6   :  { %v424_v7 = vrot.slane %v386_v60, 2 }
 0x1c8   :  { %v6217_v13 = vld.sshfl [vmem:[#allocation1] sm:$0xff pattern:$0x73625140] }
 0x1c9   :  { %451 = vst [vmem:[#allocation1] ss:$4 sm:$0xff] %v402_v8  ;;  %v449_v6 = vpack.c.bf16 %v6217_v13, %v6217_v13 }
 0x1ca   :  { %v6219_v17 = vld.sshfl [vmem:[#allocation1 + $0x20] sm:$0xff pattern:$0x73625140]  ;;  %453 = vst [vmem:[#allocation1 + $0x1] ss:$4 sm:$0xff] %v408_v12 }
 0x1cb   :  { %455 = vst [vmem:[#allocation1 + $0x2] ss:$4 sm:$0xff] %v409_v15  ;;  %v387_v21 = vpop.f32.mrf.mxu2  ;;  %v450_v0 = vpack.c.bf16 %v6219_v17, %v6219_v17  ;;  %v510_v12 = vunpack.c.l.b16 %v449_v6 }
 0x1cc   :  { %457 = vst [vmem:[#allocation1 + $0x3] ss:$4 sm:$0xff] %v410_v16 }
 0x1cd   :  { %459 = vst [vmem:[#allocation1 + $0x20] ss:$4 sm:$0xff] %v403_v18  ;;  %v511_v10 = vunpack.c.l.b16 %v450_v0 }
 0x1cf   :  { %v512_v16 = vpack.c.b16 %v511_v10, %v510_v12 }
 0x1d3   :  { %v460_v25 = vld.sshfl [vmem:[#allocation1] sm:$0xff pattern:$0x73625140]  ;;  %v6221_v26 = vpop.f32.mrf.mxu2 }
 0x1d4   :  { %v461_v27 = vld.sshfl [vmem:[#allocation1 + $0x20] sm:$0xff pattern:$0x73625140]  ;;  %462 = vst [vmem:[#allocation1] ss:$4 sm:$0xff] %v411_v23  ;;  %v473_v28 = vpack.c.bf16 %v460_v25, %v460_v25 }
 0x1d5   :  { %463 = vst [vmem:[#allocation1 + $0x1] ss:$4 sm:$0xff] %v412_v20  ;;  %v474_v31 = vpack.c.bf16 %v461_v27, %v461_v27  ;;  %v63_v25 = vld [vmem:[%s7431_s1] sm:$0x3] }
 0x1d6   :  { %464 = vst [vmem:[#allocation1 + $0x2] ss:$4 sm:$0xff] %v413_v19  ;;  %v484_v34 = vunpack.c.l.b16 %v473_v28  ;;  %vm67_vm3 = vcmp.gt.f32.partialorder %v63_v25, 0.0  ;;  %v5996_v19 = vmov 0  }
 0x1d7   :  { %465 = vst [vmem:[#allocation1 + $0x3] ss:$4 sm:$0xff] %v404_v24  ;;  %v485_v35 = vunpack.c.l.b16 %v474_v31  ;;  %v538_v27 = vsel %vm67_vm3, 1, %v5996_v19 }
 0x1d8   :  { %466 = vst [vmem:[#allocation1 + $0x20] ss:$4 sm:$0xff] %v414_v33  ;;  %v540_v28 = vperm.slane %v538_v27, 0  ;;  %v65_v33 = vrot.slane %v63_v25, 1 }
 0x1d9   :  { %v486_v36 = vpack.c.b16 %v485_v35, %v484_v34 }
 0x1da   :  { %vm6258_vm4 = vcmp.eq.s32.totalorder %v540_v28, 1  ;;  %vm68_vm6 = vcmp.gt.f32.partialorder %v65_v33, 0.0  ;;  %v5706_v33 = vld [vmem:[%s7428_s9 + $0x10] sm:$0xff] }
 0x1db   :  { %v492_v39 = vsel %vm487_vm15, %v486_v36, 0  ;;  %v6228_v40 = vpop.f32.mrf.mxu2  ;;  %v539_v36 = vsel %vm68_vm6, 1, %v5996_v19 }
 0x1dc   :  { %501 = vmatpush.bf16.xpose.msra.mxu3 %v492_v39  ;;  %v541_v29 = vperm.slane %v539_v36, 0 }
 0x1de   :  { %v467_v43 = vld.sshfl [vmem:[#allocation1] sm:$0xff pattern:$0x73625140]  ;;  %vm6268_vm8 = vcmp.eq.s32.totalorder %v541_v29, 1 }
 0x1df   :  { %v468_v46 = vld.sshfl [vmem:[#allocation1 + $0x20] sm:$0xff pattern:$0x73625140]  ;;  %602 = vst [vmem:[#allocation1] ss:$4 sm:$0xff] %v381_v38  ;;  %v475_v48 = vpack.c.bf16 %v467_v43, %v467_v43 }
 0x1e0   :  { %604 = vst [vmem:[#allocation1 + $0x1] ss:$4 sm:$0xff] %v418_v30  ;;  %v476_v50 = vpack.c.bf16 %v468_v46, %v468_v46 }
 0x1e1   :  { %606 = vst [vmem:[#allocation1 + $0x2] ss:$4 sm:$0xff] %v419_v45  ;;  %v515_v53 = vunpack.c.l.b16 %v475_v48 }
 0x1e2   :  { %608 = vst [vmem:[#allocation1 + $0x3] ss:$4 sm:$0xff] %v420_v49  ;;  %v516_v54 = vunpack.c.l.b16 %v476_v50 }
 0x1e3   :  { %610 = vst [vmem:[#allocation1 + $0x20] ss:$4 sm:$0xff] %v383_v51  ;;  %5215 = vmatmul.msk.bf16.vlgmr.msra.gmra.mxu3 %vm487_vm15, %v481_v52  ;;  %v6234_v55 = vpop.f32.mrf.mxu2 }
 0x1e4   :  { %v517_v56 = vpack.c.b16 %v516_v54, %v515_v53 }
 0x1e6   :  { %v522_v58 = vsel %vm487_vm15, %v517_v56, 0  ;;  %v69_v56 = vld [vmem:[%s7432_s2] sm:$0xff] }
 0x1e7   :  { %531 = vmatpush.bf16.xpose.msrb.mxu3 %v522_v58  ;;  %v85_v58 = vmul.f32 0.2, %v69_v56 }
 0x1e9   :  { %v611_v63 = vld.sshfl [vmem:[#allocation1] sm:$0xff pattern:$0x73625140] }
 0x1ea   :  { %v612_v2 = vld.sshfl [vmem:[#allocation1 + $0x20] sm:$0xff pattern:$0x73625140]  ;;  %613 = vst [vmem:[#allocation1] ss:$4 sm:$0xff] %v421_v59  ;;  %v624_v3 = vpack.c.bf16 %v611_v63, %v611_v63 }
 0x1eb   :  { %614 = vst [vmem:[#allocation1 + $0x1] ss:$4 sm:$0xff] %v422_v62  ;;  %v625_v4 = vpack.c.bf16 %v612_v2, %v612_v2  ;;  %v763_v5 = vpop.f32.mrf.mxu2  ;;  %v70_v62 = vld [vmem:[%s7432_s2 + $0x8] sm:$0x3] }
 0x1ec   :  { %615 = vst [vmem:[#allocation1 + $0x2] ss:$4 sm:$0xff] %v423_v1  ;;  %v635_v8 = vunpack.c.l.b16 %v624_v3  ;;  %v86_v2 = vmul.f32 0.2, %v70_v62 }
 0x1ed   :  { %616 = vst [vmem:[#allocation1 + $0x3] ss:$4 sm:$0xff] %v386_v60  ;;  %v636_v9 = vunpack.c.l.b16 %v625_v4  ;;  %v6287_v60 = vadd.f32 1.0, %v85_v58 }
 0x1ee   :  { %617 = vst [vmem:[#allocation1 + $0x20] ss:$4 sm:$0xff] %v424_v7  ;;  %v6294_v5 = vadd.f32 1.0, %v86_v2  ;;  %v77_v7 = vld [vmem:[%s7432_s2 + $0x40] sm:$0xff] }
 0x1ef   :  { %793 = vmatpush.bf16.msra.mxu3 %v5705_v57  ;;  %v637_v11 = vpack.c.b16 %v636_v9, %v635_v8 }
 0x1f1   :  { %v643_v15 = vsel %vm641_vm2, %v637_v11, 0  ;;  %v93_v11 = vmul.f32 0.2, %v77_v7 }
 0x1f2   :  { %652 = vmatpush.bf16.msrb.mxu0 %v643_v15 }
 0x1f3   :  { %794 = vmatpush.bf16.msra.mxu3 %v5704_v61 }
 0x1f4   :  { %5216 = vmatmul.msk.bf16.vlgmr.msrb.gmra.mxu3 %vm487_vm15, %v512_v16  ;;  %v618_v17 = vld.sshfl [vmem:[#allocation1] sm:$0xff pattern:$0x73625140]  ;;  %v6301_v16 = vadd.f32 1.0, %v93_v11 }
 0x1f5   :  { %v619_v18 = vld.sshfl [vmem:[#allocation1 + $0x20] sm:$0xff pattern:$0x73625140]  ;;  %v626_v13 = vpack.c.bf16 %v618_v17, %v618_v17 }
 0x1f6   :  { %v627_v21 = vpack.c.bf16 %v619_v18, %v619_v18  ;;  %v78_v18 = vld [vmem:[%s7432_s2 + $0x48] sm:$0x3] }
 0x1f7   :  { %v666_v22 = vunpack.c.l.b16 %v626_v13 }
 0x1f8   :  { %v667_v23 = vunpack.c.l.b16 %v627_v21 }
 0x1fa   :  { %v668_v24 = vpack.c.b16 %v667_v23, %v666_v22  ;;  %v94_v23 = vmul.f32 0.2, %v78_v18 }
 0x1fc   :  { %v673_v20 = vsel %vm641_vm2, %v668_v24, 0 }
 0x1fd   :  { %682 = vmatpush.bf16.msrb.mxu1 %v673_v20  ;;  %v6308_v20 = vadd.f32 1.0, %v94_v23 }
 0x204   :  { %5247 = vmatmul.msk.bf16.vlgmr.msra.gmra.mxu3 %vm123_vm1, %v6183_v42 }
 0x214   :  { %5248 = vmatmul.msk.bf16.gmra.mxu3 %vm123_vm1, %v6191_v44 }
 0x266   :  { %v503_v32 = vpop.f32.mrf.mxu3 }
 0x267   :  { %v544_v34 = vsel %vm6258_vm4, -1e+30, %v503_v32  ;;  %v5707_v32 = vld [vmem:[%s7428_s9 + $0x18] sm:$0xff] }
 0x268   :  { %v549_v35 = vsel %vm548_vm5, %v544_v34, -inf  ;;  %833 = vmatpush.bf16.msra.mxu0 %v5707_v32 }
 0x269   :  { %550 = vmax.xlane.f32.xlu2 %v549_v35 }
 0x26c   :  { %834 = vmatpush.bf16.msra.mxu0 %v5706_v33 }
 0x26e   :  { %v505_v37 = vpop.f32.mrf.mxu3 }
 0x26f   :  { %v545_v38 = vsel %vm6258_vm4, -1e+30, %v505_v37 }
 0x270   :  { %v553_v39 = vsel %vm552_vm7, %v545_v38, -inf }
 0x271   :  { %554 = vmax.xlane.f32.xlu0 %v553_v39 }
 0x277   :  { %v533_v30 = vpop.f32.mrf.mxu3 }
 0x278   :  { %v546_v43 = vsel %vm6268_vm8, -1e+30, %v533_v30 }
 0x279   :  { %v556_v45 = vsel %vm548_vm5, %v546_v43, -inf }
 0x27a   :  { %557 = vmax.xlane.f32.xlu1 %v556_v45 }
 0x27f   :  { %v535_v46 = vpop.f32.mrf.mxu3 }
 0x280   :  { %v547_v47 = vsel %vm6268_vm8, -1e+30, %v535_v46 }
 0x281   :  { %v559_v48 = vsel %vm552_vm7, %v547_v47, -inf }
 0x282   :  { %560 = vmax.xlane.f32.xlu2 %v559_v48 }
 0x287   :  { %v6278_v49 = vpop.f32.mrf.mxu3 }
 0x28f   :  { %v6280_v50 = vpop.f32.mrf.mxu3 }
 0x297   :  { %v6282_v51 = vpop.f32.mrf.mxu3 }
 0x29f   :  { %v803_v52 = vpop.f32.mrf.mxu3 }
 0x2dc   :  { %v551_v53 = vpop.xlane.xlu2 %550 }
 0x2dd   :  { %v562_v54 = vsub.f32 %v544_v34, %v551_v53 }
 0x2df   :  { %v566_v57 = vmul.f32 1.442695, %v562_v54 }
 0x2e1   :  { %5815 = vpow2.f32 %v566_v57 }
 0x2e4   :  { %v555_v59 = vpop.xlane.xlu0 %554 }
 0x2e5   :  { %v563_v61 = vsub.f32 %v545_v38, %v555_v59 }
 0x2e7   :  { %v5816_v63 = vpop.eup %5815  ;;  %v568_v0 = vmul.f32 1.442695, %v563_v61 }
 0x2e8   :  { %v574_v1 = vmul.f32 %v5816_v63, %v6287_v60 }
 0x2e9   :  { %5817 = vpow2.f32 %v568_v0 }
 0x2ea   :  { %v578_v3 = vsel %vm548_vm5, %v574_v1, 0.0 }
 0x2eb   :  { %579 = vadd.xlane.f32.xlu0 %v578_v3 }
 0x2ed   :  { %v558_v4 = vpop.xlane.xlu1 %557 }
 0x2ee   :  { %v564_v6 = vsub.f32 %v546_v43, %v558_v4 }
 0x2ef   :  { %v5818_v8 = vpop.eup %5817 }
 0x2f0   :  { %v570_v9 = vmul.f32 1.442695, %v564_v6  ;;  %v575_v10 = vmul.f32 %v5818_v8, %v6294_v5 }
 0x2f2   :  { %5819 = vpow2.f32 %v570_v9  ;;  %v581_v12 = vsel %vm552_vm7, %v575_v10, 0.0  ;;  %v5772_v9 = vld [vmem:[%s7453_s22 + $0x1] ss:$0 sm:$0xff] }
 0x2f3   :  { %582 = vadd.xlane.f32.xlu1 %v581_v12  ;;  %v759_v11 = vadd.f32 %v5772_v9, %v6228_v40  ;;  %v757_v12 = vadd.f32 %v5772_v9, %v6221_v26 }
 0x2f5   :  { %v561_v15 = vpop.xlane.xlu2 %560  ;;  %v846_v18 = vmul.f32 0.59460354, %v759_v11 }
 0x2f6   :  { %v565_v17 = vsub.f32 %v547_v47, %v561_v15 }
 0x2f8   :  { %v5820_v13 = vpop.eup %5819  ;;  %v572_v21 = vmul.f32 1.442695, %v565_v17 }
 0x2f9   :  { %v576_v22 = vmul.f32 %v5820_v13, %v6301_v16  ;;  %v762_v13 = vadd.f32 %v5772_v9, %v6234_v55  ;;  %v5773_v55 = vld [vmem:[%s7429_s8 + $0x1] ss:$0 sm:$0xff] }
 0x2fa   :  { %5821 = vpow2.f32 %v572_v21  ;;  %v799_v32 = vadd.f32 %v5773_v55, %v6280_v50 }
 0x2fb   :  { %v584_v24 = vsel %vm548_vm5, %v576_v22, 0.0  ;;  %v847_v23 = vmul.f32 0.59460354, %v762_v13 }
 0x2fc   :  { %585 = vadd.xlane.f32.xlu2 %v584_v24 }
 0x2fd   :  { %v857_v40 = vrot.slane %v847_v23, 2 }
 0x300   :  { %v5822_v25 = vpop.eup %5821 }
 0x301   :  { %v577_v19 = vmul.f32 %v5822_v25, %v6308_v20 }
 0x303   :  { %v587_v27 = vsel %vm552_vm7, %v577_v19, 0.0 }
 0x304   :  { %588 = vadd.xlane.f32.xlu0 %v587_v27 }
 0x35e   :  { %v580_v28 = vpop.xlane.xlu0 %579 }
 0x35f   :  { %5823 = vrcp.f32 %v580_v28 }
 0x365   :  { %v5824_v35 = vpop.eup %5823 }
 0x366   :  { %v583_v34 = vpop.xlane.xlu1 %582  ;;  %v594_v36 = vmul.f32 %v5824_v35, %v574_v1  ;;  %v802_v35 = vadd.f32 %v5773_v55, %v6282_v51 }
 0x367   :  { %5825 = vrcp.f32 %v583_v34  ;;  %v859_v34 = vmul.f32 0.59460354, %v799_v32 }
 0x368   :  { %v598_v38 = vpack.c.bf16 %v594_v36, %v594_v36  ;;  %v854_v36 = vrot.slane %v846_v18, 2 }
 0x36a   :  { %v630_v43 = vunpack.c.l.b16 %v598_v38  ;;  %v855_v38 = vrot.slane %v846_v18, 4 }
 0x36d   :  { %v5826_v37 = vpop.eup %5825 }
 0x36e   :  { %v595_v39 = vmul.f32 %v5826_v37, %v575_v10 }
 0x36f   :  { %v586_v29 = vpop.xlane.xlu2 %585 }
 0x370   :  { %v599_v30 = vpack.c.bf16 %v595_v39, %v595_v39  ;;  %5827 = vrcp.f32 %v586_v29  ;;  %v856_v29 = vrot.slane %v846_v18, 6 }
 0x372   :  { %v631_v45 = vunpack.c.l.b16 %v599_v30  ;;  %v860_v30 = vmul.f32 0.59460354, %v802_v35 }
 0x374   :  { %v632_v46 = vpack.c.b16 %v631_v45, %v630_v43  ;;  %v797_v43 = vadd.f32 %v5773_v55, %v6278_v49  ;;  %v870_v45 = vrot.slane %v860_v30, 2 }
 0x376   :  { %5217 = vmatmul.msk.bf16.vlgmr.msrb.gmra.mxu0 %vm548_vm5, %v632_v46  ;;  %v5828_v48 = vpop.eup %5827  ;;  %v858_v50 = vmul.f32 0.59460354, %v797_v43 }
 0x377   :  { %v589_v47 = vpop.xlane.xlu0 %588  ;;  %v596_v52 = vmul.f32 %v5828_v48, %v576_v22  ;;  %v845_v22 = vmul.f32 0.59460354, %v757_v12 }
 0x378   :  { %5829 = vrcp.f32 %v589_v47  ;;  %v864_v47 = vrot.slane %v858_v50, 2  ;;  %v865_v48 = vrot.slane %v858_v50, 4 }
 0x379   :  { %v600_v54 = vpack.c.bf16 %v596_v52, %v596_v52  ;;  %v851_v24 = vrot.slane %v845_v22, 2  ;;  %v852_v27 = vrot.slane %v845_v22, 4  ;;  %v853_v26 = vrot.slane %v845_v22, 6  ;;  %v5774_v52 = vld [vmem:[%s7430_s10 + $0x1] ss:$0 sm:$0xff] }
 0x37b   :  { %v661_v58 = vunpack.c.l.b16 %v600_v54 }
 0x37e   :  { %v5830_v53 = vpop.eup %5829 }
 0x37f   :  { %v597_v56 = vmul.f32 %v5830_v53, %v577_v19  ;;  %v866_v53 = vrot.slane %v858_v50, 6 }
 0x381   :  { %v601_v57 = vpack.c.bf16 %v597_v56, %v597_v56  ;;  %v867_v56 = vrot.slane %v859_v34, 2 }
 0x383   :  { %v662_v59 = vunpack.c.l.b16 %v601_v57 }
 0x385   :  { %v663_v61 = vpack.c.b16 %v662_v59, %v661_v58  ;;  %v868_v59 = vrot.slane %v859_v34, 4 }
 0x386   :  { %5262 = vmatmul.msk.bf16.vlgmr.msra.gmra.mxu0 %vm123_vm1, %v6183_v42 }
 0x387   :  { %5218 = vmatmul.msk.bf16.vlgmr.msrb.gmra.mxu1 %vm548_vm5, %v663_v61 }
 0x396   :  { %5263 = vmatmul.msk.bf16.gmra.mxu0 %vm123_vm1, %v6191_v44 }
 0x3f3   :  { %v654_v62 = vpop.f32.mrf.mxu0 }
 0x3f4   :  { %v693_v63 = vrot.slane %v654_v62, 2  ;;  %v694_v0 = vrot.slane %v654_v62, 4  ;;  %v695_v1 = vrot.slane %v654_v62, 6  ;;  %699 = vst [vmem:[#allocation1] ss:$4 sm:$0xff] %v654_v62  ;;  %v869_v62 = vrot.slane %v859_v34, 6 }
 0x3f6   :  { %701 = vst [vmem:[#allocation1 + $0x1] ss:$4 sm:$0xff] %v693_v63 }
 0x3f7   :  { %703 = vst [vmem:[#allocation1 + $0x2] ss:$4 sm:$0xff] %v694_v0 }
 0x3f8   :  { %705 = vst [vmem:[#allocation1 + $0x3] ss:$4 sm:$0xff] %v695_v1 }
 0x3fb   :  { %v656_v2 = vpop.f32.mrf.mxu0 }
 0x3fc   :  { %707 = vst [vmem:[#allocation1 + $0x20] ss:$4 sm:$0xff] %v656_v2 }
 0x3ff   :  { %v6329_v10 = vld.sshfl [vmem:[#allocation1] sm:$0xff pattern:$0x73625140] }
 0x403   :  { %v6324_v4 = vpop.f32.mrf.mxu0 }
 0x404   :  { %v684_v3 = vpop.f32.mrf.mxu1 }
 0x405   :  { %v696_v6 = vrot.slane %v684_v3, 2  ;;  %v697_v7 = vrot.slane %v684_v3, 4  ;;  %v698_v8 = vrot.slane %v684_v3, 6  ;;  %709 = vst [vmem:[#allocation1 + $0x21] ss:$4 sm:$0xff] %v684_v3 }
 0x407   :  { %711 = vst [vmem:[#allocation1 + $0x22] ss:$4 sm:$0xff] %v696_v6 }
 0x408   :  { %713 = vst [vmem:[#allocation1 + $0x23] ss:$4 sm:$0xff] %v697_v7 }
 0x409   :  { %716 = vst [vmem:[#allocation1] ss:$4 sm:$0xff] %v698_v8  ;;  %v837_v8 = vadd.f32 %v5774_v52, %v6324_v4 }
 0x40b   :  { %v838_v17 = vpop.f32.mrf.mxu0 }
 0x40c   :  { %v686_v15 = vpop.f32.mrf.mxu1  ;;  %v839_v54 = vadd.f32 %v5774_v52, %v838_v17  ;;  %v874_v17 = vrot.slane %v837_v8, 2 }
 0x40d   :  { %717 = vst [vmem:[#allocation1 + $0x1] ss:$4 sm:$0xff] %v686_v15 }
 0x40e   :  { %v877_v32 = vrot.slane %v839_v54, 2  ;;  %v878_v35 = vrot.slane %v839_v54, 4 }
 0x40f   :  { %v6334_v21 = vld.sshfl [vmem:[#allocation1 + $0x20] sm:$0xff pattern:$0x73625140] }
 0x410   :  { %889 = vst [vmem:[#allocation1 + $0x20] ss:$4 sm:$0xff] %v846_v18 }
 0x413   :  { %v841_v19 = vpop.f32.mrf.mxu0 }
 0x414   :  { %v6336_v25 = vld.sshfl [vmem:[#allocation1] sm:$0xff pattern:$0x73625140]  ;;  %v842_v57 = vadd.f32 %v5774_v52, %v841_v19 }
 0x415   :  { %881 = vst [vmem:[#allocation1] ss:$4 sm:$0xff] %v845_v22  ;;  %v875_v22 = vrot.slane %v837_v8, 4 }
 0x416   :  { %883 = vst [vmem:[#allocation1 + $0x1] ss:$4 sm:$0xff] %v851_v24  ;;  %v880_v1 = vrot.slane %v842_v57, 2  ;;  %v876_v24 = vrot.slane %v837_v8, 6 }
 0x417   :  { %v6338_v28 = vld.sshfl [vmem:[#allocation1 + $0x20] sm:$0xff pattern:$0x73625140]  ;;  %885 = vst [vmem:[#allocation1 + $0x2] ss:$4 sm:$0xff] %v852_v27 }
 0x418   :  { %896 = vst [vmem:[#allocation1 + $0x20] ss:$4 sm:$0xff] %v857_v40  ;;  %v904_v11 = vpack.c.bf16 %v6338_v28, %v6338_v28  ;;  %v724_v40 = vld [vmem:[%s7433_s11] sm:$0xf] }
 0x419   :  { %887 = vst [vmem:[#allocation1 + $0x3] ss:$4 sm:$0xff] %v853_v26  ;;  %v1207_v28 = vsel %vm1178_vm9, %v724_v40, 0 }
 0x41a   :  { %v936_v13 = vunpack.c.l.b16 %v904_v11 }
 0x41b   :  { %v843_v33 = vpop.f32.mrf.mxu0 }
 0x41f   :  { %v6345_v37 = vld.sshfl [vmem:[#allocation1 + $0x20] sm:$0xff pattern:$0x73625140] }
 0x420   :  { %915 = vst [vmem:[#allocation1 + $0x20] ss:$4 sm:$0xff] %v859_v34  ;;  %v890_v39 = vld.sshfl [vmem:[#allocation1] sm:$0xff pattern:$0x73625140] }
 0x421   :  { %892 = vst [vmem:[#allocation1] ss:$4 sm:$0xff] %v854_v36  ;;  %v903_v7 = vpack.c.bf16 %v890_v39, %v890_v39 }
 0x422   :  { %893 = vst [vmem:[#allocation1 + $0x1] ss:$4 sm:$0xff] %v855_v38  ;;  %v879_v38 = vrot.slane %v839_v54, 6 }
 0x423   :  { %894 = vst [vmem:[#allocation1 + $0x2] ss:$4 sm:$0xff] %v856_v29  ;;  %v935_v12 = vunpack.c.l.b16 %v903_v7  ;;  %v906_v29 = vpack.c.bf16 %v6345_v37, %v6345_v37 }
 0x424   :  { %895 = vst [vmem:[#allocation1 + $0x3] ss:$4 sm:$0xff] %v847_v23 }
 0x425   :  { %v937_v19 = vpack.c.b16 %v936_v13, %v935_v12 }
 0x427   :  { %v917_v46 = vld.sshfl [vmem:[#allocation1 + $0x20] sm:$0xff pattern:$0x73625140] }
 0x428   :  { %922 = vst [vmem:[#allocation1 + $0x20] ss:$4 sm:$0xff] %v870_v45  ;;  %v930_v58 = vpack.c.bf16 %v917_v46, %v917_v46  ;;  %v966_v46 = vunpack.c.l.b16 %v906_v29 }
 0x42a   :  { %v941_v3 = vunpack.c.l.b16 %v930_v58 }
 0x42b   :  { %v6348_v51 = vld.sshfl [vmem:[#allocation1] sm:$0xff pattern:$0x73625140] }
 0x42c   :  { %907 = vst [vmem:[#allocation1] ss:$4 sm:$0xff] %v858_v50  ;;  %v905_v34 = vpack.c.bf16 %v6348_v51, %v6348_v51 }
 0x42d   :  { %909 = vst [vmem:[#allocation1 + $0x1] ss:$4 sm:$0xff] %v864_v47 }
 0x42e   :  { %911 = vst [vmem:[#allocation1 + $0x2] ss:$4 sm:$0xff] %v865_v48  ;;  %v965_v45 = vunpack.c.l.b16 %v905_v34 }
 0x42f   :  { %v924_v49 = vld.sshfl [vmem:[#allocation1 + $0x20] sm:$0xff pattern:$0x73625140]  ;;  %913 = vst [vmem:[#allocation1 + $0x3] ss:$4 sm:$0xff] %v866_v53 }
 0x430   :  { %1057 = vst [vmem:[#allocation1 + $0x20] ss:$4 sm:$0xff] %v839_v54  ;;  %v932_v15 = vpack.c.bf16 %v924_v49, %v924_v49  ;;  %v967_v51 = vpack.c.b16 %v966_v46, %v965_v45  ;;  %v80_v46 = vld [vmem:[%s7432_s2 + $0x58] sm:$0x3] }
 0x432   :  { %v971_v4 = vunpack.c.l.b16 %v932_v15 }
 0x436   :  { %v916_v61 = vld.sshfl [vmem:[#allocation1] sm:$0xff pattern:$0x73625140] }
 0x437   :  { %918 = vst [vmem:[#allocation1] ss:$4 sm:$0xff] %v867_v56  ;;  %v929_v63 = vpack.c.bf16 %v916_v61, %v916_v61  ;;  %v1059_v0 = vld.sshfl [vmem:[#allocation1 + $0x20] sm:$0xff pattern:$0x73625140] }
 0x438   :  { %919 = vst [vmem:[#allocation1 + $0x1] ss:$4 sm:$0xff] %v868_v59  ;;  %v1072_v33 = vpack.c.bf16 %v1059_v0, %v1059_v0  ;;  %v723_v59 = vpack.c.bf16 %v6336_v25, %v6336_v25 }
 0x439   :  { %920 = vst [vmem:[#allocation1 + $0x2] ss:$4 sm:$0xff] %v869_v62  ;;  %v940_v2 = vunpack.c.l.b16 %v929_v63 }
 0x43a   :  { %921 = vst [vmem:[#allocation1 + $0x3] ss:$4 sm:$0xff] %v860_v30  ;;  %v1083_v43 = vunpack.c.l.b16 %v1072_v33 }
 0x43b   :  { %1064 = vst [vmem:[#allocation1 + $0x20] ss:$4 sm:$0xff] %v880_v1  ;;  %v942_v6 = vpack.c.b16 %v941_v3, %v940_v2 }
 0x43d   :  { %v947_v9 = vsel %vm487_vm15, %v942_v6, 0 }
 0x43e   :  { %956 = vmatpush.bf16.xpose.msra.mxu1 %v947_v9 }
 0x441   :  { %v923_v18 = vld.sshfl [vmem:[#allocation1] sm:$0xff pattern:$0x73625140] }
 0x442   :  { %1049 = vst [vmem:[#allocation1] ss:$4 sm:$0xff] %v837_v8  ;;  %v931_v23 = vpack.c.bf16 %v923_v18, %v923_v18  ;;  %v1066_v47 = vld.sshfl [vmem:[#allocation1 + $0x20] sm:$0xff pattern:$0x73625140]  ;;  %v71_v18 = vld [vmem:[%s7432_s2 + $0x10] sm:$0xff] }
 0x443   :  { %1051 = vst [vmem:[#allocation1 + $0x1] ss:$4 sm:$0xff] %v874_v17  ;;  %v1074_v52 = vpack.c.bf16 %v1066_v47, %v1066_v47 }
 0x444   :  { %1053 = vst [vmem:[#allocation1 + $0x2] ss:$4 sm:$0xff] %v875_v22  ;;  %v970_v27 = vunpack.c.l.b16 %v931_v23  ;;  %v87_v22 = vmul.f32 0.2, %v71_v18 }
 0x445   :  { %1055 = vst [vmem:[#allocation1 + $0x3] ss:$4 sm:$0xff] %v876_v24  ;;  %5264 = vmatmul.msk.bf16.vlgmr.msra.gmra.mxu1 %vm487_vm15, %v937_v19  ;;  %v1113_v37 = vunpack.c.l.b16 %v1074_v52  ;;  %v96_v52 = vmul.f32 0.2, %v80_v46 }
 0x446   :  { %v972_v26 = vpack.c.b16 %v971_v4, %v970_v27  ;;  %v6397_v24 = vadd.f32 1.0, %v87_v22  ;;  %v72_v27 = vld [vmem:[%s7432_s2 + $0x18] sm:$0x3] }
 0x448   :  { %v977_v55 = vsel %vm487_vm15, %v972_v26, 0 }
 0x449   :  { %986 = vmatpush.bf16.xpose.msrb.mxu1 %v977_v55 }
 0x44c   :  { %v1058_v36 = vld.sshfl [vmem:[#allocation1] sm:$0xff pattern:$0x73625140] }
 0x44d   :  { %1060 = vst [vmem:[#allocation1] ss:$4 sm:$0xff] %v877_v32  ;;  %v1071_v39 = vpack.c.bf16 %v1058_v36, %v1058_v36 }
 0x44e   :  { %1061 = vst [vmem:[#allocation1 + $0x1] ss:$4 sm:$0xff] %v878_v35  ;;  %v79_v35 = vld [vmem:[%s7432_s2 + $0x50] sm:$0xff] }
 0x44f   :  { %1062 = vst [vmem:[#allocation1 + $0x2] ss:$4 sm:$0xff] %v879_v38  ;;  %v1082_v30 = vunpack.c.l.b16 %v1071_v39  ;;  %v95_v29 = vmul.f32 0.2, %v79_v35 }
 0x450   :  { %1063 = vst [vmem:[#allocation1 + $0x3] ss:$4 sm:$0xff] %v842_v57  ;;  %v722_v57 = vpack.c.bf16 %v6334_v21, %v6329_v10 }
 0x451   :  { %1216 = vmatpush.bf16.msra.mxu1 %v1207_v28  ;;  %v1084_v50 = vpack.c.b16 %v1083_v43, %v1082_v30  ;;  %v88_v28 = vmul.f32 0.2, %v72_v27  ;;  %v6411_v45 = vadd.f32 1.0, %v95_v29 }
 0x453   :  { %v1089_v48 = vsel %vm641_vm2, %v1084_v50, 0  ;;  %v6404_v33 = vadd.f32 1.0, %v88_v28 }
 0x454   :  { %1098 = vmatpush.bf16.msra.mxu2 %v1089_v48 }
 0x455   :  { %5265 = vmatmul.msk.bf16.vlgmr.msrb.gmra.mxu1 %vm487_vm15, %v967_v51 }
 0x457   :  { %v1065_v53 = vld.sshfl [vmem:[#allocation1] sm:$0xff pattern:$0x73625140] }
 0x458   :  { %v1073_v54 = vpack.c.bf16 %v1065_v53, %v1065_v53 }
 0x45a   :  { %v1112_v49 = vunpack.c.l.b16 %v1073_v54  ;;  %v6418_v54 = vadd.f32 1.0, %v96_v52 }
 0x45c   :  { %v1114_v56 = vpack.c.b16 %v1113_v37, %v1112_v49 }
 0x45e   :  { %v1119_v58 = vsel %vm641_vm2, %v1114_v56, 0 }
 0x45f   :  { %1128 = vmatpush.bf16.msrb.mxu3 %v1119_v58 }
 0x465   :  { %5271 = vmatmul.msk.bf16.vlgmr.msra.gmra.mxu1 %vm487_vm15, %v722_v57  ;;  %v5709_v57 = vld [vmem:[%s7426_s5 + $0x28] sm:$0xff] }
 0x466   :  { %1255 = vmatpush.bf16.msrb.mxu2 %v5709_v57 }
 0x475   :  { %5272 = vmatmul.msk.bf16.gmra.mxu1 %vm487_vm15, %v723_v59 }
 0x4c2   :  { %v958_v61 = vpop.f32.mrf.mxu1 }
 0x4c3   :  { %v993_v62 = vsel %vm6258_vm4, -1e+30, %v958_v61  ;;  %v5708_v61 = vld [vmem:[%s7426_s5 + $0x20] sm:$0xff] }
 0x4c4   :  { %v997_v63 = vsel %vm548_vm5, %v993_v62, -inf  ;;  %1256 = vmatpush.bf16.msrb.mxu2 %v5708_v61 }
 0x4c5   :  { %998 = vmax.xlane.f32.xlu1 %v997_v63 }
 0x4ca   :  { %v960_v0 = vpop.f32.mrf.mxu1 }
 0x4cb   :  { %v994_v1 = vsel %vm6258_vm4, -1e+30, %v960_v0  ;;  %v5710_v0 = vld [vmem:[%s7427_s7 + $0x20] sm:$0xff] }
 0x4cc   :  { %v1000_v10 = vsel %vm552_vm7, %v994_v1, -inf }
 0x4cd   :  { %1001 = vmax.xlane.f32.xlu2 %v1000_v10 }
 0x4d2   :  { %v988_v21 = vpop.f32.mrf.mxu1 }
 0x4d3   :  { %v995_v25 = vsel %vm6268_vm8, -1e+30, %v988_v21 }
 0x4d4   :  { %v1003_v2 = vsel %vm548_vm5, %v995_v25, -inf }
 0x4d5   :  { %1004 = vmax.xlane.f32.xlu0 %v1003_v2 }
 0x4da   :  { %v990_v3 = vpop.f32.mrf.mxu1 }
 0x4db   :  { %v996_v6 = vsel %vm6268_vm8, -1e+30, %v990_v3 }
 0x4dc   :  { %v1006_v7 = vsel %vm552_vm7, %v996_v6, -inf }
 0x4dd   :  { %1007 = vmax.xlane.f32.xlu1 %v1006_v7 }
 0x4e2   :  { %v6388_v8 = vpop.f32.mrf.mxu1 }
 0x4ea   :  { %v6390_v9 = vpop.f32.mrf.mxu1 }
 0x4f2   :  { %v6392_v11 = vpop.f32.mrf.mxu1 }
 0x4fa   :  { %v1225_v12 = vpop.f32.mrf.mxu1 }
 0x538   :  { %v999_v15 = vpop.xlane.xlu1 %998 }
 0x539   :  { %v1009_v17 = vsub.f32 %v993_v62, %v999_v15  ;;  %v5711_v62 = vld [vmem:[%s7427_s7 + $0x28] sm:$0xff] }
 0x53a   :  { %1295 = vmatpush.bf16.msra.mxu3 %v5711_v62  ;;  %v5713_v62 = vld [vmem:[%s7428_s9 + $0x28] sm:$0xff] }
 0x53b   :  { %v1013_v13 = vmul.f32 1.442695, %v1009_v17 }
 0x53d   :  { %5831 = vpow2.f32 %v1013_v13 }
 0x53e   :  { %1296 = vmatpush.bf16.msra.mxu3 %v5710_v0 }
 0x540   :  { %v1002_v23 = vpop.xlane.xlu2 %1001 }
 0x541   :  { %v1010_v19 = vsub.f32 %v994_v1, %v1002_v23 }
 0x543   :  { %v5832_v4 = vpop.eup %5831  ;;  %v1015_v40 = vmul.f32 1.442695, %v1010_v19 }
 0x544   :  { %v1021_v26 = vmul.f32 %v5832_v4, %v6397_v24 }
 0x545   :  { %5833 = vpow2.f32 %v1015_v40 }
 0x546   :  { %v1025_v55 = vsel %vm548_vm5, %v1021_v26, 0.0 }
 0x547   :  { %1026 = vadd.xlane.f32.xlu2 %v1025_v55 }
 0x548   :  { %v1005_v32 = vpop.xlane.xlu0 %1004 }
 0x549   :  { %v1011_v34 = vsub.f32 %v995_v25, %v1005_v32 }
 0x54b   :  { %v5834_v36 = vpop.eup %5833  ;;  %v1017_v38 = vmul.f32 1.442695, %v1011_v34  ;;  %v5268_v34 = vld [vmem:[%s7433_s11 + $0x4] sm:$0xf] }
 0x54c   :  { %v1022_v39 = vmul.f32 %v5834_v36, %v6404_v33  ;;  %v1180_v35 = vsel %vm1178_vm9, %v5268_v34, 0 }
 0x54d   :  { %5835 = vpow2.f32 %v1017_v38  ;;  %1189 = vmatpush.bf16.msrb.mxu0 %v1180_v35 }
 0x54e   :  { %v1028_v30 = vsel %vm552_vm7, %v1022_v39, 0.0 }
 0x54f   :  { %1029 = vadd.xlane.f32.xlu0 %v1028_v30 }
 0x550   :  { %v1008_v43 = vpop.xlane.xlu1 %1007 }
 0x551   :  { %v1012_v50 = vsub.f32 %v996_v6, %v1008_v43  ;;  %1335 = vmatpush.bf16.msra.mxu0 %v5713_v62 }
 0x553   :  { %v5836_v47 = vpop.eup %5835  ;;  %v1019_v48 = vmul.f32 1.442695, %v1012_v50  ;;  %v5775_v50 = vld [vmem:[%s7453_s22 + $0x2] ss:$0 sm:$0xff] }
 0x554   :  { %v1023_v51 = vmul.f32 %v5836_v47, %v6411_v45 }
 0x555   :  { %5837 = vpow2.f32 %v1019_v48 }
 0x556   :  { %v1031_v53 = vsel %vm548_vm5, %v1023_v51, 0.0 }
 0x557   :  { %1032 = vadd.xlane.f32.xlu1 %v1031_v53 }
 0x55b   :  { %v5838_v49 = vpop.eup %5837 }
 0x55c   :  { %v1024_v37 = vmul.f32 %v5838_v49, %v6418_v54 }
 0x55e   :  { %v1034_v56 = vsel %vm552_vm7, %v1024_v37, 0.0 }
 0x55f   :  { %1035 = vadd.xlane.f32.xlu2 %v1034_v56 }
 0x5ba   :  { %v1027_v58 = vpop.xlane.xlu2 %1026 }
 0x5bb   :  { %5839 = vrcp.f32 %v1027_v58 }
 0x5c1   :  { %v5840_v63 = vpop.eup %5839 }
 0x5c2   :  { %v1030_v59 = vpop.xlane.xlu0 %1029  ;;  %v1041_v1 = vmul.f32 %v5840_v63, %v1021_v26 }
 0x5c3   :  { %5841 = vrcp.f32 %v1030_v59 }
 0x5c4   :  { %v1045_v21 = vpack.c.bf16 %v1041_v1, %v1041_v1 }
 0x5c6   :  { %v1077_v6 = vunpack.c.l.b16 %v1045_v21  ;;  %v5712_v21 = vld [vmem:[%s7428_s9 + $0x20] sm:$0xff] }
 0x5c7   :  { %1336 = vmatpush.bf16.msra.mxu0 %v5712_v21 }
 0x5c9   :  { %v5842_v10 = vpop.eup %5841 }
 0x5ca   :  { %v1042_v25 = vmul.f32 %v5842_v10, %v1022_v39  ;;  %v1033_v2 = vpop.xlane.xlu1 %1032 }
 0x5cb   :  { %5843 = vrcp.f32 %v1033_v2 }
 0x5cc   :  { %v1046_v3 = vpack.c.bf16 %v1042_v25, %v1042_v25 }
 0x5ce   :  { %v1078_v7 = vunpack.c.l.b16 %v1046_v3  ;;  %v5776_v3 = vld [vmem:[%s7429_s8 + $0x2] ss:$0 sm:$0xff] }
 0x5d0   :  { %v1079_v12 = vpack.c.b16 %v1078_v7, %v1077_v6 }
 0x5d1   :  { %v5844_v17 = vpop.eup %5843 }
 0x5d2   :  { %5266 = vmatmul.msk.bf16.vlgmr.msra.gmra.mxu2 %vm548_vm5, %v1079_v12  ;;  %v1036_v15 = vpop.xlane.xlu2 %1035  ;;  %v1043_v18 = vmul.f32 %v5844_v17, %v1023_v51 }
 0x5d3   :  { %5845 = vrcp.f32 %v1036_v15 }
 0x5d4   :  { %v1047_v22 = vpack.c.bf16 %v1043_v18, %v1043_v18 }
 0x5d6   :  { %v1107_v27 = vunpack.c.l.b16 %v1047_v22 }
 0x5d9   :  { %v5846_v13 = vpop.eup %5845 }
 0x5da   :  { %v1044_v23 = vmul.f32 %v5846_v13, %v1024_v37 }
 0x5dc   :  { %v1048_v19 = vpack.c.bf16 %v1044_v23, %v1044_v23 }
 0x5de   :  { %v1108_v4 = vunpack.c.l.b16 %v1048_v19 }
 0x5e0   :  { %v1109_v40 = vpack.c.b16 %v1108_v4, %v1107_v27 }
 0x5e2   :  { %5267 = vmatmul.msk.bf16.vlgmr.msrb.gmra.mxu3 %vm548_vm5, %v1109_v40  ;;  %5286 = vmatmul.msk.bf16.vlgmr.msrb.gmra.mxu2 %vm123_vm1, %v6183_v42 }
 0x5f2   :  { %5287 = vmatmul.msk.bf16.gmra.mxu2 %vm123_vm1, %v6191_v44  ;;  %5301 = vmatmul.msk.bf16.vlgmr.msra.gmra.mxu3 %vm123_vm1, %v6183_v42 }
 0x602   :  { %5302 = vmatmul.msk.bf16.gmra.mxu3 %vm123_vm1, %v6191_v44 }
 0x655   :  { %v1100_v26 = vpop.f32.mrf.mxu2 }
 0x656   :  { %v1139_v28 = vrot.slane %v1100_v26, 2  ;;  %v1140_v55 = vrot.slane %v1100_v26, 4  ;;  %v1141_v32 = vrot.slane %v1100_v26, 6  ;;  %1145 = vst [vmem:[#allocation1] ss:$4 sm:$0xff] %v1100_v26 }
 0x658   :  { %1147 = vst [vmem:[#allocation1 + $0x1] ss:$4 sm:$0xff] %v1139_v28 }
 0x659   :  { %1149 = vst [vmem:[#allocation1 + $0x2] ss:$4 sm:$0xff] %v1140_v55 }
 0x65a   :  { %1151 = vst [vmem:[#allocation1 + $0x3] ss:$4 sm:$0xff] %v1141_v32 }
 0x65d   :  { %v1102_v36 = vpop.f32.mrf.mxu2 }
 0x65e   :  { %1153 = vst [vmem:[#allocation1 + $0x20] ss:$4 sm:$0xff] %v1102_v36 }
 0x661   :  { %v1160_v46 = vld.sshfl [vmem:[#allocation1] sm:$0xff pattern:$0x73625140] }
 0x665   :  { %v1130_v38 = vpop.f32.mrf.mxu3  ;;  %v1258_v39 = vpop.f32.mrf.mxu2 }
 0x666   :  { %v1142_v29 = vrot.slane %v1130_v38, 2  ;;  %v1143_v30 = vrot.slane %v1130_v38, 4  ;;  %v1144_v43 = vrot.slane %v1130_v38, 6  ;;  %1155 = vst [vmem:[#allocation1 + $0x21] ss:$4 sm:$0xff] %v1130_v38  ;;  %v1259_v47 = vadd.f32 %v5775_v50, %v1258_v39 }
 0x668   :  { %1157 = vst [vmem:[#allocation1 + $0x22] ss:$4 sm:$0xff] %v1142_v29  ;;  %v1347_v37 = vmul.f32 0.59460354, %v1259_v47  ;;  %v5717_v29 = vld [vmem:[%s7427_s7 + $0x38] sm:$0xff] }
 0x669   :  { %1159 = vst [vmem:[#allocation1 + $0x23] ss:$4 sm:$0xff] %v1143_v30  ;;  %v5716_v30 = vld [vmem:[%s7427_s7 + $0x30] sm:$0xff] }
 0x66a   :  { %1162 = vst [vmem:[#allocation1] ss:$4 sm:$0xff] %v1144_v43  ;;  %v1353_v58 = vrot.slane %v1347_v37, 2  ;;  %v1354_v63 = vrot.slane %v1347_v37, 4  ;;  %v1355_v1 = vrot.slane %v1347_v37, 6 }
 0x66d   :  { %v1132_v48 = vpop.f32.mrf.mxu3  ;;  %v1260_v51 = vpop.f32.mrf.mxu2 }
 0x66e   :  { %1163 = vst [vmem:[#allocation1 + $0x1] ss:$4 sm:$0xff] %v1132_v48  ;;  %v1261_v52 = vadd.f32 %v5775_v50, %v1260_v51 }
 0x670   :  { %v1161_v53 = vld.sshfl [vmem:[#allocation1 + $0x20] sm:$0xff pattern:$0x73625140]  ;;  %v1348_v49 = vmul.f32 0.59460354, %v1261_v52 }
 0x671   :  { %v1168_v56 = vpack.c.bf16 %v1161_v53, %v1160_v46 }
 0x672   :  { %1391 = vst [vmem:[#allocation1 + $0x20] ss:$4 sm:$0xff] %v1348_v49  ;;  %v1356_v15 = vrot.slane %v1348_v49, 2  ;;  %v1357_v18 = vrot.slane %v1348_v49, 4  ;;  %v1358_v13 = vrot.slane %v1348_v49, 6 }
 0x673   :  { %5269 = vmatmul.msk.bf16.vlgmr.msrb.gmra.mxu0 %vm487_vm15, %v1168_v56 }
 0x674   :  { %1772 = vmatpush.bf16.msrb.mxu0 %v5717_v29 }
 0x675   :  { %v1164_v57 = vld.sshfl [vmem:[#allocation1] sm:$0xff pattern:$0x73625140]  ;;  %v1263_v59 = vpop.f32.mrf.mxu2  ;;  %v1298_v61 = vpop.f32.mrf.mxu3 }
 0x676   :  { %1383 = vst [vmem:[#allocation1] ss:$4 sm:$0xff] %v1347_v37  ;;  %v1264_v0 = vadd.f32 %v5775_v50, %v1263_v59  ;;  %v1169_v22 = vpack.c.bf16 %v1164_v57, %v1164_v57  ;;  %v1299_v27 = vadd.f32 %v5776_v3, %v1298_v61 }
 0x677   :  { %1385 = vst [vmem:[#allocation1 + $0x1] ss:$4 sm:$0xff] %v1353_v58 }
 0x678   :  { %1387 = vst [vmem:[#allocation1 + $0x2] ss:$4 sm:$0xff] %v1354_v63  ;;  %v1349_v10 = vmul.f32 0.59460354, %v1264_v0  ;;  %v1360_v26 = vmul.f32 0.59460354, %v1299_v27  ;;  %1773 = vmatpush.bf16.msrb.mxu0 %v5716_v30 }
 0x679   :  { %1389 = vst [vmem:[#allocation1 + $0x3] ss:$4 sm:$0xff] %v1355_v1  ;;  %v6458_v2 = vld.sshfl [vmem:[#allocation1 + $0x20] sm:$0xff pattern:$0x73625140] }
 0x67a   :  { %v1359_v25 = vrot.slane %v1349_v10, 2  ;;  %v1366_v32 = vrot.slane %v1360_v26, 2  ;;  %v1367_v34 = vrot.slane %v1360_v26, 4  ;;  %v1368_v36 = vrot.slane %v1360_v26, 6 }
 0x67b   :  { %v1406_v57 = vpack.c.bf16 %v6458_v2, %v6458_v2 }
 0x67c   :  { %1398 = vst [vmem:[#allocation1 + $0x20] ss:$4 sm:$0xff] %v1359_v25 }
 0x67d   :  { %v1265_v6 = vpop.f32.mrf.mxu2  ;;  %v1300_v7 = vpop.f32.mrf.mxu3  ;;  %v1438_v63 = vunpack.c.l.b16 %v1406_v57 }
 0x67e   :  { %v1301_v12 = vadd.f32 %v5776_v3, %v1300_v7 }
 0x680   :  { %v1392_v17 = vld.sshfl [vmem:[#allocation1] sm:$0xff pattern:$0x73625140]  ;;  %v1361_v23 = vmul.f32 0.59460354, %v1301_v12 }
 0x681   :  { %1394 = vst [vmem:[#allocation1] ss:$4 sm:$0xff] %v1356_v15  ;;  %v1405_v37 = vpack.c.bf16 %v1392_v17, %v1392_v17 }
 0x682   :  { %1395 = vst [vmem:[#allocation1 + $0x1] ss:$4 sm:$0xff] %v1357_v18  ;;  %v1369_v43 = vrot.slane %v1361_v23, 2  ;;  %v1370_v47 = vrot.slane %v1361_v23, 4  ;;  %v1371_v48 = vrot.slane %v1361_v23, 6 }
 0x683   :  { %1396 = vst [vmem:[#allocation1 + $0x2] ss:$4 sm:$0xff] %v1358_v13  ;;  %v1400_v19 = vld.sshfl [vmem:[#allocation1 + $0x20] sm:$0xff pattern:$0x73625140]  ;;  %5270 = vmatmul.msk.bf16.gmra.mxu0 %vm487_vm15, %v1169_v22  ;;  %v1437_v59 = vunpack.c.l.b16 %v1405_v37 }
 0x684   :  { %1397 = vst [vmem:[#allocation1 + $0x3] ss:$4 sm:$0xff] %v1349_v10  ;;  %v1408_v7 = vpack.c.bf16 %v1400_v19, %v1400_v19 }
 0x685   :  { %1417 = vst [vmem:[#allocation1 + $0x20] ss:$4 sm:$0xff] %v1361_v23  ;;  %v1303_v4 = vpop.f32.mrf.mxu3  ;;  %v1439_v1 = vpack.c.b16 %v1438_v63, %v1437_v59  ;;  %v5777_v23 = vld [vmem:[%s7430_s10 + $0x2] ss:$0 sm:$0xff] }
 0x686   :  { %v1304_v40 = vadd.f32 %v5776_v3, %v1303_v4  ;;  %v1468_v12 = vunpack.c.l.b16 %v1408_v7 }
 0x688   :  { %v1362_v28 = vmul.f32 0.59460354, %v1304_v40 }
 0x68a   :  { %v1372_v35 = vrot.slane %v1362_v28, 2 }
 0x68b   :  { %v1399_v55 = vld.sshfl [vmem:[#allocation1] sm:$0xff pattern:$0x73625140] }
 0x68c   :  { %1409 = vst [vmem:[#allocation1] ss:$4 sm:$0xff] %v1360_v26  ;;  %v1419_v38 = vld.sshfl [vmem:[#allocation1 + $0x20] sm:$0xff pattern:$0x73625140]  ;;  %v1407_v3 = vpack.c.bf16 %v1399_v55, %v1399_v55 }
 0x68d   :  { %1411 = vst [vmem:[#allocation1 + $0x1] ss:$4 sm:$0xff] %v1366_v32  ;;  %v1305_v39 = vpop.f32.mrf.mxu3  ;;  %v1432_v50 = vpack.c.bf16 %v1419_v38, %v1419_v38 }
 0x68e   :  { %1413 = vst [vmem:[#allocation1 + $0x2] ss:$4 sm:$0xff] %v1367_v34  ;;  %v1467_v2 = vunpack.c.l.b16 %v1407_v3 }
 0x68f   :  { %1415 = vst [vmem:[#allocation1 + $0x3] ss:$4 sm:$0xff] %v1368_v36  ;;  %v1443_v53 = vunpack.c.l.b16 %v1432_v50 }
 0x690   :  { %1424 = vst [vmem:[#allocation1 + $0x20] ss:$4 sm:$0xff] %v1372_v35  ;;  %v1469_v15 = vpack.c.b16 %v1468_v12, %v1467_v2 }
 0x693   :  { %5316 = vmatmul.msk.bf16.vlgmr.msra.gmra.mxu0 %vm123_vm1, %v6183_v42 }
 0x696   :  { %v1418_v46 = vld.sshfl [vmem:[#allocation1] sm:$0xff pattern:$0x73625140] }
 0x697   :  { %1420 = vst [vmem:[#allocation1] ss:$4 sm:$0xff] %v1369_v43  ;;  %v1431_v51 = vpack.c.bf16 %v1418_v46, %v1418_v46  ;;  %v1426_v56 = vld.sshfl [vmem:[#allocation1 + $0x20] sm:$0xff pattern:$0x73625140] }
 0x698   :  { %1421 = vst [vmem:[#allocation1 + $0x1] ss:$4 sm:$0xff] %v1370_v47  ;;  %v1434_v61 = vpack.c.bf16 %v1426_v56, %v1426_v56 }
 0x699   :  { %1422 = vst [vmem:[#allocation1 + $0x2] ss:$4 sm:$0xff] %v1371_v48  ;;  %v1442_v52 = vunpack.c.l.b16 %v1431_v51 }
 0x69a   :  { %1423 = vst [vmem:[#allocation1 + $0x3] ss:$4 sm:$0xff] %v1362_v28  ;;  %v1473_v21 = vunpack.c.l.b16 %v1434_v61 }
 0x69b   :  { %v1444_v49 = vpack.c.b16 %v1443_v53, %v1442_v52 }
 0x69d   :  { %v1449_v58 = vsel %vm487_vm15, %v1444_v49, 0 }
 0x69e   :  { %1458 = vmatpush.bf16.xpose.msrb.mxu1 %v1449_v58 }
 0x6a1   :  { %v1425_v62 = vld.sshfl [vmem:[#allocation1] sm:$0xff pattern:$0x73625140] }
 0x6a2   :  { %v1433_v0 = vpack.c.bf16 %v1425_v62, %v1425_v62 }
 0x6a3   :  { %5317 = vmatmul.msk.bf16.gmra.mxu0 %vm123_vm1, %v6191_v44 }
 0x6a4   :  { %v1472_v10 = vunpack.c.l.b16 %v1433_v0 }
 0x6a5   :  { %5318 = vmatmul.msk.bf16.vlgmr.msrb.gmra.mxu1 %vm487_vm15, %v1439_v1 }
 0x6a6   :  { %v1474_v25 = vpack.c.b16 %v1473_v21, %v1472_v10 }
 0x6a8   :  { %v1479_v6 = vsel %vm487_vm15, %v1474_v25, 0 }
 0x6a9   :  { %1488 = vmatpush.bf16.xpose.msra.mxu2 %v1479_v6 }
 0x6b0   :  { %5319 = vmatmul.msk.bf16.vlgmr.msra.gmra.mxu2 %vm487_vm15, %v1469_v15 }
 0x6b3   :  { %5353 = vmatmul.msk.bf16.vlgmr.msrb.gmra.mxu0 %vm123_vm1, %v6183_v42 }
 0x6c3   :  { %5354 = vmatmul.msk.bf16.gmra.mxu0 %vm123_vm1, %v6191_v44 }
 0x6f0   :  { %v6484_v17 = vpop.f32.mrf.mxu0 }
 0x6f8   :  { %v6486_v18 = vpop.f32.mrf.mxu0 }
 0x700   :  { %v6488_v13 = vpop.f32.mrf.mxu0 }
 0x708   :  { %v1198_v22 = vpop.f32.mrf.mxu0 }
 0x710   :  { %v1338_v19 = vpop.f32.mrf.mxu0 }
 0x711   :  { %v1339_v27 = vadd.f32 %v5777_v23, %v1338_v19 }
 0x713   :  { %v1376_v4 = vrot.slane %v1339_v27, 2  ;;  %v1377_v40 = vrot.slane %v1339_v27, 4  ;;  %v1378_v26 = vrot.slane %v1339_v27, 6  ;;  %1551 = vst [vmem:[#allocation1] ss:$4 sm:$0xff] %v1339_v27 }
 0x715   :  { %1553 = vst [vmem:[#allocation1 + $0x1] ss:$4 sm:$0xff] %v1376_v4 }
 0x716   :  { %1555 = vst [vmem:[#allocation1 + $0x2] ss:$4 sm:$0xff] %v1377_v40  ;;  %v73_v40 = vld [vmem:[%s7432_s2 + $0x20] sm:$0xff] }
 0x717   :  { %1557 = vst [vmem:[#allocation1 + $0x3] ss:$4 sm:$0xff] %v1378_v26 }
 0x718   :  { %v1340_v28 = vpop.f32.mrf.mxu0 }
 0x719   :  { %v1341_v55 = vadd.f32 %v5777_v23, %v1340_v28  ;;  %v89_v28 = vmul.f32 0.2, %v73_v40 }
 0x71b   :  { %v1379_v32 = vrot.slane %v1341_v55, 2  ;;  %1559 = vst [vmem:[#allocation1 + $0x20] ss:$4 sm:$0xff] %v1341_v55  ;;  %v1380_v34 = vrot.slane %v1341_v55, 4  ;;  %v1381_v35 = vrot.slane %v1341_v55, 6 }
 0x71e   :  { %v1560_v36 = vld.sshfl [vmem:[#allocation1] sm:$0xff pattern:$0x73625140] }
 0x71f   :  { %1562 = vst [vmem:[#allocation1] ss:$4 sm:$0xff] %v1379_v32  ;;  %v1573_v29 = vpack.c.bf16 %v1560_v36, %v1560_v36  ;;  %v6516_v32 = vadd.f32 1.0, %v89_v28 }
 0x720   :  { %1563 = vst [vmem:[#allocation1 + $0x1] ss:$4 sm:$0xff] %v1380_v34  ;;  %v1343_v38 = vpop.f32.mrf.mxu0 }
 0x721   :  { %1564 = vst [vmem:[#allocation1 + $0x2] ss:$4 sm:$0xff] %v1381_v35  ;;  %v1344_v39 = vadd.f32 %v5777_v23, %v1343_v38  ;;  %v1584_v51 = vunpack.c.l.b16 %v1573_v29  ;;  %v74_v35 = vld [vmem:[%s7432_s2 + $0x28] sm:$0x3] }
 0x722   :  { %v1561_v30 = vld.sshfl [vmem:[#allocation1 + $0x20] sm:$0xff pattern:$0x73625140]  ;;  %v1460_v43 = vpop.f32.mrf.mxu1  ;;  %v90_v29 = vmul.f32 0.2, %v74_v35 }
 0x723   :  { %v1495_v50 = vsel %vm6258_vm4, -1e+30, %v1460_v43  ;;  %v1382_v46 = vrot.slane %v1344_v39, 2  ;;  %1565 = vst [vmem:[#allocation1 + $0x3] ss:$4 sm:$0xff] %v1344_v39  ;;  %v1574_v47 = vpack.c.bf16 %v1561_v30, %v1561_v30 }
 0x724   :  { %v1499_v48 = vsel %vm548_vm5, %v1495_v50, -inf  ;;  %v6523_v43 = vadd.f32 1.0, %v90_v29 }
 0x725   :  { %1500 = vmax.xlane.f32.xlu0 %v1499_v48  ;;  %1566 = vst [vmem:[#allocation1 + $0x20] ss:$4 sm:$0xff] %v1382_v46  ;;  %v1585_v52 = vunpack.c.l.b16 %v1574_v47  ;;  %v81_v47 = vld [vmem:[%s7432_s2 + $0x60] sm:$0xff] }
 0x727   :  { %v1586_v53 = vpack.c.b16 %v1585_v52, %v1584_v51 }
 0x728   :  { %v1345_v49 = vpop.f32.mrf.mxu0 }
 0x729   :  { %v1591_v37 = vsel %vm641_vm2, %v1586_v53, 0  ;;  %v97_v53 = vmul.f32 0.2, %v81_v47 }
 0x72a   :  { %v1567_v56 = vld.sshfl [vmem:[#allocation1] sm:$0xff pattern:$0x73625140]  ;;  %v1462_v58 = vpop.f32.mrf.mxu1  ;;  %1600 = vmatpush.bf16.msrb.mxu3 %v1591_v37 }
 0x72b   :  { %v1496_v57 = vsel %vm6258_vm4, -1e+30, %v1462_v58  ;;  %v1575_v59 = vpack.c.bf16 %v1567_v56, %v1567_v56  ;;  %v6530_v56 = vadd.f32 1.0, %v97_v53 }
 0x72c   :  { %v1568_v61 = vld.sshfl [vmem:[#allocation1 + $0x20] sm:$0xff pattern:$0x73625140]  ;;  %v1502_v62 = vsel %vm552_vm7, %v1496_v57, -inf }
 0x72d   :  { %1503 = vmax.xlane.f32.xlu1 %v1502_v62  ;;  %v1576_v63 = vpack.c.bf16 %v1568_v61, %v1568_v61  ;;  %v1614_v0 = vunpack.c.l.b16 %v1575_v59 }
 0x72f   :  { %v1615_v1 = vunpack.c.l.b16 %v1576_v63 }
 0x730   :  { %v6500_v10 = vpop.f32.mrf.mxu0 }
 0x731   :  { %v1616_v21 = vpack.c.b16 %v1615_v1, %v1614_v0 }
 0x733   :  { %v1490_v25 = vpop.f32.mrf.mxu2  ;;  %v1621_v3 = vsel %vm641_vm2, %v1616_v21, 0 }
 0x734   :  { %v1497_v6 = vsel %vm6268_vm8, -1e+30, %v1490_v25  ;;  %1630 = vmatpush.bf16.msra.mxu1 %v1621_v3 }
 0x735   :  { %v1505_v7 = vsel %vm548_vm5, %v1497_v6, -inf }
 0x736   :  { %1506 = vmax.xlane.f32.xlu2 %v1505_v7  ;;  %v5715_v7 = vld [vmem:[%s7426_s5 + $0x38] sm:$0xff] }
 0x737   :  { %1732 = vmatpush.bf16.msra.mxu3 %v5715_v7 }
 0x738   :  { %v6506_v2 = vpop.f32.mrf.mxu0 }
 0x73b   :  { %v1492_v12 = vpop.f32.mrf.mxu2 }
 0x73c   :  { %v1498_v15 = vsel %vm6268_vm8, -1e+30, %v1492_v12  ;;  %v5714_v12 = vld [vmem:[%s7426_s5 + $0x30] sm:$0xff] }
 0x73d   :  { %v1508_v22 = vsel %vm552_vm7, %v1498_v15, -inf  ;;  %1733 = vmatpush.bf16.msra.mxu3 %v5714_v12 }
 0x73e   :  { %1509 = vmax.xlane.f32.xlu0 %v1508_v22 }
 0x740   :  { %v6511_v23 = vpop.f32.mrf.mxu0 }
 0x748   :  { %v1782_v19 = vpop.f32.mrf.mxu0 }
 0x749   :  { %v5719_v19 = vld [vmem:[%s7428_s9 + $0x38] sm:$0xff] }
 0x74a   :  { %1812 = vmatpush.bf16.msrb.mxu1 %v5719_v19 }
 0x798   :  { %v1501_v27 = vpop.xlane.xlu0 %1500 }
 0x799   :  { %v1511_v4 = vsub.f32 %v1495_v50, %v1501_v27  ;;  %v5718_v27 = vld [vmem:[%s7428_s9 + $0x30] sm:$0xff] }
 0x79a   :  { %1813 = vmatpush.bf16.msrb.mxu1 %v5718_v27 }
 0x79b   :  { %v1515_v26 = vmul.f32 1.442695, %v1511_v4 }
 0x79d   :  { %5847 = vpow2.f32 %v1515_v26 }
 0x7a0   :  { %v1504_v55 = vpop.xlane.xlu1 %1503 }
 0x7a1   :  { %v1512_v34 = vsub.f32 %v1496_v57, %v1504_v55  ;;  %v82_v57 = vld [vmem:[%s7432_s2 + $0x68] sm:$0x3] }
 0x7a2   :  { %v98_v63 = vmul.f32 0.2, %v82_v57 }
 0x7a3   :  { %v5848_v36 = vpop.eup %5847  ;;  %v1517_v38 = vmul.f32 1.442695, %v1512_v34 }
 0x7a4   :  { %v1523_v39 = vmul.f32 %v5848_v36, %v6516_v32  ;;  %v6537_v1 = vadd.f32 1.0, %v98_v63 }
 0x7a5   :  { %5849 = vpow2.f32 %v1517_v38 }
 0x7a6   :  { %v1527_v30 = vsel %vm548_vm5, %v1523_v39, 0.0 }
 0x7a7   :  { %1528 = vadd.xlane.f32.xlu1 %v1527_v30 }
 0x7a9   :  { %v1507_v50 = vpop.xlane.xlu2 %1506 }
 0x7aa   :  { %v1513_v46 = vsub.f32 %v1497_v6, %v1507_v50 }
 0x7ab   :  { %v5850_v48 = vpop.eup %5849 }
 0x7ac   :  { %v1519_v51 = vmul.f32 1.442695, %v1513_v46  ;;  %v1524_v52 = vmul.f32 %v5850_v48, %v6523_v43 }
 0x7ae   :  { %5851 = vpow2.f32 %v1519_v51  ;;  %v1530_v49 = vsel %vm552_vm7, %v1524_v52, 0.0 }
 0x7af   :  { %1531 = vadd.xlane.f32.xlu2 %v1530_v49 }
 0x7b1   :  { %v1510_v37 = vpop.xlane.xlu0 %1509 }
 0x7b2   :  { %v1514_v58 = vsub.f32 %v1498_v15, %v1510_v37 }
 0x7b4   :  { %v5852_v59 = vpop.eup %5851  ;;  %v1521_v61 = vmul.f32 1.442695, %v1514_v58 }
 0x7b5   :  { %v1525_v62 = vmul.f32 %v5852_v59, %v6530_v56 }
 0x7b6   :  { %5853 = vpow2.f32 %v1521_v61 }
 0x7b7   :  { %v1533_v0 = vsel %vm548_vm5, %v1525_v62, 0.0 }
 0x7b8   :  { %1534 = vadd.xlane.f32.xlu0 %v1533_v0 }
 0x7bc   :  { %v5854_v21 = vpop.eup %5853 }
 0x7bd   :  { %v1526_v25 = vmul.f32 %v5854_v21, %v6537_v1 }
 0x7bf   :  { %v1536_v3 = vsel %vm552_vm7, %v1526_v25, 0.0 }
 0x7c0   :  { %1537 = vadd.xlane.f32.xlu1 %v1536_v3 }
 0x81a   :  { %v1529_v6 = vpop.xlane.xlu1 %1528 }
 0x81b   :  { %5855 = vrcp.f32 %v1529_v6 }
 0x821   :  { %v5856_v22 = vpop.eup %5855 }
 0x822   :  { %v1532_v15 = vpop.xlane.xlu2 %1531  ;;  %v1543_v4 = vmul.f32 %v5856_v22, %v1523_v39 }
 0x823   :  { %5857 = vrcp.f32 %v1532_v15 }
 0x824   :  { %v1547_v26 = vpack.c.bf16 %v1543_v4, %v1543_v4 }
 0x826   :  { %v1579_v35 = vunpack.c.l.b16 %v1547_v26 }
 0x829   :  { %v5858_v40 = vpop.eup %5857 }
 0x82a   :  { %v1544_v28 = vmul.f32 %v5858_v40, %v1524_v52  ;;  %v5322_v52 = vld [vmem:[%s7433_s11 + $0x8] sm:$0xf] }
 0x82b   :  { %v1535_v55 = vpop.xlane.xlu0 %1534  ;;  %v1681_v37 = vsel %vm1178_vm9, %v5322_v52, 0 }
 0x82c   :  { %v1548_v34 = vpack.c.bf16 %v1544_v28, %v1544_v28  ;;  %5859 = vrcp.f32 %v1535_v55  ;;  %1690 = vmatpush.bf16.msrb.mxu2 %v1681_v37 }
 0x82e   :  { %v1580_v36 = vunpack.c.l.b16 %v1548_v34 }
 0x830   :  { %v1581_v38 = vpack.c.b16 %v1580_v36, %v1579_v35 }
 0x832   :  { %5320 = vmatmul.msk.bf16.vlgmr.msrb.gmra.mxu3 %vm548_vm5, %v1581_v38  ;;  %v5860_v30 = vpop.eup %5859 }
 0x833   :  { %v1538_v29 = vpop.xlane.xlu1 %1537  ;;  %v1545_v50 = vmul.f32 %v5860_v30, %v1525_v62  ;;  %v5778_v30 = vld [vmem:[%s7429_s8 + $0x3] ss:$0 sm:$0xff] }
 0x834   :  { %5861 = vrcp.f32 %v1538_v29 }
 0x835   :  { %v1549_v47 = vpack.c.bf16 %v1545_v50, %v1545_v50 }
 0x837   :  { %v1609_v51 = vunpack.c.l.b16 %v1549_v47 }
 0x83a   :  { %v5862_v46 = vpop.eup %5861 }
 0x83b   :  { %v1546_v48 = vmul.f32 %v5862_v46, %v1526_v25  ;;  %v5779_v25 = vld [vmem:[%s7453_s22 + $0x3] ss:$0 sm:$0xff] }
 0x83d   :  { %v1550_v39 = vpack.c.bf16 %v1546_v48, %v1546_v48 }
 0x83f   :  { %v1610_v53 = vunpack.c.l.b16 %v1550_v39 }
 0x841   :  { %v1611_v49 = vpack.c.b16 %v1610_v53, %v1609_v51 }
 0x842   :  { %5338 = vmatmul.msk.bf16.vlgmr.msra.gmra.mxu3 %vm123_vm1, %v6183_v42 }
 0x843   :  { %5321 = vmatmul.msk.bf16.vlgmr.msra.gmra.mxu1 %vm548_vm5, %v1611_v49  ;;  %v1776_v49 = vadd.f32 %v5778_v30, %v6500_v10 }
 0x852   :  { %5339 = vmatmul.msk.bf16.gmra.mxu3 %vm123_vm1, %v6191_v44 }
 0x853   :  { %5368 = vmatmul.msk.bf16.vlgmr.msrb.gmra.mxu1 %vm123_vm1, %v6183_v42 }
 0x863   :  { %5369 = vmatmul.msk.bf16.gmra.mxu1 %vm123_vm1, %v6191_v44 }
 0x8b5   :  { %v1602_v58 = vpop.f32.mrf.mxu3 }
 0x8b6   :  { %v1641_v57 = vrot.slane %v1602_v58, 2  ;;  %v1642_v59 = vrot.slane %v1602_v58, 4  ;;  %v1643_v61 = vrot.slane %v1602_v58, 6  ;;  %1647 = vst [vmem:[#allocation1] ss:$4 sm:$0xff] %v1602_v58 }
 0x8b7   :  { %v1837_v58 = vmul.f32 0.59460354, %v1776_v49 }
 0x8b8   :  { %1649 = vst [vmem:[#allocation1 + $0x1] ss:$4 sm:$0xff] %v1641_v57  ;;  %v1778_v57 = vadd.f32 %v5778_v30, %v6506_v2 }
 0x8b9   :  { %1651 = vst [vmem:[#allocation1 + $0x2] ss:$4 sm:$0xff] %v1642_v59  ;;  %v1843_v59 = vrot.slane %v1837_v58, 2 }
 0x8ba   :  { %1653 = vst [vmem:[#allocation1 + $0x3] ss:$4 sm:$0xff] %v1643_v61 }
 0x8bd   :  { %v1604_v62 = vpop.f32.mrf.mxu3 }
 0x8be   :  { %1655 = vst [vmem:[#allocation1 + $0x20] ss:$4 sm:$0xff] %v1604_v62  ;;  %v1844_v62 = vrot.slane %v1837_v58, 4 }
 0x8c0   :  { %v1632_v42 = vpop.f32.mrf.mxu1 }
 0x8c1   :  { %v1644_v63 = vrot.slane %v1632_v42, 2  ;;  %v1645_v44 = vrot.slane %v1632_v42, 4  ;;  %v1646_v0 = vrot.slane %v1632_v42, 6  ;;  %v1662_v21 = vld.sshfl [vmem:[#allocation1] sm:$0xff pattern:$0x73625140] }
 0x8c2   :  { %1657 = vst [vmem:[#allocation1 + $0x21] ss:$4 sm:$0xff] %v1632_v42  ;;  %v1845_v42 = vrot.slane %v1837_v58, 6 }
 0x8c3   :  { %1659 = vst [vmem:[#allocation1 + $0x22] ss:$4 sm:$0xff] %v1644_v63 }
 0x8c4   :  { %1661 = vst [vmem:[#allocation1 + $0x23] ss:$4 sm:$0xff] %v1645_v44  ;;  %v1838_v44 = vmul.f32 0.59460354, %v1778_v57 }
 0x8c5   :  { %1664 = vst [vmem:[#allocation1] ss:$4 sm:$0xff] %v1646_v0  ;;  %v1735_v3 = vpop.f32.mrf.mxu3  ;;  %v1781_v0 = vadd.f32 %v5778_v30, %v6511_v23 }
 0x8c6   :  { %v1736_v7 = vadd.f32 %v5779_v25, %v1735_v3  ;;  %v1847_v3 = vrot.slane %v1838_v44, 4  ;;  %v1848_v2 = vrot.slane %v1838_v44, 6 }
 0x8c8   :  { %v1634_v6 = vpop.f32.mrf.mxu1  ;;  %v1824_v15 = vmul.f32 0.59460354, %v1736_v7 }
 0x8c9   :  { %1665 = vst [vmem:[#allocation1 + $0x1] ss:$4 sm:$0xff] %v1634_v6 }
 0x8ca   :  { %v1830_v40 = vrot.slane %v1824_v15, 2  ;;  %v1831_v28 = vrot.slane %v1824_v15, 4  ;;  %v1832_v34 = vrot.slane %v1824_v15, 6 }
 0x8cb   :  { %v1663_v12 = vld.sshfl [vmem:[#allocation1 + $0x20] sm:$0xff pattern:$0x73625140] }
 0x8cc   :  { %v1670_v22 = vpack.c.bf16 %v1663_v12, %v1662_v21  ;;  %v1846_v21 = vrot.slane %v1838_v44, 2 }
 0x8cd   :  { %v1737_v19 = vpop.f32.mrf.mxu3 }
 0x8ce   :  { %5323 = vmatmul.msk.bf16.vlgmr.msrb.gmra.mxu2 %vm487_vm15, %v1670_v22  ;;  %v1738_v27 = vadd.f32 %v5779_v25, %v1737_v19  ;;  %v5780_v19 = vld [vmem:[%s7430_s10 + $0x3] ss:$0 sm:$0xff] }
 0x8d0   :  { %v1666_v4 = vld.sshfl [vmem:[#allocation1] sm:$0xff pattern:$0x73625140]  ;;  %v6571_v26 = vpop.f32.mrf.mxu1  ;;  %v1825_v55 = vmul.f32 0.59460354, %v1738_v27 }
 0x8d1   :  { %1860 = vst [vmem:[#allocation1] ss:$4 sm:$0xff] %v1824_v15  ;;  %v1671_v51 = vpack.c.bf16 %v1666_v4, %v1666_v4 }
 0x8d2   :  { %1862 = vst [vmem:[#allocation1 + $0x1] ss:$4 sm:$0xff] %v1830_v40  ;;  %v1833_v50 = vrot.slane %v1825_v55, 2  ;;  %v1834_v47 = vrot.slane %v1825_v55, 4  ;;  %v1835_v48 = vrot.slane %v1825_v55, 6 }
 0x8d3   :  { %1864 = vst [vmem:[#allocation1 + $0x2] ss:$4 sm:$0xff] %v1831_v28  ;;  %v1816_v28 = vadd.f32 %v5780_v19, %v6571_v26 }
 0x8d4   :  { %1866 = vst [vmem:[#allocation1 + $0x3] ss:$4 sm:$0xff] %v1832_v34 }
 0x8d5   :  { %1868 = vst [vmem:[#allocation1 + $0x20] ss:$4 sm:$0xff] %v1825_v55  ;;  %v1740_v35 = vpop.f32.mrf.mxu3  ;;  %v1854_v30 = vrot.slane %v1816_v28, 4 }
 0x8d6   :  { %v1741_v36 = vadd.f32 %v5779_v25, %v1740_v35  ;;  %v1839_v25 = vmul.f32 0.59460354, %v1781_v0 }
 0x8d8   :  { %v1826_v38 = vmul.f32 0.59460354, %v1741_v36  ;;  %v6573_v29 = vpop.f32.mrf.mxu1  ;;  %v1849_v22 = vrot.slane %v1839_v25, 2  ;;  %v1853_v36 = vrot.slane %v1816_v28, 2 }
 0x8da   :  { %v1836_v39 = vrot.slane %v1826_v38, 2 }
 0x8db   :  { %v1869_v46 = vld.sshfl [vmem:[#allocation1] sm:$0xff pattern:$0x73625140] }
 0x8dc   :  { %1871 = vst [vmem:[#allocation1] ss:$4 sm:$0xff] %v1833_v50  ;;  %v1870_v52 = vld.sshfl [vmem:[#allocation1 + $0x20] sm:$0xff pattern:$0x73625140]  ;;  %v1882_v34 = vpack.c.bf16 %v1869_v46, %v1869_v46 }
 0x8dd   :  { %1872 = vst [vmem:[#allocation1 + $0x1] ss:$4 sm:$0xff] %v1834_v47  ;;  %v1742_v53 = vpop.f32.mrf.mxu3  ;;  %v1883_v40 = vpack.c.bf16 %v1870_v52, %v1870_v52 }
 0x8de   :  { %1873 = vst [vmem:[#allocation1 + $0x2] ss:$4 sm:$0xff] %v1835_v48  ;;  %5324 = vmatmul.msk.bf16.gmra.mxu2 %vm487_vm15, %v1671_v51  ;;  %v1914_v47 = vunpack.c.l.b16 %v1882_v34  ;;  %v1818_v53 = vadd.f32 %v5780_v19, %v6573_v29 }
 0x8df   :  { %1874 = vst [vmem:[#allocation1 + $0x3] ss:$4 sm:$0xff] %v1826_v38  ;;  %v1915_v35 = vunpack.c.l.b16 %v1883_v40 }
 0x8e0   :  { %1875 = vst [vmem:[#allocation1 + $0x20] ss:$4 sm:$0xff] %v1836_v39  ;;  %v6580_v37 = vpop.f32.mrf.mxu1  ;;  %v1855_v39 = vrot.slane %v1816_v28, 6  ;;  %v1857_v29 = vrot.slane %v1818_v53, 4  ;;  %v1858_v0 = vrot.slane %v1818_v53, 6 }
 0x8e1   :  { %v1916_v49 = vpack.c.b16 %v1915_v35, %v1914_v47 }
 0x8e6   :  { %v6583_v61 = vld.sshfl [vmem:[#allocation1] sm:$0xff pattern:$0x73625140] }
 0x8e7   :  { %1886 = vst [vmem:[#allocation1] ss:$4 sm:$0xff] %v1837_v58  ;;  %v1877_v63 = vld.sshfl [vmem:[#allocation1 + $0x20] sm:$0xff pattern:$0x73625140] }
 0x8e8   :  { %1888 = vst [vmem:[#allocation1 + $0x1] ss:$4 sm:$0xff] %v1843_v59  ;;  %v1822_v10 = vpop.f32.mrf.mxu1  ;;  %v1885_v58 = vpack.c.bf16 %v1877_v63, %v1877_v63  ;;  %v1884_v59 = vpack.c.bf16 %v6583_v61, %v6583_v61 }
 0x8e9   :  { %1890 = vst [vmem:[#allocation1 + $0x2] ss:$4 sm:$0xff] %v1844_v62  ;;  %v1856_v62 = vrot.slane %v1818_v53, 2 }
 0x8ea   :  { %1892 = vst [vmem:[#allocation1 + $0x3] ss:$4 sm:$0xff] %v1845_v42  ;;  %v1821_v42 = vadd.f32 %v5780_v19, %v6580_v37  ;;  %v1945_v10 = vunpack.c.l.b16 %v1885_v58 }
 0x8eb   :  { %1894 = vst [vmem:[#allocation1 + $0x20] ss:$4 sm:$0xff] %v1838_v44 }
 0x8ec   :  { %v1859_v63 = vrot.slane %v1821_v42, 2 }
 0x8f1   :  { %v1895_v6 = vld.sshfl [vmem:[#allocation1] sm:$0xff pattern:$0x73625140] }
 0x8f2   :  { %v1896_v7 = vld.sshfl [vmem:[#allocation1 + $0x20] sm:$0xff pattern:$0x73625140]  ;;  %1897 = vst [vmem:[#allocation1] ss:$4 sm:$0xff] %v1846_v21  ;;  %v1908_v12 = vpack.c.bf16 %v1895_v6, %v1895_v6 }
 0x8f3   :  { %1898 = vst [vmem:[#allocation1 + $0x1] ss:$4 sm:$0xff] %v1847_v3  ;;  %v1909_v15 = vpack.c.bf16 %v1896_v7, %v1896_v7 }
 0x8f4   :  { %1899 = vst [vmem:[#allocation1 + $0x2] ss:$4 sm:$0xff] %v1848_v2  ;;  %v1919_v27 = vunpack.c.l.b16 %v1908_v12 }
 0x8f5   :  { %1900 = vst [vmem:[#allocation1 + $0x3] ss:$4 sm:$0xff] %v1839_v25  ;;  %v1920_v4 = vunpack.c.l.b16 %v1909_v15  ;;  %v1944_v25 = vunpack.c.l.b16 %v1884_v59  ;;  %v75_v59 = vld [vmem:[%s7432_s2 + $0x30] sm:$0xff] }
 0x8f6   :  { %1901 = vst [vmem:[#allocation1 + $0x20] ss:$4 sm:$0xff] %v1849_v22 }
 0x8f7   :  { %v1921_v23 = vpack.c.b16 %v1920_v4, %v1919_v27  ;;  %v1946_v2 = vpack.c.b16 %v1945_v10, %v1944_v25 }
 0x8f9   :  { %v1926_v55 = vsel %vm487_vm15, %v1921_v23, 0 }
 0x8fa   :  { %1935 = vmatpush.bf16.xpose.msra.mxu2 %v1926_v55  ;;  %v1219_v55 = vadd.f32 %v6388_v8, %v6484_v17 }
 0x8fc   :  { %v1902_v38 = vld.sshfl [vmem:[#allocation1] sm:$0xff pattern:$0x73625140] }
 0x8fd   :  { %2028 = vst [vmem:[#allocation1] ss:$4 sm:$0xff] %v1816_v28  ;;  %v1903_v50 = vld.sshfl [vmem:[#allocation1 + $0x20] sm:$0xff pattern:$0x73625140]  ;;  %v1910_v48 = vpack.c.bf16 %v1902_v38, %v1902_v38  ;;  %v1224_v38 = vadd.f32 %v6392_v11, %v6488_v13 }
 0x8fe   :  { %2030 = vst [vmem:[#allocation1 + $0x1] ss:$4 sm:$0xff] %v1853_v36  ;;  %v1911_v51 = vpack.c.bf16 %v1903_v50, %v1903_v50 }
 0x8ff   :  { %2032 = vst [vmem:[#allocation1 + $0x2] ss:$4 sm:$0xff] %v1854_v30  ;;  %v1949_v26 = vunpack.c.l.b16 %v1910_v48 }
 0x900   :  { %2034 = vst [vmem:[#allocation1 + $0x3] ss:$4 sm:$0xff] %v1855_v39  ;;  %v1950_v52 = vunpack.c.l.b16 %v1911_v51 }
 0x901   :  { %2036 = vst [vmem:[#allocation1 + $0x20] ss:$4 sm:$0xff] %v1818_v53  ;;  %5370 = vmatmul.msk.bf16.vlgmr.msra.gmra.mxu2 %vm487_vm15, %v1916_v49 }
 0x902   :  { %v1951_v46 = vpack.c.b16 %v1950_v52, %v1949_v26 }
 0x904   :  { %v1956_v57 = vsel %vm487_vm15, %v1951_v46, 0 }
 0x905   :  { %1965 = vmatpush.bf16.xpose.msrb.mxu3 %v1956_v57 }
 0x907   :  { %v2037_v44 = vld.sshfl [vmem:[#allocation1] sm:$0xff pattern:$0x73625140] }
 0x908   :  { %v2038_v21 = vld.sshfl [vmem:[#allocation1 + $0x20] sm:$0xff pattern:$0x73625140]  ;;  %2039 = vst [vmem:[#allocation1] ss:$4 sm:$0xff] %v1856_v62  ;;  %v2050_v3 = vpack.c.bf16 %v2037_v44, %v2037_v44 }
 0x909   :  { %2040 = vst [vmem:[#allocation1 + $0x1] ss:$4 sm:$0xff] %v1857_v29  ;;  %v2051_v6 = vpack.c.bf16 %v2038_v21, %v2038_v21 }
 0x90a   :  { %2041 = vst [vmem:[#allocation1 + $0x2] ss:$4 sm:$0xff] %v1858_v0  ;;  %v2061_v7 = vunpack.c.l.b16 %v2050_v3  ;;  %v76_v0 = vld [vmem:[%s7432_s2 + $0x38] sm:$0x3] }
 0x90b   :  { %2042 = vst [vmem:[#allocation1 + $0x3] ss:$4 sm:$0xff] %v1821_v42  ;;  %v2062_v61 = vunpack.c.l.b16 %v2051_v6  ;;  %v91_v42 = vmul.f32 0.2, %v75_v59 }
 0x90c   :  { %2043 = vst [vmem:[#allocation1 + $0x20] ss:$4 sm:$0xff] %v1859_v63  ;;  %5371 = vmatmul.msk.bf16.vlgmr.msrb.gmra.mxu3 %vm487_vm15, %v1946_v2  ;;  %v83_v2 = vld [vmem:[%s7432_s2 + $0x70] sm:$0xff] }
 0x90d   :  { %v2063_v37 = vpack.c.b16 %v2062_v61, %v2061_v7  ;;  %v6625_v29 = vadd.f32 1.0, %v91_v42  ;;  %v92_v7 = vmul.f32 0.2, %v76_v0 }
 0x90f   :  { %v2068_v12 = vsel %vm641_vm2, %v2063_v37, 0 }
 0x910   :  { %2077 = vmatpush.bf16.msra.mxu0 %v2068_v12  ;;  %v99_v12 = vmul.f32 0.2, %v83_v2 }
 0x912   :  { %v2044_v15 = vld.sshfl [vmem:[#allocation1] sm:$0xff pattern:$0x73625140] }
 0x913   :  { %v2045_v22 = vld.sshfl [vmem:[#allocation1 + $0x20] sm:$0xff pattern:$0x73625140]  ;;  %v2052_v19 = vpack.c.bf16 %v2044_v15, %v2044_v15  ;;  %v6635_v15 = vadd.f32 1.0, %v92_v7  ;;  %v5374_v7 = vld [vmem:[%s7433_s11 + $0xc] sm:$0xf] }
 0x914   :  { %v2053_v27 = vpack.c.bf16 %v2045_v22, %v2045_v22 }
 0x915   :  { %v2091_v4 = vunpack.c.l.b16 %v2052_v19 }
 0x916   :  { %v2092_v23 = vunpack.c.l.b16 %v2053_v27  ;;  %v6637_v27 = vadd.f32 1.0, %v99_v12 }
 0x918   :  { %v2093_v40 = vpack.c.b16 %v2092_v23, %v2091_v4 }
 0x91a   :  { %v2098_v28 = vsel %vm641_vm2, %v2093_v40, 0  ;;  %v84_v40 = vld [vmem:[%s7432_s2 + $0x78] sm:$0x3] }
 0x91b   :  { %2107 = vmatpush.bf16.msra.mxu1 %v2098_v28 }
 0x951   :  { %v1692_v34 = vpop.f32.mrf.mxu2 }
 0x952   :  { %v6602_v35 = vadd.f32 %v1692_v34, %v1219_v55 }
 0x959   :  { %v6604_v36 = vpop.f32.mrf.mxu2 }
 0x961   :  { %v1697_v30 = vpop.f32.mrf.mxu2 }
 0x962   :  { %v6608_v50 = vadd.f32 %v1697_v30, %v1224_v38  ;;  %v100_v30 = vmul.f32 0.2, %v84_v40 }
 0x969   :  { %v1699_v47 = vpop.f32.mrf.mxu2 }
 0x984   :  { %v1937_v48 = vpop.f32.mrf.mxu2 }
 0x985   :  { %v1972_v39 = vsel %vm6258_vm4, -1e+30, %v1937_v48  ;;  %v6646_v48 = vadd.f32 1.0, %v100_v30 }
 0x986   :  { %v1976_v51 = vsel %vm548_vm5, %v1972_v39, -inf }
 0x987   :  { %1977 = vmax.xlane.f32.xlu2 %v1976_v51 }
 0x98c   :  { %v1939_v8 = vpop.f32.mrf.mxu2 }
 0x98d   :  { %v1973_v17 = vsel %vm6258_vm4, -1e+30, %v1939_v8 }
 0x98e   :  { %v1979_v53 = vsel %vm552_vm7, %v1973_v17, -inf }
 0x98f   :  { %v1967_v49 = vpop.f32.mrf.mxu3  ;;  %1980 = vmax.xlane.f32.xlu0 %v1979_v53 }
 0x990   :  { %v1974_v11 = vsel %vm6268_vm8, -1e+30, %v1967_v49 }
 0x991   :  { %v1982_v13 = vsel %vm548_vm5, %v1974_v11, -inf }
 0x992   :  { %1983 = vmax.xlane.f32.xlu1 %v1982_v13 }
 0x997   :  { %v1969_v26 = vpop.f32.mrf.mxu3 }
 0x998   :  { %v1975_v52 = vsel %vm6268_vm8, -1e+30, %v1969_v26 }
 0x999   :  { %v1985_v46 = vsel %vm552_vm7, %v1975_v52, -inf }
 0x99a   :  { %1986 = vmax.xlane.f32.xlu2 %v1985_v46 }
 0x9fa   :  { %v1978_v58 = vpop.xlane.xlu2 %1977 }
 0x9fb   :  { %v1988_v57 = vsub.f32 %v1972_v39, %v1978_v58 }
 0x9fd   :  { %v1992_v62 = vmul.f32 1.442695, %v1988_v57 }
 0x9ff   :  { %5863 = vpow2.f32 %v1992_v62 }
 0xa02   :  { %v1981_v10 = vpop.xlane.xlu0 %1980 }
 0xa03   :  { %v1989_v44 = vsub.f32 %v1973_v17, %v1981_v10 }
 0xa05   :  { %v5864_v21 = vpop.eup %5863  ;;  %v1984_v25 = vpop.xlane.xlu1 %1983  ;;  %v1994_v3 = vmul.f32 1.442695, %v1989_v44 }
 0xa06   :  { %v1990_v6 = vsub.f32 %v1974_v11, %v1984_v25  ;;  %v2000_v63 = vmul.f32 %v5864_v21, %v6625_v29 }
 0xa07   :  { %5865 = vpow2.f32 %v1994_v3 }
 0xa08   :  { %v1996_v61 = vmul.f32 1.442695, %v1990_v6  ;;  %v2004_v37 = vsel %vm548_vm5, %v2000_v63, 0.0 }
 0xa09   :  { %2005 = vadd.xlane.f32.xlu0 %v2004_v37 }
 0xa0a   :  { %5867 = vpow2.f32 %v1996_v61  ;;  %v2158_v61 = vsel %vm1178_vm9, %v5374_v7, 0 }
 0xa0b   :  { %2167 = vmatpush.bf16.msrb.mxu2 %v2158_v61  ;;  %v5993_v61 = vld [vmem:[%s7450_s20 + $0x10] sm:$0xff] }
 0xa0d   :  { %v5866_v22 = vpop.eup %5865  ;;  %v1987_v19 = vpop.xlane.xlu2 %1986 }
 0xa0e   :  { %v1991_v4 = vsub.f32 %v1975_v52, %v1987_v19  ;;  %v2001_v23 = vmul.f32 %v5866_v22, %v6635_v15 }
 0xa10   :  { %v5868_v28 = vpop.eup %5867  ;;  %v1998_v55 = vmul.f32 1.442695, %v1991_v4  ;;  %v2007_v34 = vsel %vm552_vm7, %v2001_v23, 0.0 }
 0xa11   :  { %v2002_v38 = vmul.f32 %v5868_v28, %v6637_v27  ;;  %2008 = vadd.xlane.f32.xlu1 %v2007_v34 }
 0xa12   :  { %5869 = vpow2.f32 %v1998_v55 }
 0xa13   :  { %v2010_v47 = vsel %vm548_vm5, %v2002_v38, 0.0 }
 0xa14   :  { %2011 = vadd.xlane.f32.xlu2 %v2010_v47 }
 0xa18   :  { %v5870_v39 = vpop.eup %5869 }
 0xa19   :  { %v2003_v51 = vmul.f32 %v5870_v39, %v6646_v48 }
 0xa1b   :  { %v2013_v8 = vsel %vm552_vm7, %v2003_v51, 0.0 }
 0xa1c   :  { %2014 = vadd.xlane.f32.xlu0 %v2013_v8  ;;  %v5781_v8 = vld [vmem:[%s7434_s12] ss:$0 sm:$0xff] }
 0xa7c   :  { %v2006_v17 = vpop.xlane.xlu0 %2005 }
 0xa7d   :  { %5871 = vrcp.f32 %v2006_v17 }
 0xa83   :  { %v5872_v49 = vpop.eup %5871 }
 0xa84   :  { %v2009_v53 = vpop.xlane.xlu1 %2008  ;;  %v2020_v13 = vmul.f32 %v5872_v49, %v2000_v63 }
 0xa85   :  { %5873 = vrcp.f32 %v2009_v53 }
 0xa86   :  { %v2024_v52 = vpack.c.bf16 %v2020_v13, %v2020_v13 }
 0xa87   :  { %v2012_v11 = vpop.xlane.xlu2 %2011 }
 0xa88   :  { %5875 = vrcp.f32 %v2012_v11  ;;  %v2056_v62 = vunpack.c.l.b16 %v2024_v52  ;;  %v1221_v11 = vadd.f32 %v6390_v9, %v6486_v18  ;;  %v5991_v9 = vld [vmem:[%s7450_s20] sm:$0xff] }
 0xa8b   :  { %v5874_v26 = vpop.eup %5873 }
 0xa8c   :  { %v2021_v46 = vmul.f32 %v5874_v26, %v2001_v23 }
 0xa8e   :  { %v2025_v58 = vpack.c.bf16 %v2021_v46, %v2021_v46  ;;  %v5876_v59 = vpop.eup %5875  ;;  %v1702_v46 = vadd.f32 %v6604_v36, %v1221_v11 }
 0xa8f   :  { %v2015_v57 = vpop.xlane.xlu0 %2014  ;;  %v2022_v44 = vmul.f32 %v5876_v59, %v2002_v38 }
 0xa90   :  { %v2057_v42 = vunpack.c.l.b16 %v2025_v58  ;;  %5877 = vrcp.f32 %v2015_v57 }
 0xa91   :  { %v2026_v21 = vpack.c.bf16 %v2022_v44, %v2022_v44 }
 0xa92   :  { %v2058_v10 = vpack.c.b16 %v2057_v42, %v2056_v62 }
 0xa93   :  { %v2086_v6 = vunpack.c.l.b16 %v2026_v21 }
 0xa94   :  { %5372 = vmatmul.msk.bf16.vlgmr.msra.gmra.mxu0 %vm548_vm5, %v2058_v10 }
 0xa96   :  { %v5878_v0 = vpop.eup %5877 }
 0xa97   :  { %v2023_v25 = vmul.f32 %v5878_v0, %v2003_v51 }
 0xa99   :  { %v2027_v3 = vpack.c.bf16 %v2023_v25, %v2023_v25 }
 0xa9b   :  { %v2087_v63 = vunpack.c.l.b16 %v2027_v3  ;;  %v5992_v3 = vld [vmem:[%s7450_s20 + $0x8] sm:$0x3] }
 0xa9d   :  { %v2088_v2 = vpack.c.b16 %v2087_v63, %v2086_v6 }
 0xa9f   :  { %5373 = vmatmul.msk.bf16.vlgmr.msra.gmra.mxu1 %vm548_vm5, %v2088_v2 }
 0xb11   :  { %v2079_v37 = vpop.f32.mrf.mxu0 }
 0xb12   :  { %v2118_v12 = vrot.slane %v2079_v37, 2  ;;  %v2119_v22 = vrot.slane %v2079_v37, 4  ;;  %v2120_v19 = vrot.slane %v2079_v37, 6  ;;  %2124 = vst [vmem:[#allocation1] ss:$4 sm:$0xff] %v2079_v37 }
 0xb14   :  { %2126 = vst [vmem:[#allocation1 + $0x1] ss:$4 sm:$0xff] %v2118_v12 }
 0xb15   :  { %2128 = vst [vmem:[#allocation1 + $0x2] ss:$4 sm:$0xff] %v2119_v22 }
 0xb16   :  { %2130 = vst [vmem:[#allocation1 + $0x3] ss:$4 sm:$0xff] %v2120_v19  ;;  %v5994_v19 = vld [vmem:[%s7450_s20 + $0x18] sm:$0x3] }
 0xb19   :  { %v2081_v4 = vpop.f32.mrf.mxu0 }
 0xb1a   :  { %2132 = vst [vmem:[#allocation1 + $0x20] ss:$4 sm:$0xff] %v2081_v4 }
 0xb1c   :  { %v2109_v23 = vpop.f32.mrf.mxu1 }
 0xb1d   :  { %v2121_v40 = vrot.slane %v2109_v23, 2  ;;  %v2122_v28 = vrot.slane %v2109_v23, 4  ;;  %v2123_v55 = vrot.slane %v2109_v23, 6  ;;  %v2139_v34 = vld.sshfl [vmem:[#allocation1] sm:$0xff pattern:$0x73625140] }
 0xb1e   :  { %2134 = vst [vmem:[#allocation1 + $0x21] ss:$4 sm:$0xff] %v2109_v23 }
 0xb1f   :  { %2136 = vst [vmem:[#allocation1 + $0x22] ss:$4 sm:$0xff] %v2121_v40 }
 0xb20   :  { %2138 = vst [vmem:[#allocation1 + $0x23] ss:$4 sm:$0xff] %v2122_v28 }
 0xb21   :  { %2141 = vst [vmem:[#allocation1] ss:$4 sm:$0xff] %v2123_v55 }
 0xb24   :  { %v2111_v38 = vpop.f32.mrf.mxu1 }
 0xb25   :  { %2142 = vst [vmem:[#allocation1 + $0x1] ss:$4 sm:$0xff] %v2111_v38 }
 0xb27   :  { %v2140_v30 = vld.sshfl [vmem:[#allocation1 + $0x20] sm:$0xff pattern:$0x73625140] }
 0xb28   :  { %v2147_v47 = vpack.c.bf16 %v2140_v30, %v2139_v34 }
 0xb2a   :  { %5375 = vmatmul.msk.bf16.vlgmr.msrb.gmra.mxu2 %vm487_vm15, %v2147_v47 }
 0xb2c   :  { %v2143_v39 = vld.sshfl [vmem:[#allocation1] sm:$0xff pattern:$0x73625140] }
 0xb2d   :  { %v2148_v51 = vpack.c.bf16 %v2143_v39, %v2143_v39 }
 0xb3a   :  { %5376 = vmatmul.msk.bf16.gmra.mxu2 %vm487_vm15, %v2148_v51 }
 0xbad   :  { %v2169_v17 = vpop.f32.mrf.mxu2 }
 0xbae   :  { %v2178_v53 = vadd.f32 %v2169_v17, %v6602_v35 }
 0xbb0   :  { %v2185_v49 = vadd.f32 %v5781_v8, %v2178_v53 }
 0xbb2   :  { %v2191_v13 = vrot.slane %v2185_v49, 2  ;;  %v2192_v26 = vrot.slane %v2185_v49, 4  ;;  %v2193_v52 = vrot.slane %v2185_v49, 6  ;;  %2198 = vst [vmem:[#allocation1] ss:$4 sm:$0xff] %v2185_v49 }
 0xbb4   :  { %2200 = vst [vmem:[#allocation1 + $0x1] ss:$4 sm:$0xff] %v2191_v13 }
 0xbb5   :  { %2202 = vst [vmem:[#allocation1 + $0x2] ss:$4 sm:$0xff] %v2192_v26  ;;  %v2171_v58 = vpop.f32.mrf.mxu2 }
 0xbb6   :  { %2204 = vst [vmem:[#allocation1 + $0x3] ss:$4 sm:$0xff] %v2193_v52  ;;  %v2179_v57 = vadd.f32 %v2171_v58, %v1702_v46 }
 0xbb8   :  { %v2186_v59 = vadd.f32 %v5781_v8, %v2179_v57 }
 0xbba   :  { %v2194_v62 = vrot.slane %v2186_v59, 2  ;;  %2206 = vst [vmem:[#allocation1 + $0x20] ss:$4 sm:$0xff] %v2186_v59  ;;  %v2195_v42 = vrot.slane %v2186_v59, 4  ;;  %v2196_v35 = vrot.slane %v2186_v59, 6 }
 0xbbd   :  { %v2207_v10 = vld.sshfl [vmem:[#allocation1] sm:$0xff pattern:$0x73625140]  ;;  %v2174_v44 = vpop.f32.mrf.mxu2 }
 0xbbe   :  { %v6668_v18 = vadd.f32 %v5991_v9, %v2207_v10  ;;  %2209 = vst [vmem:[#allocation1] ss:$4 sm:$0xff] %v2194_v62  ;;  %v2180_v36 = vadd.f32 %v2174_v44, %v6608_v50 }
 0xbbf   :  { %2210 = vst [vmem:[#allocation1 + $0x1] ss:$4 sm:$0xff] %v2195_v42 }
 0xbc0   :  { %2211 = vst [vmem:[#allocation1 + $0x2] ss:$4 sm:$0xff] %v2196_v35  ;;  %v2187_v0 = vadd.f32 %v5781_v8, %v2180_v36  ;;  %v2226_v21 = vsel %vm123_vm1, %v6668_v18, 0.0 }
 0xbc1   :  { %v2208_v25 = vld.sshfl [vmem:[#allocation1 + $0x20] sm:$0xff pattern:$0x73625140]  ;;  %2227 = vadd.xlane.f32.xlu1 %v2226_v21 }
 0xbc2   :  { %v6676_v6 = vadd.f32 %v5992_v3, %v2208_v25  ;;  %v2197_v63 = vrot.slane %v2187_v0, 2  ;;  %2212 = vst [vmem:[#allocation1 + $0x3] ss:$4 sm:$0xff] %v2187_v0 }
 0xbc4   :  { %2213 = vst [vmem:[#allocation1 + $0x20] ss:$4 sm:$0xff] %v2197_v63  ;;  %v2229_v50 = vsel %vm127_vm0, %v6676_v6, 0.0 }
 0xbc5   :  { %2230 = vadd.xlane.f32.xlu0 %v2229_v50  ;;  %v2176_v2 = vpop.f32.mrf.mxu2 }
 0xbc9   :  { %v2214_v7 = vld.sshfl [vmem:[#allocation1] sm:$0xff pattern:$0x73625140] }
 0xbca   :  { %v6683_v37 = vadd.f32 %v5993_v61, %v2214_v7 }
 0xbcb   :  { %v2215_v12 = vld.sshfl [vmem:[#allocation1 + $0x20] sm:$0xff pattern:$0x73625140] }
 0xbcc   :  { %v2232_v22 = vsel %vm123_vm1, %v6683_v37, 0.0  ;;  %v6690_v4 = vadd.f32 %v5994_v19, %v2215_v12 }
 0xbcd   :  { %2233 = vadd.xlane.f32.xlu2 %v2232_v22 }
 0xbce   :  { %v2235_v23 = vsel %vm127_vm0, %v6690_v4, 0.0 }
 0xbcf   :  { %2236 = vadd.xlane.f32.xlu1 %v2235_v23  ;;  %v5721_v23 = vld [vmem:[%s7438_s15 + $0x8] sm:$0xff] }
 0xbd0   :  { %2395 = vmatpush.bf16.msra.mxu3 %v5721_v23 }
 0xc34   :  { %v2228_v40 = vpop.xlane.xlu1 %2227 }
 0xc35   :  { %v2238_v28 = vmul.f32 %v2228_v40, %v6114_v14 }
 0xc37   :  { %v2242_v55 = vsub.f32 %v6668_v18, %v2238_v28 }
 0xc38   :  { %v2231_v34 = vpop.xlane.xlu0 %2230 }
 0xc39   :  { %v2239_v38 = vmul.f32 %v2231_v34, %v6114_v14  ;;  %v2246_v30 = vmul.f32 %v2242_v55, %v2242_v55  ;;  %v5782_v34 = vld [vmem:[%s7435_s13] ss:$0 sm:$0xff] }
 0xc3b   :  { %v6698_v47 = vsub.f32 %v6676_v6, %v2239_v38  ;;  %v2250_v39 = vsel %vm123_vm1, %v2246_v30, 0.0  ;;  %v5720_v38 = vld [vmem:[%s7438_s15] sm:$0xff] }
 0xc3c   :  { %2251 = vadd.xlane.f32.xlu2 %v2250_v39  ;;  %2396 = vmatpush.bf16.msra.mxu3 %v5720_v38 }
 0xc3d   :  { %v2247_v51 = vmul.f32 %v6698_v47, %v6698_v47 }
 0xc3f   :  { %v2253_v8 = vsel %vm127_vm0, %v2247_v51, 0.0 }
 0xc40   :  { %v2234_v17 = vpop.xlane.xlu2 %2233  ;;  %2254 = vadd.xlane.f32.xlu1 %v2253_v8  ;;  %v5783_v8 = vld [vmem:[%s7436_s14] ss:$0 sm:$0xff] }
 0xc41   :  { %v2240_v53 = vmul.f32 %v2234_v17, %v6114_v14 }
 0xc42   :  { %v2237_v49 = vpop.xlane.xlu1 %2236 }
 0xc43   :  { %v6706_v11 = vsub.f32 %v6683_v37, %v2240_v53  ;;  %v2241_v13 = vmul.f32 %v2237_v49, %v6114_v14 }
 0xc45   :  { %v6710_v26 = vsub.f32 %v6690_v4, %v2241_v13  ;;  %v2248_v52 = vmul.f32 %v6706_v11, %v6706_v11 }
 0xc47   :  { %v2256_v46 = vsel %vm123_vm1, %v2248_v52, 0.0  ;;  %v2249_v58 = vmul.f32 %v6710_v26, %v6710_v26 }
 0xc48   :  { %2257 = vadd.xlane.f32.xlu0 %v2256_v46 }
 0xc49   :  { %v2259_v57 = vsel %vm127_vm0, %v2249_v58, 0.0 }
 0xc4a   :  { %2260 = vadd.xlane.f32.xlu2 %v2259_v57 }
 0xcaf   :  { %v2252_v59 = vpop.xlane.xlu2 %2251 }
 0xcb0   :  { %v2262_v62 = vmul.f32 %v2252_v59, %v6114_v14 }
 0xcb2   :  { %v2266_v42 = vadd.f32 1e-05, %v2262_v62 }
 0xcb3   :  { %v2255_v35 = vpop.xlane.xlu1 %2254 }
 0xcb4   :  { %5879 = vrsqrt.f32 %v2266_v42  ;;  %v2263_v10 = vmul.f32 %v2255_v35, %v6114_v14  ;;  %vm2276_vm11 = vweird.f32 %v2266_v42 }
 0xcb6   :  { %v2267_v44 = vadd.f32 1e-05, %v2263_v10 }
 0xcb8   :  { %5881 = vrsqrt.f32 %v2267_v44  ;;  %vm2286_vm14 = vweird.f32 %v2267_v44 }
 0xcba   :  { %v5880_v9 = vpop.eup %5879 }
 0xcbb   :  { %v2271_v36 = vmul.f32 %v5880_v9, %v2266_v42  ;;  %v2258_v0 = vpop.xlane.xlu0 %2257  ;;  %vm2277_vm10 = vweird.f32 %v5880_v9 }
 0xcbc   :  { %v2264_v21 = vmul.f32 %v2258_v0, %v6114_v14  ;;  %vm2278_vm12 = vmor %vm2276_vm11, %vm2277_vm10 }
 0xcbd   :  { %v2272_v25 = vmul.f32 %v5880_v9, %v2271_v36  ;;  %v2261_v3 = vpop.xlane.xlu2 %2260 }
 0xcbe   :  { %v5882_v63 = vpop.eup %5881  ;;  %v2268_v50 = vadd.f32 1e-05, %v2264_v21  ;;  %v2265_v2 = vmul.f32 %v2261_v3, %v6114_v14 }
 0xcbf   :  { %v2273_v7 = vmul.f32 0.5, %v2272_v25  ;;  %v2281_v61 = vmul.f32 %v5882_v63, %v2267_v44  ;;  %vm2287_vm13 = vweird.f32 %v5882_v63 }
 0xcc0   :  { %5883 = vrsqrt.f32 %v2268_v50  ;;  %v2269_v12 = vadd.f32 1e-05, %v2265_v2  ;;  %vm2288_vm3 = vmor %vm2286_vm14, %vm2287_vm13  ;;  %vm2296_vm10 = vweird.f32 %v2268_v50 }
 0xcc1   :  { %v2274_v22 = vsub.f32 1.5, %v2273_v7  ;;  %v2282_v19 = vmul.f32 %v5882_v63, %v2281_v61 }
 0xcc2   :  { %5885 = vrsqrt.f32 %v2269_v12  ;;  %vm2306_vm13 = vweird.f32 %v2269_v12 }
 0xcc3   :  { %v2275_v40 = vmul.f32 %v5880_v9, %v2274_v22  ;;  %v2283_v28 = vmul.f32 0.5, %v2282_v19 }
 0xcc5   :  { %v2279_v30 = vsel %vm2278_vm12, %v5880_v9, %v2275_v40  ;;  %v2284_v39 = vsub.f32 1.5, %v2283_v28 }
 0xcc6   :  { %v5884_v51 = vpop.eup %5883  ;;  %v2310_v17 = vmul.f32 %v2279_v30, %v2242_v55 }
 0xcc7   :  { %v2285_v53 = vmul.f32 %v5882_v63, %v2284_v39  ;;  %v2291_v49 = vmul.f32 %v5884_v51, %v2268_v50  ;;  %vm2297_vm6 = vweird.f32 %v5884_v51 }
 0xcc8   :  { %v5886_v13 = vpop.eup %5885  ;;  %v2317_v52 = vmul.f32 %v5782_v34, %v2310_v17  ;;  %vm2298_vm12 = vmor %vm2296_vm10, %vm2297_vm6 }
 0xcc9   :  { %v2289_v46 = vsel %vm2288_vm3, %v5882_v63, %v2285_v53  ;;  %v2292_v58 = vmul.f32 %v5884_v51, %v2291_v49  ;;  %v2301_v57 = vmul.f32 %v5886_v13, %v2269_v12  ;;  %vm2307_vm11 = vweird.f32 %v5886_v13  ;;  %v5729_v49 = vld [vmem:[%s7440_s17 + $0x38] sm:$0xff] }
 0xcca   :  { %v2324_v59 = vadd.f32 %v5783_v8, %v2317_v52  ;;  %v2311_v62 = vmul.f32 %v2289_v46, %v6698_v47  ;;  %vm2308_vm14 = vmor %vm2306_vm13, %vm2307_vm11  ;;  %2597 = vmatpush.bf16.msrb.mxu0 %v5729_v49  ;;  %v5723_v49 = vld [vmem:[%s7440_s17 + $0x8] sm:$0xff] }
 0xccb   :  { %v2293_v42 = vmul.f32 0.5, %v2292_v58  ;;  %v2302_v35 = vmul.f32 %v5886_v13, %v2301_v57  ;;  %v5728_v57 = vld [vmem:[%s7440_s17 + $0x30] sm:$0xff] }
 0xccc   :  { %v2332_v10 = vrot.slane %v2324_v59, 2  ;;  %v2333_v9 = vrot.slane %v2324_v59, 4  ;;  %v2334_v36 = vrot.slane %v2324_v59, 6  ;;  %2338 = vst [vmem:[#allocation1] ss:$4 sm:$0xff] %v2324_v59  ;;  %v2318_v55 = vmul.f32 %v5782_v34, %v2311_v62 }
 0xccd   :  { %v2294_v0 = vsub.f32 1.5, %v2293_v42  ;;  %v2303_v44 = vmul.f32 0.5, %v2302_v35  ;;  %v5727_v42 = vld [vmem:[%s7440_s17 + $0x28] sm:$0xff] }
 0xcce   :  { %2340 = vst [vmem:[#allocation1 + $0x1] ss:$4 sm:$0xff] %v2332_v10  ;;  %v2325_v21 = vadd.f32 %v5783_v8, %v2318_v55  ;;  %2598 = vmatpush.bf16.msrb.mxu0 %v5728_v57 }
 0xccf   :  { %2342 = vst [vmem:[#allocation1 + $0x2] ss:$4 sm:$0xff] %v2333_v9  ;;  %v2295_v25 = vmul.f32 %v5884_v51, %v2294_v0  ;;  %v2304_v3 = vsub.f32 1.5, %v2303_v44  ;;  %v5726_v44 = vld [vmem:[%s7440_s17 + $0x20] sm:$0xff] }
 0xcd0   :  { %2344 = vst [vmem:[#allocation1 + $0x3] ss:$4 sm:$0xff] %v2334_v36 }
 0xcd1   :  { %2346 = vst [vmem:[#allocation1 + $0x20] ss:$4 sm:$0xff] %v2325_v21  ;;  %v2299_v47 = vsel %vm2298_vm12, %v5884_v51, %v2295_v25  ;;  %v2305_v63 = vmul.f32 %v5886_v13, %v2304_v3 }
 0xcd2   :  { %v2312_v2 = vmul.f32 %v2299_v47, %v6706_v11  ;;  %2599 = vmatpush.bf16.msrb.mxu0 %v5727_v42 }
 0xcd3   :  { %v2309_v7 = vsel %vm2308_vm14, %v5886_v13, %v2305_v63 }
 0xcd4   :  { %v2319_v61 = vmul.f32 %v5782_v34, %v2312_v2  ;;  %v2313_v22 = vmul.f32 %v2309_v7, %v6710_v26  ;;  %v5784_v26 = vld [vmem:[%s7437_s16] ss:$0 sm:$0xff]  ;;  %v5725_v7 = vld [vmem:[%s7440_s17 + $0x18] sm:$0xff] }
 0xcd6   :  { %v2326_v19 = vadd.f32 %v5783_v8, %v2319_v61  ;;  %v2320_v23 = vmul.f32 %v5782_v34, %v2313_v22  ;;  %2600 = vmatpush.bf16.msrb.mxu0 %v5726_v44  ;;  %v5722_v44 = vld [vmem:[%s7440_s17] sm:$0xff] }
 0xcd7   :  { %v2353_v30 = vld.sshfl [vmem:[#allocation1] sm:$0xff pattern:$0x73625140] }
 0xcd8   :  { %v2335_v40 = vrot.slane %v2326_v19, 2  ;;  %v2336_v28 = vrot.slane %v2326_v19, 4  ;;  %v2337_v50 = vrot.slane %v2326_v19, 6  ;;  %2348 = vst [vmem:[#allocation1 + $0x21] ss:$4 sm:$0xff] %v2326_v19  ;;  %v2327_v38 = vadd.f32 %v5783_v8, %v2320_v23 }
 0xcda   :  { %2350 = vst [vmem:[#allocation1 + $0x22] ss:$4 sm:$0xff] %v2335_v40  ;;  %2601 = vmatpush.bf16.msrb.mxu0 %v5725_v7 }
 0xcdb   :  { %2352 = vst [vmem:[#allocation1 + $0x23] ss:$4 sm:$0xff] %v2336_v28 }
 0xcdc   :  { %2355 = vst [vmem:[#allocation1] ss:$4 sm:$0xff] %v2337_v50 }
 0xcdd   :  { %2356 = vst [vmem:[#allocation1 + $0x1] ss:$4 sm:$0xff] %v2327_v38  ;;  %v5724_v38 = vld [vmem:[%s7440_s17 + $0x10] sm:$0xff] }
 0xcde   :  { %2602 = vmatpush.bf16.msrb.mxu0 %v5724_v38 }
 0xce2   :  { %v2354_v12 = vld.sshfl [vmem:[#allocation1 + $0x20] sm:$0xff pattern:$0x73625140]  ;;  %2603 = vmatpush.bf16.msrb.mxu0 %v5723_v49 }
 0xce3   :  { %v2361_v39 = vpack.c.bf16 %v2354_v12, %v2353_v30 }
 0xce4   :  { %v2357_v11 = vld.sshfl [vmem:[#allocation1] sm:$0xff pattern:$0x73625140] }
 0xce5   :  { %5385 = vmatmul.msk.bf16.vlgmr.msra.gmra.mxu3 %vm123_vm1, %v2361_v39  ;;  %v2362_v51 = vpack.c.bf16 %v2357_v11, %v2357_v11 }
 0xce6   :  { %2604 = vmatpush.bf16.msrb.mxu0 %v5722_v44 }
 0xcf5   :  { %5386 = vmatmul.msk.bf16.gmra.mxu3 %vm123_vm1, %v2362_v51 }
 0xd68   :  { %v2398_v34 = vpop.f32.mrf.mxu3 }
 0xd69   :  { %v6742_v17 = vadd.f32 %v5784_v26, %v2398_v34 }
 0xd6b   :  { %v6745_v8 = vmul.f32 0.70710677, %v6742_v17 }
 0xd6d   :  { %v2419_v53 = vand.u32 2147483647, %v6745_v8 }
 0xd6f   :  { %v2422_v13 = vmul.f32 0.3275911, %v2419_v53  ;;  %v2500_v12 = vsub.f32 0.0, %v2419_v53 }
 0xd70   :  { %v2400_v52 = vpop.f32.mrf.mxu3 }
 0xd71   :  { %v2425_v46 = vadd.f32 1.0, %v2422_v13  ;;  %v6751_v58 = vadd.f32 %v5784_v26, %v2400_v52  ;;  %v2503_v13 = vmul.f32 %v2500_v12, %v2419_v53 }
 0xd73   :  { %5887 = vrcp.f32 %v2425_v46  ;;  %v6757_v59 = vmul.f32 0.70710677, %v6751_v58  ;;  %v2439_v3 = vand.u32 2147483648, %v2425_v46  ;;  %v2437_v2 = vand.u32 2147483647, %v2425_v46 }
 0xd74   :  { %vm2433_vm6 = vweird.f32 %v2425_v46 }
 0xd75   :  { %v6760_v62 = vand.u32 2147483647, %v6757_v59  ;;  %v2440_v23 = vor.u32 1.1754944e-38, %v2439_v3  ;;  %vm2438_vm11 = vcmp.eq.f32.partialorder %v2437_v2, 8.507059e+37 }
 0xd77   :  { %v2423_v35 = vmul.f32 0.3275911, %v6760_v62  ;;  %v2501_v2 = vsub.f32 0.0, %v6760_v62 }
 0xd78   :  { %v2403_v10 = vpop.f32.mrf.mxu3 }
 0xd79   :  { %v5888_v9 = vpop.eup %5887  ;;  %v6766_v36 = vadd.f32 %v5784_v26, %v2403_v10  ;;  %v2426_v0 = vadd.f32 1.0, %v2423_v35  ;;  %v2504_v12 = vmul.f32 %v2501_v2, %v6760_v62 }
 0xd7a   :  { %v2429_v55 = vmul.f32 %v5888_v9, %v2425_v46  ;;  %vm2434_vm3 = vweird.f32 %v5888_v9 }
 0xd7b   :  { %v6772_v21 = vmul.f32 0.70710677, %v6766_v36  ;;  %5889 = vrcp.f32 %v2426_v0  ;;  %vm2435_vm10 = vmor %vm2433_vm6, %vm2434_vm3  ;;  %v2454_v34 = vand.u32 2147483648, %v2426_v0  ;;  %v2452_v46 = vand.u32 2147483647, %v2426_v0 }
 0xd7c   :  { %v2430_v25 = vsub.f32 1.0, %v2429_v55  ;;  %vm2448_vm13 = vweird.f32 %v2426_v0 }
 0xd7d   :  { %v6775_v47 = vand.u32 2147483647, %v6772_v21  ;;  %vm2453_vm3 = vcmp.eq.f32.partialorder %v2452_v46, 8.507059e+37  ;;  %v2508_v46 = vmul.f32 1.442695, %v2504_v12 }
 0xd7e   :  { %v2431_v63 = vmul.f32 %v5888_v9, %v2430_v25  ;;  %v2506_v25 = vmul.f32 1.442695, %v2503_v13 }
 0xd7f   :  { %v2424_v61 = vmul.f32 0.3275911, %v6775_v47  ;;  %v2502_v13 = vsub.f32 0.0, %v6775_v47 }
 0xd80   :  { %v2432_v22 = vadd.f32 %v5888_v9, %v2431_v63  ;;  %v2405_v19 = vpop.f32.mrf.mxu3 }
 0xd81   :  { %v2427_v40 = vadd.f32 1.0, %v2424_v61  ;;  %v5890_v28 = vpop.eup %5889 }
 0xd82   :  { %v2436_v50 = vsel %vm2435_vm10, %v5888_v9, %v2432_v22  ;;  %v2444_v39 = vmul.f32 %v5890_v28, %v2426_v0  ;;  %vm2449_vm12 = vweird.f32 %v5890_v28  ;;  %v2455_v9 = vor.u32 1.1754944e-38, %v2454_v34 }
 0xd83   :  { %v2441_v30 = vsel %vm2438_vm11, %v2440_v23, %v2436_v50  ;;  %5891 = vrcp.f32 %v2427_v40  ;;  %vm2450_vm14 = vmor %vm2448_vm13, %vm2449_vm12  ;;  %v2469_v22 = vand.u32 2147483648, %v2427_v40  ;;  %v2467_v23 = vand.u32 2147483647, %v2427_v40 }
 0xd84   :  { %v2473_v11 = vmul.f32 1.0614054, %v2441_v30  ;;  %v2445_v51 = vsub.f32 1.0, %v2444_v39  ;;  %5893 = vpow2.f32 %v2506_v25  ;;  %vm2463_vm10 = vweird.f32 %v2427_v40 }
 0xd85   :  { %vm2468_vm12 = vcmp.eq.f32.partialorder %v2467_v23, 8.507059e+37  ;;  %5895 = vpow2.f32 %v2508_v46  ;;  %vm2413_vm13 = vcmp.ge.f32.partialorder %v6745_v8, 0.0 }
 0xd86   :  { %v2476_v26 = vadd.f32 -1.4531521, %v2473_v11  ;;  %v2446_v52 = vmul.f32 %v5890_v28, %v2445_v51  ;;  %v2470_v11 = vor.u32 1.1754944e-38, %v2469_v22  ;;  %v5997_v22 = vmov -1.0  }
 0xd88   :  { %v2479_v57 = vmul.f32 %v2476_v26, %v2441_v30  ;;  %v2447_v35 = vadd.f32 %v5890_v28, %v2446_v52 }
 0xd89   :  { %v5892_v42 = vpop.eup %5891 }
 0xd8a   :  { %v2482_v10 = vadd.f32 1.4214138, %v2479_v57  ;;  %v2459_v55 = vmul.f32 %v5892_v42, %v2427_v40  ;;  %v2451_v3 = vsel %vm2450_vm14, %v5890_v28, %v2447_v35  ;;  %vm2464_vm6 = vweird.f32 %v5892_v42  ;;  %v5894_v35 = vpop.eup %5893 }
 0xd8b   :  { %v2456_v63 = vsel %vm2453_vm3, %v2455_v9, %v2451_v3  ;;  %vm2465_vm11 = vmor %vm2463_vm10, %vm2464_vm6  ;;  %v2505_v40 = vmul.f32 %v2502_v13, %v6775_v47  ;;  %vm2414_vm14 = vcmp.ge.f32.partialorder %v6757_v59, 0.0  ;;  %vm2415_vm3 = vcmp.ge.f32.partialorder %v6772_v21, 0.0 }
 0xd8c   :  { %v2485_v53 = vmul.f32 %v2482_v10, %v2441_v30  ;;  %v2460_v7 = vsub.f32 1.0, %v2459_v55  ;;  %v2474_v61 = vmul.f32 1.0614054, %v2456_v63  ;;  %v2417_v12 = vsel %vm2414_vm14, 1.0, %v5997_v22 }
 0xd8d   :  { %v2510_v2 = vmul.f32 1.442695, %v2505_v40 }
 0xd8e   :  { %v2488_v0 = vadd.f32 -0.28449672, %v2485_v53  ;;  %v2461_v19 = vmul.f32 %v5892_v42, %v2460_v7  ;;  %v2477_v50 = vadd.f32 -1.4531521, %v2474_v61  ;;  %v5896_v61 = vpop.eup %5895 }
 0xd8f   :  { %5897 = vpow2.f32 %v2510_v2 }
 0xd90   :  { %v2491_v38 = vmul.f32 %v2488_v0, %v2441_v30  ;;  %v2462_v39 = vadd.f32 %v5892_v42, %v2461_v19  ;;  %v2480_v28 = vmul.f32 %v2477_v50, %v2456_v63  ;;  %v2416_v0 = vsel %vm2413_vm13, 1.0, %v5997_v22 }
 0xd92   :  { %v2494_v51 = vadd.f32 0.2548296, %v2491_v38  ;;  %v2466_v26 = vsel %vm2465_vm11, %v5892_v42, %v2462_v39  ;;  %v2483_v34 = vadd.f32 1.4214138, %v2480_v28 }
 0xd93   :  { %v2471_v49 = vsel %vm2468_vm12, %v2470_v11, %v2466_v26  ;;  %v2408_v26 = vmul.f32 0.5, %v6751_v58 }
 0xd94   :  { %v2497_v52 = vmul.f32 %v2494_v51, %v2441_v30  ;;  %v2475_v57 = vmul.f32 1.0614054, %v2471_v49  ;;  %v2486_v10 = vmul.f32 %v2483_v34, %v2456_v63 }
 0xd95   :  { %v5898_v51 = vpop.eup %5897 }
 0xd96   :  { %v2478_v9 = vadd.f32 -1.4531521, %v2475_v57  ;;  %v2512_v55 = vmul.f32 %v5894_v35, %v2497_v52  ;;  %v2489_v62 = vadd.f32 -0.28449672, %v2486_v10  ;;  %v2418_v35 = vsel %vm2415_vm3, 1.0, %v5997_v22 }
 0xd98   :  { %v2481_v44 = vmul.f32 %v2478_v9, %v2471_v49  ;;  %v2492_v25 = vmul.f32 %v2489_v62, %v2456_v63  ;;  %v2515_v42 = vsub.f32 1.0, %v2512_v55 }
 0xd9a   :  { %v2484_v3 = vadd.f32 1.4214138, %v2481_v44  ;;  %v2495_v53 = vadd.f32 0.2548296, %v2492_v25  ;;  %v2518_v23 = vmul.f32 %v2515_v42, %v2416_v0 }
 0xd9c   :  { %v2487_v7 = vmul.f32 %v2484_v3, %v2471_v49  ;;  %v2498_v30 = vmul.f32 %v2495_v53, %v2456_v63  ;;  %v2521_v39 = vadd.f32 1.0, %v2518_v23  ;;  %v2407_v63 = vmul.f32 0.5, %v6742_v17  ;;  %v5785_v17 = vld [vmem:[%s7439_s18] ss:$0 sm:$0xff] }
 0xd9e   :  { %v2490_v19 = vadd.f32 -0.28449672, %v2487_v7  ;;  %v2513_v47 = vmul.f32 %v5896_v61, %v2498_v30  ;;  %v2524_v52 = vmul.f32 %v2521_v39, %v2407_v63 }
 0xda0   :  { %v2493_v50 = vmul.f32 %v2490_v19, %v2471_v49  ;;  %v2516_v38 = vsub.f32 1.0, %v2513_v47 }
 0xda2   :  { %v2496_v8 = vadd.f32 0.2548296, %v2493_v50  ;;  %v2519_v28 = vmul.f32 %v2516_v38, %v2417_v12 }
 0xda4   :  { %v2499_v11 = vmul.f32 %v2496_v8, %v2471_v49  ;;  %v2522_v34 = vadd.f32 1.0, %v2519_v28  ;;  %v2409_v49 = vmul.f32 0.5, %v6766_v36 }
 0xda6   :  { %v2514_v13 = vmul.f32 %v5898_v51, %v2499_v11  ;;  %v2525_v46 = vmul.f32 %v2522_v34, %v2408_v26 }
 0xda8   :  { %v2527_v59 = vpack.c.bf16 %v2525_v46, %v2524_v52  ;;  %v2517_v57 = vsub.f32 1.0, %v2514_v13 }
 0xdaa   :  { %2605 = vmatmul.bf16.vlgmr.msrb.gmra.mxu0 %v2527_v59  ;;  %v2520_v10 = vmul.f32 %v2517_v57, %v2418_v35 }
 0xdac   :  { %v2523_v9 = vadd.f32 1.0, %v2520_v10 }
 0xdae   :  { %v2526_v55 = vmul.f32 %v2523_v9, %v2409_v49 }
 0xdb0   :  { %v2528_v62 = vpack.c.bf16 %v2526_v55, %v2526_v55 }
 0xdba   :  { %2610 = vmatmul.bf16.gmra.mxu0 %v2528_v62 }
 0xe27   :  { %v2606_v58 = vpop.f32.mrf.mxu0 }
 0xe28   :  { %v2607_v40 = vadd.f32 %v5785_v17, %v2606_v58 }
 0xe2a   :  { %v2618_v44 = vrot.slane %v2607_v40, 2  ;;  %v2619_v25 = vrot.slane %v2607_v40, 4  ;;  %v2620_v21 = vrot.slane %v2607_v40, 6  ;;  %2625 = vst [vmem:[#allocation1] ss:$4 sm:$0xff] %v2607_v40 }
 0xe2c   :  { %2627 = vst [vmem:[#allocation1 + $0x1] ss:$4 sm:$0xff] %v2618_v44 }
 0xe2d   :  { %2629 = vst [vmem:[#allocation1 + $0x2] ss:$4 sm:$0xff] %v2619_v25 }
 0xe2e   :  { %2631 = vst [vmem:[#allocation1 + $0x3] ss:$4 sm:$0xff] %v2620_v21 }
 0xe2f   :  { %v2608_v3 = vpop.f32.mrf.mxu0 }
 0xe30   :  { %v2609_v42 = vadd.f32 %v5785_v17, %v2608_v3 }
 0xe32   :  { %v2621_v53 = vrot.slane %v2609_v42, 2  ;;  %2633 = vst [vmem:[#allocation1 + $0x20] ss:$4 sm:$0xff] %v2609_v42  ;;  %v2622_v36 = vrot.slane %v2609_v42, 4  ;;  %v2623_v2 = vrot.slane %v2609_v42, 6 }
 0xe35   :  { %v2634_v7 = vld.sshfl [vmem:[#allocation1] sm:$0xff pattern:$0x73625140] }
 0xe36   :  { %2636 = vst [vmem:[#allocation1] ss:$4 sm:$0xff] %v2621_v53  ;;  %v6807_v30 = vadd.f32 %v2634_v7, %v6668_v18 }
 0xe37   :  { %2637 = vst [vmem:[#allocation1 + $0x1] ss:$4 sm:$0xff] %v2622_v36  ;;  %v2611_v61 = vpop.f32.mrf.mxu0 }
 0xe38   :  { %2638 = vst [vmem:[#allocation1 + $0x2] ss:$4 sm:$0xff] %v2623_v2  ;;  %v2612_v0 = vadd.f32 %v5785_v17, %v2611_v61  ;;  %v2655_v19 = vsel %vm123_vm1, %v6807_v30, 0.0 }
 0xe39   :  { %v2635_v23 = vld.sshfl [vmem:[#allocation1 + $0x20] sm:$0xff pattern:$0x73625140]  ;;  %2656 = vadd.xlane.f32.xlu0 %v2655_v19 }
 0xe3a   :  { %v2624_v47 = vrot.slane %v2612_v0, 2  ;;  %2639 = vst [vmem:[#allocation1 + $0x3] ss:$4 sm:$0xff] %v2612_v0  ;;  %v6812_v50 = vadd.f32 %v2635_v23, %v6676_v6 }
 0xe3c   :  { %2640 = vst [vmem:[#allocation1 + $0x20] ss:$4 sm:$0xff] %v2624_v47  ;;  %v2658_v38 = vsel %vm127_vm0, %v6812_v50, 0.0 }
 0xe3d   :  { %2659 = vadd.xlane.f32.xlu2 %v2658_v38 }
 0xe3f   :  { %v2613_v18 = vpop.f32.mrf.mxu0 }
 0xe41   :  { %v2641_v12 = vld.sshfl [vmem:[#allocation1] sm:$0xff pattern:$0x73625140] }
 0xe42   :  { %v6817_v8 = vadd.f32 %v2641_v12, %v6683_v37 }
 0xe43   :  { %v2642_v39 = vld.sshfl [vmem:[#allocation1 + $0x20] sm:$0xff pattern:$0x73625140] }
 0xe44   :  { %v2661_v28 = vsel %vm123_vm1, %v6817_v8, 0.0  ;;  %v6822_v11 = vadd.f32 %v2642_v39, %v6690_v4  ;;  %v5731_v39 = vld [vmem:[%s7426_s5 + $0x48] sm:$0xff] }
 0xe45   :  { %2662 = vadd.xlane.f32.xlu1 %v2661_v28  ;;  %v5733_v28 = vld [vmem:[%s7427_s7 + $0x48] sm:$0xff]  ;;  %2826 = vmatpush.bf16.msrb.mxu1 %v5731_v39 }
 0xe46   :  { %v2664_v6 = vsel %vm127_vm0, %v6822_v11, 0.0  ;;  %2866 = vmatpush.bf16.msra.mxu2 %v5733_v28 }
 0xe47   :  { %2665 = vadd.xlane.f32.xlu0 %v2664_v6  ;;  %v5735_v6 = vld [vmem:[%s7428_s9 + $0x48] sm:$0xff] }
 0xe48   :  { %2906 = vmatpush.bf16.msrb.mxu3 %v5735_v6 }
 0xeac   :  { %v2657_v51 = vpop.xlane.xlu0 %2656 }
 0xead   :  { %v2667_v63 = vmul.f32 %v2657_v51, %v6114_v14 }
 0xeaf   :  { %v6828_v26 = vsub.f32 %v6807_v30, %v2667_v63 }
 0xeb0   :  { %v2660_v37 = vpop.xlane.xlu2 %2659 }
 0xeb1   :  { %v2668_v34 = vmul.f32 %v2660_v37, %v6114_v14  ;;  %v2675_v13 = vmul.f32 %v6828_v26, %v6828_v26 }
 0xeb3   :  { %v6834_v4 = vsub.f32 %v6812_v50, %v2668_v34  ;;  %v2679_v52 = vsel %vm123_vm1, %v2675_v13, 0.0 }
 0xeb4   :  { %2680 = vadd.xlane.f32.xlu1 %v2679_v52  ;;  %v5730_v52 = vld [vmem:[%s7426_s5 + $0x40] sm:$0xff] }
 0xeb5   :  { %v2676_v46 = vmul.f32 %v6834_v4, %v6834_v4  ;;  %2827 = vmatpush.bf16.msrb.mxu1 %v5730_v52 }
 0xeb7   :  { %v2682_v59 = vsel %vm127_vm0, %v2676_v46, 0.0  ;;  %v5732_v46 = vld [vmem:[%s7427_s7 + $0x40] sm:$0xff] }
 0xeb8   :  { %2683 = vadd.xlane.f32.xlu0 %v2682_v59  ;;  %v2663_v57 = vpop.xlane.xlu1 %2662  ;;  %v5734_v59 = vld [vmem:[%s7428_s9 + $0x40] sm:$0xff]  ;;  %2867 = vmatpush.bf16.msra.mxu2 %v5732_v46 }
 0xeb9   :  { %v2669_v35 = vmul.f32 %v2663_v57, %v6114_v14  ;;  %v5786_v57 = vld [vmem:[%s7451_s25 + $0x1] ss:$0 sm:$0xff]  ;;  %2907 = vmatpush.bf16.msrb.mxu3 %v5734_v59 }
 0xeba   :  { %v2666_v10 = vpop.xlane.xlu0 %2665 }
 0xebb   :  { %v6842_v9 = vsub.f32 %v6817_v8, %v2669_v35  ;;  %v2670_v49 = vmul.f32 %v2666_v10, %v6114_v14 }
 0xebd   :  { %v6846_v55 = vsub.f32 %v6822_v11, %v2670_v49  ;;  %v2677_v62 = vmul.f32 %v6842_v9, %v6842_v9 }
 0xebf   :  { %v2685_v17 = vsel %vm123_vm1, %v2677_v62, 0.0  ;;  %v2678_v58 = vmul.f32 %v6846_v55, %v6846_v55  ;;  %v5787_v62 = vld [vmem:[%s7452_s27 + $0x1] ss:$0 sm:$0xff] }
 0xec0   :  { %2686 = vadd.xlane.f32.xlu2 %v2685_v17 }
 0xec1   :  { %v2688_v40 = vsel %vm127_vm0, %v2678_v58, 0.0 }
 0xec2   :  { %2689 = vadd.xlane.f32.xlu1 %v2688_v40 }
 0xf27   :  { %v2681_v44 = vpop.xlane.xlu1 %2680 }
 0xf28   :  { %v2691_v25 = vmul.f32 %v2681_v44, %v6114_v14 }
 0xf2a   :  { %v2695_v21 = vadd.f32 1e-05, %v2691_v25 }
 0xf2b   :  { %v2684_v3 = vpop.xlane.xlu0 %2683 }
 0xf2c   :  { %5899 = vrsqrt.f32 %v2695_v21  ;;  %v2692_v42 = vmul.f32 %v2684_v3, %v6114_v14  ;;  %vm2705_vm10 = vweird.f32 %v2695_v21 }
 0xf2e   :  { %v2696_v53 = vadd.f32 1e-05, %v2692_v42 }
 0xf30   :  { %5901 = vrsqrt.f32 %v2696_v53  ;;  %vm2715_vm13 = vweird.f32 %v2696_v53 }
 0xf32   :  { %v5900_v36 = vpop.eup %5899 }
 0xf33   :  { %v2700_v2 = vmul.f32 %v5900_v36, %v2695_v21  ;;  %v2687_v7 = vpop.xlane.xlu2 %2686  ;;  %vm2706_vm6 = vweird.f32 %v5900_v36 }
 0xf34   :  { %v2693_v61 = vmul.f32 %v2687_v7, %v6114_v14  ;;  %vm2707_vm11 = vmor %vm2705_vm10, %vm2706_vm6 }
 0xf35   :  { %v2701_v0 = vmul.f32 %v5900_v36, %v2700_v2  ;;  %v2690_v19 = vpop.xlane.xlu1 %2689 }
 0xf36   :  { %v5902_v23 = vpop.eup %5901  ;;  %v2697_v47 = vadd.f32 1e-05, %v2693_v61  ;;  %v2694_v38 = vmul.f32 %v2690_v19, %v6114_v14 }
 0xf37   :  { %v2702_v18 = vmul.f32 0.5, %v2701_v0  ;;  %v2710_v12 = vmul.f32 %v5902_v23, %v2696_v53  ;;  %vm2716_vm12 = vweird.f32 %v5902_v23 }
 0xf38   :  { %5903 = vrsqrt.f32 %v2697_v47  ;;  %v2698_v51 = vadd.f32 1e-05, %v2694_v38  ;;  %vm2717_vm14 = vmor %vm2715_vm13, %vm2716_vm12  ;;  %vm2725_vm6 = vweird.f32 %v2697_v47 }
 0xf39   :  { %v2703_v63 = vsub.f32 1.5, %v2702_v18  ;;  %v2711_v37 = vmul.f32 %v5902_v23, %v2710_v12 }
 0xf3a   :  { %5905 = vrsqrt.f32 %v2698_v51  ;;  %vm2735_vm12 = vweird.f32 %v2698_v51 }
 0xf3b   :  { %v2704_v34 = vmul.f32 %v5900_v36, %v2703_v63  ;;  %v2712_v13 = vmul.f32 0.5, %v2711_v37 }
 0xf3d   :  { %v2708_v35 = vsel %vm2707_vm11, %v5900_v36, %v2704_v34  ;;  %v2713_v10 = vsub.f32 1.5, %v2712_v13 }
 0xf3e   :  { %v5904_v49 = vpop.eup %5903  ;;  %v2739_v17 = vmul.f32 %v2708_v35, %v6828_v26 }
 0xf3f   :  { %v2714_v58 = vmul.f32 %v5902_v23, %v2713_v10  ;;  %v2720_v40 = vmul.f32 %v5904_v49, %v2697_v47  ;;  %vm2726_vm3 = vweird.f32 %v5904_v49  ;;  %v5737_v47 = vld [vmem:[%s7426_s5 + $0x58] sm:$0xff] }
 0xf40   :  { %v5906_v44 = vpop.eup %5905  ;;  %v2746_v25 = vmul.f32 %v5786_v57, %v2739_v17  ;;  %vm2727_vm11 = vmor %vm2725_vm6, %vm2726_vm3  ;;  %3273 = vmatpush.bf16.msra.mxu3 %v5737_v47  ;;  %v5788_v17 = vld [vmem:[%s7453_s22 + $0x4] ss:$0 sm:$0xff] }
 0xf41   :  { %v2718_v21 = vsel %vm2717_vm14, %v5902_v23, %v2714_v58  ;;  %v2721_v3 = vmul.f32 %v5904_v49, %v2720_v40  ;;  %v2730_v42 = vmul.f32 %v5906_v44, %v2698_v51  ;;  %vm2736_vm10 = vweird.f32 %v5906_v44 }
 0xf42   :  { %v2753_v36 = vadd.f32 %v5787_v62, %v2746_v25  ;;  %v2740_v2 = vmul.f32 %v2718_v21, %v6834_v4  ;;  %vm2737_vm13 = vmor %vm2735_vm12, %vm2736_vm10 }
 0xf43   :  { %v2722_v7 = vmul.f32 0.5, %v2721_v3  ;;  %v2731_v61 = vmul.f32 %v5906_v44, %v2730_v42 }
 0xf44   :  { %v2761_v0 = vrot.slane %v2753_v36, 2  ;;  %v2762_v19 = vrot.slane %v2753_v36, 4  ;;  %v2763_v38 = vrot.slane %v2753_v36, 6  ;;  %2767 = vst [vmem:[#allocation1] ss:$4 sm:$0xff] %v2753_v36  ;;  %v2747_v26 = vmul.f32 %v5786_v57, %v2740_v2 }
 0xf45   :  { %v2723_v18 = vsub.f32 1.5, %v2722_v7  ;;  %v2732_v53 = vmul.f32 0.5, %v2731_v61 }
 0xf46   :  { %2769 = vst [vmem:[#allocation1 + $0x1] ss:$4 sm:$0xff] %v2761_v0  ;;  %v2754_v12 = vadd.f32 %v5787_v62, %v2747_v26 }
 0xf47   :  { %2771 = vst [vmem:[#allocation1 + $0x2] ss:$4 sm:$0xff] %v2762_v19  ;;  %v2724_v39 = vmul.f32 %v5904_v49, %v2723_v18  ;;  %v2733_v23 = vsub.f32 1.5, %v2732_v53 }
 0xf48   :  { %2773 = vst [vmem:[#allocation1 + $0x3] ss:$4 sm:$0xff] %v2763_v38 }
 0xf49   :  { %2775 = vst [vmem:[#allocation1 + $0x20] ss:$4 sm:$0xff] %v2754_v12  ;;  %v2728_v4 = vsel %vm2727_vm11, %v5904_v49, %v2724_v39  ;;  %v2734_v28 = vmul.f32 %v5906_v44, %v2733_v23  ;;  %v5789_v39 = vld [vmem:[%s7429_s8 + $0x4] ss:$0 sm:$0xff] }
 0xf4a   :  { %v2741_v6 = vmul.f32 %v2728_v4, %v6842_v9  ;;  %v5736_v9 = vld [vmem:[%s7426_s5 + $0x50] sm:$0xff] }
 0xf4b   :  { %v2738_v63 = vsel %vm2737_vm13, %v5906_v44, %v2734_v28  ;;  %3274 = vmatpush.bf16.msra.mxu3 %v5736_v9 }
 0xf4c   :  { %v2748_v37 = vmul.f32 %v5786_v57, %v2741_v6  ;;  %v2742_v34 = vmul.f32 %v2738_v63, %v6846_v55 }
 0xf4e   :  { %v2755_v13 = vadd.f32 %v5787_v62, %v2748_v37  ;;  %v2749_v52 = vmul.f32 %v5786_v57, %v2742_v34 }
 0xf4f   :  { %v2782_v10 = vld.sshfl [vmem:[#allocation1] sm:$0xff pattern:$0x73625140] }
 0xf50   :  { %v2764_v46 = vrot.slane %v2755_v13, 2  ;;  %v2765_v59 = vrot.slane %v2755_v13, 4  ;;  %v2766_v35 = vrot.slane %v2755_v13, 6  ;;  %2777 = vst [vmem:[#allocation1 + $0x21] ss:$4 sm:$0xff] %v2755_v13  ;;  %v2756_v51 = vadd.f32 %v5787_v62, %v2749_v52 }
 0xf52   :  { %2779 = vst [vmem:[#allocation1 + $0x22] ss:$4 sm:$0xff] %v2764_v46 }
 0xf53   :  { %2781 = vst [vmem:[#allocation1 + $0x23] ss:$4 sm:$0xff] %v2765_v59 }
 0xf54   :  { %2784 = vst [vmem:[#allocation1] ss:$4 sm:$0xff] %v2766_v35 }
 0xf55   :  { %2785 = vst [vmem:[#allocation1 + $0x1] ss:$4 sm:$0xff] %v2756_v51 }
 0xf5a   :  { %v2783_v55 = vld.sshfl [vmem:[#allocation1 + $0x20] sm:$0xff pattern:$0x73625140] }
 0xf5b   :  { %v6892_v57 = vpack.c.bf16 %v2783_v55, %v2782_v10 }
 0xf5c   :  { %v2786_v49 = vld.sshfl [vmem:[#allocation1] sm:$0xff pattern:$0x73625140] }
 0xf5d   :  { %5434 = vmatmul.msk.bf16.vlgmr.msrb.gmra.mxu1 %vm123_vm1, %v6892_v57  ;;  %5449 = vmatmul.msk.bf16.vlgmr.msra.gmra.mxu2 %vm123_vm1, %v6892_v57  ;;  %v6900_v62 = vpack.c.bf16 %v2786_v49, %v2786_v49 }
 0xf5e   :  { %5464 = vmatmul.msk.bf16.vlgmr.msrb.gmra.mxu3 %vm123_vm1, %v6892_v57 }
 0xf6d   :  { %5435 = vmatmul.msk.bf16.gmra.mxu1 %vm123_vm1, %v6900_v62  ;;  %5450 = vmatmul.msk.bf16.gmra.mxu2 %vm123_vm1, %v6900_v62 }
 0xf6e   :  { %5465 = vmatmul.msk.bf16.gmra.mxu3 %vm123_vm1, %v6900_v62 }
 0xf7e   :  { %5484 = vmatmul.msk.bf16.vlgmr.msra.gmra.mxu3 %vm123_vm1, %v6892_v57 }
 0xf8e   :  { %5485 = vmatmul.msk.bf16.gmra.mxu3 %vm123_vm1, %v6900_v62 }
 0xfda   :  { %v2829_v58 = vpop.f32.mrf.mxu1 }
 0xfdb   :  { %v2830_v40 = vadd.f32 %v5788_v17, %v2829_v58 }
 0xfdd   :  { %v2918_v44 = vmul.f32 0.59460354, %v2830_v40 }
 0xfdf   :  { %v2924_v25 = vrot.slane %v2918_v44, 2  ;;  %v2925_v21 = vrot.slane %v2918_v44, 4  ;;  %v2926_v3 = vrot.slane %v2918_v44, 6  ;;  %2954 = vst [vmem:[#allocation1] ss:$4 sm:$0xff] %v2918_v44 }
 0xfe0   :  { %v2869_v42 = vpop.f32.mrf.mxu2 }
 0xfe1   :  { %2956 = vst [vmem:[#allocation1 + $0x1] ss:$4 sm:$0xff] %v2924_v25  ;;  %v6915_v36 = vpop.f32.mrf.mxu3  ;;  %v2870_v28 = vadd.f32 %v5789_v39, %v2869_v42 }
 0xfe2   :  { %2958 = vst [vmem:[#allocation1 + $0x2] ss:$4 sm:$0xff] %v2925_v21  ;;  %v2831_v2 = vpop.f32.mrf.mxu1 }
 0xfe3   :  { %2960 = vst [vmem:[#allocation1 + $0x3] ss:$4 sm:$0xff] %v2926_v3  ;;  %v2832_v7 = vadd.f32 %v5788_v17, %v2831_v2  ;;  %v2931_v52 = vmul.f32 0.59460354, %v2870_v28 }
 0xfe5   :  { %v2919_v61 = vmul.f32 0.59460354, %v2832_v7  ;;  %v2937_v46 = vrot.slane %v2931_v52, 2  ;;  %v2938_v35 = vrot.slane %v2931_v52, 4  ;;  %v2939_v51 = vrot.slane %v2931_v52, 6 }
 0xfe7   :  { %v2927_v0 = vrot.slane %v2919_v61, 2  ;;  %2962 = vst [vmem:[#allocation1 + $0x20] ss:$4 sm:$0xff] %v2919_v61  ;;  %v2928_v19 = vrot.slane %v2919_v61, 4  ;;  %v2929_v26 = vrot.slane %v2919_v61, 6 }
 0xfe8   :  { %v2871_v38 = vpop.f32.mrf.mxu2  ;;  %v5790_v61 = vld [vmem:[%s7430_s10 + $0x4] ss:$0 sm:$0xff] }
 0xfe9   :  { %v6917_v18 = vpop.f32.mrf.mxu3  ;;  %v2872_v47 = vadd.f32 %v5789_v39, %v2871_v38 }
 0xfea   :  { %v2963_v53 = vld.sshfl [vmem:[#allocation1] sm:$0xff pattern:$0x73625140]  ;;  %v2834_v12 = vpop.f32.mrf.mxu1 }
 0xfeb   :  { %2965 = vst [vmem:[#allocation1] ss:$4 sm:$0xff] %v2927_v0  ;;  %v2835_v23 = vadd.f32 %v5788_v17, %v2834_v12  ;;  %v2932_v49 = vmul.f32 0.59460354, %v2872_v47  ;;  %v2976_v28 = vpack.c.bf16 %v2963_v53, %v2963_v53 }
 0xfec   :  { %2966 = vst [vmem:[#allocation1 + $0x1] ss:$4 sm:$0xff] %v2928_v19 }
 0xfed   :  { %2967 = vst [vmem:[#allocation1 + $0x2] ss:$4 sm:$0xff] %v2929_v26  ;;  %v2920_v4 = vmul.f32 0.59460354, %v2835_v23  ;;  %v2940_v58 = vrot.slane %v2932_v49, 2  ;;  %v2941_v25 = vrot.slane %v2932_v49, 4  ;;  %v3008_v47 = vunpack.c.l.b16 %v2976_v28 }
 0xfee   :  { %v2964_v37 = vld.sshfl [vmem:[#allocation1 + $0x20] sm:$0xff pattern:$0x73625140]  ;;  %v2942_v3 = vrot.slane %v2932_v49, 6 }
 0xfef   :  { %v2930_v6 = vrot.slane %v2920_v4, 2  ;;  %2968 = vst [vmem:[#allocation1 + $0x3] ss:$4 sm:$0xff] %v2920_v4  ;;  %v2977_v12 = vpack.c.bf16 %v2964_v37, %v2964_v37  ;;  %v2912_v37 = vadd.f32 %v5790_v61, %v6917_v18 }
 0xff0   :  { %v2874_v63 = vpop.f32.mrf.mxu2 }
 0xff1   :  { %v6922_v34 = vpop.f32.mrf.mxu3  ;;  %2969 = vst [vmem:[#allocation1 + $0x20] ss:$4 sm:$0xff] %v2930_v6  ;;  %v2875_v17 = vadd.f32 %v5789_v39, %v2874_v63  ;;  %v2910_v39 = vadd.f32 %v5790_v61, %v6915_v36  ;;  %v3009_v6 = vunpack.c.l.b16 %v2977_v12 }
 0xff2   :  { %v2836_v13 = vpop.f32.mrf.mxu1 }
 0xff3   :  { %v2933_v40 = vmul.f32 0.59460354, %v2875_v17  ;;  %v2947_v63 = vrot.slane %v2910_v39, 2  ;;  %v3010_v36 = vpack.c.b16 %v3009_v6, %v3008_v47 }
 0xff5   :  { %v2943_v0 = vrot.slane %v2933_v40, 2 }
 0xff6   :  { %v6924_v59 = vld.sshfl [vmem:[#allocation1] sm:$0xff pattern:$0x73625140] }
 0xff7   :  { %2980 = vst [vmem:[#allocation1] ss:$4 sm:$0xff] %v2931_v52  ;;  %v2948_v52 = vrot.slane %v2910_v39, 4 }
 0xff8   :  { %v2876_v9 = vpop.f32.mrf.mxu2  ;;  %v6926_v10 = vld.sshfl [vmem:[#allocation1 + $0x20] sm:$0xff pattern:$0x73625140]  ;;  %2982 = vst [vmem:[#allocation1 + $0x1] ss:$4 sm:$0xff] %v2937_v46 }
 0xff9   :  { %v2916_v55 = vpop.f32.mrf.mxu3  ;;  %2984 = vst [vmem:[#allocation1 + $0x2] ss:$4 sm:$0xff] %v2938_v35  ;;  %v2949_v35 = vrot.slane %v2910_v39, 6 }
 0xffa   :  { %2986 = vst [vmem:[#allocation1 + $0x3] ss:$4 sm:$0xff] %v2939_v51 }
 0xffb   :  { %2988 = vst [vmem:[#allocation1 + $0x20] ss:$4 sm:$0xff] %v2932_v49 }
0x1001   :  { %v6928_v44 = vpop.f32.mrf.mxu3  ;;  %v2989_v21 = vld.sshfl [vmem:[#allocation1] sm:$0xff pattern:$0x73625140] }
0x1002   :  { %2991 = vst [vmem:[#allocation1] ss:$4 sm:$0xff] %v2940_v58  ;;  %v2990_v42 = vld.sshfl [vmem:[#allocation1 + $0x20] sm:$0xff pattern:$0x73625140]  ;;  %v3002_v2 = vpack.c.bf16 %v2989_v21, %v2989_v21  ;;  %v2979_v58 = vpack.c.bf16 %v6926_v10, %v6926_v10  ;;  %v2950_v21 = vrot.slane %v2912_v37, 2 }
0x1003   :  { %2992 = vst [vmem:[#allocation1 + $0x1] ss:$4 sm:$0xff] %v2941_v25  ;;  %v3003_v7 = vpack.c.bf16 %v2990_v42, %v2990_v42  ;;  %v2978_v25 = vpack.c.bf16 %v6924_v59, %v6924_v59  ;;  %v2951_v42 = vrot.slane %v2912_v37, 4  ;;  %v5738_v10 = vld [vmem:[%s7427_s7 + $0x50] sm:$0xff] }
0x1004   :  { %2993 = vst [vmem:[#allocation1 + $0x2] ss:$4 sm:$0xff] %v2942_v3  ;;  %v3013_v19 = vunpack.c.l.b16 %v3002_v2  ;;  %v2915_v3 = vadd.f32 %v5790_v61, %v6922_v34 }
0x1005   :  { %2994 = vst [vmem:[#allocation1 + $0x3] ss:$4 sm:$0xff] %v2933_v40  ;;  %v3014_v38 = vunpack.c.l.b16 %v3003_v7  ;;  %v5739_v40 = vld [vmem:[%s7427_s7 + $0x58] sm:$0xff]  ;;  %v3039_v7 = vunpack.c.l.b16 %v2979_v58  ;;  %v3038_v12 = vunpack.c.l.b16 %v2978_v25 }
0x1006   :  { %2995 = vst [vmem:[#allocation1 + $0x20] ss:$4 sm:$0xff] %v2943_v0  ;;  %v2952_v0 = vrot.slane %v2912_v37, 6 }
0x1007   :  { %v3015_v26 = vpack.c.b16 %v3014_v38, %v3013_v19  ;;  %v3040_v34 = vpack.c.b16 %v3039_v7, %v3038_v12 }
0x1009   :  { %v6934_v23 = vpop.f32.mrf.mxu3  ;;  %v3020_v4 = vsel %vm487_vm15, %v3015_v26, 0 }
0x100a   :  { %3029 = vmatpush.bf16.xpose.msra.mxu1 %v3020_v4 }
0x100c   :  { %v2996_v13 = vld.sshfl [vmem:[#allocation1] sm:$0xff pattern:$0x73625140] }
0x100d   :  { %3122 = vst [vmem:[#allocation1] ss:$4 sm:$0xff] %v2910_v39  ;;  %v3004_v46 = vpack.c.bf16 %v2996_v13, %v2996_v13  ;;  %v2997_v9 = vld.sshfl [vmem:[#allocation1 + $0x20] sm:$0xff pattern:$0x73625140]  ;;  %v2953_v39 = vrot.slane %v2915_v3, 2 }
0x100e   :  { %3124 = vst [vmem:[#allocation1 + $0x1] ss:$4 sm:$0xff] %v2947_v63  ;;  %v3005_v51 = vpack.c.bf16 %v2997_v9, %v2997_v9 }
0x100f   :  { %3126 = vst [vmem:[#allocation1 + $0x2] ss:$4 sm:$0xff] %v2948_v52  ;;  %v3043_v53 = vunpack.c.l.b16 %v3004_v46 }
0x1010   :  { %3128 = vst [vmem:[#allocation1 + $0x3] ss:$4 sm:$0xff] %v2949_v35  ;;  %v3044_v49 = vunpack.c.l.b16 %v3005_v51 }
0x1011   :  { %v6938_v55 = vpop.f32.mrf.mxu3  ;;  %5466 = vmatmul.msk.bf16.vlgmr.msra.gmra.mxu1 %vm487_vm15, %v3010_v36  ;;  %3130 = vst [vmem:[#allocation1 + $0x20] ss:$4 sm:$0xff] %v2912_v37 }
0x1012   :  { %v3045_v17 = vpack.c.b16 %v3044_v49, %v3043_v53 }
0x1014   :  { %v3050_v18 = vsel %vm487_vm15, %v3045_v17, 0 }
0x1015   :  { %3059 = vmatpush.bf16.xpose.msra.mxu0 %v3050_v18 }
0x1017   :  { %v3131_v2 = vld.sshfl [vmem:[#allocation1] sm:$0xff pattern:$0x73625140] }
0x1018   :  { %3133 = vst [vmem:[#allocation1] ss:$4 sm:$0xff] %v2950_v21  ;;  %v3132_v19 = vld.sshfl [vmem:[#allocation1 + $0x20] sm:$0xff pattern:$0x73625140]  ;;  %v3144_v38 = vpack.c.bf16 %v3131_v2, %v3131_v2 }
0x1019   :  { %v3283_v26 = vpop.f32.mrf.mxu3  ;;  %3134 = vst [vmem:[#allocation1 + $0x1] ss:$4 sm:$0xff] %v2951_v42  ;;  %v3145_v59 = vpack.c.bf16 %v3132_v19, %v3132_v19 }
0x101a   :  { %3135 = vst [vmem:[#allocation1 + $0x2] ss:$4 sm:$0xff] %v2952_v0  ;;  %v3155_v61 = vunpack.c.l.b16 %v3144_v38 }
0x101b   :  { %3136 = vst [vmem:[#allocation1 + $0x3] ss:$4 sm:$0xff] %v2915_v3  ;;  %v3156_v4 = vunpack.c.l.b16 %v3145_v59 }
0x101c   :  { %3137 = vst [vmem:[#allocation1 + $0x20] ss:$4 sm:$0xff] %v2953_v39  ;;  %5467 = vmatmul.msk.bf16.vlgmr.msra.gmra.mxu0 %vm487_vm15, %v3040_v34 }
0x101d   :  { %3313 = vmatpush.bf16.msrb.mxu0 %v5739_v40  ;;  %v3157_v28 = vpack.c.b16 %v3156_v4, %v3155_v61 }
0x101f   :  { %v3162_v6 = vsel %vm641_vm2, %v3157_v28, 0 }
0x1020   :  { %3171 = vmatpush.bf16.msrb.mxu1 %v3162_v6 }
0x1021   :  { %3314 = vmatpush.bf16.msrb.mxu0 %v5738_v10 }
0x1022   :  { %v3138_v63 = vld.sshfl [vmem:[#allocation1] sm:$0xff pattern:$0x73625140] }
0x1023   :  { %v3139_v13 = vld.sshfl [vmem:[#allocation1 + $0x20] sm:$0xff pattern:$0x73625140]  ;;  %v3146_v52 = vpack.c.bf16 %v3138_v63, %v3138_v63 }
0x1024   :  { %v3147_v47 = vpack.c.bf16 %v3139_v13, %v3139_v13 }
0x1025   :  { %v3185_v46 = vunpack.c.l.b16 %v3146_v52 }
0x1026   :  { %v3186_v35 = vunpack.c.l.b16 %v3147_v47 }
0x1028   :  { %v3187_v9 = vpack.c.b16 %v3186_v35, %v3185_v46 }
0x102a   :  { %v3192_v37 = vsel %vm641_vm2, %v3187_v9, 0 }
0x102b   :  { %3201 = vmatpush.bf16.msrb.mxu2 %v3192_v37 }
0x102c   :  { %5499 = vmatmul.msk.bf16.vlgmr.msrb.gmra.mxu0 %vm123_vm1, %v6892_v57 }
0x103c   :  { %5500 = vmatmul.msk.bf16.gmra.mxu0 %vm123_vm1, %v6900_v62 }
0x108e   :  { %v3031_v36 = vpop.f32.mrf.mxu1 }
0x108f   :  { %v3066_v51 = vsel %vm6258_vm4, -1e+30, %v3031_v36 }
0x1090   :  { %v3070_v53 = vsel %vm548_vm5, %v3066_v51, -inf }
0x1091   :  { %3071 = vmax.xlane.f32.xlu1 %v3070_v53 }
0x1096   :  { %v3033_v40 = vpop.f32.mrf.mxu1 }
0x1097   :  { %v3067_v18 = vsel %vm6258_vm4, -1e+30, %v3033_v40 }
0x1098   :  { %v3073_v3 = vsel %vm552_vm7, %v3067_v18, -inf }
0x1099   :  { %v3061_v49 = vpop.f32.mrf.mxu0 }
0x109a   :  { %v3068_v17 = vsel %vm6268_vm8, -1e+30, %v3061_v49 }
0x109b   :  { %v3076_v58 = vsel %vm548_vm5, %v3068_v17, -inf }
0x109c   :  { %3077 = vmax.xlane.f32.xlu2 %v3076_v58 }
0x10a1   :  { %v3063_v25 = vpop.f32.mrf.mxu0 }
0x10a2   :  { %v3069_v21 = vsel %vm6268_vm8, -1e+30, %v3063_v25 }
0x10a3   :  { %v3079_v42 = vsel %vm552_vm7, %v3069_v21, -inf }
0x10a4   :  { %3074 = vmax.xlane.f32.xlu2 %v3073_v3  ;;  %3080 = vmax.xlane.f32.xlu0 %v3079_v42 }
0x10a9   :  { %v6972_v2 = vpop.f32.mrf.mxu0 }
0x10b1   :  { %v6974_v7 = vpop.f32.mrf.mxu0 }
0x10b9   :  { %v6976_v10 = vpop.f32.mrf.mxu0 }
0x10c1   :  { %v3323_v0 = vpop.f32.mrf.mxu0 }
0x1104   :  { %v3072_v19 = vpop.xlane.xlu1 %3071 }
0x1105   :  { %v3082_v38 = vsub.f32 %v3066_v51, %v3072_v19 }
0x1107   :  { %v3086_v26 = vmul.f32 1.442695, %v3082_v38 }
0x1109   :  { %5907 = vpow2.f32 %v3086_v26 }
0x110f   :  { %v5908_v12 = vpop.eup %5907  ;;  %v3078_v59 = vpop.xlane.xlu2 %3077 }
0x1110   :  { %v3094_v39 = vmul.f32 %v5908_v12, %v6287_v60  ;;  %v3084_v34 = vsub.f32 %v3068_v17, %v3078_v59  ;;  %v5740_v17 = vld [vmem:[%s7428_s9 + $0x50] sm:$0xff] }
0x1112   :  { %v3098_v61 = vsel %vm548_vm5, %v3094_v39, 0.0  ;;  %v3090_v4 = vmul.f32 1.442695, %v3084_v34 }
0x1113   :  { %3099 = vadd.xlane.f32.xlu2 %v3098_v61 }
0x1114   :  { %5909 = vpow2.f32 %v3090_v4 }
0x1117   :  { %v3075_v28 = vpop.xlane.xlu2 %3074  ;;  %v3081_v6 = vpop.xlane.xlu0 %3080 }
0x1118   :  { %v3083_v63 = vsub.f32 %v3067_v18, %v3075_v28  ;;  %v3085_v13 = vsub.f32 %v3069_v21, %v3081_v6 }
0x111a   :  { %v5910_v52 = vpop.eup %5909  ;;  %v3088_v47 = vmul.f32 1.442695, %v3083_v63  ;;  %v3092_v46 = vmul.f32 1.442695, %v3085_v13 }
0x111b   :  { %v3096_v35 = vmul.f32 %v5910_v52, %v6301_v16  ;;  %v5741_v16 = vld [vmem:[%s7428_s9 + $0x58] sm:$0xff] }
0x111c   :  { %5911 = vpow2.f32 %v3088_v47  ;;  %3353 = vmatpush.bf16.msra.mxu1 %v5741_v16 }
0x111d   :  { %5913 = vpow2.f32 %v3092_v46  ;;  %v3104_v9 = vsel %vm548_vm5, %v3096_v35, 0.0 }
0x111e   :  { %3105 = vadd.xlane.f32.xlu0 %v3104_v9 }
0x1120   :  { %3354 = vmatpush.bf16.msra.mxu1 %v5740_v17 }
0x1122   :  { %v5912_v60 = vpop.eup %5911 }
0x1123   :  { %v5914_v37 = vpop.eup %5913  ;;  %v3095_v36 = vmul.f32 %v5912_v60, %v6294_v5 }
0x1124   :  { %v3097_v51 = vmul.f32 %v5914_v37, %v6308_v20 }
0x1125   :  { %v3101_v53 = vsel %vm552_vm7, %v3095_v36, 0.0 }
0x1126   :  { %3102 = vadd.xlane.f32.xlu0 %v3101_v53  ;;  %v3107_v49 = vsel %vm552_vm7, %v3097_v51, 0.0 }
0x1127   :  { %3108 = vadd.xlane.f32.xlu1 %v3107_v49 }
0x1186   :  { %v3100_v58 = vpop.xlane.xlu2 %3099 }
0x1187   :  { %5915 = vrcp.f32 %v3100_v58 }
0x118d   :  { %v5916_v40 = vpop.eup %5915 }
0x118e   :  { %v3114_v21 = vmul.f32 %v5916_v40, %v3094_v39 }
0x1190   :  { %v3118_v19 = vpack.c.bf16 %v3114_v21, %v3114_v21 }
0x1191   :  { %v3106_v5 = vpop.xlane.xlu0 %3105 }
0x1192   :  { %5917 = vrcp.f32 %v3106_v5  ;;  %v3150_v61 = vunpack.c.l.b16 %v3118_v19 }
0x1198   :  { %v5918_v25 = vpop.eup %5917 }
0x1199   :  { %v3103_v20 = vpop.xlane.xlu0 %3102  ;;  %v3116_v3 = vmul.f32 %v5918_v25, %v3096_v35 }
0x119a   :  { %v3109_v18 = vpop.xlane.xlu1 %3108  ;;  %5919 = vrcp.f32 %v3103_v20 }
0x119b   :  { %5921 = vrcp.f32 %v3109_v18  ;;  %v3120_v26 = vpack.c.bf16 %v3116_v3, %v3116_v3 }
0x119d   :  { %v3180_v28 = vunpack.c.l.b16 %v3120_v26 }
0x11a0   :  { %v5920_v42 = vpop.eup %5919 }
0x11a1   :  { %v5922_v0 = vpop.eup %5921  ;;  %v3115_v38 = vmul.f32 %v5920_v42, %v3095_v36  ;;  %v5791_v36 = vld [vmem:[%s7453_s22 + $0x5] ss:$0 sm:$0xff] }
0x11a2   :  { %v3117_v12 = vmul.f32 %v5922_v0, %v3097_v51  ;;  %v3279_v49 = vadd.f32 %v5791_v36, %v6934_v23  ;;  %v3277_v16 = vadd.f32 %v5791_v36, %v6928_v44  ;;  %v3282_v20 = vadd.f32 %v5791_v36, %v6938_v55  ;;  %v5792_v55 = vld [vmem:[%s7429_s8 + $0x5] ss:$0 sm:$0xff] }
0x11a3   :  { %v3119_v59 = vpack.c.bf16 %v3115_v38, %v3115_v38 }
0x11a4   :  { %v3121_v34 = vpack.c.bf16 %v3117_v12, %v3117_v12  ;;  %v3366_v5 = vmul.f32 0.59460354, %v3279_v49  ;;  %v3365_v18 = vmul.f32 0.59460354, %v3277_v16  ;;  %v3367_v25 = vmul.f32 0.59460354, %v3282_v20 }
0x11a5   :  { %v3151_v4 = vunpack.c.l.b16 %v3119_v59  ;;  %v3319_v12 = vadd.f32 %v5792_v55, %v6974_v7  ;;  %v5793_v49 = vld [vmem:[%s7430_s10 + $0x5] ss:$0 sm:$0xff] }
0x11a6   :  { %v3181_v6 = vunpack.c.l.b16 %v3121_v34  ;;  %v3371_v21 = vrot.slane %v3365_v18, 2  ;;  %v3372_v42 = vrot.slane %v3365_v18, 4  ;;  %v3373_v0 = vrot.slane %v3365_v18, 6 }
0x11a7   :  { %v3152_v63 = vpack.c.b16 %v3151_v4, %v3150_v61  ;;  %v3377_v44 = vrot.slane %v3367_v25, 2  ;;  %v3374_v26 = vrot.slane %v3366_v5, 2  ;;  %v3375_v59 = vrot.slane %v3366_v5, 4 }
0x11a8   :  { %v3182_v13 = vpack.c.b16 %v3181_v6, %v3180_v28  ;;  %v3376_v61 = vrot.slane %v3366_v5, 6  ;;  %v3317_v28 = vadd.f32 %v5792_v55, %v6972_v2  ;;  %v3379_v6 = vmul.f32 0.59460354, %v3319_v12 }
0x11a9   :  { %5468 = vmatmul.msk.bf16.vlgmr.msrb.gmra.mxu1 %vm548_vm5, %v3152_v63  ;;  %v3322_v63 = vadd.f32 %v5792_v55, %v6976_v10 }
0x11aa   :  { %5469 = vmatmul.msk.bf16.vlgmr.msrb.gmra.mxu2 %vm548_vm5, %v3182_v13  ;;  %v3387_v2 = vrot.slane %v3379_v6, 2  ;;  %v3388_v36 = vrot.slane %v3379_v6, 4  ;;  %v3389_v10 = vrot.slane %v3379_v6, 6 }
0x11b9   :  { %5514 = vmatmul.msk.bf16.vlgmr.msra.gmra.mxu1 %vm123_vm1, %v6892_v57 }
0x11c9   :  { %5515 = vmatmul.msk.bf16.gmra.mxu1 %vm123_vm1, %v6900_v62 }
0x1226   :  { %v3173_v39 = vpop.f32.mrf.mxu1 }
0x1227   :  { %v3212_v52 = vrot.slane %v3173_v39, 2  ;;  %v3213_v47 = vrot.slane %v3173_v39, 4  ;;  %v3214_v46 = vrot.slane %v3173_v39, 6  ;;  %3218 = vst [vmem:[#allocation1] ss:$4 sm:$0xff] %v3173_v39 }
0x1228   :  { %v3378_v39 = vmul.f32 0.59460354, %v3317_v28 }
0x1229   :  { %3220 = vst [vmem:[#allocation1 + $0x1] ss:$4 sm:$0xff] %v3212_v52  ;;  %v3380_v52 = vmul.f32 0.59460354, %v3322_v63 }
0x122a   :  { %3222 = vst [vmem:[#allocation1 + $0x2] ss:$4 sm:$0xff] %v3213_v47  ;;  %v3384_v47 = vrot.slane %v3378_v39, 2 }
0x122b   :  { %3224 = vst [vmem:[#allocation1 + $0x3] ss:$4 sm:$0xff] %v3214_v46  ;;  %v3385_v46 = vrot.slane %v3378_v39, 4 }
0x122d   :  { %v3203_v35 = vpop.f32.mrf.mxu2 }
0x122e   :  { %v3215_v9 = vrot.slane %v3203_v35, 2  ;;  %v3216_v60 = vrot.slane %v3203_v35, 4  ;;  %3228 = vst [vmem:[#allocation1 + $0x21] ss:$4 sm:$0xff] %v3203_v35  ;;  %v3175_v37 = vpop.f32.mrf.mxu1  ;;  %v3217_v51 = vrot.slane %v3203_v35, 6  ;;  %v3386_v35 = vrot.slane %v3378_v39, 6 }
0x122f   :  { %3226 = vst [vmem:[#allocation1 + $0x20] ss:$4 sm:$0xff] %v3175_v37 }
0x1230   :  { %3230 = vst [vmem:[#allocation1 + $0x22] ss:$4 sm:$0xff] %v3215_v9 }
0x1231   :  { %3232 = vst [vmem:[#allocation1 + $0x23] ss:$4 sm:$0xff] %v3216_v60  ;;  %v3390_v60 = vrot.slane %v3380_v52, 2 }
0x1232   :  { %v7001_v53 = vld.sshfl [vmem:[#allocation1] sm:$0xff pattern:$0x73625140] }
0x1233   :  { %3235 = vst [vmem:[#allocation1] ss:$4 sm:$0xff] %v3217_v51 }
0x1235   :  { %v3205_v17 = vpop.f32.mrf.mxu2 }
0x1236   :  { %3236 = vst [vmem:[#allocation1 + $0x1] ss:$4 sm:$0xff] %v3205_v17  ;;  %v7005_v58 = vpop.f32.mrf.mxu1 }
0x1238   :  { %v7008_v40 = vld.sshfl [vmem:[#allocation1 + $0x20] sm:$0xff pattern:$0x73625140] }
0x1239   :  { %3409 = vst [vmem:[#allocation1 + $0x20] ss:$4 sm:$0xff] %v3366_v5 }
0x123d   :  { %v7010_v3 = vld.sshfl [vmem:[#allocation1] sm:$0xff pattern:$0x73625140] }
0x123e   :  { %3401 = vst [vmem:[#allocation1] ss:$4 sm:$0xff] %v3365_v18  ;;  %v3358_v23 = vpop.f32.mrf.mxu1 }
0x123f   :  { %3403 = vst [vmem:[#allocation1 + $0x1] ss:$4 sm:$0xff] %v3371_v21  ;;  %v3359_v5 = vadd.f32 %v5793_v49, %v3358_v23 }
0x1240   :  { %3405 = vst [vmem:[#allocation1 + $0x2] ss:$4 sm:$0xff] %v3372_v42  ;;  %v3411_v19 = vld.sshfl [vmem:[#allocation1 + $0x20] sm:$0xff pattern:$0x73625140]  ;;  %v3357_v42 = vadd.f32 %v5793_v49, %v7005_v58 }
0x1241   :  { %3407 = vst [vmem:[#allocation1 + $0x3] ss:$4 sm:$0xff] %v3373_v0 }
0x1242   :  { %3416 = vst [vmem:[#allocation1 + $0x20] ss:$4 sm:$0xff] %v3377_v44  ;;  %v3424_v44 = vpack.c.bf16 %v3411_v19, %v3411_v19  ;;  %v3396_v63 = vrot.slane %v3357_v42, 6  ;;  %v5470_v19 = vld [vmem:[%s7433_s11 + $0x10] sm:$0xf] }
0x1244   :  { %v3456_v28 = vunpack.c.l.b16 %v3424_v44 }
0x1246   :  { %v3361_v38 = vpop.f32.mrf.mxu1 }
0x1248   :  { %v3410_v34 = vld.sshfl [vmem:[#allocation1] sm:$0xff pattern:$0x73625140] }
0x1249   :  { %3412 = vst [vmem:[#allocation1] ss:$4 sm:$0xff] %v3374_v26  ;;  %v7016_v4 = vld.sshfl [vmem:[#allocation1 + $0x20] sm:$0xff pattern:$0x73625140]  ;;  %v3423_v21 = vpack.c.bf16 %v3410_v34, %v3410_v34  ;;  %v3362_v26 = vadd.f32 %v5793_v49, %v3361_v38 }
0x124a   :  { %3413 = vst [vmem:[#allocation1 + $0x1] ss:$4 sm:$0xff] %v3375_v59  ;;  %v3394_v59 = vrot.slane %v3357_v42, 2 }
0x124b   :  { %3414 = vst [vmem:[#allocation1 + $0x2] ss:$4 sm:$0xff] %v3376_v61  ;;  %v3455_v55 = vunpack.c.l.b16 %v3423_v21 }
0x124c   :  { %3415 = vst [vmem:[#allocation1 + $0x3] ss:$4 sm:$0xff] %v3367_v25 }
0x124d   :  { %3435 = vst [vmem:[#allocation1 + $0x20] ss:$4 sm:$0xff] %v3379_v6  ;;  %v3395_v6 = vrot.slane %v3357_v42, 4 }
0x124e   :  { %v3363_v13 = vpop.f32.mrf.mxu1 }
0x124f   :  { %v3457_v13 = vpack.c.b16 %v3456_v28, %v3455_v55 }
0x1253   :  { %v7020_v7 = vld.sshfl [vmem:[#allocation1] sm:$0xff pattern:$0x73625140] }
0x1254   :  { %3427 = vst [vmem:[#allocation1] ss:$4 sm:$0xff] %v3378_v39  ;;  %v3437_v9 = vld.sshfl [vmem:[#allocation1 + $0x20] sm:$0xff pattern:$0x73625140]  ;;  %v3400_v39 = vrot.slane %v3362_v26, 2 }
0x1255   :  { %3429 = vst [vmem:[#allocation1 + $0x1] ss:$4 sm:$0xff] %v3384_v47  ;;  %v3450_v37 = vpack.c.bf16 %v3437_v9, %v3437_v9  ;;  %v3726_v47 = vsel %vm1178_vm9, %v5470_v19, 0 }
0x1256   :  { %3431 = vst [vmem:[#allocation1 + $0x2] ss:$4 sm:$0xff] %v3385_v46 }
0x1257   :  { %3433 = vst [vmem:[#allocation1 + $0x3] ss:$4 sm:$0xff] %v3386_v35  ;;  %v3461_v18 = vunpack.c.l.b16 %v3450_v37  ;;  %v3397_v35 = vrot.slane %v3359_v5, 2  ;;  %v3398_v37 = vrot.slane %v3359_v5, 4 }
0x1258   :  { %3442 = vst [vmem:[#allocation1 + $0x20] ss:$4 sm:$0xff] %v3390_v60  ;;  %v3425_v60 = vpack.c.bf16 %v7020_v7, %v7020_v7 }
0x125e   :  { %v3436_v51 = vld.sshfl [vmem:[#allocation1] sm:$0xff pattern:$0x73625140] }
0x125f   :  { %3438 = vst [vmem:[#allocation1] ss:$4 sm:$0xff] %v3387_v2  ;;  %v3449_v16 = vpack.c.bf16 %v3436_v51, %v3436_v51  ;;  %v3444_v17 = vld.sshfl [vmem:[#allocation1 + $0x20] sm:$0xff pattern:$0x73625140] }
0x1260   :  { %3439 = vst [vmem:[#allocation1 + $0x1] ss:$4 sm:$0xff] %v3388_v36  ;;  %v3452_v12 = vpack.c.bf16 %v3444_v17, %v3444_v17  ;;  %v3399_v36 = vrot.slane %v3359_v5, 6  ;;  %v3485_v17 = vunpack.c.l.b16 %v3425_v60 }
0x1261   :  { %3440 = vst [vmem:[#allocation1 + $0x2] ss:$4 sm:$0xff] %v3389_v10  ;;  %v3460_v20 = vunpack.c.l.b16 %v3449_v16  ;;  %v3426_v10 = vpack.c.bf16 %v7016_v4, %v7016_v4 }
0x1262   :  { %3441 = vst [vmem:[#allocation1 + $0x3] ss:$4 sm:$0xff] %v3380_v52  ;;  %v3491_v52 = vunpack.c.l.b16 %v3452_v12 }
0x1263   :  { %v3462_v25 = vpack.c.b16 %v3461_v18, %v3460_v20  ;;  %3577 = vst [vmem:[#allocation1 + $0x20] ss:$4 sm:$0xff] %v3359_v5  ;;  %v3486_v18 = vunpack.c.l.b16 %v3426_v10 }
0x1265   :  { %v3467_v0 = vsel %vm487_vm15, %v3462_v25, 0  ;;  %v3487_v21 = vpack.c.b16 %v3486_v18, %v3485_v17 }
0x1266   :  { %3476 = vmatpush.bf16.xpose.msra.mxu2 %v3467_v0 }
0x1269   :  { %v3443_v61 = vld.sshfl [vmem:[#allocation1] sm:$0xff pattern:$0x73625140] }
0x126a   :  { %3569 = vst [vmem:[#allocation1] ss:$4 sm:$0xff] %v3357_v42  ;;  %v3451_v23 = vpack.c.bf16 %v3443_v61, %v3443_v61  ;;  %v3579_v34 = vld.sshfl [vmem:[#allocation1 + $0x20] sm:$0xff pattern:$0x73625140] }
0x126b   :  { %3571 = vst [vmem:[#allocation1 + $0x1] ss:$4 sm:$0xff] %v3394_v59  ;;  %v3592_v9 = vpack.c.bf16 %v3579_v34, %v3579_v34  ;;  %v3242_v59 = vpack.c.bf16 %v7010_v3, %v7010_v3 }
0x126c   :  { %3573 = vst [vmem:[#allocation1 + $0x2] ss:$4 sm:$0xff] %v3395_v6  ;;  %v3490_v58 = vunpack.c.l.b16 %v3451_v23 }
0x126d   :  { %3575 = vst [vmem:[#allocation1 + $0x3] ss:$4 sm:$0xff] %v3396_v63  ;;  %5516 = vmatmul.msk.bf16.vlgmr.msra.gmra.mxu2 %vm487_vm15, %v3457_v13  ;;  %v3603_v16 = vunpack.c.l.b16 %v3592_v9 }
0x126e   :  { %v3492_v38 = vpack.c.b16 %v3491_v52, %v3490_v58  ;;  %3584 = vst [vmem:[#allocation1 + $0x20] ss:$4 sm:$0xff] %v3400_v39 }
0x1270   :  { %v3497_v46 = vsel %vm487_vm15, %v3492_v38, 0 }
0x1271   :  { %3506 = vmatpush.bf16.xpose.msrb.mxu2 %v3497_v46 }
0x1274   :  { %v3578_v2 = vld.sshfl [vmem:[#allocation1] sm:$0xff pattern:$0x73625140] }
0x1275   :  { %3580 = vst [vmem:[#allocation1] ss:$4 sm:$0xff] %v3397_v35  ;;  %v3591_v51 = vpack.c.bf16 %v3578_v2, %v3578_v2  ;;  %v3586_v7 = vld.sshfl [vmem:[#allocation1 + $0x20] sm:$0xff pattern:$0x73625140] }
0x1276   :  { %3581 = vst [vmem:[#allocation1 + $0x1] ss:$4 sm:$0xff] %v3398_v37  ;;  %v3594_v5 = vpack.c.bf16 %v3586_v7, %v3586_v7 }
0x1277   :  { %3582 = vst [vmem:[#allocation1 + $0x2] ss:$4 sm:$0xff] %v3399_v36  ;;  %v3602_v49 = vunpack.c.l.b16 %v3591_v51 }
0x1278   :  { %3583 = vst [vmem:[#allocation1 + $0x3] ss:$4 sm:$0xff] %v3362_v26  ;;  %v3633_v4 = vunpack.c.l.b16 %v3594_v5  ;;  %v3241_v26 = vpack.c.bf16 %v7008_v40, %v7001_v53 }
0x1279   :  { %3735 = vmatpush.bf16.msra.mxu2 %v3726_v47  ;;  %v3604_v20 = vpack.c.b16 %v3603_v16, %v3602_v49 }
0x127b   :  { %v3609_v25 = vsel %vm641_vm2, %v3604_v20, 0 }
0x127c   :  { %3618 = vmatpush.bf16.msrb.mxu3 %v3609_v25 }
0x127d   :  { %5517 = vmatmul.msk.bf16.vlgmr.msrb.gmra.mxu2 %vm487_vm15, %v3487_v21 }
0x127f   :  { %v3585_v42 = vld.sshfl [vmem:[#allocation1] sm:$0xff pattern:$0x73625140] }
0x1280   :  { %v3593_v0 = vpack.c.bf16 %v3585_v42, %v3585_v42 }
0x1282   :  { %v3632_v44 = vunpack.c.l.b16 %v3593_v0 }
0x1284   :  { %v3634_v55 = vpack.c.b16 %v3633_v4, %v3632_v44 }
0x1286   :  { %v3639_v12 = vsel %vm641_vm2, %v3634_v55, 0 }
0x1287   :  { %3648 = vmatpush.bf16.msra.mxu0 %v3639_v12  ;;  %v5743_v12 = vld [vmem:[%s7426_s5 + $0x68] sm:$0xff] }
0x1288   :  { %3774 = vmatpush.bf16.msra.mxu3 %v5743_v12 }
0x128d   :  { %5523 = vmatmul.msk.bf16.vlgmr.msra.gmra.mxu2 %vm487_vm15, %v3241_v26 }
0x129d   :  { %5524 = vmatmul.msk.bf16.gmra.mxu2 %vm487_vm15, %v3242_v59  ;;  %v5745_v59 = vld [vmem:[%s7427_s7 + $0x68] sm:$0xff] }
0x129e   :  { %3814 = vmatpush.bf16.msrb.mxu0 %v5745_v59 }
0x12f0   :  { %v3478_v61 = vpop.f32.mrf.mxu2 }
0x12f1   :  { %v3513_v28 = vsel %vm6258_vm4, -1e+30, %v3478_v61  ;;  %v5744_v61 = vld [vmem:[%s7427_s7 + $0x60] sm:$0xff] }
0x12f2   :  { %v3517_v6 = vsel %vm548_vm5, %v3513_v28, -inf  ;;  %3815 = vmatpush.bf16.msrb.mxu0 %v5744_v61 }
0x12f3   :  { %3518 = vmax.xlane.f32.xlu1 %v3517_v6 }
0x12f8   :  { %v3480_v23 = vpop.f32.mrf.mxu2 }
0x12f9   :  { %v3514_v63 = vsel %vm6258_vm4, -1e+30, %v3480_v23 }
0x12fa   :  { %v3520_v53 = vsel %vm552_vm7, %v3514_v63, -inf }
0x12fb   :  { %3521 = vmax.xlane.f32.xlu2 %v3520_v53 }
0x1300   :  { %v3508_v40 = vpop.f32.mrf.mxu2 }
0x1301   :  { %v3515_v3 = vsel %vm6268_vm8, -1e+30, %v3508_v40 }
0x1302   :  { %v3523_v13 = vsel %vm548_vm5, %v3515_v3, -inf }
0x1303   :  { %3524 = vmax.xlane.f32.xlu0 %v3523_v13 }
0x1308   :  { %v3510_v34 = vpop.f32.mrf.mxu2 }
0x1309   :  { %v3516_v39 = vsel %vm6268_vm8, -1e+30, %v3510_v34 }
0x130a   :  { %v3526_v58 = vsel %vm552_vm7, %v3516_v39, -inf }
0x130b   :  { %3527 = vmax.xlane.f32.xlu1 %v3526_v58 }
0x1310   :  { %v7058_v52 = vpop.f32.mrf.mxu2 }
0x1318   :  { %v7060_v19 = vpop.f32.mrf.mxu2 }
0x1320   :  { %v7062_v38 = vpop.f32.mrf.mxu2 }
0x1328   :  { %v3744_v47 = vpop.f32.mrf.mxu2 }
0x1366   :  { %v3519_v46 = vpop.xlane.xlu1 %3518 }
0x1367   :  { %v3529_v35 = vsub.f32 %v3513_v28, %v3519_v46 }
0x1369   :  { %v3533_v9 = vmul.f32 1.442695, %v3529_v35 }
0x136b   :  { %5923 = vpow2.f32 %v3533_v9 }
0x136e   :  { %v3522_v60 = vpop.xlane.xlu2 %3521 }
0x136f   :  { %v3530_v2 = vsub.f32 %v3514_v63, %v3522_v60 }
0x1371   :  { %v5924_v37 = vpop.eup %5923  ;;  %v3535_v36 = vmul.f32 1.442695, %v3530_v2 }
0x1372   :  { %v3541_v51 = vmul.f32 %v5924_v37, %v6397_v24 }
0x1373   :  { %5925 = vpow2.f32 %v3535_v36 }
0x1374   :  { %v3545_v10 = vsel %vm548_vm5, %v3541_v51, 0.0 }
0x1375   :  { %3546 = vadd.xlane.f32.xlu2 %v3545_v10 }
0x1376   :  { %v3525_v49 = vpop.xlane.xlu0 %3524 }
0x1377   :  { %v3531_v16 = vsub.f32 %v3515_v3, %v3525_v49 }
0x1379   :  { %v5926_v17 = vpop.eup %5925  ;;  %v3537_v20 = vmul.f32 1.442695, %v3531_v16 }
0x137a   :  { %v3542_v18 = vmul.f32 %v5926_v17, %v6404_v33 }
0x137b   :  { %5927 = vpow2.f32 %v3537_v20 }
0x137c   :  { %v3548_v25 = vsel %vm552_vm7, %v3542_v18, 0.0 }
0x137d   :  { %3549 = vadd.xlane.f32.xlu0 %v3548_v25 }
0x137e   :  { %v3528_v21 = vpop.xlane.xlu1 %3527 }
0x137f   :  { %v3532_v7 = vsub.f32 %v3516_v39, %v3528_v21 }
0x1381   :  { %v5928_v5 = vpop.eup %5927  ;;  %v3539_v42 = vmul.f32 1.442695, %v3532_v7 }
0x1382   :  { %v3543_v24 = vmul.f32 %v5928_v5, %v6411_v45  ;;  %v5742_v45 = vld [vmem:[%s7426_s5 + $0x60] sm:$0xff] }
0x1383   :  { %5929 = vpow2.f32 %v3539_v42  ;;  %3775 = vmatpush.bf16.msra.mxu3 %v5742_v45 }
0x1384   :  { %v3551_v0 = vsel %vm548_vm5, %v3543_v24, 0.0 }
0x1385   :  { %3552 = vadd.xlane.f32.xlu1 %v3551_v0 }
0x1389   :  { %v5930_v44 = vpop.eup %5929 }
0x138a   :  { %v3544_v4 = vmul.f32 %v5930_v44, %v6418_v54 }
0x138c   :  { %v3554_v55 = vsel %vm552_vm7, %v3544_v4, 0.0 }
0x138d   :  { %3555 = vadd.xlane.f32.xlu2 %v3554_v55  ;;  %v5747_v55 = vld [vmem:[%s7428_s9 + $0x68] sm:$0xff] }
0x13e8   :  { %v3547_v33 = vpop.xlane.xlu2 %3546 }
0x13e9   :  { %5931 = vrcp.f32 %v3547_v33 }
0x13ef   :  { %v5932_v54 = vpop.eup %5931 }
0x13f0   :  { %v3550_v26 = vpop.xlane.xlu0 %3549  ;;  %v3561_v28 = vmul.f32 %v5932_v54, %v3541_v51  ;;  %v5520_v51 = vld [vmem:[%s7433_s11 + $0x14] sm:$0xf] }
0x13f1   :  { %5933 = vrcp.f32 %v3550_v26  ;;  %v3699_v10 = vsel %vm1178_vm9, %v5520_v51, 0  ;;  %v5746_v26 = vld [vmem:[%s7428_s9 + $0x60] sm:$0xff] }
0x13f2   :  { %v3565_v23 = vpack.c.bf16 %v3561_v28, %v3561_v28  ;;  %3708 = vmatpush.bf16.msrb.mxu1 %v3699_v10 }
0x13f4   :  { %v3597_v3 = vunpack.c.l.b16 %v3565_v23 }
0x13f6   :  { %3854 = vmatpush.bf16.msra.mxu1 %v5747_v55 }
0x13f7   :  { %v5934_v6 = vpop.eup %5933 }
0x13f8   :  { %v3562_v63 = vmul.f32 %v5934_v6, %v3542_v18  ;;  %v3553_v53 = vpop.xlane.xlu1 %3552 }
0x13f9   :  { %5935 = vrcp.f32 %v3553_v53 }
0x13fa   :  { %v3566_v40 = vpack.c.bf16 %v3562_v63, %v3562_v63  ;;  %3855 = vmatpush.bf16.msra.mxu1 %v5746_v26 }
0x13fc   :  { %v3598_v13 = vunpack.c.l.b16 %v3566_v40 }
0x13fe   :  { %v3599_v34 = vpack.c.b16 %v3598_v13, %v3597_v3 }
0x13ff   :  { %v5936_v58 = vpop.eup %5935 }
0x1400   :  { %5518 = vmatmul.msk.bf16.vlgmr.msrb.gmra.mxu3 %vm548_vm5, %v3599_v34  ;;  %v3556_v39 = vpop.xlane.xlu2 %3555  ;;  %v3563_v47 = vmul.f32 %v5936_v58, %v3543_v24  ;;  %v5794_v24 = vld [vmem:[%s7453_s22 + $0x6] ss:$0 sm:$0xff] }
0x1401   :  { %5937 = vrcp.f32 %v3556_v39  ;;  %v5795_v58 = vld [vmem:[%s7429_s8 + $0x6] ss:$0 sm:$0xff] }
0x1402   :  { %v3567_v35 = vpack.c.bf16 %v3563_v47, %v3563_v47 }
0x1404   :  { %v3627_v2 = vunpack.c.l.b16 %v3567_v35 }
0x1407   :  { %v5938_v46 = vpop.eup %5937 }
0x1408   :  { %v3564_v9 = vmul.f32 %v5938_v46, %v3544_v4 }
0x140a   :  { %v3568_v60 = vpack.c.bf16 %v3564_v9, %v3564_v9 }
0x140c   :  { %v3628_v37 = vunpack.c.l.b16 %v3568_v60 }
0x140e   :  { %v3629_v36 = vpack.c.b16 %v3628_v37, %v3627_v2 }
0x1410   :  { %5519 = vmatmul.msk.bf16.vlgmr.msra.gmra.mxu0 %vm548_vm5, %v3629_v36  ;;  %5538 = vmatmul.msk.bf16.vlgmr.msra.gmra.mxu3 %vm123_vm1, %v6892_v57 }
0x1420   :  { %5539 = vmatmul.msk.bf16.gmra.mxu3 %vm123_vm1, %v6900_v62  ;;  %5553 = vmatmul.msk.bf16.vlgmr.msrb.gmra.mxu0 %vm123_vm1, %v6892_v57 }
0x1430   :  { %5554 = vmatmul.msk.bf16.gmra.mxu0 %vm123_vm1, %v6900_v62 }
0x1483   :  { %v3620_v49 = vpop.f32.mrf.mxu3 }
0x1484   :  { %v3659_v16 = vrot.slane %v3620_v49, 2  ;;  %v3660_v17 = vrot.slane %v3620_v49, 4  ;;  %v3661_v20 = vrot.slane %v3620_v49, 6  ;;  %3665 = vst [vmem:[#allocation1] ss:$4 sm:$0xff] %v3620_v49 }
0x1486   :  { %3667 = vst [vmem:[#allocation1 + $0x1] ss:$4 sm:$0xff] %v3659_v16 }
0x1487   :  { %3669 = vst [vmem:[#allocation1 + $0x2] ss:$4 sm:$0xff] %v3660_v17 }
0x1488   :  { %3671 = vst [vmem:[#allocation1 + $0x3] ss:$4 sm:$0xff] %v3661_v20 }
0x148b   :  { %v3622_v18 = vpop.f32.mrf.mxu3 }
0x148c   :  { %3673 = vst [vmem:[#allocation1 + $0x20] ss:$4 sm:$0xff] %v3622_v18 }
0x148d   :  { %v3650_v25 = vpop.f32.mrf.mxu0 }
0x148e   :  { %v3662_v21 = vrot.slane %v3650_v25, 2  ;;  %v3663_v7 = vrot.slane %v3650_v25, 4  ;;  %v3664_v5 = vrot.slane %v3650_v25, 6  ;;  %3675 = vst [vmem:[#allocation1 + $0x21] ss:$4 sm:$0xff] %v3650_v25 }
0x148f   :  { %v3680_v42 = vld.sshfl [vmem:[#allocation1] sm:$0xff pattern:$0x73625140] }
0x1490   :  { %3682 = vst [vmem:[#allocation1] ss:$4 sm:$0xff] %v3664_v5 }
0x1491   :  { %3677 = vst [vmem:[#allocation1 + $0x22] ss:$4 sm:$0xff] %v3662_v21 }
0x1492   :  { %3679 = vst [vmem:[#allocation1 + $0x23] ss:$4 sm:$0xff] %v3663_v7 }
0x1493   :  { %v3777_v0 = vpop.f32.mrf.mxu3 }
0x1494   :  { %v3778_v44 = vadd.f32 %v5794_v24, %v3777_v0 }
0x1495   :  { %v3652_v4 = vpop.f32.mrf.mxu0 }
0x1496   :  { %3683 = vst [vmem:[#allocation1 + $0x1] ss:$4 sm:$0xff] %v3652_v4  ;;  %v3866_v33 = vmul.f32 0.59460354, %v3778_v44 }
0x1498   :  { %v3872_v61 = vrot.slane %v3866_v33, 2  ;;  %v3873_v23 = vrot.slane %v3866_v33, 4  ;;  %v3874_v53 = vrot.slane %v3866_v33, 6 }
0x1499   :  { %v3681_v12 = vld.sshfl [vmem:[#allocation1 + $0x20] sm:$0xff pattern:$0x73625140] }
0x149a   :  { %v3688_v45 = vpack.c.bf16 %v3681_v12, %v3680_v42  ;;  %v5751_v42 = vld [vmem:[%s7427_s7 + $0x78] sm:$0xff] }
0x149b   :  { %v3779_v59 = vpop.f32.mrf.mxu3 }
0x149c   :  { %5521 = vmatmul.msk.bf16.vlgmr.msrb.gmra.mxu1 %vm487_vm15, %v3688_v45  ;;  %v3780_v54 = vadd.f32 %v5794_v24, %v3779_v59 }
0x149d   :  { %v3684_v28 = vld.sshfl [vmem:[#allocation1] sm:$0xff pattern:$0x73625140]  ;;  %v3817_v6 = vpop.f32.mrf.mxu0  ;;  %4291 = vmatpush.bf16.msrb.mxu1 %v5751_v42 }
0x149e   :  { %3902 = vst [vmem:[#allocation1] ss:$4 sm:$0xff] %v3866_v33  ;;  %v3867_v63 = vmul.f32 0.59460354, %v3780_v54  ;;  %v3689_v60 = vpack.c.bf16 %v3684_v28, %v3684_v28  ;;  %v3818_v2 = vadd.f32 %v5795_v58, %v3817_v6 }
0x149f   :  { %3904 = vst [vmem:[#allocation1 + $0x1] ss:$4 sm:$0xff] %v3872_v61 }
0x14a0   :  { %3906 = vst [vmem:[#allocation1 + $0x2] ss:$4 sm:$0xff] %v3873_v23  ;;  %v3875_v39 = vrot.slane %v3867_v63, 2  ;;  %v3876_v46 = vrot.slane %v3867_v63, 4  ;;  %v3877_v35 = vrot.slane %v3867_v63, 6 }
0x14a1   :  { %3908 = vst [vmem:[#allocation1 + $0x3] ss:$4 sm:$0xff] %v3874_v53  ;;  %v3879_v10 = vmul.f32 0.59460354, %v3818_v2 }
0x14a2   :  { %3910 = vst [vmem:[#allocation1 + $0x20] ss:$4 sm:$0xff] %v3867_v63 }
0x14a3   :  { %v3782_v40 = vpop.f32.mrf.mxu3  ;;  %v3885_v16 = vrot.slane %v3879_v10, 2  ;;  %v3886_v20 = vrot.slane %v3879_v10, 4  ;;  %v3887_v18 = vrot.slane %v3879_v10, 6 }
0x14a4   :  { %v3783_v3 = vadd.f32 %v5794_v24, %v3782_v40  ;;  %v5750_v24 = vld [vmem:[%s7427_s7 + $0x70] sm:$0xff] }
0x14a5   :  { %v3819_v13 = vpop.f32.mrf.mxu0  ;;  %4292 = vmatpush.bf16.msrb.mxu1 %v5750_v24 }
0x14a6   :  { %v3868_v34 = vmul.f32 0.59460354, %v3783_v3  ;;  %v3820_v49 = vadd.f32 %v5795_v58, %v3819_v13 }
0x14a8   :  { %v3911_v47 = vld.sshfl [vmem:[#allocation1] sm:$0xff pattern:$0x73625140]  ;;  %v3878_v9 = vrot.slane %v3868_v34, 2  ;;  %v3880_v7 = vmul.f32 0.59460354, %v3820_v49 }
0x14a9   :  { %3913 = vst [vmem:[#allocation1] ss:$4 sm:$0xff] %v3875_v39  ;;  %v3912_v36 = vld.sshfl [vmem:[#allocation1 + $0x20] sm:$0xff pattern:$0x73625140]  ;;  %v3924_v63 = vpack.c.bf16 %v3911_v47, %v3911_v47 }
0x14aa   :  { %3914 = vst [vmem:[#allocation1 + $0x1] ss:$4 sm:$0xff] %v3876_v46  ;;  %v3888_v0 = vrot.slane %v3880_v7, 2  ;;  %v3889_v4 = vrot.slane %v3880_v7, 4  ;;  %v3890_v33 = vrot.slane %v3880_v7, 6  ;;  %v3925_v6 = vpack.c.bf16 %v3912_v36, %v3912_v36 }
0x14ab   :  { %3915 = vst [vmem:[#allocation1 + $0x2] ss:$4 sm:$0xff] %v3877_v35  ;;  %v3784_v37 = vpop.f32.mrf.mxu3  ;;  %v3956_v3 = vunpack.c.l.b16 %v3924_v63 }
0x14ac   :  { %3916 = vst [vmem:[#allocation1 + $0x3] ss:$4 sm:$0xff] %v3868_v34  ;;  %5522 = vmatmul.msk.bf16.gmra.mxu1 %vm487_vm15, %v3689_v60  ;;  %v3957_v53 = vunpack.c.l.b16 %v3925_v6 }
0x14ad   :  { %v3822_v51 = vpop.f32.mrf.mxu0  ;;  %3917 = vst [vmem:[#allocation1 + $0x20] ss:$4 sm:$0xff] %v3878_v9 }
0x14ae   :  { %v3823_v5 = vadd.f32 %v5795_v58, %v3822_v51  ;;  %v3958_v58 = vpack.c.b16 %v3957_v53, %v3956_v3 }
0x14b0   :  { %v3881_v44 = vmul.f32 0.59460354, %v3823_v5 }
0x14b2   :  { %v3891_v59 = vrot.slane %v3881_v44, 2 }
0x14b3   :  { %v3918_v17 = vld.sshfl [vmem:[#allocation1] sm:$0xff pattern:$0x73625140] }
0x14b4   :  { %3928 = vst [vmem:[#allocation1] ss:$4 sm:$0xff] %v3879_v10  ;;  %v3919_v21 = vld.sshfl [vmem:[#allocation1 + $0x20] sm:$0xff pattern:$0x73625140]  ;;  %v3926_v47 = vpack.c.bf16 %v3918_v17, %v3918_v17 }
0x14b5   :  { %3930 = vst [vmem:[#allocation1 + $0x1] ss:$4 sm:$0xff] %v3885_v16  ;;  %v3824_v25 = vpop.f32.mrf.mxu0  ;;  %v3927_v60 = vpack.c.bf16 %v3919_v21, %v3919_v21  ;;  %v5796_v17 = vld [vmem:[%s7430_s10 + $0x6] ss:$0 sm:$0xff] }
0x14b6   :  { %3932 = vst [vmem:[#allocation1 + $0x2] ss:$4 sm:$0xff] %v3886_v20  ;;  %v3986_v36 = vunpack.c.l.b16 %v3926_v47 }
0x14b7   :  { %3934 = vst [vmem:[#allocation1 + $0x3] ss:$4 sm:$0xff] %v3887_v18  ;;  %v3987_v37 = vunpack.c.l.b16 %v3927_v60 }
0x14b8   :  { %3936 = vst [vmem:[#allocation1 + $0x20] ss:$4 sm:$0xff] %v3880_v7 }
0x14b9   :  { %v3988_v51 = vpack.c.b16 %v3987_v37, %v3986_v36 }
0x14bc   :  { %5568 = vmatmul.msk.bf16.vlgmr.msra.gmra.mxu1 %vm123_vm1, %v6892_v57 }
0x14be   :  { %v3937_v55 = vld.sshfl [vmem:[#allocation1] sm:$0xff pattern:$0x73625140] }
0x14bf   :  { %v3938_v12 = vld.sshfl [vmem:[#allocation1 + $0x20] sm:$0xff pattern:$0x73625140]  ;;  %v3950_v26 = vpack.c.bf16 %v3937_v55, %v3937_v55  ;;  %3939 = vst [vmem:[#allocation1] ss:$4 sm:$0xff] %v3888_v0 }
0x14c0   :  { %v3951_v45 = vpack.c.bf16 %v3938_v12, %v3938_v12  ;;  %3940 = vst [vmem:[#allocation1 + $0x1] ss:$4 sm:$0xff] %v3889_v4 }
0x14c1   :  { %3941 = vst [vmem:[#allocation1 + $0x2] ss:$4 sm:$0xff] %v3890_v33  ;;  %v3961_v54 = vunpack.c.l.b16 %v3950_v26 }
0x14c2   :  { %v3962_v61 = vunpack.c.l.b16 %v3951_v45  ;;  %3942 = vst [vmem:[#allocation1 + $0x3] ss:$4 sm:$0xff] %v3881_v44 }
0x14c3   :  { %3943 = vst [vmem:[#allocation1 + $0x20] ss:$4 sm:$0xff] %v3891_v59 }
0x14c4   :  { %v3963_v28 = vpack.c.b16 %v3962_v61, %v3961_v54 }
0x14c6   :  { %v3968_v23 = vsel %vm487_vm15, %v3963_v28, 0 }
0x14c7   :  { %3977 = vmatpush.bf16.xpose.msrb.mxu2 %v3968_v23 }
0x14c9   :  { %v3944_v40 = vld.sshfl [vmem:[#allocation1] sm:$0xff pattern:$0x73625140] }
0x14ca   :  { %v3945_v13 = vld.sshfl [vmem:[#allocation1 + $0x20] sm:$0xff pattern:$0x73625140]  ;;  %v3952_v34 = vpack.c.bf16 %v3944_v40, %v3944_v40 }
0x14cb   :  { %v3953_v39 = vpack.c.bf16 %v3945_v13, %v3945_v13 }
0x14cc   :  { %5569 = vmatmul.msk.bf16.gmra.mxu1 %vm123_vm1, %v6900_v62  ;;  %v3991_v46 = vunpack.c.l.b16 %v3952_v34 }
0x14cd   :  { %v3992_v35 = vunpack.c.l.b16 %v3953_v39 }
0x14ce   :  { %5570 = vmatmul.msk.bf16.vlgmr.msrb.gmra.mxu2 %vm487_vm15, %v3958_v58 }
0x14cf   :  { %v3993_v9 = vpack.c.b16 %v3992_v35, %v3991_v46 }
0x14d1   :  { %v3998_v2 = vsel %vm487_vm15, %v3993_v9, 0 }
0x14d2   :  { %4007 = vmatpush.bf16.xpose.msrb.mxu3 %v3998_v2 }
0x14d9   :  { %5571 = vmatmul.msk.bf16.vlgmr.msrb.gmra.mxu3 %vm487_vm15, %v3988_v51 }
0x14dc   :  { %5605 = vmatmul.msk.bf16.vlgmr.msrb.gmra.mxu1 %vm123_vm1, %v6892_v57 }
0x14ec   :  { %5606 = vmatmul.msk.bf16.gmra.mxu1 %vm123_vm1, %v6900_v62 }
0x1519   :  { %v7130_v10 = vpop.f32.mrf.mxu1 }
0x1521   :  { %v7132_v49 = vpop.f32.mrf.mxu1 }
0x1529   :  { %v7134_v16 = vpop.f32.mrf.mxu1 }
0x1531   :  { %v3717_v20 = vpop.f32.mrf.mxu1 }
0x1539   :  { %v3857_v18 = vpop.f32.mrf.mxu1 }
0x153a   :  { %v3858_v25 = vadd.f32 %v5796_v17, %v3857_v18 }
0x153c   :  { %v3895_v21 = vrot.slane %v3858_v25, 2  ;;  %v3896_v7 = vrot.slane %v3858_v25, 4  ;;  %v3897_v5 = vrot.slane %v3858_v25, 6  ;;  %4070 = vst [vmem:[#allocation1] ss:$4 sm:$0xff] %v3858_v25 }
0x153e   :  { %4072 = vst [vmem:[#allocation1 + $0x1] ss:$4 sm:$0xff] %v3895_v21 }
0x153f   :  { %4074 = vst [vmem:[#allocation1 + $0x2] ss:$4 sm:$0xff] %v3896_v7 }
0x1540   :  { %4076 = vst [vmem:[#allocation1 + $0x3] ss:$4 sm:$0xff] %v3897_v5 }
0x1541   :  { %v3859_v42 = vpop.f32.mrf.mxu1 }
0x1542   :  { %v3860_v24 = vadd.f32 %v5796_v17, %v3859_v42 }
0x1544   :  { %v3898_v0 = vrot.slane %v3860_v24, 2  ;;  %4078 = vst [vmem:[#allocation1 + $0x20] ss:$4 sm:$0xff] %v3860_v24  ;;  %v3899_v44 = vrot.slane %v3860_v24, 4  ;;  %v3900_v4 = vrot.slane %v3860_v24, 6 }
0x1547   :  { %v4079_v55 = vld.sshfl [vmem:[#allocation1] sm:$0xff pattern:$0x73625140] }
0x1548   :  { %4081 = vst [vmem:[#allocation1] ss:$4 sm:$0xff] %v3898_v0  ;;  %v4092_v26 = vpack.c.bf16 %v4079_v55, %v4079_v55 }
0x1549   :  { %v3862_v33 = vpop.f32.mrf.mxu1  ;;  %4082 = vst [vmem:[#allocation1 + $0x1] ss:$4 sm:$0xff] %v3899_v44 }
0x154a   :  { %v3863_v12 = vadd.f32 %v5796_v17, %v3862_v33  ;;  %4083 = vst [vmem:[#allocation1 + $0x2] ss:$4 sm:$0xff] %v3900_v4  ;;  %v4103_v61 = vunpack.c.l.b16 %v4092_v26 }
0x154b   :  { %v4080_v45 = vld.sshfl [vmem:[#allocation1 + $0x20] sm:$0xff pattern:$0x73625140] }
0x154c   :  { %v3901_v59 = vrot.slane %v3863_v12, 2  ;;  %v4093_v54 = vpack.c.bf16 %v4080_v45, %v4080_v45  ;;  %4084 = vst [vmem:[#allocation1 + $0x3] ss:$4 sm:$0xff] %v3863_v12 }
0x154e   :  { %v4104_v28 = vunpack.c.l.b16 %v4093_v54  ;;  %4085 = vst [vmem:[#allocation1 + $0x20] ss:$4 sm:$0xff] %v3901_v59 }
0x1550   :  { %v4105_v6 = vpack.c.b16 %v4104_v28, %v4103_v61 }
0x1551   :  { %v3979_v23 = vpop.f32.mrf.mxu2  ;;  %v3864_v63 = vpop.f32.mrf.mxu1 }
0x1552   :  { %v4014_v53 = vsel %vm6258_vm4, -1e+30, %v3979_v23  ;;  %v4110_v40 = vsel %vm641_vm2, %v4105_v6, 0 }
0x1553   :  { %v4018_v3 = vsel %vm548_vm5, %v4014_v53, -inf  ;;  %4119 = vmatpush.bf16.msra.mxu0 %v4110_v40  ;;  %v4086_v13 = vld.sshfl [vmem:[#allocation1] sm:$0xff pattern:$0x73625140] }
0x1554   :  { %4019 = vmax.xlane.f32.xlu0 %v4018_v3  ;;  %v4094_v34 = vpack.c.bf16 %v4086_v13, %v4086_v13 }
0x1555   :  { %v4087_v39 = vld.sshfl [vmem:[#allocation1 + $0x20] sm:$0xff pattern:$0x73625140] }
0x1556   :  { %v4095_v58 = vpack.c.bf16 %v4087_v39, %v4087_v39  ;;  %v4133_v46 = vunpack.c.l.b16 %v4094_v34 }
0x1558   :  { %v4134_v35 = vunpack.c.l.b16 %v4095_v58 }
0x1559   :  { %v3981_v9 = vpop.f32.mrf.mxu2  ;;  %v7143_v60 = vpop.f32.mrf.mxu1 }
0x155a   :  { %v4015_v2 = vsel %vm6258_vm4, -1e+30, %v3981_v9  ;;  %v4135_v47 = vpack.c.b16 %v4134_v35, %v4133_v46  ;;  %v5753_v9 = vld [vmem:[%s7428_s9 + $0x78] sm:$0xff] }
0x155b   :  { %v4021_v37 = vsel %vm552_vm7, %v4015_v2, -inf }
0x155c   :  { %v4009_v36 = vpop.f32.mrf.mxu3  ;;  %4022 = vmax.xlane.f32.xlu1 %v4021_v37  ;;  %v4140_v51 = vsel %vm641_vm2, %v4135_v47, 0 }
0x155d   :  { %v4016_v20 = vsel %vm6268_vm8, -1e+30, %v4009_v36  ;;  %4149 = vmatpush.bf16.msra.mxu2 %v4140_v51 }
0x155e   :  { %v4024_v17 = vsel %vm548_vm5, %v4016_v20, -inf }
0x155f   :  { %4025 = vmax.xlane.f32.xlu2 %v4024_v17 }
0x1561   :  { %v7152_v18 = vpop.f32.mrf.mxu1  ;;  %4331 = vmatpush.bf16.msrb.mxu2 %v5753_v9 }
0x1564   :  { %v4011_v25 = vpop.f32.mrf.mxu3 }
0x1565   :  { %v4017_v21 = vsel %vm6268_vm8, -1e+30, %v4011_v25 }
0x1566   :  { %v4027_v7 = vsel %vm552_vm7, %v4017_v21, -inf }
0x1567   :  { %4028 = vmax.xlane.f32.xlu0 %v4027_v7 }
0x1569   :  { %v7157_v5 = vpop.f32.mrf.mxu1 }
0x1571   :  { %v4301_v42 = vpop.f32.mrf.mxu1 }
0x15c7   :  { %v4020_v24 = vpop.xlane.xlu0 %4019 }
0x15c8   :  { %v4030_v0 = vsub.f32 %v4014_v53, %v4020_v24 }
0x15ca   :  { %v4034_v44 = vmul.f32 1.442695, %v4030_v0 }
0x15cc   :  { %5939 = vpow2.f32 %v4034_v44 }
0x15cf   :  { %v4023_v4 = vpop.xlane.xlu1 %4022 }
0x15d0   :  { %v4031_v55 = vsub.f32 %v4015_v2, %v4023_v4  ;;  %v5752_v2 = vld [vmem:[%s7428_s9 + $0x70] sm:$0xff] }
0x15d1   :  { %4332 = vmatpush.bf16.msrb.mxu2 %v5752_v2 }
0x15d2   :  { %v5940_v33 = vpop.eup %5939  ;;  %v4026_v12 = vpop.xlane.xlu2 %4025  ;;  %v4036_v26 = vmul.f32 1.442695, %v4031_v55 }
0x15d3   :  { %v4032_v45 = vsub.f32 %v4016_v20, %v4026_v12  ;;  %v4042_v59 = vmul.f32 %v5940_v33, %v6516_v32 }
0x15d4   :  { %5941 = vpow2.f32 %v4036_v26 }
0x15d5   :  { %v4038_v54 = vmul.f32 1.442695, %v4032_v45  ;;  %v4046_v61 = vsel %vm548_vm5, %v4042_v59, 0.0 }
0x15d6   :  { %4047 = vadd.xlane.f32.xlu1 %v4046_v61 }
0x15d7   :  { %5943 = vpow2.f32 %v4038_v54 }
0x15da   :  { %v5942_v28 = vpop.eup %5941  ;;  %v4029_v6 = vpop.xlane.xlu0 %4028 }
0x15db   :  { %v4033_v23 = vsub.f32 %v4017_v21, %v4029_v6  ;;  %v4043_v63 = vmul.f32 %v5942_v28, %v6523_v43  ;;  %v5749_v43 = vld [vmem:[%s7426_s5 + $0x78] sm:$0xff] }
0x15dc   :  { %4251 = vmatpush.bf16.msrb.mxu0 %v5749_v43 }
0x15dd   :  { %v5944_v53 = vpop.eup %5943  ;;  %v4040_v40 = vmul.f32 1.442695, %v4033_v23  ;;  %v4049_v3 = vsel %vm552_vm7, %v4043_v63, 0.0 }
0x15de   :  { %v4044_v13 = vmul.f32 %v5944_v53, %v6530_v56  ;;  %4050 = vadd.xlane.f32.xlu2 %v4049_v3  ;;  %v5748_v56 = vld [vmem:[%s7426_s5 + $0x70] sm:$0xff] }
0x15df   :  { %5945 = vpow2.f32 %v4040_v40 }
0x15e0   :  { %v4052_v32 = vsel %vm548_vm5, %v4044_v13, 0.0  ;;  %4252 = vmatpush.bf16.msrb.mxu0 %v5748_v56 }
0x15e1   :  { %4053 = vadd.xlane.f32.xlu0 %v4052_v32 }
0x15e5   :  { %v5946_v34 = vpop.eup %5945 }
0x15e6   :  { %v4045_v39 = vmul.f32 %v5946_v34, %v6537_v1 }
0x15e8   :  { %v4055_v58 = vsel %vm552_vm7, %v4045_v39, 0.0 }
0x15e9   :  { %4056 = vadd.xlane.f32.xlu1 %v4055_v58 }
0x1649   :  { %v4048_v46 = vpop.xlane.xlu1 %4047 }
0x164a   :  { %5947 = vrcp.f32 %v4048_v46 }
0x1650   :  { %v5948_v1 = vpop.eup %5947 }
0x1651   :  { %v4051_v35 = vpop.xlane.xlu2 %4050  ;;  %v4062_v37 = vmul.f32 %v5948_v1, %v4042_v59  ;;  %v5574_v59 = vld [vmem:[%s7433_s11 + $0x18] sm:$0xf] }
0x1652   :  { %5949 = vrcp.f32 %v4051_v35  ;;  %v4200_v54 = vsel %vm1178_vm9, %v5574_v59, 0 }
0x1653   :  { %v4066_v51 = vpack.c.bf16 %v4062_v37, %v4062_v37  ;;  %4209 = vmatpush.bf16.msra.mxu3 %v4200_v54 }
0x1654   :  { %v4054_v47 = vpop.xlane.xlu0 %4053 }
0x1655   :  { %5951 = vrcp.f32 %v4054_v47  ;;  %v4098_v7 = vunpack.c.l.b16 %v4066_v51 }
0x1658   :  { %v5950_v36 = vpop.eup %5949 }
0x1659   :  { %v4063_v20 = vmul.f32 %v5950_v36, %v4043_v63 }
0x165b   :  { %v4067_v17 = vpack.c.bf16 %v4063_v20, %v4063_v20  ;;  %v5952_v21 = vpop.eup %5951 }
0x165c   :  { %v4057_v25 = vpop.xlane.xlu1 %4056  ;;  %v4064_v0 = vmul.f32 %v5952_v21, %v4044_v13  ;;  %v5798_v13 = vld [vmem:[%s7453_s22 + $0x7] ss:$0 sm:$0xff] }
0x165d   :  { %v4099_v42 = vunpack.c.l.b16 %v4067_v17  ;;  %5953 = vrcp.f32 %v4057_v25 }
0x165e   :  { %v4068_v4 = vpack.c.bf16 %v4064_v0, %v4064_v0 }
0x165f   :  { %v4100_v24 = vpack.c.b16 %v4099_v42, %v4098_v7 }
0x1660   :  { %v4128_v12 = vunpack.c.l.b16 %v4068_v4 }
0x1661   :  { %5572 = vmatmul.msk.bf16.vlgmr.msra.gmra.mxu0 %vm548_vm5, %v4100_v24  ;;  %v5797_v24 = vld [vmem:[%s7429_s8 + $0x7] ss:$0 sm:$0xff] }
0x1662   :  { %v4297_v0 = vadd.f32 %v5797_v24, %v7152_v18  ;;  %v4300_v18 = vadd.f32 %v5797_v24, %v7157_v5  ;;  %v5799_v5 = vld [vmem:[%s7430_s10 + $0x7] ss:$0 sm:$0xff] }
0x1663   :  { %v5954_v44 = vpop.eup %5953 }
0x1664   :  { %v4065_v55 = vmul.f32 %v5954_v44, %v4045_v39  ;;  %v4357_v59 = vmul.f32 0.59460354, %v4297_v0 }
0x1666   :  { %v4069_v33 = vpack.c.bf16 %v4065_v55, %v4065_v55 }
0x1668   :  { %v4129_v26 = vunpack.c.l.b16 %v4069_v33 }
0x166a   :  { %v4130_v45 = vpack.c.b16 %v4129_v26, %v4128_v12 }
0x166c   :  { %5573 = vmatmul.msk.bf16.vlgmr.msra.gmra.mxu2 %vm548_vm5, %v4130_v45  ;;  %v4295_v45 = vadd.f32 %v5797_v24, %v7143_v60 }
0x1671   :  { %5590 = vmatmul.msk.bf16.vlgmr.msrb.gmra.mxu0 %vm123_vm1, %v6892_v57 }
0x167c   :  { %5620 = vmatmul.msk.bf16.vlgmr.msrb.gmra.mxu2 %vm123_vm1, %v6892_v57 }
0x1681   :  { %5591 = vmatmul.msk.bf16.gmra.mxu0 %vm123_vm1, %v6900_v62 }
0x168c   :  { %5621 = vmatmul.msk.bf16.gmra.mxu2 %vm123_vm1, %v6900_v62 }
0x16de   :  { %v4121_v61 = vpop.f32.mrf.mxu0 }
0x16df   :  { %v4160_v28 = vrot.slane %v4121_v61, 2  ;;  %v4161_v6 = vrot.slane %v4121_v61, 4  ;;  %v4162_v23 = vrot.slane %v4121_v61, 6  ;;  %4166 = vst [vmem:[#allocation1] ss:$4 sm:$0xff] %v4121_v61 }
0x16e0   :  { %v4356_v61 = vmul.f32 0.59460354, %v4295_v45 }
0x16e1   :  { %4168 = vst [vmem:[#allocation1 + $0x1] ss:$4 sm:$0xff] %v4160_v28  ;;  %v4358_v28 = vmul.f32 0.59460354, %v4300_v18 }
0x16e2   :  { %4170 = vst [vmem:[#allocation1 + $0x2] ss:$4 sm:$0xff] %v4161_v6  ;;  %v4362_v6 = vrot.slane %v4356_v61, 2 }
0x16e3   :  { %4172 = vst [vmem:[#allocation1 + $0x3] ss:$4 sm:$0xff] %v4162_v23 }
0x16e6   :  { %v4123_v57 = vpop.f32.mrf.mxu0 }
0x16e7   :  { %4174 = vst [vmem:[#allocation1 + $0x20] ss:$4 sm:$0xff] %v4123_v57  ;;  %v4363_v57 = vrot.slane %v4356_v61, 4 }
0x16ea   :  { %v4181_v32 = vld.sshfl [vmem:[#allocation1] sm:$0xff pattern:$0x73625140] }
0x16ee   :  { %v4254_v63 = vpop.f32.mrf.mxu0 }
0x16ef   :  { %v4151_v53 = vpop.f32.mrf.mxu2  ;;  %v4255_v39 = vadd.f32 %v5798_v13, %v4254_v63 }
0x16f0   :  { %v4163_v62 = vrot.slane %v4151_v53, 2  ;;  %v4164_v40 = vrot.slane %v4151_v53, 4  ;;  %v4165_v3 = vrot.slane %v4151_v53, 6  ;;  %4176 = vst [vmem:[#allocation1 + $0x21] ss:$4 sm:$0xff] %v4151_v53  ;;  %v4364_v53 = vrot.slane %v4356_v61, 6 }
0x16f1   :  { %v4343_v35 = vmul.f32 0.59460354, %v4255_v39 }
0x16f2   :  { %4178 = vst [vmem:[#allocation1 + $0x22] ss:$4 sm:$0xff] %v4163_v62 }
0x16f3   :  { %4180 = vst [vmem:[#allocation1 + $0x23] ss:$4 sm:$0xff] %v4164_v40  ;;  %v4349_v2 = vrot.slane %v4343_v35, 2  ;;  %v4350_v51 = vrot.slane %v4343_v35, 4  ;;  %v4351_v17 = vrot.slane %v4343_v35, 6  ;;  %v4368_v40 = vrot.slane %v4358_v28, 2 }
0x16f4   :  { %4183 = vst [vmem:[#allocation1] ss:$4 sm:$0xff] %v4165_v3  ;;  %v4365_v3 = vrot.slane %v4357_v59, 2 }
0x16f6   :  { %v4256_v34 = vpop.f32.mrf.mxu0 }
0x16f7   :  { %v4153_v58 = vpop.f32.mrf.mxu2  ;;  %v4257_v46 = vadd.f32 %v5798_v13, %v4256_v34  ;;  %v4367_v34 = vrot.slane %v4357_v59, 6 }
0x16f8   :  { %4184 = vst [vmem:[#allocation1 + $0x1] ss:$4 sm:$0xff] %v4153_v58 }
0x16f9   :  { %v4344_v43 = vmul.f32 0.59460354, %v4257_v46 }
0x16fa   :  { %v4182_v56 = vld.sshfl [vmem:[#allocation1 + $0x20] sm:$0xff pattern:$0x73625140] }
0x16fb   :  { %v4189_v9 = vpack.c.bf16 %v4182_v56, %v4181_v32  ;;  %4387 = vst [vmem:[#allocation1 + $0x20] ss:$4 sm:$0xff] %v4344_v43  ;;  %v4352_v44 = vrot.slane %v4344_v43, 2  ;;  %v4353_v4 = vrot.slane %v4344_v43, 4  ;;  %v4354_v12 = vrot.slane %v4344_v43, 6 }
0x16fd   :  { %5575 = vmatmul.msk.bf16.vlgmr.msra.gmra.mxu3 %vm487_vm15, %v4189_v9 }
0x16fe   :  { %v4259_v1 = vpop.f32.mrf.mxu0 }
0x16ff   :  { %v7197_v47 = vpop.f32.mrf.mxu2  ;;  %v4260_v37 = vadd.f32 %v5798_v13, %v4259_v1  ;;  %v4185_v36 = vld.sshfl [vmem:[#allocation1] sm:$0xff pattern:$0x73625140]  ;;  %v4366_v13 = vrot.slane %v4357_v59, 4 }
0x1700   :  { %4379 = vst [vmem:[#allocation1] ss:$4 sm:$0xff] %v4343_v35  ;;  %v4190_v55 = vpack.c.bf16 %v4185_v36, %v4185_v36  ;;  %v4335_v1 = vadd.f32 %v5799_v5, %v7197_v47 }
0x1701   :  { %v4345_v20 = vmul.f32 0.59460354, %v4260_v37  ;;  %4381 = vst [vmem:[#allocation1 + $0x1] ss:$4 sm:$0xff] %v4349_v2 }
0x1702   :  { %4383 = vst [vmem:[#allocation1 + $0x2] ss:$4 sm:$0xff] %v4350_v51  ;;  %v7199_v21 = vld.sshfl [vmem:[#allocation1 + $0x20] sm:$0xff pattern:$0x73625140] }
0x1703   :  { %v4355_v25 = vrot.slane %v4345_v20, 2  ;;  %4385 = vst [vmem:[#allocation1 + $0x3] ss:$4 sm:$0xff] %v4351_v17  ;;  %v4402_v37 = vpack.c.bf16 %v7199_v21, %v7199_v21  ;;  %v4372_v17 = vrot.slane %v4335_v1, 2 }
0x1705   :  { %4394 = vst [vmem:[#allocation1 + $0x20] ss:$4 sm:$0xff] %v4355_v25  ;;  %v4434_v25 = vunpack.c.l.b16 %v4402_v37  ;;  %v3743_v37 = vadd.f32 %v7062_v38, %v7134_v16 }
0x1706   :  { %v4261_v7 = vpop.f32.mrf.mxu0 }
0x1707   :  { %v4336_v42 = vpop.f32.mrf.mxu2 }
0x1708   :  { %v4337_v43 = vadd.f32 %v5799_v5, %v4336_v42  ;;  %v4373_v42 = vrot.slane %v4335_v1, 4 }
0x170a   :  { %v4388_v33 = vld.sshfl [vmem:[#allocation1] sm:$0xff pattern:$0x73625140] }
0x170b   :  { %4390 = vst [vmem:[#allocation1] ss:$4 sm:$0xff] %v4352_v44  ;;  %v4401_v9 = vpack.c.bf16 %v4388_v33, %v4388_v33  ;;  %v4374_v44 = vrot.slane %v4335_v1, 6 }
0x170c   :  { %4391 = vst [vmem:[#allocation1 + $0x1] ss:$4 sm:$0xff] %v4353_v4  ;;  %v7206_v26 = vld.sshfl [vmem:[#allocation1 + $0x20] sm:$0xff pattern:$0x73625140] }
0x170d   :  { %5576 = vmatmul.msk.bf16.gmra.mxu3 %vm487_vm15, %v4190_v55  ;;  %4392 = vst [vmem:[#allocation1 + $0x2] ss:$4 sm:$0xff] %v4354_v12  ;;  %v4433_v51 = vunpack.c.l.b16 %v4401_v9  ;;  %v4404_v45 = vpack.c.bf16 %v7206_v26, %v7206_v26  ;;  %v3740_v9 = vadd.f32 %v7060_v19, %v7132_v49 }
0x170e   :  { %4393 = vst [vmem:[#allocation1 + $0x3] ss:$4 sm:$0xff] %v4345_v20 }
0x170f   :  { %v4339_v54 = vpop.f32.mrf.mxu2  ;;  %4413 = vst [vmem:[#allocation1 + $0x20] ss:$4 sm:$0xff] %v4357_v59  ;;  %v4435_v4 = vpack.c.b16 %v4434_v25, %v4433_v51 }
0x1710   :  { %v4340_v20 = vadd.f32 %v5799_v5, %v4339_v54 }
0x1712   :  { %v4378_v55 = vrot.slane %v4340_v20, 2 }
0x1715   :  { %v4395_v23 = vld.sshfl [vmem:[#allocation1] sm:$0xff pattern:$0x73625140] }
0x1716   :  { %4405 = vst [vmem:[#allocation1] ss:$4 sm:$0xff] %v4356_v61  ;;  %v4415_v62 = vld.sshfl [vmem:[#allocation1 + $0x20] sm:$0xff pattern:$0x73625140]  ;;  %v4403_v12 = vpack.c.bf16 %v4395_v23, %v4395_v23  ;;  %v4464_v61 = vunpack.c.l.b16 %v4404_v45 }
0x1717   :  { %v4341_v63 = vpop.f32.mrf.mxu2  ;;  %4407 = vst [vmem:[#allocation1 + $0x1] ss:$4 sm:$0xff] %v4362_v6  ;;  %v4428_v60 = vpack.c.bf16 %v4415_v62, %v4415_v62  ;;  %v4376_v6 = vrot.slane %v4337_v43, 4 }
0x1718   :  { %4409 = vst [vmem:[#allocation1 + $0x2] ss:$4 sm:$0xff] %v4363_v57  ;;  %v4463_v18 = vunpack.c.l.b16 %v4403_v12  ;;  %v4377_v63 = vrot.slane %v4337_v43, 6 }
0x1719   :  { %4411 = vst [vmem:[#allocation1 + $0x3] ss:$4 sm:$0xff] %v4364_v53  ;;  %v4439_v58 = vunpack.c.l.b16 %v4428_v60 }
0x171a   :  { %4420 = vst [vmem:[#allocation1 + $0x20] ss:$4 sm:$0xff] %v4368_v40  ;;  %v4465_v40 = vpack.c.b16 %v4464_v61, %v4463_v18 }
0x1720   :  { %v4414_v32 = vld.sshfl [vmem:[#allocation1] sm:$0xff pattern:$0x73625140] }
0x1721   :  { %v4427_v39 = vpack.c.bf16 %v4414_v32, %v4414_v32  ;;  %4416 = vst [vmem:[#allocation1] ss:$4 sm:$0xff] %v4365_v3  ;;  %v4422_v46 = vld.sshfl [vmem:[#allocation1 + $0x20] sm:$0xff pattern:$0x73625140] }
0x1722   :  { %4417 = vst [vmem:[#allocation1 + $0x1] ss:$4 sm:$0xff] %v4366_v13  ;;  %v4430_v36 = vpack.c.bf16 %v4422_v46, %v4422_v46 }
0x1723   :  { %v4438_v56 = vunpack.c.l.b16 %v4427_v39  ;;  %4418 = vst [vmem:[#allocation1 + $0x2] ss:$4 sm:$0xff] %v4367_v34 }
0x1724   :  { %4419 = vst [vmem:[#allocation1 + $0x3] ss:$4 sm:$0xff] %v4358_v28  ;;  %v4469_v0 = vunpack.c.l.b16 %v4430_v36  ;;  %v4375_v28 = vrot.slane %v4337_v43, 2 }
0x1725   :  { %v4440_v35 = vpack.c.b16 %v4439_v58, %v4438_v56  ;;  %4555 = vst [vmem:[#allocation1 + $0x20] ss:$4 sm:$0xff] %v4337_v43  ;;  %v3738_v43 = vadd.f32 %v7058_v52, %v7130_v10 }
0x1727   :  { %v4445_v2 = vsel %vm487_vm15, %v4440_v35, 0 }
0x1728   :  { %4454 = vmatpush.bf16.xpose.msrb.mxu3 %v4445_v2 }
0x172b   :  { %v4421_v7 = vld.sshfl [vmem:[#allocation1] sm:$0xff pattern:$0x73625140] }
0x172c   :  { %v4429_v24 = vpack.c.bf16 %v4421_v7, %v4421_v7  ;;  %4547 = vst [vmem:[#allocation1] ss:$4 sm:$0xff] %v4335_v1  ;;  %v4557_v47 = vld.sshfl [vmem:[#allocation1 + $0x20] sm:$0xff pattern:$0x73625140] }
0x172d   :  { %4549 = vst [vmem:[#allocation1 + $0x1] ss:$4 sm:$0xff] %v4372_v17  ;;  %v4570_v54 = vpack.c.bf16 %v4557_v47, %v4557_v47 }
0x172e   :  { %v4468_v33 = vunpack.c.l.b16 %v4429_v24  ;;  %4551 = vst [vmem:[#allocation1 + $0x2] ss:$4 sm:$0xff] %v4373_v42 }
0x172f   :  { %5622 = vmatmul.msk.bf16.vlgmr.msrb.gmra.mxu3 %vm487_vm15, %v4435_v4  ;;  %4553 = vst [vmem:[#allocation1 + $0x3] ss:$4 sm:$0xff] %v4374_v44  ;;  %v4581_v62 = vunpack.c.l.b16 %v4570_v54 }
0x1730   :  { %v4470_v21 = vpack.c.b16 %v4469_v0, %v4468_v33  ;;  %4562 = vst [vmem:[#allocation1 + $0x20] ss:$4 sm:$0xff] %v4378_v55 }
0x1732   :  { %v4475_v59 = vsel %vm487_vm15, %v4470_v21, 0 }
0x1733   :  { %4484 = vmatpush.bf16.xpose.msra.mxu0 %v4475_v59 }
0x1736   :  { %v4556_v57 = vld.sshfl [vmem:[#allocation1] sm:$0xff pattern:$0x73625140] }
0x1737   :  { %v4569_v53 = vpack.c.bf16 %v4556_v57, %v4556_v57  ;;  %4558 = vst [vmem:[#allocation1] ss:$4 sm:$0xff] %v4375_v28  ;;  %v4564_v60 = vld.sshfl [vmem:[#allocation1 + $0x20] sm:$0xff pattern:$0x73625140] }
0x1738   :  { %4559 = vst [vmem:[#allocation1 + $0x1] ss:$4 sm:$0xff] %v4376_v6  ;;  %v4572_v13 = vpack.c.bf16 %v4564_v60, %v4564_v60 }
0x1739   :  { %v4580_v23 = vunpack.c.l.b16 %v4569_v53  ;;  %4560 = vst [vmem:[#allocation1 + $0x2] ss:$4 sm:$0xff] %v4377_v63 }
0x173a   :  { %5623 = vmatmul.msk.bf16.vlgmr.msra.gmra.mxu0 %vm487_vm15, %v4465_v40  ;;  %4561 = vst [vmem:[#allocation1 + $0x3] ss:$4 sm:$0xff] %v4340_v20  ;;  %v4611_v5 = vunpack.c.l.b16 %v4572_v13 }
0x173b   :  { %v4582_v26 = vpack.c.b16 %v4581_v62, %v4580_v23 }
0x173d   :  { %v4587_v3 = vsel %vm641_vm2, %v4582_v26, 0 }
0x173e   :  { %4596 = vmatpush.bf16.msra.mxu2 %v4587_v3 }
0x1741   :  { %v4563_v32 = vld.sshfl [vmem:[#allocation1] sm:$0xff pattern:$0x73625140] }
0x1742   :  { %v4571_v34 = vpack.c.bf16 %v4563_v32, %v4563_v32 }
0x1744   :  { %v4610_v39 = vunpack.c.l.b16 %v4571_v34 }
0x1746   :  { %v4612_v58 = vpack.c.b16 %v4611_v5, %v4610_v39 }
0x1748   :  { %v4617_v46 = vsel %vm641_vm2, %v4612_v58, 0 }
0x1749   :  { %4626 = vmatpush.bf16.msrb.mxu2 %v4617_v46 }
0x1780   :  { %v4211_v56 = vpop.f32.mrf.mxu3 }
0x1781   :  { %v7226_v35 = vadd.f32 %v4211_v56, %v3738_v43 }
0x1788   :  { %v4213_v1 = vpop.f32.mrf.mxu3 }
0x1789   :  { %v7230_v2 = vadd.f32 %v4213_v1, %v3740_v9 }
0x1790   :  { %v4216_v36 = vpop.f32.mrf.mxu3 }
0x1791   :  { %v7234_v51 = vadd.f32 %v4216_v36, %v3743_v37 }
0x1798   :  { %v4218_v20 = vpop.f32.mrf.mxu3 }
0x17b2   :  { %v4456_v17 = vpop.f32.mrf.mxu3 }
0x17b3   :  { %v4491_v52 = vsel %vm6258_vm4, -1e+30, %v4456_v17 }
0x17b4   :  { %v4495_v10 = vsel %vm548_vm5, %v4491_v52, -inf }
0x17b5   :  { %4496 = vmax.xlane.f32.xlu2 %v4495_v10 }
0x17b7   :  { %v4486_v25 = vpop.f32.mrf.mxu0 }
0x17b8   :  { %v4493_v19 = vsel %vm6268_vm8, -1e+30, %v4486_v25  ;;  %v5626_v25 = vld [vmem:[%s7433_s11 + $0x1c] sm:$0xf] }
0x17b9   :  { %v4501_v49 = vsel %vm548_vm5, %v4493_v19, -inf }
0x17ba   :  { %4502 = vmax.xlane.f32.xlu1 %v4501_v49  ;;  %v4458_v7 = vpop.f32.mrf.mxu3 }
0x17bb   :  { %v4492_v38 = vsel %vm6258_vm4, -1e+30, %v4458_v7 }
0x17bc   :  { %v4498_v16 = vsel %vm552_vm7, %v4492_v38, -inf }
0x17bd   :  { %4499 = vmax.xlane.f32.xlu0 %v4498_v16 }
0x17bf   :  { %v4488_v42 = vpop.f32.mrf.mxu0 }
0x17c0   :  { %v4494_v24 = vsel %vm6268_vm8, -1e+30, %v4488_v42 }
0x17c1   :  { %v4504_v0 = vsel %vm552_vm7, %v4494_v24, -inf }
0x17c2   :  { %4505 = vmax.xlane.f32.xlu2 %v4504_v0 }
0x1828   :  { %v4497_v44 = vpop.xlane.xlu2 %4496 }
0x1829   :  { %v4507_v4 = vsub.f32 %v4491_v52, %v4497_v44 }
0x182b   :  { %v4511_v47 = vmul.f32 1.442695, %v4507_v4 }
0x182d   :  { %5955 = vpow2.f32 %v4511_v47  ;;  %v4503_v55 = vpop.xlane.xlu1 %4502 }
0x182e   :  { %v4509_v33 = vsub.f32 %v4493_v19, %v4503_v55  ;;  %v4677_v19 = vsel %vm1178_vm9, %v5626_v25, 0 }
0x182f   :  { %4686 = vmatpush.bf16.msra.mxu3 %v4677_v19 }
0x1830   :  { %v4515_v21 = vmul.f32 1.442695, %v4509_v33  ;;  %v4500_v12 = vpop.xlane.xlu0 %4499 }
0x1831   :  { %v4508_v31 = vsub.f32 %v4492_v38, %v4500_v12 }
0x1832   :  { %5957 = vpow2.f32 %v4515_v21 }
0x1833   :  { %v5956_v45 = vpop.eup %5955  ;;  %v4513_v59 = vmul.f32 1.442695, %v4508_v31 }
0x1834   :  { %v4519_v54 = vmul.f32 %v5956_v45, %v6625_v29  ;;  %v5800_v45 = vld [vmem:[%s7434_s12 + $0x1] ss:$0 sm:$0xff] }
0x1835   :  { %5959 = vpow2.f32 %v4513_v59  ;;  %v4506_v41 = vpop.xlane.xlu2 %4505 }
0x1836   :  { %v4510_v18 = vsub.f32 %v4494_v24, %v4506_v41  ;;  %v4523_v61 = vsel %vm548_vm5, %v4519_v54, 0.0 }
0x1837   :  { %4524 = vadd.xlane.f32.xlu0 %v4523_v61 }
0x1838   :  { %v5958_v28 = vpop.eup %5957  ;;  %v4517_v6 = vmul.f32 1.442695, %v4510_v18 }
0x1839   :  { %v4521_v57 = vmul.f32 %v5958_v28, %v6637_v27 }
0x183a   :  { %5961 = vpow2.f32 %v4517_v6 }
0x183b   :  { %v5960_v63 = vpop.eup %5959  ;;  %v4529_v53 = vsel %vm548_vm5, %v4521_v57, 0.0 }
0x183c   :  { %4530 = vadd.xlane.f32.xlu2 %v4529_v53  ;;  %v4520_v62 = vmul.f32 %v5960_v63, %v6635_v15 }
0x183e   :  { %v4526_v40 = vsel %vm552_vm7, %v4520_v62, 0.0 }
0x183f   :  { %4527 = vadd.xlane.f32.xlu1 %v4526_v40 }
0x1840   :  { %v5962_v29 = vpop.eup %5961 }
0x1841   :  { %v4522_v23 = vmul.f32 %v5962_v29, %v6646_v48 }
0x1843   :  { %v4532_v26 = vsel %vm552_vm7, %v4522_v23, 0.0 }
0x1844   :  { %4533 = vadd.xlane.f32.xlu0 %v4532_v26 }
0x18aa   :  { %v4525_v60 = vpop.xlane.xlu0 %4524 }
0x18ab   :  { %5963 = vrcp.f32 %v4525_v60 }
0x18af   :  { %v4531_v39 = vpop.xlane.xlu2 %4530 }
0x18b1   :  { %v5964_v27 = vpop.eup %5963 }
0x18b2   :  { %v4528_v3 = vpop.xlane.xlu1 %4527  ;;  %v4539_v13 = vmul.f32 %v5964_v27, %v4519_v54 }
0x18b3   :  { %5965 = vrcp.f32 %v4528_v3 }
0x18b4   :  { %v4543_v5 = vpack.c.bf16 %v4539_v13, %v4539_v13 }
0x18b6   :  { %v4575_v46 = vunpack.c.l.b16 %v4543_v5 }
0x18b7   :  { %v4534_v32 = vpop.xlane.xlu0 %4533 }
0x18b8   :  { %5967 = vrcp.f32 %v4534_v32 }
0x18b9   :  { %v5966_v34 = vpop.eup %5965  ;;  %5969 = vrcp.f32 %v4531_v39 }
0x18ba   :  { %v4540_v15 = vmul.f32 %v5966_v34, %v4520_v62 }
0x18bc   :  { %v4544_v58 = vpack.c.bf16 %v4540_v15, %v4540_v15 }
0x18be   :  { %v4576_v43 = vunpack.c.l.b16 %v4544_v58  ;;  %v5968_v56 = vpop.eup %5967 }
0x18bf   :  { %v5970_v9 = vpop.eup %5969  ;;  %v4542_v1 = vmul.f32 %v5968_v56, %v4522_v23 }
0x18c0   :  { %v4577_v48 = vpack.c.b16 %v4576_v43, %v4575_v46  ;;  %v4541_v37 = vmul.f32 %v5970_v9, %v4521_v57 }
0x18c1   :  { %v4546_v36 = vpack.c.bf16 %v4542_v1, %v4542_v1 }
0x18c2   :  { %5624 = vmatmul.msk.bf16.vlgmr.msra.gmra.mxu2 %vm548_vm5, %v4577_v48  ;;  %v4545_v20 = vpack.c.bf16 %v4541_v37, %v4541_v37 }
0x18c3   :  { %v4606_v17 = vunpack.c.l.b16 %v4546_v36 }
0x18c4   :  { %v4605_v52 = vunpack.c.l.b16 %v4545_v20 }
0x18c6   :  { %v4607_v10 = vpack.c.b16 %v4606_v17, %v4605_v52 }
0x18d2   :  { %5625 = vmatmul.msk.bf16.vlgmr.msrb.gmra.mxu2 %vm548_vm5, %v4607_v10 }
0x1945   :  { %v4598_v49 = vpop.f32.mrf.mxu2 }
0x1946   :  { %v4637_v7 = vrot.slane %v4598_v49, 2  ;;  %v4638_v38 = vrot.slane %v4598_v49, 4  ;;  %v4639_v16 = vrot.slane %v4598_v49, 6  ;;  %4643 = vst [vmem:[#allocation1] ss:$4 sm:$0xff] %v4598_v49 }
0x1948   :  { %4645 = vst [vmem:[#allocation1 + $0x1] ss:$4 sm:$0xff] %v4637_v7 }
0x1949   :  { %4647 = vst [vmem:[#allocation1 + $0x2] ss:$4 sm:$0xff] %v4638_v38 }
0x194a   :  { %4649 = vst [vmem:[#allocation1 + $0x3] ss:$4 sm:$0xff] %v4639_v16 }
0x194d   :  { %v4600_v42 = vpop.f32.mrf.mxu2 }
0x194e   :  { %4651 = vst [vmem:[#allocation1 + $0x20] ss:$4 sm:$0xff] %v4600_v42 }
0x1951   :  { %v4658_v47 = vld.sshfl [vmem:[#allocation1] sm:$0xff pattern:$0x73625140] }
0x1955   :  { %v4628_v24 = vpop.f32.mrf.mxu2 }
0x1956   :  { %v4640_v0 = vrot.slane %v4628_v24, 2  ;;  %v4641_v44 = vrot.slane %v4628_v24, 4  ;;  %v4642_v4 = vrot.slane %v4628_v24, 6  ;;  %4653 = vst [vmem:[#allocation1 + $0x21] ss:$4 sm:$0xff] %v4628_v24 }
0x1958   :  { %4655 = vst [vmem:[#allocation1 + $0x22] ss:$4 sm:$0xff] %v4640_v0 }
0x1959   :  { %4657 = vst [vmem:[#allocation1 + $0x23] ss:$4 sm:$0xff] %v4641_v44 }
0x195a   :  { %4660 = vst [vmem:[#allocation1] ss:$4 sm:$0xff] %v4642_v4 }
0x195d   :  { %v4630_v55 = vpop.f32.mrf.mxu2 }
0x195e   :  { %4661 = vst [vmem:[#allocation1 + $0x1] ss:$4 sm:$0xff] %v4630_v55 }
0x1960   :  { %v4659_v33 = vld.sshfl [vmem:[#allocation1 + $0x20] sm:$0xff pattern:$0x73625140] }
0x1961   :  { %v4666_v21 = vpack.c.bf16 %v4659_v33, %v4658_v47 }
0x1963   :  { %5627 = vmatmul.msk.bf16.vlgmr.msra.gmra.mxu3 %vm487_vm15, %v4666_v21  ;;  %v5755_v21 = vld [vmem:[%s7438_s15 + $0x18] sm:$0xff] }
0x1964   :  { %4919 = vmatpush.bf16.msrb.mxu0 %v5755_v21 }
0x1965   :  { %v4662_v12 = vld.sshfl [vmem:[#allocation1] sm:$0xff pattern:$0x73625140] }
0x1966   :  { %v4667_v31 = vpack.c.bf16 %v4662_v12, %v4662_v12 }
0x1973   :  { %5628 = vmatmul.msk.bf16.gmra.mxu3 %vm487_vm15, %v4667_v31 }
0x19e6   :  { %v4688_v59 = vpop.f32.mrf.mxu3 }
0x19e7   :  { %v4697_v54 = vadd.f32 %v4688_v59, %v7226_v35  ;;  %v5754_v59 = vld [vmem:[%s7438_s15 + $0x10] sm:$0xff] }
0x19e8   :  { %4920 = vmatpush.bf16.msrb.mxu0 %v5754_v59 }
0x19e9   :  { %v4705_v41 = vadd.f32 %v5800_v45, %v4697_v54 }
0x19eb   :  { %v4711_v18 = vrot.slane %v4705_v41, 2  ;;  %v4712_v61 = vrot.slane %v4705_v41, 4  ;;  %v4713_v28 = vrot.slane %v4705_v41, 6  ;;  %4718 = vst [vmem:[#allocation1] ss:$4 sm:$0xff] %v4705_v41 }
0x19ed   :  { %4720 = vst [vmem:[#allocation1 + $0x1] ss:$4 sm:$0xff] %v4711_v18 }
0x19ee   :  { %4722 = vst [vmem:[#allocation1 + $0x2] ss:$4 sm:$0xff] %v4712_v61  ;;  %v4690_v6 = vpop.f32.mrf.mxu3 }
0x19ef   :  { %4724 = vst [vmem:[#allocation1 + $0x3] ss:$4 sm:$0xff] %v4713_v28  ;;  %v4698_v57 = vadd.f32 %v4690_v6, %v7230_v2 }
0x19f1   :  { %v4706_v63 = vadd.f32 %v5800_v45, %v4698_v57 }
0x19f3   :  { %v4714_v53 = vrot.slane %v4706_v63, 2  ;;  %4726 = vst [vmem:[#allocation1 + $0x20] ss:$4 sm:$0xff] %v4706_v63  ;;  %v4715_v62 = vrot.slane %v4706_v63, 4  ;;  %v4716_v40 = vrot.slane %v4706_v63, 6 }
0x19f6   :  { %v4693_v29 = vpop.f32.mrf.mxu3  ;;  %v4727_v23 = vld.sshfl [vmem:[#allocation1] sm:$0xff pattern:$0x73625140] }
0x19f7   :  { %v4699_v35 = vadd.f32 %v4693_v29, %v7234_v51  ;;  %v7271_v26 = vadd.f32 %v4727_v23, %v6807_v30  ;;  %4729 = vst [vmem:[#allocation1] ss:$4 sm:$0xff] %v4714_v53 }
0x19f8   :  { %4730 = vst [vmem:[#allocation1 + $0x1] ss:$4 sm:$0xff] %v4715_v62 }
0x19f9   :  { %v4707_v60 = vadd.f32 %v5800_v45, %v4699_v35  ;;  %v4748_v3 = vsel %vm123_vm1, %v7271_v26, 0.0  ;;  %4731 = vst [vmem:[#allocation1 + $0x2] ss:$4 sm:$0xff] %v4716_v40  ;;  %v5801_v40 = vld [vmem:[%s7435_s13 + $0x1] ss:$0 sm:$0xff] }
0x19fa   :  { %4749 = vadd.xlane.f32.xlu1 %v4748_v3  ;;  %v4728_v2 = vld.sshfl [vmem:[#allocation1 + $0x20] sm:$0xff pattern:$0x73625140] }
0x19fb   :  { %v4717_v27 = vrot.slane %v4707_v60, 2  ;;  %4732 = vst [vmem:[#allocation1 + $0x3] ss:$4 sm:$0xff] %v4707_v60  ;;  %v7276_v13 = vadd.f32 %v4728_v2, %v6812_v50  ;;  %v5802_v35 = vld [vmem:[%s7436_s14 + $0x1] ss:$0 sm:$0xff] }
0x19fd   :  { %v4751_v51 = vsel %vm127_vm0, %v7276_v13, 0.0  ;;  %4733 = vst [vmem:[#allocation1 + $0x20] ss:$4 sm:$0xff] %v4717_v27 }
0x19fe   :  { %v4695_v30 = vpop.f32.mrf.mxu3  ;;  %4752 = vadd.xlane.f32.xlu0 %v4751_v51 }
0x1a02   :  { %v4734_v32 = vld.sshfl [vmem:[#allocation1] sm:$0xff pattern:$0x73625140] }
0x1a03   :  { %v7281_v34 = vadd.f32 %v4734_v32, %v6817_v8 }
0x1a04   :  { %v4735_v5 = vld.sshfl [vmem:[#allocation1 + $0x20] sm:$0xff pattern:$0x73625140] }
0x1a05   :  { %v4754_v39 = vsel %vm123_vm1, %v7281_v34, 0.0  ;;  %v7286_v15 = vadd.f32 %v4735_v5, %v6822_v11 }
0x1a06   :  { %4755 = vadd.xlane.f32.xlu2 %v4754_v39 }
0x1a07   :  { %v4757_v50 = vsel %vm127_vm0, %v7286_v15, 0.0 }
0x1a08   :  { %4758 = vadd.xlane.f32.xlu1 %v4757_v50 }
0x1a6d   :  { %v4750_v58 = vpop.xlane.xlu1 %4749 }
0x1a6e   :  { %v4760_v46 = vmul.f32 %v4750_v58, %v6114_v14 }
0x1a70   :  { %v4764_v43 = vsub.f32 %v7271_v26, %v4760_v46 }
0x1a71   :  { %v4753_v48 = vpop.xlane.xlu0 %4752 }
0x1a72   :  { %v4761_v8 = vmul.f32 %v4753_v48, %v6114_v14  ;;  %v4768_v56 = vmul.f32 %v4764_v43, %v4764_v43 }
0x1a74   :  { %v7294_v9 = vsub.f32 %v7276_v13, %v4761_v8  ;;  %v4772_v11 = vsel %vm123_vm1, %v4768_v56, 0.0 }
0x1a75   :  { %4773 = vadd.xlane.f32.xlu2 %v4772_v11 }
0x1a76   :  { %v4769_v1 = vmul.f32 %v7294_v9, %v7294_v9 }
0x1a78   :  { %v4775_v37 = vsel %vm127_vm0, %v4769_v1, 0.0 }
0x1a79   :  { %4776 = vadd.xlane.f32.xlu1 %v4775_v37  ;;  %v4756_v36 = vpop.xlane.xlu2 %4755 }
0x1a7a   :  { %v4762_v20 = vmul.f32 %v4756_v36, %v6114_v14 }
0x1a7b   :  { %v4759_v17 = vpop.xlane.xlu1 %4758 }
0x1a7c   :  { %v7302_v52 = vsub.f32 %v7281_v34, %v4762_v20  ;;  %v4763_v10 = vmul.f32 %v4759_v17, %v6114_v14 }
0x1a7e   :  { %v7306_v25 = vsub.f32 %v7286_v15, %v4763_v10  ;;  %v4770_v19 = vmul.f32 %v7302_v52, %v7302_v52 }
0x1a80   :  { %v4778_v49 = vsel %vm123_vm1, %v4770_v19, 0.0  ;;  %v4771_v7 = vmul.f32 %v7306_v25, %v7306_v25 }
0x1a81   :  { %4779 = vadd.xlane.f32.xlu0 %v4778_v49 }
0x1a82   :  { %v4781_v38 = vsel %vm127_vm0, %v4771_v7, 0.0 }
0x1a83   :  { %4782 = vadd.xlane.f32.xlu2 %v4781_v38 }
0x1ae8   :  { %v4774_v16 = vpop.xlane.xlu2 %4773 }
0x1ae9   :  { %v4784_v42 = vmul.f32 %v4774_v16, %v6114_v14 }
0x1aeb   :  { %v4788_v24 = vadd.f32 1e-05, %v4784_v42 }
0x1aec   :  { %v4777_v0 = vpop.xlane.xlu1 %4776 }
0x1aed   :  { %5971 = vrsqrt.f32 %v4788_v24  ;;  %v4785_v44 = vmul.f32 %v4777_v0, %v6114_v14  ;;  %vm4798_vm2 = vweird.f32 %v4788_v24 }
0x1aef   :  { %v4789_v4 = vadd.f32 1e-05, %v4785_v44 }
0x1af1   :  { %5973 = vrsqrt.f32 %v4789_v4  ;;  %vm4808_vm7 = vweird.f32 %v4789_v4 }
0x1af3   :  { %v5972_v47 = vpop.eup %5971 }
0x1af4   :  { %v4793_v55 = vmul.f32 %v5972_v47, %v4788_v24  ;;  %v4780_v33 = vpop.xlane.xlu0 %4779  ;;  %vm4799_vm15 = vweird.f32 %v5972_v47 }
0x1af5   :  { %v4786_v12 = vmul.f32 %v4780_v33, %v6114_v14  ;;  %vm4800_vm4 = vmor %vm4798_vm2, %vm4799_vm15 }
0x1af6   :  { %v4794_v31 = vmul.f32 %v5972_v47, %v4793_v55  ;;  %v4783_v45 = vpop.xlane.xlu2 %4782 }
0x1af7   :  { %v5974_v54 = vpop.eup %5973  ;;  %v4790_v41 = vadd.f32 1e-05, %v4786_v12  ;;  %v4787_v18 = vmul.f32 %v4783_v45, %v6114_v14 }
0x1af8   :  { %v4795_v61 = vmul.f32 0.5, %v4794_v31  ;;  %v4803_v28 = vmul.f32 %v5974_v54, %v4789_v4  ;;  %vm4809_vm5 = vweird.f32 %v5974_v54 }
0x1af9   :  { %5975 = vrsqrt.f32 %v4790_v41  ;;  %v4791_v6 = vadd.f32 1e-05, %v4787_v18  ;;  %vm4810_vm8 = vmor %vm4808_vm7, %vm4809_vm5  ;;  %vm4818_vm14 = vweird.f32 %v4790_v41 }
0x1afa   :  { %v4796_v57 = vsub.f32 1.5, %v4795_v61  ;;  %v4804_v63 = vmul.f32 %v5974_v54, %v4803_v28 }
0x1afb   :  { %5977 = vrsqrt.f32 %v4791_v6  ;;  %vm4828_vm10 = vweird.f32 %v4791_v6 }
0x1afc   :  { %v4797_v53 = vmul.f32 %v5972_v47, %v4796_v57  ;;  %v4805_v62 = vmul.f32 0.5, %v4804_v63 }
0x1afe   :  { %v4801_v29 = vsel %vm4800_vm4, %v5972_v47, %v4797_v53  ;;  %v4806_v23 = vsub.f32 1.5, %v4805_v62  ;;  %v5761_v62 = vld [vmem:[%s7440_s17 + $0x68] sm:$0xff] }
0x1aff   :  { %v5976_v14 = vpop.eup %5975  ;;  %v4832_v60 = vmul.f32 %v4801_v29, %v4764_v43 }
0x1b00   :  { %v4807_v3 = vmul.f32 %v5974_v54, %v4806_v23  ;;  %v4813_v2 = vmul.f32 %v5976_v14, %v4790_v41  ;;  %vm4819_vm9 = vweird.f32 %v5976_v14  ;;  %v5763_v41 = vld [vmem:[%s7440_s17 + $0x78] sm:$0xff] }
0x1b01   :  { %v5978_v27 = vpop.eup %5977  ;;  %v4839_v51 = vmul.f32 %v5801_v40, %v4832_v60  ;;  %vm4820_vm6 = vmor %vm4818_vm14, %vm4819_vm9  ;;  %5123 = vmatpush.bf16.msra.mxu1 %v5763_v41 }
0x1b02   :  { %v4811_v30 = vsel %vm4810_vm8, %v5974_v54, %v4807_v3  ;;  %v4814_v32 = vmul.f32 %v5976_v14, %v4813_v2  ;;  %v4823_v5 = vmul.f32 %v5978_v27, %v4791_v6  ;;  %vm4829_vm3 = vweird.f32 %v5978_v27  ;;  %v5762_v6 = vld [vmem:[%s7440_s17 + $0x70] sm:$0xff]  ;;  %v5760_v3 = vld [vmem:[%s7440_s17 + $0x60] sm:$0xff] }
0x1b03   :  { %v4846_v39 = vadd.f32 %v5802_v35, %v4839_v51  ;;  %v4833_v50 = vmul.f32 %v4811_v30, %v7294_v9  ;;  %vm4830_vm11 = vmor %vm4828_vm10, %vm4829_vm3 }
0x1b04   :  { %v4815_v58 = vmul.f32 0.5, %v4814_v32  ;;  %v4824_v46 = vmul.f32 %v5978_v27, %v4823_v5 }
0x1b05   :  { %v4854_v48 = vrot.slane %v4846_v39, 2  ;;  %v4855_v8 = vrot.slane %v4846_v39, 4  ;;  %v4856_v56 = vrot.slane %v4846_v39, 6  ;;  %4860 = vst [vmem:[#allocation1] ss:$4 sm:$0xff] %v4846_v39  ;;  %v4840_v11 = vmul.f32 %v5801_v40, %v4833_v50  ;;  %5124 = vmatpush.bf16.msra.mxu1 %v5762_v6  ;;  %v5759_v50 = vld [vmem:[%s7440_s17 + $0x58] sm:$0xff] }
0x1b06   :  { %v4816_v43 = vsub.f32 1.5, %v4815_v58  ;;  %v4825_v1 = vmul.f32 0.5, %v4824_v46 }
0x1b07   :  { %4862 = vst [vmem:[#allocation1 + $0x1] ss:$4 sm:$0xff] %v4854_v48  ;;  %v4847_v37 = vadd.f32 %v5802_v35, %v4840_v11 }
0x1b08   :  { %4864 = vst [vmem:[#allocation1 + $0x2] ss:$4 sm:$0xff] %v4855_v8  ;;  %v4817_v36 = vmul.f32 %v5976_v14, %v4816_v43  ;;  %v4826_v20 = vsub.f32 1.5, %v4825_v1 }
0x1b09   :  { %4866 = vst [vmem:[#allocation1 + $0x3] ss:$4 sm:$0xff] %v4856_v56  ;;  %5125 = vmatpush.bf16.msra.mxu1 %v5761_v62 }
0x1b0a   :  { %4868 = vst [vmem:[#allocation1 + $0x20] ss:$4 sm:$0xff] %v4847_v37  ;;  %v4821_v9 = vsel %vm4820_vm6, %v5976_v14, %v4817_v36  ;;  %v4827_v17 = vmul.f32 %v5978_v27, %v4826_v20  ;;  %v5758_v37 = vld [vmem:[%s7440_s17 + $0x50] sm:$0xff] }
0x1b0b   :  { %v4834_v10 = vmul.f32 %v4821_v9, %v7302_v52 }
0x1b0c   :  { %v4831_v19 = vsel %vm4830_vm11, %v5978_v27, %v4827_v17 }
0x1b0d   :  { %v4841_v49 = vmul.f32 %v5801_v40, %v4834_v10  ;;  %v4835_v7 = vmul.f32 %v4831_v19, %v7306_v25  ;;  %v5803_v25 = vld [vmem:[%s7437_s16 + $0x1] ss:$0 sm:$0xff]  ;;  %5126 = vmatpush.bf16.msra.mxu1 %v5760_v3 }
0x1b0f   :  { %v4848_v38 = vadd.f32 %v5802_v35, %v4841_v49  ;;  %v4842_v16 = vmul.f32 %v5801_v40, %v4835_v7  ;;  %v5757_v7 = vld [vmem:[%s7440_s17 + $0x48] sm:$0xff] }
0x1b10   :  { %v4875_v4 = vld.sshfl [vmem:[#allocation1] sm:$0xff pattern:$0x73625140] }
0x1b11   :  { %v4857_v42 = vrot.slane %v4848_v38, 2  ;;  %v4858_v24 = vrot.slane %v4848_v38, 4  ;;  %v4859_v0 = vrot.slane %v4848_v38, 6  ;;  %4870 = vst [vmem:[#allocation1 + $0x21] ss:$4 sm:$0xff] %v4848_v38  ;;  %v4849_v44 = vadd.f32 %v5802_v35, %v4842_v16  ;;  %5127 = vmatpush.bf16.msra.mxu1 %v5759_v50 }
0x1b13   :  { %4872 = vst [vmem:[#allocation1 + $0x22] ss:$4 sm:$0xff] %v4857_v42 }
0x1b14   :  { %4874 = vst [vmem:[#allocation1 + $0x23] ss:$4 sm:$0xff] %v4858_v24 }
0x1b15   :  { %4877 = vst [vmem:[#allocation1] ss:$4 sm:$0xff] %v4859_v0  ;;  %5128 = vmatpush.bf16.msra.mxu1 %v5758_v37 }
0x1b16   :  { %4878 = vst [vmem:[#allocation1 + $0x1] ss:$4 sm:$0xff] %v4849_v44  ;;  %v5756_v44 = vld [vmem:[%s7440_s17 + $0x40] sm:$0xff] }
0x1b19   :  { %5129 = vmatpush.bf16.msra.mxu1 %v5757_v7 }
0x1b1b   :  { %v4876_v47 = vld.sshfl [vmem:[#allocation1 + $0x20] sm:$0xff pattern:$0x73625140] }
0x1b1c   :  { %v4883_v55 = vpack.c.bf16 %v4876_v47, %v4875_v4 }
0x1b1d   :  { %v4879_v52 = vld.sshfl [vmem:[#allocation1] sm:$0xff pattern:$0x73625140]  ;;  %5130 = vmatpush.bf16.msra.mxu1 %v5756_v44 }
0x1b1e   :  { %5645 = vmatmul.msk.bf16.vlgmr.msrb.gmra.mxu0 %vm123_vm1, %v4883_v55  ;;  %v4884_v33 = vpack.c.bf16 %v4879_v52, %v4879_v52 }
0x1b2e   :  { %5646 = vmatmul.msk.bf16.gmra.mxu0 %vm123_vm1, %v4884_v33 }
0x1b9b   :  { %v4922_v21 = vpop.f32.mrf.mxu0 }
0x1b9c   :  { %v7338_v12 = vadd.f32 %v5803_v25, %v4922_v21 }
0x1b9e   :  { %v7341_v31 = vmul.f32 0.70710677, %v7338_v12 }
0x1ba0   :  { %v4943_v45 = vand.u32 2147483647, %v7341_v31  ;;  %vm4937_vm10 = vcmp.ge.f32.partialorder %v7341_v31, 0.0 }
0x1ba2   :  { %v4946_v59 = vmul.f32 0.3275911, %v4943_v45  ;;  %v5024_v11 = vsub.f32 0.0, %v4943_v45 }
0x1ba3   :  { %v4924_v54 = vpop.f32.mrf.mxu0 }
0x1ba4   :  { %v4949_v18 = vadd.f32 1.0, %v4946_v59  ;;  %v7347_v61 = vadd.f32 %v5803_v25, %v4924_v54  ;;  %v5027_v17 = vmul.f32 %v5024_v11, %v4943_v45 }
0x1ba6   :  { %5979 = vrcp.f32 %v4949_v18  ;;  %v7350_v28 = vmul.f32 0.70710677, %v7347_v61  ;;  %v4963_v2 = vand.u32 2147483648, %v4949_v18  ;;  %v4961_v30 = vand.u32 2147483647, %v4949_v18 }
0x1ba7   :  { %vm4957_vm13 = vweird.f32 %v4949_v18  ;;  %v5030_v4 = vmul.f32 1.442695, %v5027_v17  ;;  %v4932_v44 = vmul.f32 0.5, %v7347_v61 }
0x1ba8   :  { %v7356_v57 = vand.u32 2147483647, %v7350_v28  ;;  %v4964_v58 = vor.u32 1.1754944e-38, %v4963_v2  ;;  %vm4962_vm2 = vcmp.eq.f32.partialorder %v4961_v30, 8.507059e+37  ;;  %vm4938_vm11 = vcmp.ge.f32.partialorder %v7350_v28, 0.0 }
0x1ba9   :  { %v4941_v7 = vsel %vm4938_vm11, 1.0, %v5997_v22 }
0x1baa   :  { %v4947_v63 = vmul.f32 0.3275911, %v7356_v57  ;;  %v5025_v33 = vsub.f32 0.0, %v7356_v57 }
0x1bab   :  { %v4927_v53 = vpop.f32.mrf.mxu0 }
0x1bac   :  { %v5980_v40 = vpop.eup %5979  ;;  %v7362_v29 = vadd.f32 %v5803_v25, %v4927_v53  ;;  %v4950_v14 = vadd.f32 1.0, %v4947_v63  ;;  %v5028_v63 = vmul.f32 %v5025_v33, %v7356_v57 }
0x1bad   :  { %v4953_v23 = vmul.f32 %v5980_v40, %v4949_v18  ;;  %vm4958_vm12 = vweird.f32 %v5980_v40 }
0x1bae   :  { %v7365_v35 = vmul.f32 0.70710677, %v7362_v29  ;;  %5981 = vrcp.f32 %v4950_v14  ;;  %vm4959_vm15 = vmor %vm4957_vm13, %vm4958_vm12  ;;  %v4978_v9 = vand.u32 2147483648, %v4950_v14  ;;  %v4976_v19 = vand.u32 2147483647, %v4950_v14 }
0x1baf   :  { %v4954_v60 = vsub.f32 1.0, %v4953_v23  ;;  %vm4972_vm5 = vweird.f32 %v4950_v14  ;;  %v5032_v30 = vmul.f32 1.442695, %v5028_v63 }
0x1bb0   :  { %v7371_v27 = vand.u32 2147483647, %v7365_v35  ;;  %v4979_v24 = vor.u32 1.1754944e-38, %v4978_v9  ;;  %vm4977_vm8 = vcmp.eq.f32.partialorder %v4976_v19, 8.507059e+37  ;;  %v4940_v9 = vsel %vm4937_vm10, 1.0, %v5997_v22 }
0x1bb1   :  { %v4955_v51 = vmul.f32 %v5980_v40, %v4954_v60  ;;  %vm4939_vm12 = vcmp.ge.f32.partialorder %v7365_v35, 0.0 }
0x1bb2   :  { %v4948_v32 = vmul.f32 0.3275911, %v7371_v27  ;;  %v5026_v2 = vsub.f32 0.0, %v7371_v27 }
0x1bb3   :  { %v4956_v5 = vadd.f32 %v5980_v40, %v4955_v51  ;;  %v4929_v39 = vpop.f32.mrf.mxu0 }
0x1bb4   :  { %v4951_v46 = vadd.f32 1.0, %v4948_v32  ;;  %v5982_v48 = vpop.eup %5981 }
0x1bb5   :  { %v4960_v8 = vsel %vm4959_vm15, %v5980_v40, %v4956_v5  ;;  %v4968_v43 = vmul.f32 %v5982_v48, %v4950_v14  ;;  %vm4973_vm4 = vweird.f32 %v5982_v48 }
0x1bb6   :  { %v4965_v56 = vsel %vm4962_vm2, %v4964_v58, %v4960_v8  ;;  %5983 = vrcp.f32 %v4951_v46  ;;  %vm4974_vm7 = vmor %vm4972_vm5, %vm4973_vm4  ;;  %v4993_v45 = vand.u32 2147483648, %v4951_v46  ;;  %v4991_v41 = vand.u32 2147483647, %v4951_v46 }
0x1bb7   :  { %v4997_v1 = vmul.f32 1.0614054, %v4965_v56  ;;  %v4969_v36 = vsub.f32 1.0, %v4968_v43  ;;  %5985 = vpow2.f32 %v5030_v4  ;;  %vm4987_vm14 = vweird.f32 %v4951_v46 }
0x1bb8   :  { %v4994_v40 = vor.u32 1.1754944e-38, %v4993_v45  ;;  %vm4992_vm6 = vcmp.eq.f32.partialorder %v4991_v41, 8.507059e+37  ;;  %5987 = vpow2.f32 %v5032_v30 }
0x1bb9   :  { %v5000_v20 = vadd.f32 -1.4531521, %v4997_v1  ;;  %v4970_v10 = vmul.f32 %v5982_v48, %v4969_v36 }
0x1bbb   :  { %v5003_v49 = vmul.f32 %v5000_v20, %v4965_v56  ;;  %v4971_v16 = vadd.f32 %v5982_v48, %v4970_v10 }
0x1bbc   :  { %v5984_v38 = vpop.eup %5983 }
0x1bbd   :  { %v5006_v42 = vadd.f32 1.4214138, %v5003_v49  ;;  %v4983_v0 = vmul.f32 %v5984_v38, %v4951_v46  ;;  %v4975_v47 = vsel %vm4974_vm7, %v5982_v48, %v4971_v16  ;;  %vm4988_vm9 = vweird.f32 %v5984_v38  ;;  %v5986_v5 = vpop.eup %5985 }
0x1bbe   :  { %v4980_v52 = vsel %vm4977_vm8, %v4979_v24, %v4975_v47  ;;  %vm4989_vm3 = vmor %vm4987_vm14, %vm4988_vm9  ;;  %v5029_v46 = vmul.f32 %v5026_v2, %v7371_v27  ;;  %v5988_v20 = vpop.eup %5987 }
0x1bbf   :  { %v5009_v55 = vmul.f32 %v5006_v42, %v4965_v56  ;;  %v4984_v25 = vsub.f32 1.0, %v4983_v0  ;;  %v4998_v21 = vmul.f32 1.0614054, %v4980_v52  ;;  %v4931_v0 = vmul.f32 0.5, %v7338_v12  ;;  %v5804_v12 = vld [vmem:[%s7439_s18 + $0x1] ss:$0 sm:$0xff] }
0x1bc0   :  { %v5034_v37 = vmul.f32 1.442695, %v5029_v46 }
0x1bc1   :  { %v5012_v59 = vadd.f32 -0.28449672, %v5009_v55  ;;  %v4985_v54 = vmul.f32 %v5984_v38, %v4984_v25  ;;  %v5001_v18 = vadd.f32 -1.4531521, %v4998_v21  ;;  %v4942_v25 = vsel %vm4939_vm12, 1.0, %v5997_v22 }
0x1bc2   :  { %5989 = vpow2.f32 %v5034_v37 }
0x1bc3   :  { %v5015_v6 = vmul.f32 %v5012_v59, %v4965_v56  ;;  %v4986_v53 = vadd.f32 %v5984_v38, %v4985_v54  ;;  %v5004_v62 = vmul.f32 %v5001_v18, %v4980_v52  ;;  %v4933_v59 = vmul.f32 0.5, %v7362_v29 }
0x1bc5   :  { %v5018_v23 = vadd.f32 0.2548296, %v5015_v6  ;;  %v4990_v14 = vsel %vm4989_vm3, %v5984_v38, %v4986_v53  ;;  %v5007_v60 = vadd.f32 1.4214138, %v5004_v62 }
0x1bc6   :  { %v4995_v3 = vsel %vm4992_vm6, %v4994_v40, %v4990_v14 }
0x1bc7   :  { %v5021_v51 = vmul.f32 %v5018_v23, %v4965_v56  ;;  %v4999_v32 = vmul.f32 1.0614054, %v4995_v3  ;;  %v5010_v39 = vmul.f32 %v5007_v60, %v4980_v52 }
0x1bc8   :  { %v5990_v24 = vpop.eup %5989 }
0x1bc9   :  { %v5002_v50 = vadd.f32 -1.4531521, %v4999_v32  ;;  %v5036_v58 = vmul.f32 %v5986_v5, %v5021_v51  ;;  %v5013_v57 = vadd.f32 -0.28449672, %v5010_v39 }
0x1bcb   :  { %v5005_v48 = vmul.f32 %v5002_v50, %v4995_v3  ;;  %v5016_v8 = vmul.f32 %v5013_v57, %v4980_v52  ;;  %v5039_v43 = vsub.f32 1.0, %v5036_v58 }
0x1bcd   :  { %v5008_v11 = vadd.f32 1.4214138, %v5005_v48  ;;  %v5019_v1 = vadd.f32 0.2548296, %v5016_v8  ;;  %v5042_v10 = vmul.f32 %v5039_v43, %v4940_v9 }
0x1bcf   :  { %v5011_v36 = vmul.f32 %v5008_v11, %v4995_v3  ;;  %v5022_v56 = vmul.f32 %v5019_v1, %v4980_v52  ;;  %v5045_v31 = vadd.f32 1.0, %v5042_v10 }
0x1bd1   :  { %v5014_v17 = vadd.f32 -0.28449672, %v5011_v36  ;;  %v5037_v19 = vmul.f32 %v5988_v20, %v5022_v56  ;;  %v5048_v55 = vmul.f32 %v5045_v31, %v4931_v0 }
0x1bd3   :  { %v5017_v27 = vmul.f32 %v5014_v17, %v4995_v3  ;;  %v5040_v49 = vsub.f32 1.0, %v5037_v19 }
0x1bd5   :  { %v5020_v38 = vadd.f32 0.2548296, %v5017_v27  ;;  %v5043_v16 = vmul.f32 %v5040_v49, %v4941_v7 }
0x1bd7   :  { %v5023_v42 = vmul.f32 %v5020_v38, %v4995_v3  ;;  %v5046_v4 = vadd.f32 1.0, %v5043_v16 }
0x1bd9   :  { %v5038_v47 = vmul.f32 %v5990_v24, %v5023_v42  ;;  %v5049_v52 = vmul.f32 %v5046_v4, %v4932_v44 }
0x1bdb   :  { %v5051_v28 = vpack.c.bf16 %v5049_v52, %v5048_v55  ;;  %v5041_v33 = vsub.f32 1.0, %v5038_v47 }
0x1bdd   :  { %5131 = vmatmul.bf16.vlgmr.msra.gmra.mxu1 %v5051_v28  ;;  %v5044_v21 = vmul.f32 %v5041_v33, %v4942_v25 }
0x1bdf   :  { %v5047_v45 = vadd.f32 1.0, %v5044_v21 }
0x1be1   :  { %v5050_v54 = vmul.f32 %v5047_v45, %v4933_v59 }
0x1be3   :  { %v5052_v41 = vpack.c.bf16 %v5050_v54, %v5050_v54 }
0x1bed   :  { %5136 = vmatmul.bf16.gmra.mxu1 %v5052_v41 }
0x1c5a   :  { %v5132_v61 = vpop.f32.mrf.mxu1 }
0x1c5b   :  { %v5133_v18 = vadd.f32 %v5804_v12, %v5132_v61 }
0x1c5d   :  { %v5144_v6 = vrot.slane %v5133_v18, 2  ;;  %v5145_v63 = vrot.slane %v5133_v18, 4  ;;  %v5146_v35 = vrot.slane %v5133_v18, 6  ;;  %5151 = vst [vmem:[#allocation1] ss:$4 sm:$0xff] %v5133_v18 }
0x1c5f   :  { %5153 = vst [vmem:[#allocation1 + $0x1] ss:$4 sm:$0xff] %v5144_v6 }
0x1c60   :  { %5155 = vst [vmem:[#allocation1 + $0x2] ss:$4 sm:$0xff] %v5145_v63 }
0x1c61   :  { %5157 = vst [vmem:[#allocation1 + $0x3] ss:$4 sm:$0xff] %v5146_v35 }
0x1c62   :  { %v5134_v22 = vpop.f32.mrf.mxu1 }
0x1c63   :  { %v5135_v53 = vadd.f32 %v5804_v12, %v5134_v22 }
0x1c65   :  { %v5147_v62 = vrot.slane %v5135_v53, 2  ;;  %5159 = vst [vmem:[#allocation1 + $0x20] ss:$4 sm:$0xff] %v5135_v53  ;;  %v5148_v29 = vrot.slane %v5135_v53, 4  ;;  %v5149_v40 = vrot.slane %v5135_v53, 6 }
0x1c68   :  { %v5160_v23 = vld.sshfl [vmem:[#allocation1] sm:$0xff pattern:$0x73625140] }
0x1c69   :  { %5162 = vst [vmem:[#allocation1] ss:$4 sm:$0xff] %v5147_v62  ;;  %v5173_v14 = vadd.f32 %v5160_v23, %v7271_v26 }
0x1c6a   :  { %5163 = vst [vmem:[#allocation1 + $0x1] ss:$4 sm:$0xff] %v5148_v29  ;;  %v5137_v60 = vpop.f32.mrf.mxu1 }
0x1c6b   :  { %5164 = vst [vmem:[#allocation1 + $0x2] ss:$4 sm:$0xff] %v5149_v40  ;;  %v5138_v3 = vadd.f32 %v5804_v12, %v5137_v60 }
0x1c6c   :  { %v5161_v2 = vld.sshfl [vmem:[#allocation1 + $0x20] sm:$0xff pattern:$0x73625140]  ;;  %5177 = vst.msk [vmem:[%s7441_s19] sm:$0xff] %vm123_vm1, %v5173_v14 }
0x1c6d   :  { %v5174_v51 = vadd.f32 %v5161_v2, %v7276_v13  ;;  %v5150_v30 = vrot.slane %v5138_v3, 2  ;;  %5165 = vst [vmem:[#allocation1 + $0x3] ss:$4 sm:$0xff] %v5138_v3 }
0x1c6f   :  { %5178 = vst.msk [vmem:[%s7441_s19 + $0x8] sm:$0x3] %vm127_vm0, %v5174_v51 }
0x1c70   :  { %5166 = vst [vmem:[#allocation1 + $0x20] ss:$4 sm:$0xff] %v5150_v30 }
0x1c72   :  { %v5139_v26 = vpop.f32.mrf.mxu1 }
0x1c74   :  { %v5167_v32 = vld.sshfl [vmem:[#allocation1] sm:$0xff pattern:$0x73625140] }
0x1c75   :  { %v5175_v5 = vadd.f32 %v5167_v32, %v7281_v34 }
0x1c77   :  { %v5168_v39 = vld.sshfl [vmem:[#allocation1 + $0x20] sm:$0xff pattern:$0x73625140]  ;;  %5179 = vst.msk [vmem:[%s7441_s19 + $0x10] sm:$0xff] %vm123_vm1, %v5175_v5 }
0x1c78   :  { %v5176_v13 = vadd.f32 %v5168_v39, %v7286_v15 }
0x1c7a   :  { %5180 = vst.msk [vmem:[%s7441_s19 + $0x18] sm:$0x3] %vm127_vm0, %v5176_v13 }

</bundles_post_ra>
